<compile_context>
chip_gen: v5e
topology: v5e:2x2
jax: 0.10.0
libtpu: 0.0.40
codegen_flags: <defaults>
</compile_context>

<pallas_src>
import jax
import jax.numpy as jnp
from jax.experimental import pallas as pl
from jax.experimental.pallas import tpu as pltpu

NOISE_DIM = 100
NOISE_PAD = 128          # lane-aligned contraction dim for layer 1
HIDDEN = 512
OUT_DIM = 64 * 64 * 3    # 12288


# ---------------------------------------------------------------------------
# Kernel: grid = (M tiles, output-column tiles).  Hidden stack computed once
# per M tile (first column step) into a bf16 VMEM scratch; each step then does
# one (tm, 512) @ (512, tn) output matmul + bias + tanh.
# ---------------------------------------------------------------------------
def _mlp_g_kernel(x_ref, w1_ref, b1_ref, w2_ref, b2_ref, w3_ref, b3_ref,
                  w4_ref, b4_ref, o_ref, h_ref):
    @pl.when(pl.program_id(1) == 0)
    def _():
        h = jnp.dot(x_ref[...].astype(jnp.bfloat16), w1_ref[...],
                    preferred_element_type=jnp.float32)
        h = jnp.maximum(h + b1_ref[...], 0.0)
        h = jnp.dot(h.astype(jnp.bfloat16), w2_ref[...],
                    preferred_element_type=jnp.float32)
        h = jnp.maximum(h + b2_ref[...], 0.0)
        h = jnp.dot(h.astype(jnp.bfloat16), w3_ref[...],
                    preferred_element_type=jnp.float32)
        h = jnp.maximum(h + b3_ref[...], 0.0)
        h_ref[...] = h.astype(jnp.bfloat16)

    # Output layer tile: (tm, 512) @ (512, tn) + bias, tanh in f32.
    y = jnp.dot(h_ref[...], w4_ref[...], preferred_element_type=jnp.float32)
    o_ref[...] = jnp.tanh(y + b4_ref[...]).astype(o_ref.dtype)


def mlp_g_forward(x, params, *, tn=3072, tm=256):
    """x: (B, 100, 1, 1) or (B, 100) float32 noise. Returns (B, 12288) f32."""
    w1, b1, w2, b2, w3, b3, w4, b4 = params
    B = x.shape[0]
    x2d = x.reshape(B, NOISE_DIM).astype(jnp.float32)  # mirrors x.view(B, 100)

    # Batch tiling: round batch up to a multiple of 8 (f32 sublane), cap the
    # M tile at `tm` rows and pad batch up to a multiple of the tile.
    Bp0 = max(8, ((B + 7) // 8) * 8)
    tm = min(tm, Bp0)
    Bp = ((Bp0 + tm - 1) // tm) * tm

    # Zero-pad: batch rows to Bp, noise columns 100 -> 128.
    x2d = jnp.pad(x2d, ((0, Bp - B), (0, NOISE_PAD - NOISE_DIM)))
    w1p = w1 if w1.shape[0] == NOISE_PAD else jnp.pad(
        w1, ((0, NOISE_PAD - w1.shape[0]), (0, 0)))

    assert OUT_DIM % tn == 0 and Bp % tm == 0
    grid = (Bp // tm, OUT_DIM // tn)

    cost = pl.CostEstimate(
        flops=2 * Bp * (NOISE_PAD * HIDDEN + 2 * HIDDEN * HIDDEN
                        + HIDDEN * OUT_DIM),
        transcendentals=Bp * OUT_DIM,
        bytes_accessed=(w1p.size + w2.size + w3.size + w4.size) * 2
        + (b1.size + b2.size + b3.size + b4.size) * 4
        + x2d.size * 4 + Bp * OUT_DIM * 4,
    )

    out = pl.pallas_call(
        _mlp_g_kernel,
        out_shape=jax.ShapeDtypeStruct((Bp, OUT_DIM), jnp.float32),
        grid_spec=pltpu.PrefetchScalarGridSpec(
            num_scalar_prefetch=0,
            grid=grid,
            in_specs=[
                # Per-M-tile input block.
                pl.BlockSpec((tm, NOISE_PAD), lambda i, j: (i, 0)),
                # Small hidden-stack weights/biases: constant index, resident.
                pl.BlockSpec((NOISE_PAD, HIDDEN), lambda i, j: (0, 0)),
                pl.BlockSpec((1, HIDDEN), lambda i, j: (0, 0)),
                pl.BlockSpec((HIDDEN, HIDDEN), lambda i, j: (0, 0)),
                pl.BlockSpec((1, HIDDEN), lambda i, j: (0, 0)),
                pl.BlockSpec((HIDDEN, HIDDEN), lambda i, j: (0, 0)),
                pl.BlockSpec((1, HIDDEN), lambda i, j: (0, 0)),
                # Streamed output-layer weight/bias tiles (the HBM-bound part).
                pl.BlockSpec((HIDDEN, tn), lambda i, j: (0, j)),
                pl.BlockSpec((1, tn), lambda i, j: (0, j)),
            ],
            out_specs=pl.BlockSpec((tm, tn), lambda i, j: (i, j)),
            scratch_shapes=[pltpu.VMEM((tm, HIDDEN), jnp.bfloat16)],
        ),
        compiler_params=pltpu.CompilerParams(
            dimension_semantics=("parallel", "arbitrary"),
            vmem_limit_bytes=32 * 1024 * 1024,
        ),
        cost_estimate=cost,
    )(x2d, w1p, b1, w2, b2, w3, b3, w4, b4)

    return out[:B]
    # TODO(synk): if downstream accepts bf16 images, switch out_shape / final
    # store to bfloat16 — at large batch the f32 output write dominates HBM.


def init_params(key):
    """Deterministic init. Weights stored (in, out) in bf16, biases f32."""
    ks = jax.random.split(key, 8)

    def lin(kw, kb, fan_in, fan_out):
        # PyTorch nn.Linear default: U(-1/sqrt(fan_in), 1/sqrt(fan_in))
        bound = 1.0 / jnp.sqrt(fan_in)
        w = jax.random.uniform(kw, (fan_in, fan_out), jnp.float32, -bound, bound)
        b = jax.random.uniform(kb, (1, fan_out), jnp.float32, -bound, bound)
        return w.astype(jnp.bfloat16), b

    w1, b1 = lin(ks[0], ks[1], NOISE_DIM, HIDDEN)
    w2, b2 = lin(ks[2], ks[3], HIDDEN, HIDDEN)
    w3, b3 = lin(ks[4], ks[5], HIDDEN, HIDDEN)
    w4, b4 = lin(ks[6], ks[7], HIDDEN, OUT_DIM)
    return (w1, b1, w2, b2, w3, b3, w4, b4)


def _reference_bf16(x, params):
    """Plain-JAX reference mirroring the kernel's precision (bf16 MXU, f32 acc)."""
    w1, b1, w2, b2, w3, b3, w4, b4 = params
    h = x.reshape(x.shape[0], NOISE_DIM).astype(jnp.float32)

    def lin(h, w, b):
        return jnp.dot(h.astype(jnp.bfloat16), w,
                       preferred_element_type=jnp.float32) + b

    h = jnp.maximum(lin(h, w1, b1), 0.0)
    h = jnp.maximum(lin(h, w2, b2), 0.0)
    h = jnp.maximum(lin(h, w3, b3), 0.0)
    return jnp.tanh(lin(h, w4, b4))


def _reference_f32(x, params):
    """Full-f32 math (module semantics) with the same (bf16-rounded) weights."""
    w1, b1, w2, b2, w3, b3, w4, b4 = params
    h = x.reshape(x.shape[0], NOISE_DIM).astype(jnp.float32)
    h = jnp.maximum(h @ w1.astype(jnp.float32) + b1, 0.0)
    h = jnp.maximum(h @ w2.astype(jnp.float32) + b2, 0.0)
    h = jnp.maximum(h @ w3.astype(jnp.float32) + b3, 0.0)
    return jnp.tanh(h @ w4.astype(jnp.float32) + b4)


if __name__ == "__main__":
    key = jax.random.PRNGKey(0)
    kp, kx = jax.random.split(key)
    params = init_params(kp)

    batch = 2
    x = jax.random.normal(kx, (batch, NOISE_DIM, 1, 1), dtype=jnp.float32)

    out = mlp_g_forward(x, params)
    out = jax.block_until_ready(out)
    assert out.shape == (batch, OUT_DIM)

    # Tight check against a reference that mirrors the kernel's bf16/f32 path.
    ref_bf16 = _reference_bf16(x, params)
    assert jnp.allclose(out, ref_bf16, atol=1e-3, rtol=1e-3), \
        "mismatch vs precision-matched JAX reference"

    # Looser check against full-f32 math (bf16 activation rounding only).
    ref_f32 = _reference_f32(x, params)
    assert jnp.allclose(out, ref_f32, atol=3e-2, rtol=3e-2), \
        "mismatch vs f32 JAX reference"

    print("KERNEL_OK")
</pallas_src>

<mosaic_0001>
module attributes {stable_mosaic.version = 11 : i64} {
  func.func @_mlp_g_kernel(%arg0: i32, %arg1: i32, %arg2: memref<8x128xf32, #tpu.memory_space<vmem>>, %arg3: memref<128x512xbf16, #tpu.memory_space<vmem>>, %arg4: memref<1x512xf32, #tpu.memory_space<vmem>>, %arg5: memref<512x512xbf16, #tpu.memory_space<vmem>>, %arg6: memref<1x512xf32, #tpu.memory_space<vmem>>, %arg7: memref<512x512xbf16, #tpu.memory_space<vmem>>, %arg8: memref<1x512xf32, #tpu.memory_space<vmem>>, %arg9: memref<512x3072xbf16, #tpu.memory_space<vmem>>, %arg10: memref<1x3072xf32, #tpu.memory_space<vmem>>, %arg11: memref<8x3072xf32, #tpu.memory_space<vmem>>, %arg12: memref<8x512xbf16, #tpu.memory_space<vmem>>) attributes {dimension_semantics = [#tpu.dimension_semantics<parallel>, #tpu.dimension_semantics<arbitrary>], iteration_bounds = array<i64: 1, 4>, scalar_prefetch = 0 : i64, scratch_operands = 1 : i64, tpu.core_type = #tpu.core_type<tc>, window_params = [{transform_indices = @transform_0, window_bounds = array<i64: 8, 128>}, {pipeline_mode = #tpu.pipeline_mode<synchronous>, transform_indices = @transform_1, window_bounds = array<i64: 128, 512>}, {pipeline_mode = #tpu.pipeline_mode<synchronous>, transform_indices = @transform_2, window_bounds = array<i64: 1, 512>}, {pipeline_mode = #tpu.pipeline_mode<synchronous>, transform_indices = @transform_3, window_bounds = array<i64: 512, 512>}, {pipeline_mode = #tpu.pipeline_mode<synchronous>, transform_indices = @transform_4, window_bounds = array<i64: 1, 512>}, {pipeline_mode = #tpu.pipeline_mode<synchronous>, transform_indices = @transform_5, window_bounds = array<i64: 512, 512>}, {pipeline_mode = #tpu.pipeline_mode<synchronous>, transform_indices = @transform_6, window_bounds = array<i64: 1, 512>}, {transform_indices = @transform_7, window_bounds = array<i64: 512, 3072>}, {transform_indices = @transform_8, window_bounds = array<i64: 1, 3072>}, {transform_indices = @transform_9, window_bounds = array<i64: 8, 3072>}]} {
    %c0_i32 = arith.constant 0 : i32
    %0 = arith.cmpi eq, %arg1, %c0_i32 : i32
    %1 = arith.extui %0 : i1 to i32
    %c0_i32_0 = arith.constant 0 : i32
    %2 = arith.cmpi ne, %1, %c0_i32_0 : i32
    scf.if %2 {
      %c0_8 = arith.constant 0 : index
      %c0_9 = arith.constant 0 : index
      %11 = vector.load %arg2[%c0_8, %c0_9] : memref<8x128xf32, #tpu.memory_space<vmem>>, vector<8x128xf32>
      %12 = arith.truncf %11 : vector<8x128xf32> to vector<8x128xbf16>
      %c0_10 = arith.constant 0 : index
      %c0_11 = arith.constant 0 : index
      %13 = vector.load %arg3[%c0_10, %c0_11] : memref<128x512xbf16, #tpu.memory_space<vmem>>, vector<128x512xbf16>
      %cst_12 = arith.constant dense<0.000000e+00> : vector<8x512xf32>
      %14 = tpu.matmul %12, %13, %cst_12 {dimension_numbers = #tpu.dot_dimension_numbers<[1], [0], [0], [1], [0, 0, 1, 1], [], []>} : vector<8x128xbf16>, vector<128x512xbf16>, vector<8x512xf32> -> vector<8x512xf32>
      %c0_13 = arith.constant 0 : index
      %c0_14 = arith.constant 0 : index
      %15 = vector.load %arg4[%c0_13, %c0_14] : memref<1x512xf32, #tpu.memory_space<vmem>>, vector<1x512xf32>
      %16 = vector.broadcast %15 : vector<1x512xf32> to vector<8x512xf32>
      %17 = arith.addf %14, %16 : vector<8x512xf32>
      %cst_15 = arith.constant 0.000000e+00 : f32
      %18 = vector.broadcast %cst_15 : f32 to vector<8x512xf32>
      %19 = arith.maximumf %17, %18 : vector<8x512xf32>
      %20 = arith.truncf %19 : vector<8x512xf32> to vector<8x512xbf16>
      %c0_16 = arith.constant 0 : index
      %c0_17 = arith.constant 0 : index
      %21 = vector.load %arg5[%c0_16, %c0_17] : memref<512x512xbf16, #tpu.memory_space<vmem>>, vector<512x512xbf16>
      %cst_18 = arith.constant dense<0.000000e+00> : vector<8x512xf32>
      %22 = tpu.matmul %20, %21, %cst_18 {dimension_numbers = #tpu.dot_dimension_numbers<[1], [0], [0], [1], [0, 0, 1, 1], [], []>} : vector<8x512xbf16>, vector<512x512xbf16>, vector<8x512xf32> -> vector<8x512xf32>
      %c0_19 = arith.constant 0 : index
      %c0_20 = arith.constant 0 : index
      %23 = vector.load %arg6[%c0_19, %c0_20] : memref<1x512xf32, #tpu.memory_space<vmem>>, vector<1x512xf32>
      %24 = vector.broadcast %23 : vector<1x512xf32> to vector<8x512xf32>
      %25 = arith.addf %22, %24 : vector<8x512xf32>
      %cst_21 = arith.constant 0.000000e+00 : f32
      %26 = vector.broadcast %cst_21 : f32 to vector<8x512xf32>
      %27 = arith.maximumf %25, %26 : vector<8x512xf32>
      %28 = arith.truncf %27 : vector<8x512xf32> to vector<8x512xbf16>
      %c0_22 = arith.constant 0 : index
      %c0_23 = arith.constant 0 : index
      %29 = vector.load %arg7[%c0_22, %c0_23] : memref<512x512xbf16, #tpu.memory_space<vmem>>, vector<512x512xbf16>
      %cst_24 = arith.constant dense<0.000000e+00> : vector<8x512xf32>
      %30 = tpu.matmul %28, %29, %cst_24 {dimension_numbers = #tpu.dot_dimension_numbers<[1], [0], [0], [1], [0, 0, 1, 1], [], []>} : vector<8x512xbf16>, vector<512x512xbf16>, vector<8x512xf32> -> vector<8x512xf32>
      %c0_25 = arith.constant 0 : index
      %c0_26 = arith.constant 0 : index
      %31 = vector.load %arg8[%c0_25, %c0_26] : memref<1x512xf32, #tpu.memory_space<vmem>>, vector<1x512xf32>
      %32 = vector.broadcast %31 : vector<1x512xf32> to vector<8x512xf32>
      %33 = arith.addf %30, %32 : vector<8x512xf32>
      %cst_27 = arith.constant 0.000000e+00 : f32
      %34 = vector.broadcast %cst_27 : f32 to vector<8x512xf32>
      %35 = arith.maximumf %33, %34 : vector<8x512xf32>
      %36 = arith.truncf %35 : vector<8x512xf32> to vector<8x512xbf16>
      %c0_28 = arith.constant 0 : index
      %c0_29 = arith.constant 0 : index
      %37 = vector.load %arg12[%c0_28, %c0_29] : memref<8x512xbf16, #tpu.memory_space<vmem>>, vector<8x512xbf16>
      tpu.vector_store %arg12[%c0_28, %c0_29], %36 {strides = array<i32>} : memref<8x512xbf16, #tpu.memory_space<vmem>>, vector<8x512xbf16>,
    } else {
    }
    %c0 = arith.constant 0 : index
    %c0_1 = arith.constant 0 : index
    %3 = vector.load %arg12[%c0, %c0_1] : memref<8x512xbf16, #tpu.memory_space<vmem>>, vector<8x512xbf16>
    %c0_2 = arith.constant 0 : index
    %c0_3 = arith.constant 0 : index
    %4 = vector.load %arg9[%c0_2, %c0_3] : memref<512x3072xbf16, #tpu.memory_space<vmem>>, vector<512x3072xbf16>
    %cst = arith.constant dense<0.000000e+00> : vector<8x3072xf32>
    %5 = tpu.matmul %3, %4, %cst {dimension_numbers = #tpu.dot_dimension_numbers<[1], [0], [0], [1], [0, 0, 1, 1], [], []>} : vector<8x512xbf16>, vector<512x3072xbf16>, vector<8x3072xf32> -> vector<8x3072xf32>
    %c0_4 = arith.constant 0 : index
    %c0_5 = arith.constant 0 : index
    %6 = vector.load %arg10[%c0_4, %c0_5] : memref<1x3072xf32, #tpu.memory_space<vmem>>, vector<1x3072xf32>
    %7 = vector.broadcast %6 : vector<1x3072xf32> to vector<8x3072xf32>
    %8 = arith.addf %5, %7 : vector<8x3072xf32>
    %9 = math.tanh %8 : vector<8x3072xf32>
    %c0_6 = arith.constant 0 : index
    %c0_7 = arith.constant 0 : index
    %10 = vector.load %arg11[%c0_6, %c0_7] : memref<8x3072xf32, #tpu.memory_space<vmem>>, vector<8x3072xf32>
    tpu.vector_store %arg11[%c0_6, %c0_7], %9 {strides = array<i32>} : memref<8x3072xf32, #tpu.memory_space<vmem>>, vector<8x3072xf32>,
    return
  }
  func.func @transform_0(%arg0: i32, %arg1: i32) -> (i32, i32) {
    %c0_i32 = arith.constant 0 : i32
    %c0_i32_0 = arith.constant 0 : i32
    return %arg0, %c0_i32 : i32, i32
  }
  func.func @transform_1(%arg0: i32, %arg1: i32) -> (i32, i32) {
    %c0_i32 = arith.constant 0 : i32
    %c0_i32_0 = arith.constant 0 : i32
    %c0_i32_1 = arith.constant 0 : i32
    return %c0_i32, %c0_i32_0 : i32, i32
  }
  func.func @transform_2(%arg0: i32, %arg1: i32) -> (i32, i32) {
    %c0_i32 = arith.constant 0 : i32
    %c0_i32_0 = arith.constant 0 : i32
    %c0_i32_1 = arith.constant 0 : i32
    return %c0_i32, %c0_i32_0 : i32, i32
  }
  func.func @transform_3(%arg0: i32, %arg1: i32) -> (i32, i32) {
    %c0_i32 = arith.constant 0 : i32
    %c0_i32_0 = arith.constant 0 : i32
    %c0_i32_1 = arith.constant 0 : i32
    return %c0_i32, %c0_i32_0 : i32, i32
  }
  func.func @transform_4(%arg0: i32, %arg1: i32) -> (i32, i32) {
    %c0_i32 = arith.constant 0 : i32
    %c0_i32_0 = arith.constant 0 : i32
    %c0_i32_1 = arith.constant 0 : i32
    return %c0_i32, %c0_i32_0 : i32, i32
  }
  func.func @transform_5(%arg0: i32, %arg1: i32) -> (i32, i32) {
    %c0_i32 = arith.constant 0 : i32
    %c0_i32_0 = arith.constant 0 : i32
    %c0_i32_1 = arith.constant 0 : i32
    return %c0_i32, %c0_i32_0 : i32, i32
  }
  func.func @transform_6(%arg0: i32, %arg1: i32) -> (i32, i32) {
    %c0_i32 = arith.constant 0 : i32
    %c0_i32_0 = arith.constant 0 : i32
    %c0_i32_1 = arith.constant 0 : i32
    return %c0_i32, %c0_i32_0 : i32, i32
  }
  func.func @transform_7(%arg0: i32, %arg1: i32) -> (i32, i32) {
    %c0_i32 = arith.constant 0 : i32
    %c0_i32_0 = arith.constant 0 : i32
    return %c0_i32, %arg1 : i32, i32
  }
  func.func @transform_8(%arg0: i32, %arg1: i32) -> (i32, i32) {
    %c0_i32 = arith.constant 0 : i32
    %c0_i32_0 = arith.constant 0 : i32
    return %c0_i32, %arg1 : i32, i32
  }
  func.func @transform_9(%arg0: i32, %arg1: i32) -> (i32, i32) {
    %c0_i32 = arith.constant 0 : i32
    return %arg0, %arg1 : i32, i32
  }
}

</mosaic_0001>

<bundles_post_ra>
// kernel: tpu_custom_call.1
= control target key start
LH: loop header
LB: loop body
LE: loop exit
PB: predicated region body
PF: predicated region fallthrough
CT: control target
= control target key end

     0   :  { %s16855_s0 = inlined_call_operand.hbm [shape: f32[8,128], index: 0, kind: input, shape index: {}]   ;;  %s16856_s1 = inlined_call_operand.hbm [shape: bf16[128,512], index: 1, kind: input, shape index: {}]   ;;  %s16857_s2 = inlined_call_operand.hbm [shape: f32[1,512], index: 2, kind: input, shape index: {}]   ;;  %s16858_s3 = inlined_call_operand.hbm [shape: bf16[512,512], index: 3, kind: input, shape index: {}]   ;;  %s16859_s4 = inlined_call_operand.hbm [shape: f32[1,512], index: 4, kind: input, shape index: {}]   ;;  %s16860_s5 = inlined_call_operand.hbm [shape: bf16[512,512], index: 5, kind: input, shape index: {}]   ;;  %s16861_s6 = inlined_call_operand.hbm [shape: f32[1,512], index: 6, kind: input, shape index: {}]   ;;  %s16862_s7 = inlined_call_operand.hbm [shape: bf16[512,12288], index: 7, kind: input, shape index: {}]   ;;  %s16863_s8 = inlined_call_operand.hbm [shape: f32[1,12288], index: 8, kind: input, shape index: {}]   ;;  %s16864_s9 = inlined_call_operand.hbm [shape: f32[8,12288], index: 9, kind: output, shape index: {}]  }
   0x1   :  { %16873 = sst [smem:[#allocation31_spill]] %s16856_s1 }
   0x2   :  { %16874 = sst [smem:[#allocation32_spill]] %s16858_s3 }
   0x3   :  { %16875 = sst [smem:[#allocation33_spill]] %s16860_s5 }
   0x4   :  { %16876 = sst [smem:[#allocation34_spill]] %s16862_s7 }
   0x5   :  { %14 = vsyncpa [#allocation4], 0 }
   0x6   :  { %15 = vsyncpa [#allocation7], 0 }
   0x7   :  { %16 = vsyncpa [#allocation10], 0 }
   0x8   :  { %17 = vsyncpa [#allocation13], 0 }
   0x9   :  { %18 = vsyncpa [#allocation16], 0 }
   0xa   :  { %20 = vsyncpa [#allocation16 + $0x1], 0 }
   0xb   :  { %21 = vsyncpa [#allocation5], 0 }
   0xc   :  { %23 = vsyncpa [#allocation5 + $0x1], 0  ;;  %s14878_s30 = smov 0   ;;  %s14880_s10 = smov 0  }
   0xd   :  { %s14882_s11 = smov 0   ;;  %s14884_s12 = smov 0  }
   0xe   :  { %s14886_s13 = smov 0   ;;  %s14888_s14 = smov 0  }
   0xf LB: > { %16877 = sst [smem:[#allocation25_spill]] %s14794_s30  ;;  %s14912_s18 = sadd.s32 4294967295, %s14814_s14   ;;  %s14814_s14 = sphi %s14888_s14, %s29_s14   ;;  %s14810_s13 = sphi %s14886_s13, %s16905_s13   ;;  %s14806_s12 = sphi %s14884_s12, %s16904_s12   ;;  %s14802_s11 = sphi %s14882_s11, %s16903_s11   ;;  %s14798_s10 = sphi %s14880_s10, %s16902_s10   ;;  %s14794_s30 = sphi %s14878_s30, %s16901_s30  }
  0x10   : > { %16878 = sst [smem:[#allocation26_spill]] %s14814_s14  ;;  %p8944_p0 = scmp.ge.s32.totalorder %s14814_s14, 1 }
  0x11   : > { %s16879_s1 = sld [smem:[#allocation31_spill]]  ;;  %p214_p1 = scmp.eq.s32.totalorder %s14912_s18, 0 }
  0x12   : > { %p278_p2 = scmp.lt.s32.totalorder %s14814_s14, 5  ;;  %s14816_s20 = smov [#allocation6]  }
  0x13   : > { %s305_s21 = sshll.u32 %s14816_s20, 4  ;;  %s16881_s3 = sld [smem:[#allocation32_spill]]  ;;  %s306_s21 = int_to_ptr.vmem [resolvable:$true] %s305_s21 }
  0x14   : > { %p14917_p3 = pnand %p8944_p0, %p278_p2  ;;  %s16883_s5 = sld [smem:[#allocation33_spill]] }
  0x15   : > { %s14817_s29 = smov [#allocation9]   ;;  %s14818_s16 = smov 256  }
  0x16   : > { %p14287_p4 = pneg %p14917_p3  ;;  %s331_s15 = sshll.u32 %s14817_s29, 4  ;;  %s332_s15 = int_to_ptr.vmem [resolvable:$true] %s331_s15 }
  0x17   : > { %s303_s17 = sshll.u32 %s16879_s1, 4  ;;  %s14819_s20 = smov 16   ;;  %s304_s17 = int_to_ptr.hbm [resolvable:$true] %s303_s17 }
  0x18   : > { %p14928_p5 = pnand %p14287_p4, %p214_p1  ;;  %s14820_s22 = smov [#allocation12]  }
  0x19   : > { %s329_s24 = sshll.u32 %s16881_s3, 4  ;;  %s357_s23 = sshll.u32 %s14820_s22, 4  ;;  %s330_s24 = int_to_ptr.hbm [resolvable:$true] %s329_s24  ;;  %s358_s23 = int_to_ptr.vmem [resolvable:$true] %s357_s23 }
  0x1a   : > { %s355_s28 = sshll.u32 %s16883_s5, 4  ;;  %s8943_s26 = sadd.s32 4294967294, %s14814_s14   ;;  %s356_s28 = int_to_ptr.hbm [resolvable:$true] %s355_s28 }
  0x1b   : > { %14293 = dma.hbm_to_vmem [thread:$0]  (!%p14928_p5), %s304_s17, 4096, %s306_s21, [#allocation7], %s14818_s16, %s14818_s16, %s14819_s20  }
  0x1c   : > { %14299 = dma.hbm_to_vmem [thread:$0]  (!%p14928_p5), %s330_s24, 16384, %s332_s15, [#allocation10], %s14818_s16, %s14818_s16, %s14819_s20  }
  0x1d   : > { %14305 = dma.hbm_to_vmem [thread:$0]  (!%p14928_p5), %s356_s28, 16384, %s358_s23, [#allocation13], %s14818_s16, %s14818_s16, %s14819_s20  }
  0x1e   : > { %s38_s27 = sadd.s32 1, %s14810_s13  ;;  %s200_s29 = sadd.s32 1, %s14802_s11 }
  0x1f   : > { %p39_p6 = scmp.ge.s32.totalorder %s38_s27, 4  ;;  %p207_p7 = scmp.ne.s32.totalorder %s14802_s11, %s14798_s10 }
  0x20   : > { %p208_p8 = scmp.eq.s32.totalorder %s14814_s14, 0  ;;  %p213_p9 = scmp.ne.s32.totalorder %s14798_s10, %s14794_s30 }
  0x21   : > { %s16907_s27 = smov (%p39_p6, %s38_s27), 0  ;;  %p265_p12 = scmp.eq.s32.totalorder %s14912_s18, 3 }
  0x22   : > { %16884 = sst [smem:[#allocation27_spill]] %s16907_s27  ;;  %p14951_p10 = por %p208_p8, %p207_p7 }
  0x23   : > { %p14957_p11 = por %p214_p1, %p213_p9  ;;  %s197_s24 = ssub.s32 %s14810_s13, %s16907_s27 }
  0x24   : > { %p198_p13 = scmp.eq.s32.totalorder %s197_s24, 0  ;;  %p271_p0 = scmp.eq.s32.totalorder %s8943_s26, 3 }
  0x25   : > { %p14964_p2 = por %p265_p12, %p207_p7  ;;  %p14327_p4 = scmp.lt.s32.totalorder %s14814_s14, 4 }
  0x26   : > { %s14970_s15 = scalar_select %p198_p13, %s14802_s11, %s200_s29  }
  0x27   : > { %s16887_s28 = scalar_select %p14964_p2, 1, 0 }
  0x28   : > { %16889 = sst [smem:[#allocation29_spill]] %s14970_s15  ;;  %p14972_p6 = por %p271_p0, %p213_p9 }
  0x29   : > { %16888 = sst [smem:[#allocation28_spill]] %s16887_s28  ;;  %s383_s20 = sand.u32 1, %s14814_s14  }
  0x2a   : > { %s16890_s16 = scalar_select %p14972_p6, 1, 0 }
  0x2b   : > { %s16867_s22 = sand.u32 1, %s14802_s11   ;;  %p14982_p8 = pnand %p14327_p4, %p14951_p10 }
  0x2c   : > { %16891 = sst [smem:[#allocation30_spill]] %s16890_s16  ;;  %s14248_s23 = smul.u32 6144, %s16867_s22 }
  0x2d   : > { %s13190_s26 = smul.u32 96, %s14810_s13  ;;  %s16893_s7 = sld [smem:[#allocation34_spill]] }
  0x2e   : > { %s387_s5 = scalar_lea.vmem [#allocation15], %s14248_s23  ;;  %s14990_s16 = scalar_lea.sflag [#allocation16], %s383_s20 }
  0x2f   : > { %s395_s27 = sshll.u32 %s387_s5, 4  ;;  %s14821_s17 = smov 6144   ;;  %s396_s27 = int_to_ptr.vmem [resolvable:$true] %s395_s27 }
  0x30   : > { %s14822_s22 = smov 1536   ;;  %s14823_s30 = smov 96  }
  0x31   : > { %s292_s3 = sshll.u32 %s16855_s0, 4  ;;  %s14824_s23 = smov [#allocation3]   ;;  %s293_s3 = int_to_ptr.hbm [resolvable:$true] %s292_s3 }
  0x32   : > { %s294_s5 = sshll.u32 %s14824_s23, 4  ;;  %s318_s20 = sshll.u32 %s16857_s2, 4  ;;  %s295_s5 = int_to_ptr.vmem [resolvable:$true] %s294_s5  ;;  %s319_s20 = int_to_ptr.hbm [resolvable:$true] %s318_s20 }
  0x33   : > { %s392_s29 = scalar_lea.hbm %s16893_s7, %s13190_s26  ;;  %s14825_s14 = smov [#allocation8]  }
  0x34   : > { %s393_s15 = sshll.u32 %s392_s29, 4  ;;  %s14826_s28 = smov [#allocation11]   ;;  %s394_s15 = int_to_ptr.hbm [resolvable:$true] %s393_s15 }
  0x35   : > { %14312 = dma.hbm_to_vmem [thread:$0]  (!%p14982_p8), %s394_s15, 98304, %s396_s27, %s14990_s16, %s14821_s17, %s14822_s22, %s14823_s30  }
  0x36   : > { %14290 = dma.hbm_to_vmem [thread:$0]  (!%p14928_p5), %s293_s3, 128, %s295_s5, [#allocation4]  }
  0x37   : > { %s344_s30 = sshll.u32 %s16859_s4, 4  ;;  %s320_s27 = sshll.u32 %s14825_s14, 4  ;;  %s345_s30 = int_to_ptr.hbm [resolvable:$true] %s344_s30  ;;  %s321_s27 = int_to_ptr.vmem [resolvable:$true] %s320_s27 }
  0x38   : > { %14296 = dma.hbm_to_vmem [thread:$0]  (!%p14928_p5), %s319_s20, 64, %s321_s27, [#allocation7]  }
  0x39   : > { %s346_s15 = sshll.u32 %s14826_s28, 4  ;;  %s370_s23 = sshll.u32 %s16861_s6, 4  ;;  %s347_s15 = int_to_ptr.vmem [resolvable:$true] %s346_s15  ;;  %s371_s23 = int_to_ptr.hbm [resolvable:$true] %s370_s23 }
  0x3a   : > { %14302 = dma.hbm_to_vmem [thread:$0]  (!%p14928_p5), %s345_s30, 64, %s347_s15, [#allocation10]  }
  0x3b   : > { %s16894_s7 = sand.u32 1, %s14802_s11   ;;  %s14827_s5 = smov [#allocation14]  }
  0x3c   : > { %s14249_s3 = smul.u32 24, %s16894_s7  ;;  %s372_s26 = sshll.u32 %s14827_s5, 4  ;;  %s373_s26 = int_to_ptr.vmem [resolvable:$true] %s372_s26 }
  0x3d   : > { %s410_s24 = smul.u32 24, %s14810_s13 }
  0x3e   : > { %14308 = dma.hbm_to_vmem [thread:$0]  (!%p14928_p5), %s371_s23, 64, %s373_s26, [#allocation13]  }
  0x3f   : > { %s413_s14 = scalar_lea.hbm %s16863_s8, %s410_s24  ;;  %s409_s27 = scalar_lea.vmem [#allocation17], %s14249_s3 }
  0x40   : > { %s417_s28 = sshll.u32 %s409_s27, 4  ;;  %s415_s22 = sshll.u32 %s413_s14, 4  ;;  %s418_s28 = int_to_ptr.vmem [resolvable:$true] %s417_s28  ;;  %s416_s22 = int_to_ptr.hbm [resolvable:$true] %s415_s22 }
  0x41   : > { %14315 = dma.hbm_to_vmem [thread:$0]  (!%p14982_p8), %s416_s22, 384, %s418_s28, %s14990_s16  }
  0x42   : > { %426 = sbr.rel (%p14917_p3) target bundleno = 1639 (0x667), region = 56 }
  0x47   : > { %14769 = dma.done.wait (%p214_p1), [#allocation4], 128  }
  0x48   : > { %14771 = vsyncadd (%p214_p1), [#allocation4], 4294967168 }
  0x49   : > { %14773 = dma.done.wait (%p214_p1), [#allocation7], 4160  }
  0x4a   : > { %14775 = vsyncadd (%p214_p1), [#allocation7], 4294963136 }
  0x4b   : > { %14777 = dma.done.wait (%p214_p1), [#allocation10], 16448  }
  0x4c   : > { %14779 = vsyncadd (%p214_p1), [#allocation10], 4294950848 }
  0x4d   : > { %14781 = dma.done.wait (%p214_p1), [#allocation13], 16448  }
  0x4e   : > { %14783 = vsyncadd (%p214_p1), [#allocation13], 4294950848  ;;  %s463_s1 = sand.u32 1, %s14912_s18   ;;  %s15044_s19 = sand.u32 1, %s14798_s10  }
  0x4f   : > { %s14250_s25 = smul.u32 6144, %s15044_s19  ;;  %s464_s16 = scalar_lea.sflag [#allocation16], %s463_s1 }
  0x51   : > { %s15047_s30 = scalar_lea.vmem [#allocation15], %s14250_s25 }
  0x52   : > { %14785 = dma.done.wait (%p14957_p11), %s464_s16, 98688  }
  0x53   : > { %14787 = vsyncadd (%p14957_p11), %s464_s16, 4294868608  ;;  %s14251_s15 = smul.u32 24, %s15044_s19  ;;  %p8962_p1 = scmp.ne.s32.totalorder %s14806_s12, 0 }
  0x54   : > { %s14252_s17 = smul.u32 192, %s15044_s19 }
  0x55   : > { %s15055_s23 = scalar_lea.vmem [#allocation17], %s14251_s15  ;;  %524 = sbr.rel (%p8962_p1) target bundleno = 672 (0x2a0), region = 96 }
  0x56   : > { %s15057_s7 = scalar_lea.vmem [#allocation18], %s14252_s17 }
  0x5a   : > { %v9077_v0 = vld [vmem:[#allocation6 + $0xe0] sm:$0xf]  ;;  %v13221_v1 = vld [vmem:[#allocation6 + $0xec] sm:$0xf0]  ;;  %v13219_v2 = vld [vmem:[#allocation6 + $0xe4] sm:$0xf] }
  0x5b   : > { %v9078_v3 = vor.u32 %v13221_v1, %v9077_v0  ;;  %v9079_v4 = vld [vmem:[#allocation6 + $0xf0] sm:$0xf0]  ;;  %v9085_v5 = vld [vmem:[#allocation6 + $0xe8] sm:$0xf]  ;;  %v13222_v6 = vld [vmem:[#allocation6 + $0xf4] sm:$0xf0] }
  0x5c   : > { %v9082_v7 = vor.u32 %v13219_v2, %v9079_v4  ;;  %v9086_v8 = vor.u32 %v13222_v6, %v9085_v5  ;;  %v13220_v9 = vld [vmem:[#allocation6 + $0xec] sm:$0xf]  ;;  %v9087_v10 = vld [vmem:[#allocation6 + $0xf8] sm:$0xf0]  ;;  %v9061_v11 = vld [vmem:[#allocation6 + $0xc0] sm:$0xf] }
  0x5d   : > { %729 = vmatpush.bf16.msra.mxu0 %v9078_v3  ;;  %v9090_v12 = vor.u32 %v13220_v9, %v9087_v10  ;;  %v13217_v13 = vld [vmem:[#allocation6 + $0xcc] sm:$0xf0]  ;;  %v13215_v14 = vld [vmem:[#allocation6 + $0xc4] sm:$0xf]  ;;  %v9063_v15 = vld [vmem:[#allocation6 + $0xd0] sm:$0xf0] }
  0x5e   : > { %742 = vmatpush.bf16.msra.mxu1 %v9082_v7  ;;  %755 = vmatpush.bf16.msra.mxu2 %v9086_v8  ;;  %v9062_v16 = vor.u32 %v13217_v13, %v9061_v11  ;;  %v9066_v17 = vor.u32 %v13215_v14, %v9063_v15  ;;  %v9069_v18 = vld [vmem:[#allocation6 + $0xc8] sm:$0xf]  ;;  %v13218_v19 = vld [vmem:[#allocation6 + $0xd4] sm:$0xf0]  ;;  %v13216_v20 = vld [vmem:[#allocation6 + $0xcc] sm:$0xf] }
  0x5f   : > { %768 = vmatpush.bf16.msra.mxu3 %v9090_v12  ;;  %v9070_v21 = vor.u32 %v13218_v19, %v9069_v18  ;;  %v9071_v22 = vld [vmem:[#allocation6 + $0xd8] sm:$0xf0]  ;;  %v9045_v23 = vld [vmem:[#allocation6 + $0xa0] sm:$0xf]  ;;  %v13213_v24 = vld [vmem:[#allocation6 + $0xac] sm:$0xf0] }
  0x60   : > { %v9074_v25 = vor.u32 %v13216_v20, %v9071_v22  ;;  %v13211_v26 = vld [vmem:[#allocation6 + $0xa4] sm:$0xf]  ;;  %v9047_v27 = vld [vmem:[#allocation6 + $0xb0] sm:$0xf0]  ;;  %v9053_v28 = vld [vmem:[#allocation6 + $0xa8] sm:$0xf]  ;;  %v9046_v29 = vor.u32 %v13213_v24, %v9045_v23 }
  0x61   : > { %730 = vmatpush.bf16.msra.mxu0 %v9062_v16  ;;  %v13214_v30 = vld [vmem:[#allocation6 + $0xb4] sm:$0xf0]  ;;  %v13212_v31 = vld [vmem:[#allocation6 + $0xac] sm:$0xf]  ;;  %v9055_v32 = vld [vmem:[#allocation6 + $0xb8] sm:$0xf0]  ;;  %v9050_v33 = vor.u32 %v13211_v26, %v9047_v27 }
  0x62   : > { %743 = vmatpush.bf16.msra.mxu1 %v9066_v17  ;;  %756 = vmatpush.bf16.msra.mxu2 %v9070_v21  ;;  %v9054_v34 = vor.u32 %v13214_v30, %v9053_v28  ;;  %v9029_v35 = vld [vmem:[#allocation6 + $0x80] sm:$0xf]  ;;  %v13209_v36 = vld [vmem:[#allocation6 + $0x8c] sm:$0xf0]  ;;  %v13207_v37 = vld [vmem:[#allocation6 + $0x84] sm:$0xf]  ;;  %v9058_v38 = vor.u32 %v13212_v31, %v9055_v32 }
  0x63   : > { %769 = vmatpush.bf16.msra.mxu3 %v9074_v25  ;;  %v9031_v39 = vld [vmem:[#allocation6 + $0x90] sm:$0xf0]  ;;  %v9037_v40 = vld [vmem:[#allocation6 + $0x88] sm:$0xf]  ;;  %v13210_v41 = vld [vmem:[#allocation6 + $0x94] sm:$0xf0]  ;;  %v9030_v44 = vor.u32 %v13209_v36, %v9029_v35 }
  0x64   : > { %v13208_v42 = vld [vmem:[#allocation6 + $0x8c] sm:$0xf]  ;;  %v9039_v43 = vld [vmem:[#allocation6 + $0x98] sm:$0xf0]  ;;  %v9034_v45 = vor.u32 %v13207_v37, %v9031_v39  ;;  %v9038_v46 = vor.u32 %v13210_v41, %v9037_v40  ;;  %v9013_v47 = vld [vmem:[#allocation6 + $0x60] sm:$0xf] }
  0x65   : > { %731 = vmatpush.bf16.msra.mxu0 %v9046_v29  ;;  %v13205_v48 = vld [vmem:[#allocation6 + $0x6c] sm:$0xf0]  ;;  %v13203_v49 = vld [vmem:[#allocation6 + $0x64] sm:$0xf]  ;;  %v9042_v50 = vor.u32 %v13208_v42, %v9039_v43  ;;  %v9015_v51 = vld [vmem:[#allocation6 + $0x70] sm:$0xf0] }
  0x66   : > { %744 = vmatpush.bf16.msra.mxu1 %v9050_v33  ;;  %757 = vmatpush.bf16.msra.mxu2 %v9054_v34  ;;  %v9021_v52 = vld [vmem:[#allocation6 + $0x68] sm:$0xf]  ;;  %v13206_v53 = vld [vmem:[#allocation6 + $0x74] sm:$0xf0]  ;;  %v13204_v54 = vld [vmem:[#allocation6 + $0x6c] sm:$0xf]  ;;  %v9014_v56 = vor.u32 %v13205_v48, %v9013_v47  ;;  %v9018_v57 = vor.u32 %v13203_v49, %v9015_v51 }
  0x67   : > { %770 = vmatpush.bf16.msra.mxu3 %v9058_v38  ;;  %v9023_v55 = vld [vmem:[#allocation6 + $0x78] sm:$0xf0]  ;;  %v9022_v58 = vor.u32 %v13206_v53, %v9021_v52  ;;  %v8997_v59 = vld [vmem:[#allocation6 + $0x40] sm:$0xf]  ;;  %v13201_v60 = vld [vmem:[#allocation6 + $0x4c] sm:$0xf0] }
  0x68   : > { %v13199_v61 = vld [vmem:[#allocation6 + $0x44] sm:$0xf]  ;;  %v9026_v62 = vor.u32 %v13204_v54, %v9023_v55  ;;  %v8999_v63 = vld [vmem:[#allocation6 + $0x50] sm:$0xf0]  ;;  %v9005_v0 = vld [vmem:[#allocation6 + $0x48] sm:$0xf]  ;;  %v8998_v4 = vor.u32 %v13201_v60, %v8997_v59 }
  0x69   : > { %732 = vmatpush.bf16.msra.mxu0 %v9030_v44  ;;  %v13202_v1 = vld [vmem:[#allocation6 + $0x54] sm:$0xf0]  ;;  %v13200_v2 = vld [vmem:[#allocation6 + $0x4c] sm:$0xf]  ;;  %v9007_v3 = vld [vmem:[#allocation6 + $0x58] sm:$0xf0]  ;;  %v9002_v5 = vor.u32 %v13199_v61, %v8999_v63 }
  0x6a   : > { %745 = vmatpush.bf16.msra.mxu1 %v9034_v45  ;;  %758 = vmatpush.bf16.msra.mxu2 %v9038_v46  ;;  %v9006_v6 = vor.u32 %v13202_v1, %v9005_v0  ;;  %v8981_v7 = vld [vmem:[#allocation6 + $0x20] sm:$0xf]  ;;  %v13197_v8 = vld [vmem:[#allocation6 + $0x2c] sm:$0xf0]  ;;  %v13195_v9 = vld [vmem:[#allocation6 + $0x24] sm:$0xf]  ;;  %v9010_v10 = vor.u32 %v13200_v2, %v9007_v3 }
  0x6b   : > { %771 = vmatpush.bf16.msra.mxu3 %v9042_v50  ;;  %v8983_v11 = vld [vmem:[#allocation6 + $0x30] sm:$0xf0]  ;;  %v8989_v12 = vld [vmem:[#allocation6 + $0x28] sm:$0xf]  ;;  %v13198_v13 = vld [vmem:[#allocation6 + $0x34] sm:$0xf0]  ;;  %v8982_v16 = vor.u32 %v13197_v8, %v8981_v7 }
  0x6c   : > { %v13196_v14 = vld [vmem:[#allocation6 + $0x2c] sm:$0xf]  ;;  %v8991_v15 = vld [vmem:[#allocation6 + $0x38] sm:$0xf0]  ;;  %v8965_v17 = vld [vmem:[#allocation6] sm:$0xf]  ;;  %v8986_v18 = vor.u32 %v13195_v9, %v8983_v11  ;;  %v8990_v19 = vor.u32 %v13198_v13, %v8989_v12 }
  0x6d   : > { %733 = vmatpush.bf16.msra.mxu0 %v9014_v56  ;;  %v13193_v20 = vld [vmem:[#allocation6 + $0xc] sm:$0xf0]  ;;  %v13191_v21 = vld [vmem:[#allocation6 + $0x4] sm:$0xf]  ;;  %v8967_v22 = vld [vmem:[#allocation6 + $0x10] sm:$0xf0]  ;;  %v8994_v23 = vor.u32 %v13196_v14, %v8991_v15 }
  0x6e   : > { %746 = vmatpush.bf16.msra.mxu1 %v9018_v57  ;;  %759 = vmatpush.bf16.msra.mxu2 %v9022_v58  ;;  %v8973_v24 = vld [vmem:[#allocation6 + $0x8] sm:$0xf]  ;;  %v13194_v25 = vld [vmem:[#allocation6 + $0x14] sm:$0xf0]  ;;  %v13192_v26 = vld [vmem:[#allocation6 + $0xc] sm:$0xf]  ;;  %v8966_v30 = vor.u32 %v13193_v20, %v8965_v17  ;;  %v8970_v34 = vor.u32 %v13191_v21, %v8967_v22 }
  0x6f   : > { %772 = vmatpush.bf16.msra.mxu3 %v9026_v62  ;;  %v8975_v27 = vld [vmem:[#allocation6 + $0x18] sm:$0xf0]  ;;  %v9205_v28 = vld [vmem:[#allocation9 + $0xe0] sm:$0xf]  ;;  %v13253_v29 = vld [vmem:[#allocation9 + $0xec] sm:$0xf0]  ;;  %v8974_v35 = vor.u32 %v13194_v25, %v8973_v24 }
  0x70   : > { %v525_v31 = vld [vmem:[#allocation3] sm:$0xff]  ;;  %v9333_v32 = vld [vmem:[#allocation9 + $0x1e0] sm:$0xf]  ;;  %v13285_v33 = vld [vmem:[#allocation9 + $0x1ec] sm:$0xf0]  ;;  %v8978_v36 = vor.u32 %v13192_v26, %v8975_v27  ;;  %v9206_v37 = vor.u32 %v13253_v29, %v9205_v28 }
  0x71   : > { %734 = vmatpush.bf16.msra.mxu0 %v8998_v4  ;;  %v9189_v38 = vld [vmem:[#allocation9 + $0xc0] sm:$0xf]  ;;  %v13317_v40 = vld [vmem:[#allocation9 + $0x2ec] sm:$0xf0]  ;;  %v526_v41 = vpack.c.bf16 %v525_v31, %v525_v31  ;;  %v9334_v42 = vor.u32 %v13285_v33, %v9333_v32 }
  0x72   : > { %747 = vmatpush.bf16.msra.mxu1 %v9002_v5  ;;  %760 = vmatpush.bf16.msra.mxu2 %v9006_v6  ;;  %v9461_v39 = vld [vmem:[#allocation9 + $0x2e0] sm:$0xf]  ;;  %v13249_v43 = vld [vmem:[#allocation9 + $0xcc] sm:$0xf0] }
  0x73   : > { %773 = vmatpush.bf16.msra.mxu3 %v9010_v10  ;;  %v9589_v44 = vld [vmem:[#allocation9 + $0x3e0] sm:$0xf]  ;;  %v13349_v45 = vld [vmem:[#allocation9 + $0x3ec] sm:$0xf0]  ;;  %v9462_v48 = vor.u32 %v13317_v40, %v9461_v39  ;;  %v9190_v49 = vor.u32 %v13249_v43, %v9189_v38 }
  0x74   : > { %v9317_v46 = vld [vmem:[#allocation9 + $0x1c0] sm:$0xf]  ;;  %v13281_v47 = vld [vmem:[#allocation9 + $0x1cc] sm:$0xf0]  ;;  %v9590_v50 = vor.u32 %v13349_v45, %v9589_v44 }
  0x75   : > { %735 = vmatpush.bf16.msra.mxu0 %v8982_v16  ;;  %v9173_v51 = vld [vmem:[#allocation9 + $0xa0] sm:$0xf]  ;;  %v13313_v53 = vld [vmem:[#allocation9 + $0x2cc] sm:$0xf0]  ;;  %v9318_v54 = vor.u32 %v13281_v47, %v9317_v46 }
  0x76   : > { %748 = vmatpush.bf16.msra.mxu1 %v8986_v18  ;;  %761 = vmatpush.bf16.msra.mxu2 %v8990_v19  ;;  %v9445_v52 = vld [vmem:[#allocation9 + $0x2c0] sm:$0xf]  ;;  %v13245_v55 = vld [vmem:[#allocation9 + $0xac] sm:$0xf0] }
  0x77   : > { %774 = vmatpush.bf16.msra.mxu3 %v8994_v23  ;;  %v9573_v56 = vld [vmem:[#allocation9 + $0x3c0] sm:$0xf]  ;;  %v13345_v57 = vld [vmem:[#allocation9 + $0x3cc] sm:$0xf0]  ;;  %v9446_v60 = vor.u32 %v13313_v53, %v9445_v52  ;;  %v9174_v61 = vor.u32 %v13245_v55, %v9173_v51 }
  0x78   : > { %v9301_v58 = vld [vmem:[#allocation9 + $0x1a0] sm:$0xf]  ;;  %v13277_v59 = vld [vmem:[#allocation9 + $0x1ac] sm:$0xf0]  ;;  %v9574_v62 = vor.u32 %v13345_v57, %v9573_v56  ;;  %v13251_v56 = vld [vmem:[#allocation9 + $0xe4] sm:$0xf] }
  0x79   : > { %736 = vmatpush.bf16.msra.mxu0 %v8966_v30  ;;  %v9157_v63 = vld [vmem:[#allocation9 + $0x80] sm:$0xf]  ;;  %v13309_v1 = vld [vmem:[#allocation9 + $0x2ac] sm:$0xf0]  ;;  %v9302_v2 = vor.u32 %v13277_v59, %v9301_v58  ;;  %v9207_v57 = vld [vmem:[#allocation9 + $0xf0] sm:$0xf0] }
  0x7a   : > { %749 = vmatpush.bf16.msra.mxu1 %v8970_v34  ;;  %762 = vmatpush.bf16.msra.mxu2 %v8974_v35  ;;  %v9429_v0 = vld [vmem:[#allocation9 + $0x2a0] sm:$0xf]  ;;  %v13241_v3 = vld [vmem:[#allocation9 + $0x8c] sm:$0xf0]  ;;  %v13283_v58 = vld [vmem:[#allocation9 + $0x1e4] sm:$0xf] }
  0x7b   : > { %775 = vmatpush.bf16.msra.mxu3 %v8978_v36  ;;  %v9557_v4 = vld [vmem:[#allocation9 + $0x3a0] sm:$0xf]  ;;  %v13341_v5 = vld [vmem:[#allocation9 + $0x3ac] sm:$0xf0]  ;;  %v9430_v8 = vor.u32 %v13309_v1, %v9429_v0  ;;  %v9158_v9 = vor.u32 %v13241_v3, %v9157_v63  ;;  %v9335_v59 = vld [vmem:[#allocation9 + $0x1f0] sm:$0xf0] }
  0x7c   : > { %737 = vmatmul.bf16.vlgmr.msra.gmra.mxu0 %v526_v41  ;;  %v9285_v6 = vld [vmem:[#allocation9 + $0x180] sm:$0xf]  ;;  %v13273_v7 = vld [vmem:[#allocation9 + $0x18c] sm:$0xf0]  ;;  %v9558_v10 = vor.u32 %v13341_v5, %v9557_v4  ;;  %v13247_v63 = vld [vmem:[#allocation9 + $0xc4] sm:$0xf]  ;;  %v9210_v4 = vor.u32 %v13251_v56, %v9207_v57 }
  0x7d   : > { %1567 = vmatpush.bf16.msrb.mxu0 %v9206_v37  ;;  %750 = vmatmul.bf16.vlgmr.msra.gmra.mxu1 %v526_v41  ;;  %v9141_v11 = vld [vmem:[#allocation9 + $0x60] sm:$0xf]  ;;  %v13305_v13 = vld [vmem:[#allocation9 + $0x28c] sm:$0xf0]  ;;  %v9286_v14 = vor.u32 %v13273_v7, %v9285_v6  ;;  %v13315_v6 = vld [vmem:[#allocation9 + $0x2e4] sm:$0xf] }
  0x7e   : > { %1580 = vmatpush.bf16.msrb.mxu1 %v9334_v42  ;;  %763 = vmatmul.bf16.vlgmr.msra.gmra.mxu2 %v526_v41  ;;  %v9413_v12 = vld [vmem:[#allocation9 + $0x280] sm:$0xf]  ;;  %v13237_v15 = vld [vmem:[#allocation9 + $0x6c] sm:$0xf0]  ;;  %v9463_v7 = vld [vmem:[#allocation9 + $0x2f0] sm:$0xf0] }
  0x7f   : > { %776 = vmatmul.bf16.vlgmr.msra.gmra.mxu3 %v526_v41  ;;  %1593 = vmatpush.bf16.msrb.mxu2 %v9462_v48  ;;  %v9541_v16 = vld [vmem:[#allocation9 + $0x380] sm:$0xf]  ;;  %v13337_v17 = vld [vmem:[#allocation9 + $0x38c] sm:$0xf0]  ;;  %v9414_v20 = vor.u32 %v13305_v13, %v9413_v12  ;;  %v9142_v21 = vor.u32 %v13237_v15, %v9141_v11  ;;  %v9591_v11 = vld [vmem:[#allocation9 + $0x3f0] sm:$0xf0] }
  0x80   : > { %1606 = vmatpush.bf16.msrb.mxu3 %v9590_v50  ;;  %v9269_v18 = vld [vmem:[#allocation9 + $0x160] sm:$0xf]  ;;  %v13269_v19 = vld [vmem:[#allocation9 + $0x16c] sm:$0xf0]  ;;  %v9542_v22 = vor.u32 %v13337_v17, %v9541_v16  ;;  %v13279_v12 = vld [vmem:[#allocation9 + $0x1c4] sm:$0xf]  ;;  %v9466_v16 = vor.u32 %v13315_v6, %v9463_v7 }
  0x81   : > { %1568 = vmatpush.bf16.msrb.mxu0 %v9190_v49  ;;  %v9125_v23 = vld [vmem:[#allocation9 + $0x40] sm:$0xf]  ;;  %v13301_v25 = vld [vmem:[#allocation9 + $0x26c] sm:$0xf0]  ;;  %v9270_v26 = vor.u32 %v13269_v19, %v9269_v18  ;;  %v9319_v13 = vld [vmem:[#allocation9 + $0x1d0] sm:$0xf0] }
  0x82   : > { %1581 = vmatpush.bf16.msrb.mxu1 %v9318_v54  ;;  %v9397_v24 = vld [vmem:[#allocation9 + $0x260] sm:$0xf]  ;;  %v13233_v27 = vld [vmem:[#allocation9 + $0x4c] sm:$0xf0]  ;;  %v13243_v19 = vld [vmem:[#allocation9 + $0xa4] sm:$0xf] }
  0x83   : > { %1594 = vmatpush.bf16.msrb.mxu2 %v9446_v60  ;;  %v9525_v28 = vld [vmem:[#allocation9 + $0x360] sm:$0xf]  ;;  %v13333_v29 = vld [vmem:[#allocation9 + $0x36c] sm:$0xf0]  ;;  %v9398_v32 = vor.u32 %v13301_v25, %v9397_v24  ;;  %v9126_v33 = vor.u32 %v13233_v27, %v9125_v23  ;;  %v9175_v23 = vld [vmem:[#allocation9 + $0xb0] sm:$0xf0] }
  0x84   : > { %1607 = vmatpush.bf16.msrb.mxu3 %v9574_v62  ;;  %v9253_v30 = vld [vmem:[#allocation9 + $0x140] sm:$0xf]  ;;  %v13265_v31 = vld [vmem:[#allocation9 + $0x14c] sm:$0xf0]  ;;  %v9526_v34 = vor.u32 %v13333_v29, %v9525_v28  ;;  %v13343_v24 = vld [vmem:[#allocation9 + $0x3c4] sm:$0xf]  ;;  %v9178_v29 = vor.u32 %v13243_v19, %v9175_v23 }
  0x85   : > { %1569 = vmatpush.bf16.msrb.mxu0 %v9174_v61  ;;  %v9109_v35 = vld [vmem:[#allocation9 + $0x20] sm:$0xf]  ;;  %v13297_v37 = vld [vmem:[#allocation9 + $0x24c] sm:$0xf0]  ;;  %v9254_v38 = vor.u32 %v13265_v31, %v9253_v30  ;;  %v9575_v25 = vld [vmem:[#allocation9 + $0x3d0] sm:$0xf0] }
  0x86   : > { %1582 = vmatpush.bf16.msrb.mxu1 %v9302_v2  ;;  %v9381_v36 = vld [vmem:[#allocation9 + $0x240] sm:$0xf]  ;;  %v13229_v39 = vld [vmem:[#allocation9 + $0x2c] sm:$0xf0]  ;;  %v9303_v27 = vld [vmem:[#allocation9 + $0x1b0] sm:$0xf0]  ;;  %v9578_v30 = vor.u32 %v13343_v24, %v9575_v25 }
  0x87   : > { %1595 = vmatpush.bf16.msrb.mxu2 %v9430_v8  ;;  %v9509_v40 = vld [vmem:[#allocation9 + $0x340] sm:$0xf]  ;;  %v13329_v41 = vld [vmem:[#allocation9 + $0x34c] sm:$0xf0]  ;;  %v9382_v44 = vor.u32 %v13297_v37, %v9381_v36  ;;  %v9110_v46 = vor.u32 %v13229_v39, %v9109_v35  ;;  %v9338_v8 = vor.u32 %v13283_v58, %v9335_v59  ;;  %v13239_v31 = vld [vmem:[#allocation9 + $0x84] sm:$0xf] }
  0x88   : > { %1608 = vmatpush.bf16.msrb.mxu3 %v9558_v10  ;;  %v9237_v42 = vld [vmem:[#allocation9 + $0x120] sm:$0xf]  ;;  %v13261_v43 = vld [vmem:[#allocation9 + $0x12c] sm:$0xf0]  ;;  %v9510_v47 = vor.u32 %v13329_v41, %v9509_v40  ;;  %v13347_v10 = vld [vmem:[#allocation9 + $0x3e4] sm:$0xf] }
  0x89   : > { %1570 = vmatpush.bf16.msrb.mxu0 %v9158_v9  ;;  %v9093_v45 = vld [vmem:[#allocation9] sm:$0xf]  ;;  %v13225_v48 = vld [vmem:[#allocation9 + $0xc] sm:$0xf0]  ;;  %v9238_v51 = vor.u32 %v13261_v43, %v9237_v42  ;;  %v9191_v9 = vld [vmem:[#allocation9 + $0xd0] sm:$0xf0]  ;;  %v9594_v18 = vor.u32 %v13347_v10, %v9591_v11 }
  0x8a   : > { %1583 = vmatpush.bf16.msrb.mxu1 %v9286_v14  ;;  %v9365_v49 = vld [vmem:[#allocation9 + $0x220] sm:$0xf]  ;;  %v13293_v50 = vld [vmem:[#allocation9 + $0x22c] sm:$0xf0]  ;;  %v9094_v61 = vor.u32 %v13225_v48, %v9093_v45  ;;  %v9194_v17 = vor.u32 %v13247_v63, %v9191_v9  ;;  %v9159_v35 = vld [vmem:[#allocation9 + $0x90] sm:$0xf0] }
  0x8b   : > { %1596 = vmatpush.bf16.msrb.mxu2 %v9414_v20  ;;  %v9221_v52 = vld [vmem:[#allocation9 + $0x100] sm:$0xf]  ;;  %v13325_v54 = vld [vmem:[#allocation9 + $0x32c] sm:$0xf0]  ;;  %v9366_v60 = vor.u32 %v13293_v50, %v9365_v49  ;;  %v13311_v20 = vld [vmem:[#allocation9 + $0x2c4] sm:$0xf]  ;;  %v9162_v41 = vor.u32 %v13239_v31, %v9159_v35 }
  0x8c   : > { %1609 = vmatpush.bf16.msrb.mxu3 %v9542_v22  ;;  %v9493_v53 = vld [vmem:[#allocation9 + $0x320] sm:$0xf]  ;;  %v13257_v55 = vld [vmem:[#allocation9 + $0x10c] sm:$0xf0]  ;;  %v9322_v22 = vor.u32 %v13279_v12, %v9319_v13  ;;  %v13339_v36 = vld [vmem:[#allocation9 + $0x3a4] sm:$0xf] }
  0x8d   : > { %1571 = vmatpush.bf16.msrb.mxu0 %v9142_v21  ;;  %v9494_v62 = vor.u32 %v13325_v54, %v9493_v53  ;;  %v9349_v0 = vld [vmem:[#allocation9 + $0x200] sm:$0xf]  ;;  %v13289_v1 = vld [vmem:[#allocation9 + $0x20c] sm:$0xf0]  ;;  %v9222_v3 = vor.u32 %v13257_v55, %v9221_v52  ;;  %v9447_v21 = vld [vmem:[#allocation9 + $0x2d0] sm:$0xf0] }
  0x8e   : > { %1584 = vmatpush.bf16.msrb.mxu1 %v9270_v26  ;;  %v9477_v2 = vld [vmem:[#allocation9 + $0x300] sm:$0xf]  ;;  %v13321_v5 = vld [vmem:[#allocation9 + $0x30c] sm:$0xf0]  ;;  %v9350_v14 = vor.u32 %v13289_v1, %v9349_v0  ;;  %v13275_v26 = vld [vmem:[#allocation9 + $0x1a4] sm:$0xf]  ;;  %v9450_v28 = vor.u32 %v13311_v20, %v9447_v21 }
  0x8f   : > { %1597 = vmatpush.bf16.msrb.mxu2 %v9398_v32  ;;  %v9478_v15 = vor.u32 %v13321_v5, %v9477_v2  ;;  %v13307_v32 = vld [vmem:[#allocation9 + $0x2a4] sm:$0xf]  ;;  %v9559_v37 = vld [vmem:[#allocation9 + $0x3b0] sm:$0xf0] }
  0x90   : > { %1610 = vmatpush.bf16.msrb.mxu3 %v9526_v34  ;;  %v9306_v34 = vor.u32 %v13275_v26, %v9303_v27  ;;  %v9287_v39 = vld [vmem:[#allocation9 + $0x190] sm:$0xf0]  ;;  %v9562_v42 = vor.u32 %v13339_v36, %v9559_v37  ;;  %v13235_v43 = vld [vmem:[#allocation9 + $0x64] sm:$0xf] }
  0x91   : > { %1572 = vmatpush.bf16.msrb.mxu0 %v9126_v33  ;;  %v9431_v33 = vld [vmem:[#allocation9 + $0x2b0] sm:$0xf0]  ;;  %v13335_v48 = vld [vmem:[#allocation9 + $0x384] sm:$0xf] }
  0x92   : > { %1585 = vmatpush.bf16.msrb.mxu1 %v9254_v38  ;;  %v13271_v38 = vld [vmem:[#allocation9 + $0x184] sm:$0xf]  ;;  %v9434_v40 = vor.u32 %v13307_v32, %v9431_v33  ;;  %v9415_v45 = vld [vmem:[#allocation9 + $0x290] sm:$0xf0] }
  0x93   : > { %1598 = vmatpush.bf16.msrb.mxu2 %v9382_v44  ;;  %v13303_v44 = vld [vmem:[#allocation9 + $0x284] sm:$0xf]  ;;  %v9543_v49 = vld [vmem:[#allocation9 + $0x390] sm:$0xf0] }
  0x94   : > { %1611 = vmatpush.bf16.msrb.mxu3 %v9510_v47  ;;  %v9143_v47 = vld [vmem:[#allocation9 + $0x70] sm:$0xf0]  ;;  %v13267_v50 = vld [vmem:[#allocation9 + $0x164] sm:$0xf]  ;;  %v9418_v52 = vor.u32 %v13303_v44, %v9415_v45  ;;  %v9546_v54 = vor.u32 %v13335_v48, %v9543_v49  ;;  %v13286_v44 = vld [vmem:[#allocation9 + $0x1f4] sm:$0xf0] }
  0x95   : > { %1573 = vmatpush.bf16.msrb.mxu0 %v9110_v46  ;;  %v9290_v46 = vor.u32 %v13271_v38, %v9287_v39  ;;  %v9146_v53 = vor.u32 %v13235_v43, %v9143_v47  ;;  %v13231_v56 = vld [vmem:[#allocation9 + $0x44] sm:$0xf]  ;;  %v9127_v57 = vld [vmem:[#allocation9 + $0x50] sm:$0xf0]  ;;  %v9341_v43 = vld [vmem:[#allocation9 + $0x1e8] sm:$0xf] }
  0x96   : > { %1586 = vmatpush.bf16.msrb.mxu1 %v9238_v51  ;;  %v9271_v51 = vld [vmem:[#allocation9 + $0x170] sm:$0xf0]  ;;  %v13263_v58 = vld [vmem:[#allocation9 + $0x144] sm:$0xf] }
  0x97   : > { %1599 = vmatpush.bf16.msrb.mxu2 %v9366_v60  ;;  %v9274_v55 = vor.u32 %v13267_v50, %v9271_v51  ;;  %v9255_v59 = vld [vmem:[#allocation9 + $0x150] sm:$0xf0]  ;;  %v9130_v60 = vor.u32 %v13231_v56, %v9127_v57  ;;  %v13331_v0 = vld [vmem:[#allocation9 + $0x364] sm:$0xf]  ;;  %v9342_v51 = vor.u32 %v13286_v44, %v9341_v43  ;;  %v13282_v56 = vld [vmem:[#allocation9 + $0x1d4] sm:$0xf0] }
  0x98   : > { %1612 = vmatpush.bf16.msrb.mxu3 %v9494_v62  ;;  %v13299_v62 = vld [vmem:[#allocation9 + $0x264] sm:$0xf]  ;;  %v9399_v63 = vld [vmem:[#allocation9 + $0x270] sm:$0xf0] }
  0x99   : > { %1574 = vmatpush.bf16.msrb.mxu0 %v9094_v61  ;;  %v9258_v61 = vor.u32 %v13263_v58, %v9255_v59  ;;  %v9402_v1 = vor.u32 %v13299_v62, %v9399_v63  ;;  %v9527_v2 = vld [vmem:[#allocation9 + $0x370] sm:$0xf0]  ;;  %v13259_v7 = vld [vmem:[#allocation9 + $0x124] sm:$0xf]  ;;  %v9469_v62 = vld [vmem:[#allocation9 + $0x2e8] sm:$0xf] }
  0x9a   : > { %1587 = vmatpush.bf16.msrb.mxu1 %v9222_v3  ;;  %v9530_v3 = vor.u32 %v13331_v0, %v9527_v2  ;;  %v9111_v5 = vld [vmem:[#allocation9 + $0x30] sm:$0xf0]  ;;  %v13295_v10 = vld [vmem:[#allocation9 + $0x244] sm:$0xf]  ;;  %v13318_v63 = vld [vmem:[#allocation9 + $0x2f4] sm:$0xf0] }
  0x9b   : > { %1600 = vmatpush.bf16.msrb.mxu2 %v9350_v14  ;;  %v9383_v11 = vld [vmem:[#allocation9 + $0x250] sm:$0xf0]  ;;  %v13327_v12 = vld [vmem:[#allocation9 + $0x344] sm:$0xf]  ;;  %v9597_v0 = vld [vmem:[#allocation9 + $0x3e8] sm:$0xf] }
  0x9c   : > { %1613 = vmatpush.bf16.msrb.mxu3 %v9478_v15  ;;  %v9386_v13 = vor.u32 %v13295_v10, %v9383_v11  ;;  %v9511_v14 = vld [vmem:[#allocation9 + $0x350] sm:$0xf0]  ;;  %v13323_v25 = vld [vmem:[#allocation9 + $0x324] sm:$0xf]  ;;  %v9470_v11 = vor.u32 %v13318_v63, %v9469_v62  ;;  %v13230_v62 = vld [vmem:[#allocation9 + $0x34] sm:$0xf0] }
  0x9d   : > { %1619 = vmatpush.bf16.msra.mxu0 %v9210_v4  ;;  %v13227_v4 = vld [vmem:[#allocation9 + $0x24] sm:$0xf]  ;;  %v9514_v15 = vor.u32 %v13327_v12, %v9511_v14  ;;  %v9223_v20 = vld [vmem:[#allocation9 + $0x110] sm:$0xf0]  ;;  %v9245_v63 = vld [vmem:[#allocation9 + $0x128] sm:$0xf] }
  0x9e   : > { %1632 = vmatpush.bf16.msra.mxu1 %v9338_v8  ;;  %v9114_v6 = vor.u32 %v13227_v4, %v9111_v5  ;;  %v9239_v8 = vld [vmem:[#allocation9 + $0x130] sm:$0xf0]  ;;  %v13319_v31 = vld [vmem:[#allocation9 + $0x304] sm:$0xf]  ;;  %v13350_v4 = vld [vmem:[#allocation9 + $0x3f4] sm:$0xf0] }
  0x9f   : > { %1645 = vmatpush.bf16.msra.mxu2 %v9466_v16  ;;  %v9242_v9 = vor.u32 %v13259_v7, %v9239_v8  ;;  %v13223_v16 = vld [vmem:[#allocation9 + $0x4] sm:$0xf]  ;;  %v9367_v23 = vld [vmem:[#allocation9 + $0x230] sm:$0xf0]  ;;  %v9181_v5 = vld [vmem:[#allocation9 + $0xa8] sm:$0xf] }
  0xa0   : > { %1658 = vmatpush.bf16.msra.mxu3 %v9594_v18  ;;  %v13255_v18 = vld [vmem:[#allocation9 + $0x104] sm:$0xf]  ;;  %v9495_v26 = vld [vmem:[#allocation9 + $0x330] sm:$0xf0]  ;;  %v9309_v8 = vld [vmem:[#allocation9 + $0x1a8] sm:$0xf] }
  0xa1   : > { %1620 = vmatpush.bf16.msra.mxu0 %v9194_v17  ;;  %v9095_v17 = vld [vmem:[#allocation9 + $0x10] sm:$0xf0]  ;;  %v9226_v21 = vor.u32 %v13255_v18, %v9223_v20  ;;  %v9498_v27 = vor.u32 %v13323_v25, %v9495_v26  ;;  %v13346_v20 = vld [vmem:[#allocation9 + $0x3d4] sm:$0xf0] }
  0xa2   : > { %1633 = vmatpush.bf16.msra.mxu1 %v9322_v22  ;;  %v9098_v19 = vor.u32 %v13223_v16, %v9095_v17  ;;  %v13291_v22 = vld [vmem:[#allocation9 + $0x224] sm:$0xf]  ;;  %v9479_v32 = vld [vmem:[#allocation9 + $0x310] sm:$0xf0]  ;;  %v13314_v16 = vld [vmem:[#allocation9 + $0x2d4] sm:$0xf0] }
  0xa3   : > { %1646 = vmatpush.bf16.msra.mxu2 %v9450_v28  ;;  %v9370_v24 = vor.u32 %v13291_v22, %v9367_v23  ;;  %v13287_v28 = vld [vmem:[#allocation9 + $0x204] sm:$0xf]  ;;  %v9482_v33 = vor.u32 %v13319_v31, %v9479_v32  ;;  %v9581_v17 = vld [vmem:[#allocation9 + $0x3c8] sm:$0xf]  ;;  %v13242_v22 = vld [vmem:[#allocation9 + $0x94] sm:$0xf0] }
  0xa4   : > { %1659 = vmatpush.bf16.msra.mxu3 %v9578_v30  ;;  %v9293_v23 = vld [vmem:[#allocation9 + $0x188] sm:$0xf]  ;;  %v13310_v31 = vld [vmem:[#allocation9 + $0x2b4] sm:$0xf0] }
  0xa5   : > { %1621 = vmatpush.bf16.msra.mxu0 %v9178_v29  ;;  %v9351_v29 = vld [vmem:[#allocation9 + $0x210] sm:$0xf0] }
  0xa6   : > { %1634 = vmatpush.bf16.msra.mxu1 %v9306_v34  ;;  %v9354_v30 = vor.u32 %v13287_v28, %v9351_v29  ;;  %v559_v34 = vld [vmem:[#allocation8] sm:$0xf]  ;;  %v9582_v28 = vor.u32 %v13346_v20, %v9581_v17  ;;  %v13284_v17 = vld [vmem:[#allocation9 + $0x1ec] sm:$0xf] }
  0xa7   : > { %1647 = vmatpush.bf16.msra.mxu2 %v9434_v40  ;;  %v561_v35 = vperm.slane %v559_v34, 0  ;;  %v562_v36 = vperm.slane %v559_v34, 1  ;;  %v9213_v40 = vld [vmem:[#allocation9 + $0xe8] sm:$0xf]  ;;  %v563_v47 = vperm.slane %v559_v34, 2  ;;  %v564_v50 = vperm.slane %v559_v34, 3 }
  0xa8   : > { %1660 = vmatpush.bf16.msra.mxu3 %v9562_v42  ;;  %v13342_v34 = vld [vmem:[#allocation9 + $0x3b4] sm:$0xf0] }
  0xa9   : > { %1622 = vmatpush.bf16.msra.mxu0 %v9162_v41  ;;  %v13254_v41 = vld [vmem:[#allocation9 + $0xf4] sm:$0xf0] }
  0xaa   : > { %1635 = vmatpush.bf16.msra.mxu1 %v9290_v46  ;;  %v9214_v48 = vor.u32 %v13254_v41, %v9213_v40  ;;  %v9421_v41 = vld [vmem:[#allocation9 + $0x288] sm:$0xf] }
  0xab   : > { %1648 = vmatpush.bf16.msra.mxu2 %v9418_v52  ;;  %v9197_v52 = vld [vmem:[#allocation9 + $0xc8] sm:$0xf] }
  0xac   : > { %1661 = vmatpush.bf16.msra.mxu3 %v9546_v54 }
  0xad   : > { %1623 = vmatpush.bf16.msra.mxu0 %v9146_v53  ;;  %v13250_v53 = vld [vmem:[#allocation9 + $0xd4] sm:$0xf0] }
  0xae   : > { %1636 = vmatpush.bf16.msra.mxu1 %v9274_v55  ;;  %v9325_v55 = vld [vmem:[#allocation9 + $0x1c8] sm:$0xf] }
  0xaf   : > { %1649 = vmatpush.bf16.msra.mxu2 %v9402_v1 }
  0xb0   : > { %1662 = vmatpush.bf16.msra.mxu3 %v9530_v3  ;;  %v9326_v3 = vor.u32 %v13282_v56, %v9325_v55  ;;  %v9405_v55 = vld [vmem:[#allocation9 + $0x268] sm:$0xf]  ;;  %v13302_v56 = vld [vmem:[#allocation9 + $0x274] sm:$0xf0] }
  0xb1   : > { %1624 = vmatpush.bf16.msra.mxu0 %v9130_v60 }
  0xb2   : > { %1637 = vmatpush.bf16.msra.mxu1 %v9258_v61  ;;  %v9198_v61 = vor.u32 %v13250_v53, %v9197_v52 }
  0xb3   : > { %1650 = vmatpush.bf16.msra.mxu2 %v9386_v13  ;;  %v9598_v13 = vor.u32 %v13350_v4, %v9597_v0  ;;  %v13262_v0 = vld [vmem:[#allocation9 + $0x134] sm:$0xf0] }
  0xb4   : > { %1663 = vmatpush.bf16.msra.mxu3 %v9514_v15  ;;  %v9453_v15 = vld [vmem:[#allocation9 + $0x2c8] sm:$0xf]  ;;  %v13298_v4 = vld [vmem:[#allocation9 + $0x254] sm:$0xf0] }
  0xb5   : > { %1625 = vmatpush.bf16.msra.mxu0 %v9114_v6  ;;  %v13246_v6 = vld [vmem:[#allocation9 + $0xb4] sm:$0xf0]  ;;  %v9454_v26 = vor.u32 %v13314_v16, %v9453_v15  ;;  %v9215_v16 = vld [vmem:[#allocation9 + $0xf8] sm:$0xf0] }
  0xb6   : > { %1638 = vmatpush.bf16.msra.mxu1 %v9242_v9  ;;  %v13278_v9 = vld [vmem:[#allocation9 + $0x1b4] sm:$0xf0]  ;;  %v9182_v14 = vor.u32 %v13246_v6, %v9181_v5  ;;  %v9517_v5 = vld [vmem:[#allocation9 + $0x348] sm:$0xf] }
  0xb7   : > { %1651 = vmatpush.bf16.msra.mxu2 %v9370_v24  ;;  %v13274_v24 = vld [vmem:[#allocation9 + $0x194] sm:$0xf0] }
  0xb8   : > { %1664 = vmatpush.bf16.msra.mxu3 %v9498_v27  ;;  %v9294_v32 = vor.u32 %v13274_v24, %v9293_v23 }
  0xb9   : > { %1626 = vmatpush.bf16.msra.mxu0 %v9098_v19  ;;  %v9310_v19 = vor.u32 %v13278_v9, %v9309_v8  ;;  %v13330_v8 = vld [vmem:[#allocation9 + $0x354] sm:$0xf0]  ;;  %v9101_v9 = vld [vmem:[#allocation9 + $0x8] sm:$0xf] }
  0xba   : > { %1639 = vmatpush.bf16.msra.mxu1 %v9226_v21  ;;  %v9165_v21 = vld [vmem:[#allocation9 + $0x88] sm:$0xf]  ;;  %v9518_v20 = vor.u32 %v13330_v8, %v9517_v5  ;;  %v9567_v8 = vld [vmem:[#allocation9 + $0x3b8] sm:$0xf0] }
  0xbb   : > { %1652 = vmatpush.bf16.msra.mxu2 %v9354_v30  ;;  %v9166_v29 = vor.u32 %v13242_v22, %v9165_v21  ;;  %v9437_v30 = vld [vmem:[#allocation9 + $0x2a8] sm:$0xf]  ;;  %v13294_v22 = vld [vmem:[#allocation9 + $0x234] sm:$0xf0] }
  0xbc   : > { %1665 = vmatpush.bf16.msra.mxu3 %v9482_v33  ;;  %v9565_v33 = vld [vmem:[#allocation9 + $0x3a8] sm:$0xf] }
  0xbd   : > { %v9566_v40 = vor.u32 %v13342_v34, %v9565_v33  ;;  %v9373_v21 = vld [vmem:[#allocation9 + $0x228] sm:$0xf]  ;;  %v9327_v33 = vld [vmem:[#allocation9 + $0x1d8] sm:$0xf0] }
  0xf9   : > { %v738_v37 = vpop.f32.mrf.mxu0 }
  0xfa   : > { %v739_v38 = vadd.f32 %v738_v37, %v561_v35  ;;  %v751_v39 = vpop.f32.mrf.mxu1  ;;  %v9149_v35 = vld [vmem:[#allocation9 + $0x68] sm:$0xf] }
  0xfb   : > { %v752_v42 = vadd.f32 %v751_v39, %v562_v36  ;;  %v13238_v36 = vld [vmem:[#allocation9 + $0x74] sm:$0xf0]  ;;  %v9277_v37 = vld [vmem:[#allocation9 + $0x168] sm:$0xf]  ;;  %v9438_v39 = vor.u32 %v13310_v31, %v9437_v30  ;;  %v9374_v30 = vor.u32 %v13294_v22, %v9373_v21  ;;  %v9199_v31 = vld [vmem:[#allocation9 + $0xd8] sm:$0xf0] }
  0xfc   : > { %v781_v45 = vmax.f32 %v739_v38, 0.0  ;;  %v13270_v38 = vld [vmem:[#allocation9 + $0x174] sm:$0xf0]  ;;  %v9150_v43 = vor.u32 %v13238_v36, %v9149_v35  ;;  %v9357_v35 = vld [vmem:[#allocation9 + $0x208] sm:$0xf] }
  0xfd   : > { %v782_v46 = vmax.f32 %v752_v42, 0.0  ;;  %v13306_v42 = vld [vmem:[#allocation9 + $0x294] sm:$0xf0]  ;;  %v9278_v44 = vor.u32 %v13270_v38, %v9277_v37  ;;  %v9485_v37 = vld [vmem:[#allocation9 + $0x308] sm:$0xf] }
  0xfe   : > { %v15060_v49 = vpack.c.bf16 %v781_v45, %v781_v45  ;;  %v9549_v45 = vld [vmem:[#allocation9 + $0x388] sm:$0xf]  ;;  %v9422_v52 = vor.u32 %v13306_v42, %v9421_v41  ;;  %v13290_v36 = vld [vmem:[#allocation9 + $0x214] sm:$0xf0]  ;;  %v13336_v21 = vld [vmem:[#allocation9 + $0x38c] sm:$0xf] }
  0xff   : > { %v15062_v54 = vpack.c.bf16 %v782_v46, %v782_v46  ;;  %v13338_v46 = vld [vmem:[#allocation9 + $0x394] sm:$0xf0]  ;;  %v9551_v22 = vld [vmem:[#allocation9 + $0x398] sm:$0xf0] }
 0x100   : > { %1575 = vmatmul.bf16.vlgmr.msrb.gmra.mxu0 %v15060_v49  ;;  %v9550_v53 = vor.u32 %v13338_v46, %v9549_v45  ;;  %v13322_v38 = vld [vmem:[#allocation9 + $0x314] sm:$0xf0]  ;;  %v13244_v45 = vld [vmem:[#allocation9 + $0xac] sm:$0xf]  ;;  %v9358_v46 = vor.u32 %v13290_v36, %v9357_v35  ;;  %v9119_v36 = vld [vmem:[#allocation9 + $0x38] sm:$0xf0] }
 0x101   : > { %v764_v57 = vpop.f32.mrf.mxu2  ;;  %1588 = vmatmul.bf16.vlgmr.msrb.gmra.mxu1 %v15062_v54  ;;  %1671 = vmatpush.bf16.msrb.mxu0 %v9214_v48  ;;  %v740_v60 = vpop.f32.mrf.mxu0  ;;  %v13234_v48 = vld [vmem:[#allocation9 + $0x54] sm:$0xf0]  ;;  %v13228_v35 = vld [vmem:[#allocation9 + $0x2c] sm:$0xf] }
 0x102   : > { %v765_v58 = vadd.f32 %v764_v57, %v563_v47  ;;  %v777_v59 = vpop.f32.mrf.mxu3  ;;  %1684 = vmatpush.bf16.msrb.mxu1 %v9342_v51  ;;  %v753_v2 = vpop.f32.mrf.mxu1  ;;  %v9133_v47 = vld [vmem:[#allocation9 + $0x48] sm:$0xf]  ;;  %v13266_v51 = vld [vmem:[#allocation9 + $0x154] sm:$0xf0] }
 0x103   : > { %v778_v1 = vadd.f32 %v777_v59, %v564_v50  ;;  %v9261_v50 = vld [vmem:[#allocation9 + $0x148] sm:$0xf]  ;;  %v9134_v57 = vor.u32 %v13234_v48, %v9133_v47  ;;  %v13334_v60 = vld [vmem:[#allocation9 + $0x374] sm:$0xf0]  ;;  %v9183_v47 = vld [vmem:[#allocation9 + $0xb8] sm:$0xf0] }
 0x104   : > { %v783_v7 = vmax.f32 %v765_v58, 0.0  ;;  %v9262_v58 = vor.u32 %v13266_v51, %v9261_v50  ;;  %v9533_v59 = vld [vmem:[#allocation9 + $0x368] sm:$0xf]  ;;  %v13276_v48 = vld [vmem:[#allocation9 + $0x1ac] sm:$0xf]  ;;  %v9486_v51 = vor.u32 %v13322_v38, %v9485_v37 }
 0x105   : > { %v784_v10 = vmax.f32 %v778_v1, 0.0  ;;  %1672 = vmatpush.bf16.msrb.mxu0 %v9198_v61  ;;  %v9117_v61 = vld [vmem:[#allocation9 + $0x28] sm:$0xf]  ;;  %v9406_v1 = vor.u32 %v13302_v56, %v9405_v55  ;;  %v9534_v2 = vor.u32 %v13334_v60, %v9533_v59  ;;  %v9311_v50 = vld [vmem:[#allocation9 + $0x1b8] sm:$0xf0] }
 0x106   : > { %v15066_v12 = vpack.c.bf16 %v783_v7, %v783_v7  ;;  %1685 = vmatpush.bf16.msrb.mxu1 %v9326_v3  ;;  %v9389_v3 = vld [vmem:[#allocation9 + $0x248] sm:$0xf]  ;;  %v9118_v6 = vor.u32 %v13230_v62, %v9117_v61  ;;  %v9246_v7 = vor.u32 %v13262_v0, %v9245_v63  ;;  %v13312_v55 = vld [vmem:[#allocation9 + $0x2cc] sm:$0xf]  ;;  %v9455_v56 = vld [vmem:[#allocation9 + $0x2d8] sm:$0xf0] }
 0x107   : > { %v15068_v18 = vpack.c.bf16 %v784_v10, %v784_v10  ;;  %v13226_v10 = vld [vmem:[#allocation9 + $0x14] sm:$0xf0]  ;;  %v9390_v15 = vor.u32 %v13298_v4, %v9389_v3  ;;  %v13344_v59 = vld [vmem:[#allocation9 + $0x3cc] sm:$0xf]  ;;  %v9583_v60 = vld [vmem:[#allocation9 + $0x3d8] sm:$0xf0] }
 0x108   : > { %1601 = vmatmul.bf16.vlgmr.msrb.gmra.mxu2 %v15066_v12  ;;  %v9102_v23 = vor.u32 %v13226_v10, %v9101_v9  ;;  %v13240_v61 = vld [vmem:[#allocation9 + $0x8c] sm:$0xf]  ;;  %v9167_v62 = vld [vmem:[#allocation9 + $0x98] sm:$0xf0] }
 0x109   : > { %1614 = vmatmul.bf16.vlgmr.msrb.gmra.mxu3 %v15068_v18  ;;  %1697 = vmatpush.bf16.msrb.mxu2 %v9470_v11  ;;  %v766_v25 = vpop.f32.mrf.mxu2  ;;  %v9229_v11 = vld [vmem:[#allocation9 + $0x108] sm:$0xf]  ;;  %v13272_v63 = vld [vmem:[#allocation9 + $0x18c] sm:$0xf]  ;;  %v9295_v0 = vld [vmem:[#allocation9 + $0x198] sm:$0xf0]  ;;  %v9170_v5 = vor.u32 %v13240_v61, %v9167_v62 }
 0x10a   : > { %1710 = vmatpush.bf16.msrb.mxu3 %v9598_v13  ;;  %v779_v27 = vpop.f32.mrf.mxu3  ;;  %1673 = vmatpush.bf16.msrb.mxu0 %v9182_v14  ;;  %v13258_v13 = vld [vmem:[#allocation9 + $0x114] sm:$0xf0]  ;;  %v13252_v14 = vld [vmem:[#allocation9 + $0xec] sm:$0xf]  ;;  %v9501_v25 = vld [vmem:[#allocation9 + $0x328] sm:$0xf] }
 0x10b   : > { %1686 = vmatpush.bf16.msrb.mxu1 %v9310_v19  ;;  %v9343_v19 = vld [vmem:[#allocation9 + $0x1f8] sm:$0xf0]  ;;  %v9230_v24 = vor.u32 %v13258_v13, %v9229_v11  ;;  %v9218_v27 = vor.u32 %v13252_v14, %v9215_v16  ;;  %v13308_v3 = vld [vmem:[#allocation9 + $0x2ac] sm:$0xf] }
 0x10c   : > { %v9439_v4 = vld [vmem:[#allocation9 + $0x2b8] sm:$0xf0]  ;;  %v13236_v9 = vld [vmem:[#allocation9 + $0x6c] sm:$0xf] }
 0x10d   : > { %1698 = vmatpush.bf16.msrb.mxu2 %v9454_v26  ;;  %v13326_v26 = vld [vmem:[#allocation9 + $0x334] sm:$0xf0]  ;;  %v9151_v10 = vld [vmem:[#allocation9 + $0x78] sm:$0xf0]  ;;  %v13268_v11 = vld [vmem:[#allocation9 + $0x16c] sm:$0xf]  ;;  %v9442_v14 = vor.u32 %v13308_v3, %v9439_v4 }
 0x10e   : > { %1711 = vmatpush.bf16.msrb.mxu3 %v9582_v28  ;;  %1674 = vmatpush.bf16.msrb.mxu0 %v9166_v29  ;;  %v9346_v28 = vor.u32 %v13284_v17, %v9343_v19  ;;  %v13248_v29 = vld [vmem:[#allocation9 + $0xcc] sm:$0xf]  ;;  %v9502_v34 = vor.u32 %v13326_v26, %v9501_v25  ;;  %v9279_v13 = vld [vmem:[#allocation9 + $0x178] sm:$0xf0]  ;;  %v9154_v19 = vor.u32 %v13236_v9, %v9151_v10 }
 0x10f   : > { %1687 = vmatpush.bf16.msrb.mxu1 %v9294_v32  ;;  %v13280_v32 = vld [vmem:[#allocation9 + $0x1cc] sm:$0xf]  ;;  %v9202_v41 = vor.u32 %v13248_v29, %v9199_v31  ;;  %v9423_v17 = vld [vmem:[#allocation9 + $0x298] sm:$0xf0] }
 0x110   : > { %1627 = vmatmul.bf16.vlgmr.msra.gmra.mxu0 %v15060_v49  ;;  %v9330_v42 = vor.u32 %v13280_v32, %v9327_v33  ;;  %v13304_v16 = vld [vmem:[#allocation9 + $0x28c] sm:$0xf]  ;;  %v9263_v26 = vld [vmem:[#allocation9 + $0x158] sm:$0xf0] }
 0x111   : > { %1699 = vmatpush.bf16.msrb.mxu2 %v9438_v39  ;;  %1640 = vmatmul.bf16.vlgmr.msra.gmra.mxu1 %v15062_v54  ;;  %v13316_v39 = vld [vmem:[#allocation9 + $0x2ec] sm:$0xf]  ;;  %v9247_v38 = vld [vmem:[#allocation9 + $0x138] sm:$0xf0] }
 0x112   : > { %1712 = vmatpush.bf16.msrb.mxu3 %v9566_v40  ;;  %1675 = vmatpush.bf16.msrb.mxu0 %v9150_v43  ;;  %v9471_v40 = vld [vmem:[#allocation9 + $0x2f8] sm:$0xf0]  ;;  %v13348_v43 = vld [vmem:[#allocation9 + $0x3ec] sm:$0xf] }
 0x113   : > { %1688 = vmatpush.bf16.msrb.mxu1 %v9278_v44  ;;  %v9599_v44 = vld [vmem:[#allocation9 + $0x3f8] sm:$0xf0]  ;;  %v13264_v25 = vld [vmem:[#allocation9 + $0x14c] sm:$0xf] }
 0x114   : > { %v13300_v29 = vld [vmem:[#allocation9 + $0x26c] sm:$0xf]  ;;  %v9266_v32 = vor.u32 %v13264_v25, %v9263_v26  ;;  %v9359_v10 = vld [vmem:[#allocation9 + $0x218] sm:$0xf0]  ;;  %v9957_v26 = vld [vmem:[#allocation12 + $0x2c0] sm:$0xf] }
 0x115   : > { %1700 = vmatpush.bf16.msrb.mxu2 %v9422_v52  ;;  %v9474_v52 = vor.u32 %v13316_v39, %v9471_v40  ;;  %v13332_v33 = vld [vmem:[#allocation9 + $0x36c] sm:$0xf] }
 0x116   : > { %1713 = vmatpush.bf16.msrb.mxu3 %v9550_v53  ;;  %1676 = vmatpush.bf16.msrb.mxu0 %v9134_v57  ;;  %v9602_v53 = vor.u32 %v13348_v43, %v9599_v44  ;;  %v9186_v57 = vor.u32 %v13244_v45, %v9183_v47  ;;  %v13260_v37 = vld [vmem:[#allocation9 + $0x12c] sm:$0xf]  ;;  %v9122_v44 = vor.u32 %v13228_v35, %v9119_v36  ;;  %v13365_v35 = vld [vmem:[#allocation12 + $0x6c] sm:$0xf0] }
 0x117   : > { %1689 = vmatpush.bf16.msrb.mxu1 %v9262_v58  ;;  %v9314_v58 = vor.u32 %v13276_v48, %v9311_v50  ;;  %v13328_v43 = vld [vmem:[#allocation9 + $0x34c] sm:$0xf]  ;;  %v9250_v45 = vor.u32 %v13260_v37, %v9247_v38  ;;  %v9103_v48 = vld [vmem:[#allocation9 + $0x18] sm:$0xf0]  ;;  %v9781_v37 = vld [vmem:[#allocation12 + $0x160] sm:$0xf] }
 0x118   : > { %1653 = vmatmul.bf16.vlgmr.msra.gmra.mxu2 %v15066_v12  ;;  %v13224_v47 = vld [vmem:[#allocation9 + $0xc] sm:$0xf]  ;;  %v13397_v38 = vld [vmem:[#allocation12 + $0x16c] sm:$0xf0] }
 0x119   : > { %1666 = vmatmul.bf16.vlgmr.msra.gmra.mxu3 %v15068_v18  ;;  %1701 = vmatpush.bf16.msrb.mxu2 %v9406_v1  ;;  %v9458_v1 = vor.u32 %v13312_v55, %v9455_v56  ;;  %v13256_v50 = vld [vmem:[#allocation9 + $0x10c] sm:$0xf]  ;;  %v13381_v55 = vld [vmem:[#allocation12 + $0xec] sm:$0xf0]  ;;  %v9845_v56 = vld [vmem:[#allocation12 + $0x1e0] sm:$0xf]  ;;  %v9106_v61 = vor.u32 %v13224_v47, %v9103_v48 }
 0x11a   : > { %1714 = vmatpush.bf16.msrb.mxu3 %v9534_v2  ;;  %1677 = vmatpush.bf16.msrb.mxu0 %v9118_v6  ;;  %v9586_v2 = vor.u32 %v13344_v59, %v9583_v60  ;;  %v9298_v6 = vor.u32 %v13272_v63, %v9295_v0  ;;  %v13292_v59 = vld [vmem:[#allocation9 + $0x22c] sm:$0xf]  ;;  %v9375_v60 = vld [vmem:[#allocation9 + $0x238] sm:$0xf0]  ;;  %v9605_v48 = vld [vmem:[#allocation12] sm:$0xf] }
 0x11b   : > { %1690 = vmatpush.bf16.msrb.mxu1 %v9246_v7  ;;  %v13340_v7 = vld [vmem:[#allocation9 + $0x3ac] sm:$0xf]  ;;  %v9503_v0 = vld [vmem:[#allocation9 + $0x338] sm:$0xf0]  ;;  %v9378_v4 = vor.u32 %v13292_v59, %v9375_v60  ;;  %v13371_v59 = vld [vmem:[#allocation12 + $0xa4] sm:$0xf] }
 0x11c   : > { %v13324_v63 = vld [vmem:[#allocation9 + $0x32c] sm:$0xf]  ;;  %v9687_v60 = vld [vmem:[#allocation12 + $0xb0] sm:$0xf0] }
 0x11d   : > { %1702 = vmatpush.bf16.msrb.mxu2 %v9390_v15  ;;  %v9570_v15 = vor.u32 %v13340_v7, %v9567_v8  ;;  %v13409_v7 = vld [vmem:[#allocation12 + $0x1cc] sm:$0xf0]  ;;  %v9506_v8 = vor.u32 %v13324_v63, %v9503_v0  ;;  %v13288_v9 = vld [vmem:[#allocation9 + $0x20c] sm:$0xf]  ;;  %v9941_v0 = vld [vmem:[#allocation12 + $0x2a0] sm:$0xf] }
 0x11e   : > { %1715 = vmatpush.bf16.msrb.mxu3 %v9518_v20  ;;  %1678 = vmatpush.bf16.msrb.mxu0 %v9102_v23  ;;  %v9282_v20 = vor.u32 %v13268_v11, %v9279_v13  ;;  %v13232_v23 = vld [vmem:[#allocation9 + $0x4c] sm:$0xf]  ;;  %v9487_v13 = vld [vmem:[#allocation9 + $0x318] sm:$0xf0]  ;;  %v13389_v63 = vld [vmem:[#allocation12 + $0x12c] sm:$0xf0] }
 0x11f   : > { %1691 = vmatpush.bf16.msrb.mxu1 %v9230_v24  ;;  %v9135_v24 = vld [vmem:[#allocation9 + $0x58] sm:$0xf0]  ;;  %v13320_v11 = vld [vmem:[#allocation9 + $0x30c] sm:$0xf] }
 0x120   : > { %v9138_v31 = vor.u32 %v13232_v23, %v9135_v24  ;;  %v9813_v23 = vld [vmem:[#allocation12 + $0x1a0] sm:$0xf]  ;;  %v13405_v24 = vld [vmem:[#allocation12 + $0x1ac] sm:$0xf0] }
 0x121   : > { %1703 = vmatpush.bf16.msrb.mxu2 %v9374_v30  ;;  %1679 = vmatmul.bf16.vlgmr.msrb.gmra.mxu0 %v15060_v49  ;;  %v9407_v30 = vld [vmem:[#allocation9 + $0x278] sm:$0xf0] }
 0x122   : > { %1723 = vmatpush.bf16.msra.mxu0 %v9218_v27  ;;  %1716 = vmatpush.bf16.msrb.mxu3 %v9502_v34  ;;  %v9426_v27 = vor.u32 %v13304_v16, %v9423_v17  ;;  %v9535_v34 = vld [vmem:[#allocation9 + $0x378] sm:$0xf0]  ;;  %v9410_v39 = vor.u32 %v13300_v29, %v9407_v30  ;;  %v9669_v29 = vld [vmem:[#allocation12 + $0x80] sm:$0xf]  ;;  %v13369_v30 = vld [vmem:[#allocation12 + $0x8c] sm:$0xf0] }
 0x123   : > { %1736 = vmatpush.bf16.msra.mxu1 %v9346_v28  ;;  %v9554_v28 = vor.u32 %v13336_v21, %v9551_v22  ;;  %v9538_v40 = vor.u32 %v13332_v33, %v9535_v34  ;;  %v13373_v21 = vld [vmem:[#allocation12 + $0xac] sm:$0xf0]  ;;  %v9490_v22 = vor.u32 %v13320_v11, %v9487_v13  ;;  %v9670_v34 = vor.u32 %v13369_v30, %v9669_v29  ;;  %v9893_v30 = vld [vmem:[#allocation12 + $0x240] sm:$0xf] }
 0x124   : > { %1692 = vmatmul.bf16.vlgmr.msrb.gmra.mxu1 %v15062_v54  ;;  %v13401_v33 = vld [vmem:[#allocation12 + $0x18c] sm:$0xf0] }
 0x125   : > { %1704 = vmatpush.bf16.msrb.mxu2 %v9358_v46  ;;  %v9519_v46 = vld [vmem:[#allocation9 + $0x358] sm:$0xf0]  ;;  %v13433_v11 = vld [vmem:[#allocation12 + $0x28c] sm:$0xf0] }
 0x126   : > { %1724 = vmatpush.bf16.msra.mxu0 %v9202_v41  ;;  %1717 = vmatpush.bf16.msrb.mxu3 %v9486_v51  ;;  %v13296_v41 = vld [vmem:[#allocation9 + $0x24c] sm:$0xf]  ;;  %v9231_v51 = vld [vmem:[#allocation9 + $0x118] sm:$0xf0] }
 0x127   : > { %1737 = vmatpush.bf16.msra.mxu1 %v9330_v42  ;;  %v9391_v42 = vld [vmem:[#allocation9 + $0x258] sm:$0xf0]  ;;  %v9234_v62 = vor.u32 %v13256_v50, %v9231_v51  ;;  %v13353_v50 = vld [vmem:[#allocation12 + $0xc] sm:$0xf0]  ;;  %v13379_v51 = vld [vmem:[#allocation12 + $0xe4] sm:$0xf] }
 0x128   : > { %1705 = vmatmul.bf16.vlgmr.msrb.gmra.mxu2 %v15066_v12 }
 0x129   : > { %1749 = vmatpush.bf16.msra.mxu2 %v9474_v52  ;;  %1718 = vmatmul.bf16.vlgmr.msrb.gmra.mxu3 %v15068_v18  ;;  %v9717_v52 = vld [vmem:[#allocation12 + $0xe0] sm:$0xf] }
 0x12a   : > { %1762 = vmatpush.bf16.msra.mxu3 %v9602_v53  ;;  %1725 = vmatpush.bf16.msra.mxu0 %v9186_v57  ;;  %v9394_v53 = vor.u32 %v13296_v41, %v9391_v42  ;;  %v13413_v57 = vld [vmem:[#allocation12 + $0x1ec] sm:$0xf0]  ;;  %v9782_v42 = vor.u32 %v13397_v38, %v9781_v37  ;;  %v9877_v37 = vld [vmem:[#allocation12 + $0x220] sm:$0xf] }
 0x12b   : > { %1738 = vmatpush.bf16.msra.mxu1 %v9314_v58  ;;  %v9522_v58 = vor.u32 %v13328_v43, %v9519_v46  ;;  %v9846_v3 = vor.u32 %v13413_v57, %v9845_v56  ;;  %v13361_v41 = vld [vmem:[#allocation12 + $0x4c] sm:$0xf0]  ;;  %v9765_v43 = vld [vmem:[#allocation12 + $0x140] sm:$0xf]  ;;  %v13375_v56 = vld [vmem:[#allocation12 + $0xc4] sm:$0xf] }
 0x12c   : > { %v13357_v46 = vld [vmem:[#allocation12 + $0x2c] sm:$0xf0]  ;;  %v9703_v57 = vld [vmem:[#allocation12 + $0xd0] sm:$0xf0] }
 0x12d   : > { %1750 = vmatpush.bf16.msra.mxu2 %v9458_v1  ;;  %v9718_v1 = vor.u32 %v13381_v55, %v9717_v52  ;;  %v9719_v52 = vld [vmem:[#allocation12 + $0xf0] sm:$0xf0]  ;;  %v13421_v38 = vld [vmem:[#allocation12 + $0x22c] sm:$0xf0] }
 0x12e   : > { %1763 = vmatpush.bf16.msra.mxu3 %v9586_v2  ;;  %1726 = vmatpush.bf16.msra.mxu0 %v9170_v5  ;;  %v9701_v2 = vld [vmem:[#allocation12 + $0xc0] sm:$0xf]  ;;  %v13377_v5 = vld [vmem:[#allocation12 + $0xcc] sm:$0xf0]  ;;  %v9722_v55 = vor.u32 %v13379_v51, %v9719_v52  ;;  %v9783_v51 = vld [vmem:[#allocation12 + $0x170] sm:$0xf0] }
 0x12f   : > { %1739 = vmatpush.bf16.msra.mxu1 %v9298_v6  ;;  %v9829_v6 = vld [vmem:[#allocation12 + $0x1c0] sm:$0xf]  ;;  %v9702_v16 = vor.u32 %v13377_v5, %v9701_v2  ;;  %v13437_v2 = vld [vmem:[#allocation12 + $0x2ac] sm:$0xf0] }
 0x130   : > { %v9830_v17 = vor.u32 %v13409_v7, %v9829_v6  ;;  %v9942_v5 = vor.u32 %v13437_v2, %v9941_v0  ;;  %v9733_v7 = vld [vmem:[#allocation12 + $0x100] sm:$0xf] }
 0x131   : > { %1751 = vmatpush.bf16.msra.mxu2 %v9442_v14  ;;  %v9973_v14 = vld [vmem:[#allocation12 + $0x2e0] sm:$0xf] }
 0x132   : > { %1764 = vmatpush.bf16.msra.mxu3 %v9570_v15  ;;  %1727 = vmatpush.bf16.msra.mxu0 %v9154_v19  ;;  %v13445_v15 = vld [vmem:[#allocation12 + $0x2ec] sm:$0xf0]  ;;  %v9362_v19 = vor.u32 %v13288_v9, %v9359_v10  ;;  %v9925_v9 = vld [vmem:[#allocation12 + $0x280] sm:$0xf] }
 0x133   : > { %1740 = vmatpush.bf16.msra.mxu1 %v9282_v20  ;;  %v9685_v20 = vld [vmem:[#allocation12 + $0xa0] sm:$0xf]  ;;  %v9974_v25 = vor.u32 %v13445_v15, %v9973_v14  ;;  %v9926_v13 = vor.u32 %v13433_v11, %v9925_v9  ;;  %v13363_v14 = vld [vmem:[#allocation12 + $0x64] sm:$0xf]  ;;  %v9655_v15 = vld [vmem:[#allocation12 + $0x70] sm:$0xf0] }
 0x134   : > { %v9751_v9 = vld [vmem:[#allocation12 + $0x130] sm:$0xf0] }
 0x135   : > { %1752 = vmatpush.bf16.msra.mxu2 %v9426_v27  ;;  %v13441_v27 = vld [vmem:[#allocation12 + $0x2cc] sm:$0xf0] }
 0x136   : > { %1765 = vmatpush.bf16.msra.mxu3 %v9554_v28  ;;  %1728 = vmatpush.bf16.msra.mxu0 %v9138_v31  ;;  %v9686_v28 = vor.u32 %v13373_v21, %v9685_v20  ;;  %v9814_v31 = vor.u32 %v13405_v24, %v9813_v23  ;;  %v9909_v20 = vld [vmem:[#allocation12 + $0x260] sm:$0xf]  ;;  %v13429_v21 = vld [vmem:[#allocation12 + $0x26c] sm:$0xf0]  ;;  %v13359_v24 = vld [vmem:[#allocation12 + $0x44] sm:$0xf] }
 0x137   : > { %1741 = vmatpush.bf16.msra.mxu1 %v9266_v32  ;;  %v9797_v32 = vld [vmem:[#allocation12 + $0x180] sm:$0xf]  ;;  %v9910_v23 = vor.u32 %v13429_v21, %v9909_v20  ;;  %v13383_v21 = vld [vmem:[#allocation12 + $0x104] sm:$0xf] }
 0x138   : > { %v9798_v36 = vor.u32 %v13401_v33, %v9797_v32  ;;  %v13355_v33 = vld [vmem:[#allocation12 + $0x24] sm:$0xf] }
 0x139   : > { %1753 = vmatpush.bf16.msra.mxu2 %v9410_v39 }
 0x13a   : > { %1766 = vmatpush.bf16.msra.mxu3 %v9538_v40  ;;  %1729 = vmatpush.bf16.msra.mxu0 %v9122_v44  ;;  %v9637_v40 = vld [vmem:[#allocation12 + $0x40] sm:$0xf]  ;;  %v13393_v44 = vld [vmem:[#allocation12 + $0x14c] sm:$0xf0] }
 0x13b   : > { %1742 = vmatpush.bf16.msra.mxu1 %v9250_v45  ;;  %v9621_v45 = vld [vmem:[#allocation12 + $0x20] sm:$0xf] }
 0x13c   : > { %v9622_v47 = vor.u32 %v13357_v46, %v9621_v45  ;;  %v9861_v45 = vld [vmem:[#allocation12 + $0x200] sm:$0xf]  ;;  %v13417_v46 = vld [vmem:[#allocation12 + $0x20c] sm:$0xf0] }
 0x13d   : > { %1754 = vmatpush.bf16.msra.mxu2 %v9394_v53  ;;  %v9606_v53 = vor.u32 %v13353_v50, %v9605_v48  ;;  %v13477_v48 = vld [vmem:[#allocation12 + $0x3ec] sm:$0xf0]  ;;  %v13395_v50 = vld [vmem:[#allocation12 + $0x164] sm:$0xf] }
 0x13e   : > { %1767 = vmatpush.bf16.msra.mxu3 %v9522_v58  ;;  %1730 = vmatpush.bf16.msra.mxu0 %v9106_v61  ;;  %v9706_v58 = vor.u32 %v13375_v56, %v9703_v57  ;;  %v9690_v61 = vor.u32 %v13371_v59, %v9687_v60  ;;  %v9975_v56 = vld [vmem:[#allocation12 + $0x2f0] sm:$0xf0]  ;;  %v13473_v59 = vld [vmem:[#allocation12 + $0x3cc] sm:$0xf0] }
 0x13f   : > { %1743 = vmatpush.bf16.msra.mxu1 %v9234_v62  ;;  %v9749_v62 = vld [vmem:[#allocation12 + $0x120] sm:$0xf] }
 0x141   : > { %1755 = vmatpush.bf16.msra.mxu2 %v9378_v4  ;;  %1731 = vmatmul.bf16.vlgmr.msra.gmra.mxu0 %v15060_v49  ;;  %v9958_v49 = vor.u32 %v13441_v27, %v9957_v26  ;;  %v9671_v4 = vld [vmem:[#allocation12 + $0x90] sm:$0xf0]  ;;  %v13407_v26 = vld [vmem:[#allocation12 + $0x1c4] sm:$0xf] }
 0x142   : > { %2561 = vmatpush.bf16.msrb.mxu0 %v9718_v1  ;;  %1768 = vmatpush.bf16.msra.mxu3 %v9506_v8  ;;  %v9750_v1 = vor.u32 %v13389_v63, %v9749_v62  ;;  %v13385_v8 = vld [vmem:[#allocation12 + $0x10c] sm:$0xf0]  ;;  %v9767_v62 = vld [vmem:[#allocation12 + $0x150] sm:$0xf0]  ;;  %v13439_v63 = vld [vmem:[#allocation12 + $0x2c4] sm:$0xf] }
 0x143   : > { %2574 = vmatpush.bf16.msrb.mxu1 %v9846_v3  ;;  %v13367_v3 = vld [vmem:[#allocation12 + $0x84] sm:$0xf]  ;;  %v9734_v10 = vor.u32 %v13385_v8, %v9733_v7 }
 0x144   : > { %1744 = vmatmul.bf16.vlgmr.msra.gmra.mxu1 %v15062_v54  ;;  %v9653_v54 = vld [vmem:[#allocation12 + $0x60] sm:$0xf]  ;;  %v9674_v6 = vor.u32 %v13367_v3, %v9671_v4  ;;  %v15084_v3 = vld [vmem:[#allocation11] sm:$0xf]  ;;  %v13387_v8 = vld [vmem:[#allocation12 + $0x124] sm:$0xf] }
 0x145   : > { %1756 = vmatpush.bf16.msra.mxu2 %v9362_v19  ;;  %v9654_v39 = vor.u32 %v13365_v35, %v9653_v54  ;;  %v9847_v19 = vld [vmem:[#allocation12 + $0x1f0] sm:$0xf0]  ;;  %v10069_v4 = vld [vmem:[#allocation12 + $0x3a0] sm:$0xf] }
 0x146   : > { %2562 = vmatpush.bf16.msrb.mxu0 %v9702_v16  ;;  %1769 = vmatpush.bf16.msra.mxu3 %v9490_v22  ;;  %v13411_v16 = vld [vmem:[#allocation12 + $0x1e4] sm:$0xf]  ;;  %v9815_v35 = vld [vmem:[#allocation12 + $0x1b0] sm:$0xf0] }
 0x147   : > { %2575 = vmatpush.bf16.msrb.mxu1 %v9830_v17  ;;  %v9658_v17 = vor.u32 %v13363_v14, %v9655_v15  ;;  %v9850_v22 = vor.u32 %v13411_v16, %v9847_v19  ;;  %v9943_v14 = vld [vmem:[#allocation12 + $0x2b0] sm:$0xf0]  ;;  %v919_v15 = vperm.slane %v15084_v3, 0  ;;  %v13465_v19 = vld [vmem:[#allocation12 + $0x38c] sm:$0xf0] }
 0x148   : > { %1757 = vmatmul.bf16.vlgmr.msra.gmra.mxu2 %v15066_v12  ;;  %v9638_v12 = vor.u32 %v13361_v41, %v9637_v40  ;;  %v13351_v40 = vld [vmem:[#allocation12 + $0x4] sm:$0xf]  ;;  %v9607_v41 = vld [vmem:[#allocation12 + $0x10] sm:$0xf0] }
 0x149   : > { %2587 = vmatpush.bf16.msrb.mxu2 %v9974_v25  ;;  %1770 = vmatmul.bf16.vlgmr.msra.gmra.mxu3 %v15068_v18  ;;  %v9766_v18 = vor.u32 %v13393_v44, %v9765_v43  ;;  %v9639_v25 = vld [vmem:[#allocation12 + $0x50] sm:$0xf0]  ;;  %v9610_v43 = vor.u32 %v13351_v40, %v9607_v41 }
 0x14a   : > { %2563 = vmatpush.bf16.msrb.mxu0 %v9686_v28  ;;  %v9642_v27 = vor.u32 %v13359_v24, %v9639_v25  ;;  %v9831_v28 = vld [vmem:[#allocation12 + $0x1d0] sm:$0xf0] }
 0x14b   : > { %2576 = vmatpush.bf16.msrb.mxu1 %v9814_v31  ;;  %v9834_v29 = vor.u32 %v13407_v26, %v9831_v28  ;;  %v13425_v31 = vld [vmem:[#allocation12 + $0x24c] sm:$0xf0]  ;;  %v9799_v44 = vld [vmem:[#allocation12 + $0x190] sm:$0xf0]  ;;  %v10037_v28 = vld [vmem:[#allocation12 + $0x360] sm:$0xf] }
 0x14c   : > { %v9894_v32 = vor.u32 %v13425_v31, %v9893_v30  ;;  %v9927_v25 = vld [vmem:[#allocation12 + $0x290] sm:$0xf0] }
 0x14d   : > { %2588 = vmatpush.bf16.msrb.mxu2 %v9958_v49  ;;  %v9623_v49 = vld [vmem:[#allocation12 + $0x30] sm:$0xf0] }
 0x14e   : > { %2564 = vmatpush.bf16.msrb.mxu0 %v9670_v34  ;;  %v13403_v34 = vld [vmem:[#allocation12 + $0x1a4] sm:$0xf]  ;;  %v9626_v54 = vor.u32 %v13355_v33, %v9623_v49  ;;  %v9911_v33 = vld [vmem:[#allocation12 + $0x270] sm:$0xf0] }
 0x14f   : > { %2577 = vmatpush.bf16.msrb.mxu1 %v9798_v36  ;;  %v9818_v36 = vor.u32 %v13403_v34, %v9815_v35  ;;  %v10021_v35 = vld [vmem:[#allocation12 + $0x340] sm:$0xf] }
 0x151   : > { %2589 = vmatpush.bf16.msrb.mxu2 %v9942_v5  ;;  %v13469_v5 = vld [vmem:[#allocation12 + $0x3ac] sm:$0xf0] }
 0x152   : > { %2565 = vmatpush.bf16.msrb.mxu0 %v9654_v39  ;;  %v9878_v39 = vor.u32 %v13421_v38, %v9877_v37  ;;  %v10070_v7 = vor.u32 %v13469_v5, %v10069_v4  ;;  %v13423_v38 = vld [vmem:[#allocation12 + $0x244] sm:$0xf] }
 0x153   : > { %2578 = vmatpush.bf16.msrb.mxu1 %v9782_v42  ;;  %v13399_v42 = vld [vmem:[#allocation12 + $0x184] sm:$0xf] }
 0x155   : > { %2590 = vmatpush.bf16.msrb.mxu2 %v9926_v13  ;;  %v9754_v13 = vor.u32 %v13387_v8, %v9751_v9 }
 0x156   : > { %2566 = vmatpush.bf16.msrb.mxu0 %v9638_v12  ;;  %v9802_v12 = vor.u32 %v13399_v42, %v9799_v44  ;;  %v9725_v44 = vld [vmem:[#allocation12 + $0xe8] sm:$0xf] }
 0x157   : > { %2579 = vmatpush.bf16.msrb.mxu1 %v9766_v18  ;;  %v10101_v18 = vld [vmem:[#allocation12 + $0x3e0] sm:$0xf] }
 0x158   : > { %v10102_v52 = vor.u32 %v13477_v48, %v10101_v18 }
 0x159   : > { %2591 = vmatpush.bf16.msrb.mxu2 %v9910_v23  ;;  %v13431_v23 = vld [vmem:[#allocation12 + $0x284] sm:$0xf] }
 0x15a   : > { %2567 = vmatpush.bf16.msrb.mxu0 %v9622_v47  ;;  %v9862_v47 = vor.u32 %v13417_v46, %v9861_v45  ;;  %2600 = vmatpush.bf16.msrb.mxu3 %v10102_v52  ;;  %v13453_v45 = vld [vmem:[#allocation12 + $0x32c] sm:$0xf0] }
 0x15b   : > { %2580 = vmatpush.bf16.msrb.mxu1 %v9750_v1  ;;  %v9959_v1 = vld [vmem:[#allocation12 + $0x2d0] sm:$0xf0] }
 0x15c   : > { %v9962_v2 = vor.u32 %v13439_v63, %v9959_v1  ;;  %v9863_v1 = vld [vmem:[#allocation12 + $0x210] sm:$0xf0] }
 0x15d   : > { %2592 = vmatpush.bf16.msrb.mxu2 %v9894_v32  ;;  %v13427_v32 = vld [vmem:[#allocation12 + $0x264] sm:$0xf] }
 0x15e   : > { %2568 = vmatpush.bf16.msrb.mxu0 %v9606_v53  ;;  %v9786_v53 = vor.u32 %v13395_v50, %v9783_v51  ;;  %v9914_v34 = vor.u32 %v13427_v32, %v9911_v33  ;;  %v13419_v50 = vld [vmem:[#allocation12 + $0x224] sm:$0xf]  ;;  %v9879_v51 = vld [vmem:[#allocation12 + $0x230] sm:$0xf0]  ;;  %v13366_v32 = vld [vmem:[#allocation12 + $0x74] sm:$0xf0] }
 0x15f   : > { %2581 = vmatpush.bf16.msrb.mxu1 %v9734_v10  ;;  %v13435_v10 = vld [vmem:[#allocation12 + $0x2a4] sm:$0xf]  ;;  %v9853_v33 = vld [vmem:[#allocation12 + $0x1e8] sm:$0xf] }
 0x160   : > { %v9946_v16 = vor.u32 %v13435_v10, %v9943_v14  ;;  %v9693_v10 = vld [vmem:[#allocation12 + $0xa8] sm:$0xf]  ;;  %v13374_v14 = vld [vmem:[#allocation12 + $0xb4] sm:$0xf0] }
 0x161   : > { %2593 = vmatpush.bf16.msrb.mxu2 %v9878_v39  ;;  %v9895_v39 = vld [vmem:[#allocation12 + $0x250] sm:$0xf0] }
 0x162   : > { %2613 = vmatpush.bf16.msra.mxu0 %v9722_v55  ;;  %v13443_v55 = vld [vmem:[#allocation12 + $0x2e4] sm:$0xf]  ;;  %v9898_v41 = vor.u32 %v13423_v38, %v9895_v39 }
 0x163   : > { %2626 = vmatpush.bf16.msra.mxu1 %v9850_v22  ;;  %v9978_v57 = vor.u32 %v13443_v55, %v9975_v56  ;;  %v9735_v22 = vld [vmem:[#allocation12 + $0x110] sm:$0xf0]  ;;  %v920_v56 = vperm.slane %v15084_v3, 1 }
 0x164   : > { %v9738_v24 = vor.u32 %v13383_v21, %v9735_v22  ;;  %v9677_v21 = vld [vmem:[#allocation12 + $0x88] sm:$0xf] }
 0x165   : > { %2594 = vmatpush.bf16.msrb.mxu2 %v9862_v47  ;;  %v13382_v47 = vld [vmem:[#allocation12 + $0xf4] sm:$0xf0] }
 0x166   : > { %2614 = vmatpush.bf16.msra.mxu0 %v9706_v58  ;;  %v10085_v58 = vld [vmem:[#allocation12 + $0x3c0] sm:$0xf] }
 0x167   : > { %2627 = vmatpush.bf16.msra.mxu1 %v9834_v29  ;;  %v10086_v60 = vor.u32 %v13473_v59, %v10085_v58  ;;  %v13461_v29 = vld [vmem:[#allocation12 + $0x36c] sm:$0xf0]  ;;  %v9726_v58 = vor.u32 %v13382_v47, %v9725_v44  ;;  %v13378_v59 = vld [vmem:[#allocation12 + $0xd4] sm:$0xf0]  ;;  %v9837_v44 = vld [vmem:[#allocation12 + $0x1c8] sm:$0xf] }
 0x168   : > { %v10038_v31 = vor.u32 %v13461_v29, %v10037_v28  ;;  %v921_v47 = vperm.slane %v15084_v3, 2 }
 0x169   : > { %2639 = vmatpush.bf16.msra.mxu2 %v9978_v57  ;;  %2601 = vmatpush.bf16.msrb.mxu3 %v10086_v60  ;;  %v9709_v57 = vld [vmem:[#allocation12 + $0xc8] sm:$0xf]  ;;  %v9989_v60 = vld [vmem:[#allocation12 + $0x300] sm:$0xf] }
 0x16a   : > { %2615 = vmatpush.bf16.msra.mxu0 %v9690_v61  ;;  %v13391_v61 = vld [vmem:[#allocation12 + $0x144] sm:$0xf]  ;;  %v9710_v9 = vor.u32 %v13378_v59, %v9709_v57  ;;  %v9821_v57 = vld [vmem:[#allocation12 + $0x1a8] sm:$0xf] }
 0x16b   : > { %2628 = vmatpush.bf16.msra.mxu1 %v9818_v36  ;;  %v9770_v0 = vor.u32 %v13391_v61, %v9767_v62  ;;  %v13457_v36 = vld [vmem:[#allocation12 + $0x34c] sm:$0xf0]  ;;  %v13455_v59 = vld [vmem:[#allocation12 + $0x344] sm:$0xf] }
 0x16c   : > { %v10022_v37 = vor.u32 %v13457_v36, %v10021_v35  ;;  %v13449_v61 = vld [vmem:[#allocation12 + $0x30c] sm:$0xf0]  ;;  %v10055_v35 = vld [vmem:[#allocation12 + $0x390] sm:$0xf0] }
 0x16d   : > { %2640 = vmatpush.bf16.msra.mxu2 %v9962_v2  ;;  %2602 = vmatpush.bf16.msrb.mxu3 %v10070_v7  ;;  %v9990_v63 = vor.u32 %v13449_v61, %v9989_v60  ;;  %v13475_v2 = vld [vmem:[#allocation12 + $0x3e4] sm:$0xf]  ;;  %v10023_v60 = vld [vmem:[#allocation12 + $0x350] sm:$0xf0] }
 0x16e   : > { %2616 = vmatpush.bf16.msra.mxu0 %v9674_v6 }
 0x16f   : > { %2629 = vmatpush.bf16.msra.mxu1 %v9802_v12  ;;  %v10005_v12 = vld [vmem:[#allocation12 + $0x320] sm:$0xf] }
 0x170   : > { %v10006_v48 = vor.u32 %v13453_v45, %v10005_v12  ;;  %v13410_v45 = vld [vmem:[#allocation12 + $0x1d4] sm:$0xf0] }
 0x171   : > { %2641 = vmatpush.bf16.msra.mxu2 %v9946_v16  ;;  %v10087_v16 = vld [vmem:[#allocation12 + $0x3d0] sm:$0xf0] }
 0x172   : > { %2617 = vmatpush.bf16.msra.mxu0 %v9658_v17  ;;  %v10053_v17 = vld [vmem:[#allocation12 + $0x380] sm:$0xf] }
 0x173   : > { %2630 = vmatpush.bf16.msra.mxu1 %v9786_v53  ;;  %v10054_v20 = vor.u32 %v13465_v19, %v10053_v17  ;;  %v9882_v53 = vor.u32 %v13419_v50, %v9879_v51 }
 0x175   : > { %2603 = vmatpush.bf16.msrb.mxu3 %v10054_v20  ;;  %v9694_v20 = vor.u32 %v13374_v14, %v9693_v10  ;;  %v10007_v10 = vld [vmem:[#allocation12 + $0x330] sm:$0xf0]  ;;  %v9727_v14 = vld [vmem:[#allocation12 + $0xf8] sm:$0xf0] }
 0x176   : > { %2618 = vmatpush.bf16.msra.mxu0 %v9642_v27  ;;  %v9930_v27 = vor.u32 %v13431_v23, %v9927_v25  ;;  %v13370_v23 = vld [vmem:[#allocation12 + $0x94] sm:$0xf0]  ;;  %v10071_v25 = vld [vmem:[#allocation12 + $0x3b0] sm:$0xf0] }
 0x177   : > { %2631 = vmatpush.bf16.msra.mxu1 %v9770_v0  ;;  %v13415_v0 = vld [vmem:[#allocation12 + $0x204] sm:$0xf] }
 0x178   : > { %2642 = vmatpush.bf16.msra.mxu2 %v9930_v27  ;;  %v9866_v5 = vor.u32 %v13415_v0, %v9863_v1  ;;  %v10026_v0 = vor.u32 %v13455_v59, %v10023_v60  ;;  %v9933_v59 = vld [vmem:[#allocation12 + $0x288] sm:$0xf]  ;;  %v13434_v60 = vld [vmem:[#allocation12 + $0x294] sm:$0xf0] }
 0x179   : > { %2604 = vmatpush.bf16.msrb.mxu3 %v10038_v31  ;;  %v9661_v31 = vld [vmem:[#allocation12 + $0x68] sm:$0xf] }
 0x17a   : > { %2619 = vmatpush.bf16.msra.mxu0 %v9626_v54 }
 0x17b   : > { %2632 = vmatpush.bf16.msra.mxu1 %v9754_v13 }
 0x17c   : > { %2643 = vmatpush.bf16.msra.mxu2 %v9914_v34  ;;  %v13414_v34 = vld [vmem:[#allocation12 + $0x1f4] sm:$0xf0] }
 0x17d   : > { %v1576_v6 = vpop.f32.mrf.mxu0  ;;  %2605 = vmatpush.bf16.msrb.mxu3 %v10022_v37 }
 0x17e   : > { %2620 = vmatpush.bf16.msra.mxu0 %v9610_v43  ;;  %v1589_v11 = vpop.f32.mrf.mxu1  ;;  %v1577_v26 = vadd.f32 %v1576_v6, %v919_v15  ;;  %v10103_v6 = vld [vmem:[#allocation12 + $0x3f0] sm:$0xf0]  ;;  %v13471_v15 = vld [vmem:[#allocation12 + $0x3c4] sm:$0xf] }
 0x17f   : > { %2633 = vmatpush.bf16.msra.mxu1 %v9738_v24  ;;  %v10106_v8 = vor.u32 %v13475_v2, %v10103_v6  ;;  %v10090_v19 = vor.u32 %v13471_v15, %v10087_v16  ;;  %v13467_v24 = vld [vmem:[#allocation12 + $0x3a4] sm:$0xf]  ;;  %v13354_v6 = vld [vmem:[#allocation12 + $0x14] sm:$0xf0] }
 0x180   : > { %v1590_v54 = vadd.f32 %v1589_v11, %v1577_v26  ;;  %2644 = vmatpush.bf16.msra.mxu2 %v9898_v41  ;;  %v10074_v27 = vor.u32 %v13467_v24, %v10071_v25  ;;  %v9854_v41 = vor.u32 %v13414_v34, %v9853_v33  ;;  %v9981_v25 = vld [vmem:[#allocation12 + $0x2e8] sm:$0xf] }
 0x181   : > { %2606 = vmatpush.bf16.msrb.mxu3 %v10006_v48 }
 0x184   : > { %2645 = vmatpush.bf16.msra.mxu2 %v9882_v53  ;;  %v9838_v53 = vor.u32 %v13410_v45, %v9837_v44 }
 0x185   : > { %v1578_v30 = vpop.f32.mrf.mxu0  ;;  %2607 = vmatpush.bf16.msrb.mxu3 %v9990_v63 }
 0x186   : > { %v1591_v49 = vpop.f32.mrf.mxu1  ;;  %v9678_v30 = vor.u32 %v13370_v23, %v9677_v21  ;;  %v13398_v23 = vld [vmem:[#allocation12 + $0x174] sm:$0xf0] }
 0x188   : > { %2646 = vmatpush.bf16.msra.mxu2 %v9866_v5  ;;  %v9613_v5 = vld [vmem:[#allocation12 + $0x8] sm:$0xf] }
 0x189   : > { %2652 = vmatpush.bf16.msra.mxu3 %v10106_v8  ;;  %v13402_v8 = vld [vmem:[#allocation12 + $0x194] sm:$0xf0] }
 0x18b   : > { %v1602_v40 = vpop.f32.mrf.mxu2 }
 0x18c   : > { %v1603_v42 = vadd.f32 %v1602_v40, %v1590_v54  ;;  %v1615_v43 = vpop.f32.mrf.mxu3  ;;  %v13463_v54 = vld [vmem:[#allocation12 + $0x384] sm:$0xf]  ;;  %v9662_v40 = vor.u32 %v13366_v32, %v9661_v31  ;;  %v9711_v31 = vld [vmem:[#allocation12 + $0xd8] sm:$0xf0] }
 0x18d   : > { %v1628_v18 = vpop.f32.mrf.mxu0  ;;  %2653 = vmatpush.bf16.msra.mxu3 %v10090_v19  ;;  %v10058_v37 = vor.u32 %v13463_v54, %v10055_v35  ;;  %v9773_v35 = vld [vmem:[#allocation12 + $0x148] sm:$0xf] }
 0x18e   : > { %v1616_v46 = vadd.f32 %v1615_v43, %v1603_v42  ;;  %v1641_v52 = vpop.f32.mrf.mxu1  ;;  %v1629_v11 = vadd.f32 %v1628_v18, %v920_v56  ;;  %v9645_v42 = vld [vmem:[#allocation12 + $0x48] sm:$0xf]  ;;  %v13362_v43 = vld [vmem:[#allocation12 + $0x54] sm:$0xf0]  ;;  %v10039_v18 = vld [vmem:[#allocation12 + $0x370] sm:$0xf0] }
 0x18f   : > { %v13358_v56 = vld [vmem:[#allocation12 + $0x34] sm:$0xf0] }
 0x190   : > { %v1775_v55 = vmax.f32 %v1616_v46, 0.0  ;;  %v1642_v22 = vadd.f32 %v1641_v52, %v1629_v11  ;;  %v13459_v46 = vld [vmem:[#allocation12 + $0x364] sm:$0xf]  ;;  %v9646_v52 = vor.u32 %v13362_v43, %v9645_v42 }
 0x191   : > { %2654 = vmatpush.bf16.msra.mxu3 %v10074_v27  ;;  %v10042_v50 = vor.u32 %v13459_v46, %v10039_v18  ;;  %v9991_v27 = vld [vmem:[#allocation12 + $0x310] sm:$0xf0]  ;;  %v9757_v18 = vld [vmem:[#allocation12 + $0x128] sm:$0xf] }
 0x192   : > { %v15088_v62 = vpack.c.bf16 %v1775_v55, %v1775_v55  ;;  %v9629_v55 = vld [vmem:[#allocation12 + $0x28] sm:$0xf] }
 0x193   : > { %v1604_v4 = vpop.f32.mrf.mxu2  ;;  %v9630_v2 = vor.u32 %v13358_v56, %v9629_v55 }
 0x194   : > { %v1617_v7 = vpop.f32.mrf.mxu3  ;;  %2569 = vmatmul.bf16.vlgmr.msrb.gmra.mxu0 %v15088_v62 }
 0x195   : > { %2665 = vmatpush.bf16.msrb.mxu0 %v9726_v58  ;;  %v1630_v13 = vpop.f32.mrf.mxu0  ;;  %2655 = vmatpush.bf16.msra.mxu3 %v10058_v37  ;;  %v13406_v58 = vld [vmem:[#allocation12 + $0x1b4] sm:$0xf0]  ;;  %v9805_v7 = vld [vmem:[#allocation12 + $0x188] sm:$0xf] }
 0x196   : > { %v1643_v17 = vpop.f32.mrf.mxu1  ;;  %v9822_v4 = vor.u32 %v13406_v58, %v9821_v57  ;;  %v13380_v13 = vld [vmem:[#allocation12 + $0xec] sm:$0xf]  ;;  %v9806_v21 = vor.u32 %v13402_v8, %v9805_v7  ;;  %v9965_v37 = vld [vmem:[#allocation12 + $0x2c8] sm:$0xf]  ;;  %v13386_v58 = vld [vmem:[#allocation12 + $0x114] sm:$0xf0]  ;;  %v9934_v7 = vor.u32 %v13434_v60, %v9933_v59 }
 0x197   : > { %v9730_v24 = vor.u32 %v13380_v13, %v9727_v14  ;;  %v9741_v57 = vld [vmem:[#allocation12 + $0x108] sm:$0xf]  ;;  %v13360_v13 = vld [vmem:[#allocation12 + $0x4c] sm:$0xf]  ;;  %v9647_v14 = vld [vmem:[#allocation12 + $0x58] sm:$0xf0] }
 0x198   : > { %v10093_v60 = vld [vmem:[#allocation12 + $0x3c8] sm:$0xf] }
 0x199   : > { %2666 = vmatpush.bf16.msrb.mxu0 %v9710_v9  ;;  %2656 = vmatpush.bf16.msra.mxu3 %v10042_v50  ;;  %v13451_v9 = vld [vmem:[#allocation12 + $0x324] sm:$0xf]  ;;  %v13438_v50 = vld [vmem:[#allocation12 + $0x2b4] sm:$0xf0] }
 0x19a   : > { %v10010_v15 = vor.u32 %v13451_v9, %v10007_v10  ;;  %v9917_v9 = vld [vmem:[#allocation12 + $0x268] sm:$0xf] }
 0x19b   : > { %v1654_v26 = vpop.f32.mrf.mxu2 }
 0x19c   : > { %v1655_v28 = vadd.f32 %v1654_v26, %v1642_v22  ;;  %v1667_v29 = vpop.f32.mrf.mxu3  ;;  %v9789_v22 = vld [vmem:[#allocation12 + $0x168] sm:$0xf]  ;;  %v13447_v26 = vld [vmem:[#allocation12 + $0x304] sm:$0xf] }
 0x19d   : > { %2667 = vmatpush.bf16.msrb.mxu0 %v9694_v20  ;;  %2657 = vmatpush.bf16.msra.mxu3 %v10026_v0  ;;  %v9614_v20 = vor.u32 %v13354_v6, %v9613_v5  ;;  %v9994_v32 = vor.u32 %v13447_v26, %v9991_v27  ;;  %v9742_v5 = vor.u32 %v13386_v58, %v9741_v57  ;;  %v922_v6 = vperm.slane %v15084_v3, 3  ;;  %v13404_v26 = vld [vmem:[#allocation12 + $0x1ac] sm:$0xf]  ;;  %v9823_v27 = vld [vmem:[#allocation12 + $0x1b8] sm:$0xf0] }
 0x19e   : > { %v1668_v49 = vadd.f32 %v1667_v29, %v1655_v28  ;;  %v1680_v36 = vpop.f32.mrf.mxu0  ;;  %v13446_v29 = vld [vmem:[#allocation12 + $0x2f4] sm:$0xf0] }
 0x19f   : > { %v1681_v61 = vadd.f32 %v1680_v36, %v921_v47  ;;  %v9982_v34 = vor.u32 %v13446_v29, %v9981_v25  ;;  %v13394_v36 = vld [vmem:[#allocation12 + $0x154] sm:$0xf0] }
 0x1a0   : > { %v1776_v38 = vmax.f32 %v1668_v49, 0.0  ;;  %v9790_v49 = vor.u32 %v13398_v23, %v9789_v22  ;;  %v9774_v44 = vor.u32 %v13394_v36, %v9773_v35  ;;  %v13390_v47 = vld [vmem:[#allocation12 + $0x134] sm:$0xf0]  ;;  %v13356_v23 = vld [vmem:[#allocation12 + $0x2c] sm:$0xf] }
 0x1a1   : > { %v1693_v39 = vpop.f32.mrf.mxu1  ;;  %2668 = vmatpush.bf16.msrb.mxu0 %v9678_v30  ;;  %2658 = vmatpush.bf16.msra.mxu3 %v10010_v15  ;;  %v13376_v30 = vld [vmem:[#allocation12 + $0xcc] sm:$0xf]  ;;  %v13426_v22 = vld [vmem:[#allocation12 + $0x254] sm:$0xf0] }
 0x1a2   : > { %v15091_v12 = vpack.c.bf16 %v1776_v38, %v1776_v38  ;;  %v1694_v11 = vadd.f32 %v1693_v39, %v1681_v61  ;;  %v9714_v54 = vor.u32 %v13376_v30, %v9711_v31  ;;  %v13442_v39 = vld [vmem:[#allocation12 + $0x2d4] sm:$0xf0]  ;;  %v13364_v61 = vld [vmem:[#allocation12 + $0x6c] sm:$0xf]  ;;  %v9885_v31 = vld [vmem:[#allocation12 + $0x228] sm:$0xf] }
 0x1a3   : > { %v1656_v48 = vpop.f32.mrf.mxu2  ;;  %v9966_v45 = vor.u32 %v13442_v39, %v9965_v37  ;;  %v13408_v15 = vld [vmem:[#allocation12 + $0x1cc] sm:$0xf]  ;;  %v9807_v37 = vld [vmem:[#allocation12 + $0x198] sm:$0xf0] }
 0x1a4   : > { %v1669_v51 = vpop.f32.mrf.mxu3  ;;  %2582 = vmatmul.bf16.vlgmr.msrb.gmra.mxu1 %v15091_v12  ;;  %2621 = vmatmul.bf16.vlgmr.msra.gmra.mxu0 %v15088_v62  ;;  %v9949_v48 = vld [vmem:[#allocation12 + $0x2a8] sm:$0xf]  ;;  %v13400_v36 = vld [vmem:[#allocation12 + $0x18c] sm:$0xf] }
 0x1a5   : > { %2669 = vmatpush.bf16.msrb.mxu0 %v9662_v40  ;;  %2678 = vmatpush.bf16.msrb.mxu1 %v9854_v41  ;;  %v13372_v40 = vld [vmem:[#allocation12 + $0xac] sm:$0xf]  ;;  %v9695_v41 = vld [vmem:[#allocation12 + $0xb8] sm:$0xf0]  ;;  %v9950_v55 = vor.u32 %v13438_v50, %v9949_v48 }
 0x1a6   : > { %v1682_v63 = vpop.f32.mrf.mxu0  ;;  %2659 = vmatpush.bf16.msra.mxu3 %v9994_v32  ;;  %v9698_v46 = vor.u32 %v13372_v40, %v9695_v41  ;;  %v13368_v51 = vld [vmem:[#allocation12 + $0x8c] sm:$0xf]  ;;  %v9791_v50 = vld [vmem:[#allocation12 + $0x178] sm:$0xf0] }
 0x1a7   : > { %v9663_v63 = vld [vmem:[#allocation12 + $0x78] sm:$0xf0]  ;;  %v13396_v48 = vld [vmem:[#allocation12 + $0x16c] sm:$0xf] }
 0x1a8   : > { %v9666_v8 = vor.u32 %v13364_v61, %v9663_v63  ;;  %v9794_v58 = vor.u32 %v13396_v48, %v9791_v50  ;;  %v13474_v61 = vld [vmem:[#allocation12 + $0x3d4] sm:$0xf0]  ;;  %v13392_v63 = vld [vmem:[#allocation12 + $0x14c] sm:$0xf]  ;;  %v10111_v48 = vld [vmem:[#allocation12 + $0x3f8] sm:$0xf0] }
 0x1a9   : > { %v1695_v1 = vpop.f32.mrf.mxu1  ;;  %2670 = vmatpush.bf16.msrb.mxu0 %v9646_v52  ;;  %2679 = vmatpush.bf16.msrb.mxu1 %v9838_v53  ;;  %v9679_v52 = vld [vmem:[#allocation12 + $0x98] sm:$0xf0]  ;;  %v9758_v53 = vor.u32 %v13390_v47, %v9757_v18  ;;  %v10109_v18 = vld [vmem:[#allocation12 + $0x3e8] sm:$0xf]  ;;  %v13478_v47 = vld [vmem:[#allocation12 + $0x3f4] sm:$0xf0] }
 0x1aa   : > { %v9682_v56 = vor.u32 %v13368_v51, %v9679_v52  ;;  %v13412_v1 = vld [vmem:[#allocation12 + $0x1ec] sm:$0xf]  ;;  %v9983_v52 = vld [vmem:[#allocation12 + $0x2f8] sm:$0xf0] }
 0x1ab   : > { %v1706_v16 = vpop.f32.mrf.mxu2  ;;  %v13444_v51 = vld [vmem:[#allocation12 + $0x2ec] sm:$0xf] }
 0x1ac   : > { %v1719_v17 = vpop.f32.mrf.mxu3  ;;  %v1707_v19 = vadd.f32 %v1706_v16, %v1694_v11  ;;  %v13430_v11 = vld [vmem:[#allocation12 + $0x274] sm:$0xf0]  ;;  %v9839_v16 = vld [vmem:[#allocation12 + $0x1d8] sm:$0xf0]  ;;  %v9986_v59 = vor.u32 %v13444_v51, %v9983_v52  ;;  %v13472_v52 = vld [vmem:[#allocation12 + $0x3cc] sm:$0xf] }
 0x1ad   : > { %2671 = vmatpush.bf16.msrb.mxu0 %v9630_v2  ;;  %2680 = vmatpush.bf16.msrb.mxu1 %v9822_v4  ;;  %v9855_v2 = vld [vmem:[#allocation12 + $0x1f8] sm:$0xf0]  ;;  %v9842_v3 = vor.u32 %v13408_v15, %v9839_v16 }
 0x1ae   : > { %v1720_v28 = vadd.f32 %v1719_v17, %v1707_v19  ;;  %v9858_v10 = vor.u32 %v13412_v1, %v9855_v2  ;;  %v9918_v17 = vor.u32 %v13430_v11, %v9917_v9  ;;  %v9650_v19 = vor.u32 %v13360_v13, %v9647_v14  ;;  %v9775_v1 = vld [vmem:[#allocation12 + $0x158] sm:$0xf0]  ;;  %v13440_v2 = vld [vmem:[#allocation12 + $0x2cc] sm:$0xf]  ;;  %v10077_v9 = vld [vmem:[#allocation12 + $0x3a8] sm:$0xf] }
 0x1af   : > { %v13388_v11 = vld [vmem:[#allocation12 + $0x12c] sm:$0xf]  ;;  %v9759_v13 = vld [vmem:[#allocation12 + $0x138] sm:$0xf0] }
 0x1b0   : > { %v1777_v33 = vmax.f32 %v1720_v28, 0.0  ;;  %v13436_v14 = vld [vmem:[#allocation12 + $0x2ac] sm:$0xf]  ;;  %v9951_v15 = vld [vmem:[#allocation12 + $0x2b8] sm:$0xf0] }
 0x1b1   : > { %2672 = vmatpush.bf16.msrb.mxu0 %v9614_v20  ;;  %2681 = vmatpush.bf16.msrb.mxu1 %v9806_v21  ;;  %v9901_v20 = vld [vmem:[#allocation12 + $0x248] sm:$0xf] }
 0x1b2   : > { %v15096_v38 = vpack.c.bf16 %v1777_v33, %v1777_v33  ;;  %v9902_v29 = vor.u32 %v13426_v22, %v9901_v20  ;;  %v9826_v33 = vor.u32 %v13404_v26, %v9823_v27  ;;  %v13466_v20 = vld [vmem:[#allocation12 + $0x394] sm:$0xf0]  ;;  %v13432_v22 = vld [vmem:[#allocation12 + $0x28c] sm:$0xf]  ;;  %v10045_v27 = vld [vmem:[#allocation12 + $0x368] sm:$0xf] }
 0x1b3   : > { %v1708_v42 = vpop.f32.mrf.mxu2 }
 0x1b4   : > { %v1721_v43 = vpop.f32.mrf.mxu3  ;;  %2634 = vmatmul.bf16.vlgmr.msra.gmra.mxu1 %v15091_v12  ;;  %2673 = vmatmul.bf16.vlgmr.msrb.gmra.mxu0 %v15088_v62 }
 0x1b5   : > { %2717 = vmatpush.bf16.msra.mxu0 %v9730_v24  ;;  %2595 = vmatmul.bf16.vlgmr.msrb.gmra.mxu2 %v15096_v38  ;;  %v9631_v24 = vld [vmem:[#allocation12 + $0x38] sm:$0xf0]  ;;  %v9869_v43 = vld [vmem:[#allocation12 + $0x208] sm:$0xf] }
 0x1b6   : > { %2682 = vmatpush.bf16.msrb.mxu1 %v9790_v49  ;;  %2691 = vmatpush.bf16.msrb.mxu2 %v9982_v34  ;;  %v9634_v30 = vor.u32 %v13356_v23, %v9631_v24  ;;  %v13422_v49 = vld [vmem:[#allocation12 + $0x234] sm:$0xf0]  ;;  %v13352_v34 = vld [vmem:[#allocation12 + $0xc] sm:$0xf]  ;;  %v9935_v23 = vld [vmem:[#allocation12 + $0x298] sm:$0xf0] }
 0x1b7   : > { %v9886_v41 = vor.u32 %v13422_v49, %v9885_v31  ;;  %v9938_v26 = vor.u32 %v13432_v22, %v9935_v23  ;;  %v13458_v49 = vld [vmem:[#allocation12 + $0x354] sm:$0xf0]  ;;  %v1911_v23 = vld [vmem:[#allocation14] sm:$0xf] }
 0x1b9   : > { %2718 = vmatpush.bf16.msra.mxu0 %v9714_v54  ;;  %v9615_v54 = vld [vmem:[#allocation12 + $0x18] sm:$0xf0] }
 0x1ba   : > { %2683 = vmatpush.bf16.msrb.mxu1 %v9774_v44  ;;  %2692 = vmatpush.bf16.msrb.mxu2 %v9966_v45  ;;  %v9618_v42 = vor.u32 %v13352_v34, %v9615_v54  ;;  %v13418_v44 = vld [vmem:[#allocation12 + $0x214] sm:$0xf0]  ;;  %v13424_v34 = vld [vmem:[#allocation12 + $0x24c] sm:$0xf]  ;;  %v9903_v54 = vld [vmem:[#allocation12 + $0x258] sm:$0xf0] }
 0x1bd   : > { %2719 = vmatpush.bf16.msra.mxu0 %v9698_v46  ;;  %v9810_v46 = vor.u32 %v13400_v36, %v9807_v37  ;;  %v9906_v36 = vor.u32 %v13424_v34, %v9903_v54  ;;  %v10013_v37 = vld [vmem:[#allocation12 + $0x328] sm:$0xf]  ;;  %v1913_v34 = vperm.slane %v1911_v23, 0  ;;  %v1914_v54 = vperm.slane %v1911_v23, 1 }
 0x1be   : > { %v1732_v0 = vpop.f32.mrf.mxu0  ;;  %2684 = vmatpush.bf16.msrb.mxu1 %v9758_v53  ;;  %2693 = vmatpush.bf16.msrb.mxu2 %v9950_v55  ;;  %v9870_v55 = vor.u32 %v13418_v44, %v9869_v43  ;;  %v9997_v44 = vld [vmem:[#allocation12 + $0x308] sm:$0xf] }
 0x1bf   : > { %v1733_v21 = vadd.f32 %v1732_v0, %v922_v6  ;;  %v10094_v6 = vor.u32 %v13474_v61, %v10093_v60  ;;  %v13464_v60 = vld [vmem:[#allocation12 + $0x38c] sm:$0xf]  ;;  %v10063_v61 = vld [vmem:[#allocation12 + $0x398] sm:$0xf0] }
 0x1c1   : > { %v1745_v4 = vpop.f32.mrf.mxu1  ;;  %2720 = vmatpush.bf16.msra.mxu0 %v9682_v56  ;;  %v10110_v56 = vor.u32 %v13478_v47, %v10109_v18  ;;  %v9871_v18 = vld [vmem:[#allocation12 + $0x218] sm:$0xf0]  ;;  %v13476_v47 = vld [vmem:[#allocation12 + $0x3ec] sm:$0xf] }
 0x1c2   : > { %2685 = vmatpush.bf16.msrb.mxu1 %v9742_v5  ;;  %2694 = vmatpush.bf16.msrb.mxu2 %v9934_v7  ;;  %v1746_v32 = vadd.f32 %v1745_v4, %v1733_v21  ;;  %v9967_v4 = vld [vmem:[#allocation12 + $0x2d8] sm:$0xf0]  ;;  %v9778_v7 = vor.u32 %v13392_v63, %v9775_v1  ;;  %v13384_v21 = vld [vmem:[#allocation12 + $0x10c] sm:$0xf]  ;;  %v10114_v51 = vor.u32 %v13476_v47, %v10111_v48 }
 0x1c3   : > { %v10066_v63 = vor.u32 %v13464_v60, %v10063_v61  ;;  %v10047_v1 = vld [vmem:[#allocation12 + $0x378] sm:$0xf0] }
 0x1c5   : > { %2721 = vmatpush.bf16.msra.mxu0 %v9666_v8  ;;  %2686 = vmatmul.bf16.vlgmr.msrb.gmra.mxu1 %v15091_v12  ;;  %v9970_v8 = vor.u32 %v13440_v2, %v9967_v4  ;;  %v13456_v4 = vld [vmem:[#allocation12 + $0x34c] sm:$0xf] }
 0x1c6   : > { %2730 = vmatpush.bf16.msra.mxu1 %v9858_v10  ;;  %v1734_v25 = vpop.f32.mrf.mxu0  ;;  %2647 = vmatmul.bf16.vlgmr.msra.gmra.mxu2 %v15096_v38  ;;  %v13470_v10 = vld [vmem:[#allocation12 + $0x3b4] sm:$0xf0] }
 0x1c7   : > { %2695 = vmatpush.bf16.msrb.mxu2 %v9918_v17  ;;  %v10078_v16 = vor.u32 %v13470_v10, %v10077_v9  ;;  %v9954_v17 = vor.u32 %v13436_v14, %v9951_v15  ;;  %v13448_v10 = vld [vmem:[#allocation12 + $0x30c] sm:$0xf] }
 0x1c9   : > { %v1747_v28 = vpop.f32.mrf.mxu1  ;;  %2722 = vmatpush.bf16.msra.mxu0 %v9650_v19  ;;  %v10061_v19 = vld [vmem:[#allocation12 + $0x388] sm:$0xf] }
 0x1ca   : > { %2731 = vmatpush.bf16.msra.mxu1 %v9842_v3  ;;  %v9743_v3 = vld [vmem:[#allocation12 + $0x118] sm:$0xf0]  ;;  %v10062_v24 = vor.u32 %v13466_v20, %v10061_v19  ;;  %v13462_v28 = vld [vmem:[#allocation12 + $0x374] sm:$0xf0] }
 0x1cb   : > { %v1758_v35 = vpop.f32.mrf.mxu2  ;;  %2696 = vmatpush.bf16.msrb.mxu2 %v9902_v29  ;;  %v9746_v25 = vor.u32 %v13384_v21, %v9743_v3  ;;  %v13428_v29 = vld [vmem:[#allocation12 + $0x26c] sm:$0xf]  ;;  %v10046_v31 = vor.u32 %v13462_v28, %v10045_v27 }
 0x1cc   : > { %v1759_v39 = vadd.f32 %v1758_v35, %v1746_v32  ;;  %v1771_v40 = vpop.f32.mrf.mxu3 }
 0x1cd   : > { %2723 = vmatpush.bf16.msra.mxu0 %v9634_v30  ;;  %v9919_v30 = vld [vmem:[#allocation12 + $0x278] sm:$0xf0] }
 0x1ce   : > { %v1772_v45 = vadd.f32 %v1771_v40, %v1759_v39  ;;  %2732 = vmatpush.bf16.msra.mxu1 %v9826_v33  ;;  %v9922_v32 = vor.u32 %v13428_v29, %v9919_v30  ;;  %v10029_v33 = vld [vmem:[#allocation12 + $0x348] sm:$0xf]  ;;  %v13454_v39 = vld [vmem:[#allocation12 + $0x334] sm:$0xf0]  ;;  %v13420_v40 = vld [vmem:[#allocation12 + $0x22c] sm:$0xf] }
 0x1cf   : > { %2697 = vmatpush.bf16.msrb.mxu2 %v9886_v41  ;;  %v10030_v35 = vor.u32 %v13458_v49, %v10029_v33  ;;  %v9887_v41 = vld [vmem:[#allocation12 + $0x238] sm:$0xf0] }
 0x1d0   : > { %v1778_v53 = vmax.f32 %v1772_v45, 0.0  ;;  %v9890_v43 = vor.u32 %v13420_v40, %v9887_v41  ;;  %v13450_v45 = vld [vmem:[#allocation12 + $0x314] sm:$0xf0] }
 0x1d1   : > { %2724 = vmatpush.bf16.msra.mxu0 %v9618_v42  ;;  %v10014_v42 = vor.u32 %v13454_v39, %v10013_v37  ;;  %v9998_v50 = vor.u32 %v13450_v45, %v9997_v44 }
 0x1d2   : > { %v15104_v57 = vpack.c.bf16 %v1778_v53, %v1778_v53  ;;  %2733 = vmatpush.bf16.msra.mxu1 %v9810_v46  ;;  %v13416_v46 = vld [vmem:[#allocation12 + $0x20c] sm:$0xf]  ;;  %v10095_v53 = vld [vmem:[#allocation12 + $0x3d8] sm:$0xf0] }
 0x1d3   : > { %v1760_v0 = vpop.f32.mrf.mxu2  ;;  %2698 = vmatpush.bf16.msrb.mxu2 %v9870_v55  ;;  %v10098_v55 = vor.u32 %v13472_v52, %v10095_v53 }
 0x1d4   : > { %v1773_v5 = vpop.f32.mrf.mxu3  ;;  %2608 = vmatmul.bf16.vlgmr.msrb.gmra.mxu3 %v15104_v57  ;;  %2725 = vmatmul.bf16.vlgmr.msra.gmra.mxu0 %v15088_v62  ;;  %v9762_v62 = vor.u32 %v13388_v11, %v9759_v13  ;;  %v13460_v0 = vld [vmem:[#allocation12 + $0x36c] sm:$0xf] }
 0x1d5   : > { %2704 = vmatpush.bf16.msrb.mxu3 %v10110_v56  ;;  %v13468_v56 = vld [vmem:[#allocation12 + $0x3ac] sm:$0xf]  ;;  %v10050_v2 = vor.u32 %v13460_v0, %v10047_v1  ;;  %v10031_v5 = vld [vmem:[#allocation12 + $0x358] sm:$0xf0] }
 0x1d6   : > { %2734 = vmatpush.bf16.msra.mxu1 %v9794_v58  ;;  %2699 = vmatmul.bf16.vlgmr.msrb.gmra.mxu2 %v15096_v38  ;;  %v10079_v58 = vld [vmem:[#allocation12 + $0x3b8] sm:$0xf0] }
 0x1d7   : > { %2743 = vmatpush.bf16.msra.mxu2 %v9986_v59  ;;  %v10082_v59 = vor.u32 %v13468_v56, %v10079_v58  ;;  %v1916_v58 = vperm.slane %v1911_v23, 3 }
 0x1d9   : > { %2705 = vmatpush.bf16.msrb.mxu3 %v10094_v6  ;;  %v10034_v6 = vor.u32 %v13456_v4, %v10031_v5 }
 0x1da   : > { %2735 = vmatpush.bf16.msra.mxu1 %v9778_v7  ;;  %v13452_v7 = vld [vmem:[#allocation12 + $0x32c] sm:$0xf] }
 0x1db   : > { %2744 = vmatpush.bf16.msra.mxu2 %v9970_v8  ;;  %v10015_v8 = vld [vmem:[#allocation12 + $0x338] sm:$0xf0] }
 0x1dc   : > { %v10018_v9 = vor.u32 %v13452_v7, %v10015_v8 }
 0x1dd   : > { %2706 = vmatpush.bf16.msrb.mxu3 %v10078_v16 }
 0x1de   : > { %2736 = vmatpush.bf16.msra.mxu1 %v9762_v62 }
 0x1df   : > { %2745 = vmatpush.bf16.msra.mxu2 %v9954_v17 }
 0x1e1   : > { %2707 = vmatpush.bf16.msrb.mxu3 %v10062_v24  ;;  %v1915_v24 = vperm.slane %v1911_v23, 2 }
 0x1e2   : > { %2737 = vmatpush.bf16.msra.mxu1 %v9746_v25 }
 0x1e3   : > { %2746 = vmatpush.bf16.msra.mxu2 %v9938_v26 }
 0x1e4   : > { %2660 = vmatmul.bf16.vlgmr.msra.gmra.mxu3 %v15104_v57 }
 0x1e5   : > { %2708 = vmatpush.bf16.msrb.mxu3 %v10046_v31  ;;  %2738 = vmatmul.bf16.vlgmr.msra.gmra.mxu1 %v15091_v12  ;;  %v9874_v12 = vor.u32 %v13416_v46, %v9871_v18 }
 0x1e7   : > { %2747 = vmatpush.bf16.msra.mxu2 %v9922_v32 }
 0x1e9   : > { %2709 = vmatpush.bf16.msrb.mxu3 %v10030_v35 }
 0x1eb   : > { %2748 = vmatpush.bf16.msra.mxu2 %v9906_v36 }
 0x1ed   : > { %2710 = vmatpush.bf16.msrb.mxu3 %v10014_v42 }
 0x1ef   : > { %2749 = vmatpush.bf16.msra.mxu2 %v9890_v43 }
 0x1f1   : > { %2711 = vmatpush.bf16.msrb.mxu3 %v9998_v50 }
 0x1f3   : > { %2750 = vmatpush.bf16.msra.mxu2 %v9874_v12 }
 0x1f4   : > { %2712 = vmatmul.bf16.vlgmr.msrb.gmra.mxu3 %v15104_v57 }
 0x1f5   : > { %2756 = vmatpush.bf16.msra.mxu3 %v10114_v51 }
 0x1f6   : > { %2751 = vmatmul.bf16.vlgmr.msra.gmra.mxu2 %v15096_v38  ;;  %v9999_v38 = vld [vmem:[#allocation12 + $0x318] sm:$0xf0] }
 0x1f7   : > { %v10002_v11 = vor.u32 %v13448_v10, %v9999_v38 }
 0x1f9   : > { %2757 = vmatpush.bf16.msra.mxu3 %v10098_v55 }
 0x1fd   : > { %2758 = vmatpush.bf16.msra.mxu3 %v10082_v59 }
 0x201   : > { %2759 = vmatpush.bf16.msra.mxu3 %v10066_v63 }
 0x205   : > { %2760 = vmatpush.bf16.msra.mxu3 %v10050_v2 }
 0x209   : > { %2761 = vmatpush.bf16.msra.mxu3 %v10034_v6 }
 0x20d   : > { %2762 = vmatpush.bf16.msra.mxu3 %v10018_v9 }
 0x211   : > { %2763 = vmatpush.bf16.msra.mxu3 %v10002_v11  ;;  %v2570_v13 = vpop.f32.mrf.mxu0 }
 0x212   : > { %v2571_v36 = vadd.f32 %v2570_v13, %v1913_v34 }
 0x214   : > { %2764 = vmatmul.bf16.vlgmr.msra.gmra.mxu3 %v15104_v57 }
 0x219   : > { %v2572_v14 = vpop.f32.mrf.mxu0 }
 0x221   : > { %v2583_v15 = vpop.f32.mrf.mxu1  ;;  %v2622_v16 = vpop.f32.mrf.mxu0 }
 0x222   : > { %v2584_v37 = vadd.f32 %v2583_v15, %v2571_v36  ;;  %v2623_v39 = vadd.f32 %v2622_v16, %v1914_v54 }
 0x229   : > { %v2585_v62 = vpop.f32.mrf.mxu1  ;;  %v2624_v17 = vpop.f32.mrf.mxu0 }
 0x231   : > { %v2635_v19 = vpop.f32.mrf.mxu1  ;;  %v2674_v20 = vpop.f32.mrf.mxu0 }
 0x232   : > { %v2675_v25 = vadd.f32 %v2674_v20, %v1915_v24  ;;  %v2636_v42 = vadd.f32 %v2635_v19, %v2623_v39 }
 0x238   : > { %v2596_v21 = vpop.f32.mrf.mxu2 }
 0x239   : > { %v2637_v3 = vpop.f32.mrf.mxu1  ;;  %v2676_v22 = vpop.f32.mrf.mxu0  ;;  %v2597_v43 = vadd.f32 %v2596_v21, %v2584_v37 }
 0x240   : > { %v2598_v26 = vpop.f32.mrf.mxu2 }
 0x242   : > { %v2687_v27 = vpop.f32.mrf.mxu1 }
 0x243   : > { %v2688_v28 = vadd.f32 %v2687_v27, %v2675_v25 }
 0x249   : > { %v2648_v29 = vpop.f32.mrf.mxu2 }
 0x24a   : > { %v2689_v30 = vpop.f32.mrf.mxu1  ;;  %v2649_v44 = vadd.f32 %v2648_v29, %v2636_v42 }
 0x251   : > { %v2726_v57 = vpop.f32.mrf.mxu0  ;;  %v2650_v31 = vpop.f32.mrf.mxu2 }
 0x252   : > { %v2727_v59 = vadd.f32 %v2726_v57, %v1916_v58 }
 0x257   : > { %v2609_v32 = vpop.f32.mrf.mxu3 }
 0x258   : > { %v2610_v45 = vadd.f32 %v2609_v32, %v2597_v43 }
 0x259   : > { %v2728_v33 = vpop.f32.mrf.mxu0  ;;  %v2700_v49 = vpop.f32.mrf.mxu2 }
 0x25a   : > { %v2769_v47 = vmax.f32 %v2610_v45, 0.0  ;;  %v2701_v60 = vadd.f32 %v2700_v49, %v2688_v28 }
 0x25f   : > { %v2611_v35 = vpop.f32.mrf.mxu3 }
 0x261   : > { %v2702_v41 = vpop.f32.mrf.mxu2 }
 0x262   : > { %v2739_v40 = vpop.f32.mrf.mxu1 }
 0x263   : > { %v2740_v61 = vadd.f32 %v2739_v40, %v2727_v59 }
 0x267   : > { %v2661_v46 = vpop.f32.mrf.mxu3 }
 0x268   : > { %v2662_v18 = vadd.f32 %v2661_v46, %v2649_v44 }
 0x26a   : > { %v2770_v48 = vmax.f32 %v2662_v18, 0.0  ;;  %v2741_v50 = vpop.f32.mrf.mxu1 }
 0x26c   : > { %v2773_v12 = vpack.c.bf16 %v2770_v48, %v2769_v47 }
 0x26e   : > { %2775 = vst [vmem:[#allocation2] sm:$0xff] %v2773_v12 }
 0x26f   : > { %v2663_v51 = vpop.f32.mrf.mxu3 }
 0x277   : > { %v2713_v52 = vpop.f32.mrf.mxu3 }
 0x278   : > { %v2714_v63 = vadd.f32 %v2713_v52, %v2701_v60 }
 0x279   : > { %v2752_v53 = vpop.f32.mrf.mxu2 }
 0x27a   : > { %v2753_v0 = vadd.f32 %v2752_v53, %v2740_v61  ;;  %v2771_v4 = vmax.f32 %v2714_v63, 0.0 }
 0x27f   : > { %v2715_v55 = vpop.f32.mrf.mxu3 }
 0x281   : > { %v2754_v56 = vpop.f32.mrf.mxu2 }
 0x297   : > { %v2765_v1 = vpop.f32.mrf.mxu3 }
 0x298   : > { %v2766_v2 = vadd.f32 %v2765_v1, %v2753_v0 }
 0x29a   : > { %v2772_v5 = vmax.f32 %v2766_v2, 0.0 }
 0x29c   : > { %v2774_v6 = vpack.c.bf16 %v2772_v5, %v2771_v4 }
 0x29e   : > { %2776 = vst [vmem:[#allocation2 + $0x8] sm:$0xff] %v2774_v6 }
 0x29f   : > { %v2767_v7 = vpop.f32.mrf.mxu3 }
 0x2a0 PF: > { %v10789_v8 = vld [vmem:[%s15047_s30 + $0x540] sm:$0xf]  ;;  %s14247_s18 = smul.u32 192, %s14806_s12  ;;  %s8767_s24 = sshll.u32 %s15057_s7, 4  ;;  %s8768_s24 = int_to_ptr.vmem [resolvable:$true] %s8767_s24 }
 0x2a1   : > { %v13659_v9 = vld [vmem:[%s15047_s30 + $0x59c] sm:$0xf0]  ;;  %s8752_s12 = scalar_lea.sflag [#allocation5], %s15044_s19  ;;  %s14736_s22 = scalar_lea.hbm %s16864_s9, 768 }
 0x2a2   : > { %v11557_v10 = vld [vmem:[%s15047_s30 + $0xb40] sm:$0xf]  ;;  %v10790_v38 = vor.u32 %v13659_v9, %v10789_v8  ;;  %s8765_s26 = scalar_lea.hbm %s16864_s9, %s14247_s18 }
 0x2a3   : > { %v13851_v11 = vld [vmem:[%s15047_s30 + $0xb9c] sm:$0xf0]  ;;  %s8769_s20 = sshll.u32 %s8765_s26, 4  ;;  %s8770_s20 = int_to_ptr.hbm [resolvable:$true] %s8769_s20 }
 0x2a4   : > { %v12325_v13 = vld [vmem:[%s15047_s30 + $0x1140] sm:$0xf]  ;;  %v11558_v15 = vor.u32 %v13851_v11, %v11557_v10  ;;  %7455 = vmatpush.bf16.msra.mxu0 %v10790_v38  ;;  %s14730_s29 = sshra.s32 %s8770_s20, 4  ;;  %s14731_s29 = int_to_ptr.hbm [resolvable:$true] %s14730_s29 }
 0x2a5   : > { %v14043_v14 = vld [vmem:[%s15047_s30 + $0x119c] sm:$0xf0]  ;;  %s14732_s14 = scalar_lea.hbm %s14731_s29, 192  ;;  %p14737_p9 = scmp.lt.s32.totalorder %s14731_s29, %s16864_s9 }
 0x2a6   : > { %v12326_v16 = vor.u32 %v14043_v14, %v12325_v13  ;;  %v13093_v62 = vld [vmem:[%s15047_s30 + $0x1740] sm:$0xf]  ;;  %7468 = vmatpush.bf16.msra.mxu1 %v11558_v15  ;;  %p14733_p3 = scmp.ne.s32.totalorder %s14731_s29, %s14732_s14  ;;  %p14738_p10 = scmp.lt.s32.totalorder %s14736_s22, %s14732_s14 }
 0x2a7   : > { %v14235_v17 = vld [vmem:[%s15047_s30 + $0x179c] sm:$0xf0] }
 0x2a8   : > { %v10693_v19 = vld [vmem:[%s15047_s30 + $0x480] sm:$0xf]  ;;  %v13094_v20 = vor.u32 %v14235_v17, %v13093_v62  ;;  %7481 = vmatpush.bf16.msra.mxu2 %v12326_v16  ;;  %p14734_p5 = pnand %p14733_p3, %p14964_p2  ;;  %p14739_p11 = por %p14738_p10, %p14737_p9 }
 0x2a9   : > { %v13635_v21 = vld [vmem:[%s15047_s30 + $0x4dc] sm:$0xf0] }
 0x2aa   : > { %v11461_v3 = vld [vmem:[%s15047_s30 + $0xa80] sm:$0xf]  ;;  %v10694_v23 = vor.u32 %v13635_v21, %v10693_v19  ;;  %7494 = vmatpush.bf16.msra.mxu3 %v13094_v20  ;;  %p14735_p7 = pneg %p14734_p5 }
 0x2ab   : > { %v13827_v22 = vld [vmem:[%s15047_s30 + $0xadc] sm:$0xf0] }
 0x2ac   : > { %v11462_v24 = vor.u32 %v13827_v22, %v11461_v3  ;;  %v12229_v25 = vld [vmem:[%s15047_s30 + $0x1080] sm:$0xf]  ;;  %7456 = vmatpush.bf16.msra.mxu0 %v10694_v23  ;;  %p14740_p12 = pnand %p14739_p11, %p14735_p7 }
 0x2ad   : > { %v14019_v26 = vld [vmem:[%s15047_s30 + $0x10dc] sm:$0xf0] }
 0x2ae   : > { %v12997_v27 = vld [vmem:[%s15047_s30 + $0x1680] sm:$0xf]  ;;  %v12230_v28 = vor.u32 %v14019_v26, %v12229_v25  ;;  %7469 = vmatpush.bf16.msra.mxu1 %v11462_v24 }
 0x2af   : > { %v14211_v29 = vld [vmem:[%s15047_s30 + $0x16dc] sm:$0xf0] }
 0x2b0   : > { %v10597_v30 = vld [vmem:[%s15047_s30 + $0x3c0] sm:$0xf]  ;;  %v12998_v31 = vor.u32 %v14211_v29, %v12997_v27  ;;  %7482 = vmatpush.bf16.msra.mxu2 %v12230_v28 }
 0x2b1   : > { %v13611_v57 = vld [vmem:[%s15047_s30 + $0x41c] sm:$0xf0] }
 0x2b2   : > { %v11365_v32 = vld [vmem:[%s15047_s30 + $0x9c0] sm:$0xf]  ;;  %v10598_v34 = vor.u32 %v13611_v57, %v10597_v30  ;;  %7495 = vmatpush.bf16.msra.mxu3 %v12998_v31 }
 0x2b3   : > { %v13803_v33 = vld [vmem:[%s15047_s30 + $0xa1c] sm:$0xf0] }
 0x2b4   : > { %v12133_v49 = vld [vmem:[%s15047_s30 + $0xfc0] sm:$0xf]  ;;  %v11366_v37 = vor.u32 %v13803_v33, %v11365_v32  ;;  %7457 = vmatpush.bf16.msra.mxu0 %v10598_v34  ;;  %v10791_v34 = vld [vmem:[%s15047_s30 + $0x5a0] sm:$0xf0] }
 0x2b5   : > { %v13995_v54 = vld [vmem:[%s15047_s30 + $0x101c] sm:$0xf0] }
 0x2b6   : > { %v12901_v35 = vld [vmem:[%s15047_s30 + $0x15c0] sm:$0xf]  ;;  %v12134_v39 = vor.u32 %v13995_v54, %v12133_v49  ;;  %7470 = vmatpush.bf16.msra.mxu1 %v11366_v37  ;;  %v13647_v49 = vld [vmem:[%s15047_s30 + $0x544] sm:$0xf] }
 0x2b7   : > { %v14187_v36 = vld [vmem:[%s15047_s30 + $0x161c] sm:$0xf0]  ;;  %v13839_v54 = vld [vmem:[%s15047_s30 + $0xb44] sm:$0xf] }
 0x2b8   : > { %v10501_v40 = vld [vmem:[%s15047_s30 + $0x300] sm:$0xf]  ;;  %v12902_v43 = vor.u32 %v14187_v36, %v12901_v35  ;;  %7483 = vmatpush.bf16.msra.mxu2 %v12134_v39  ;;  %v11559_v36 = vld [vmem:[%s15047_s30 + $0xba0] sm:$0xf0] }
 0x2b9   : > { %v13587_v41 = vld [vmem:[%s15047_s30 + $0x35c] sm:$0xf0]  ;;  %v14031_v37 = vld [vmem:[%s15047_s30 + $0x1144] sm:$0xf] }
 0x2ba   : > { %v11269_v42 = vld [vmem:[%s15047_s30 + $0x900] sm:$0xf]  ;;  %v10502_v48 = vor.u32 %v13587_v41, %v10501_v40  ;;  %7496 = vmatpush.bf16.msra.mxu3 %v12902_v43  ;;  %v12327_v39 = vld [vmem:[%s15047_s30 + $0x11a0] sm:$0xf0] }
 0x2bb   : > { %v13779_v44 = vld [vmem:[%s15047_s30 + $0x95c] sm:$0xf0]  ;;  %v13095_v43 = vld [vmem:[%s15047_s30 + $0x17a0] sm:$0xf0] }
 0x2bc   : > { %v12037_v45 = vld [vmem:[%s15047_s30 + $0xf00] sm:$0xf]  ;;  %v11270_v50 = vor.u32 %v13779_v44, %v11269_v42  ;;  %7458 = vmatpush.bf16.msra.mxu0 %v10502_v48  ;;  %v14223_v42 = vld [vmem:[%s15047_s30 + $0x1744] sm:$0xf] }
 0x2bd   : > { %v13971_v46 = vld [vmem:[%s15047_s30 + $0xf5c] sm:$0xf0]  ;;  %v10695_v48 = vld [vmem:[%s15047_s30 + $0x4e0] sm:$0xf0] }
 0x2be   : > { %v12805_v18 = vld [vmem:[%s15047_s30 + $0x1500] sm:$0xf]  ;;  %v12038_v12 = vor.u32 %v13971_v46, %v12037_v45  ;;  %7471 = vmatpush.bf16.msra.mxu1 %v11270_v50  ;;  %v10794_v45 = vor.u32 %v13647_v49, %v10791_v34  ;;  %v11562_v46 = vor.u32 %v13839_v54, %v11559_v36  ;;  %v13815_v50 = vld [vmem:[%s15047_s30 + $0xa84] sm:$0xf] }
 0x2bf   : > { %v14163_v47 = vld [vmem:[%s15047_s30 + $0x155c] sm:$0xf0]  ;;  %v11175_v34 = vld [vmem:[%s15047_s30 + $0x8a0] sm:$0xf0] }
 0x2c0   : > { %v10405_v51 = vld [vmem:[%s15047_s30 + $0x240] sm:$0xf]  ;;  %v12806_v55 = vor.u32 %v14163_v47, %v12805_v18  ;;  %7484 = vmatpush.bf16.msra.mxu2 %v12038_v12  ;;  %v12330_v18 = vor.u32 %v14031_v37, %v12327_v39  ;;  %v13623_v47 = vld [vmem:[%s15047_s30 + $0x484] sm:$0xf]  ;;  %v13098_v12 = vor.u32 %v14223_v42, %v13095_v43 }
 0x2c1   : > { %v13563_v52 = vld [vmem:[%s15047_s30 + $0x29c] sm:$0xf0]  ;;  %v13935_v54 = vld [vmem:[%s15047_s30 + $0xe44] sm:$0xf] }
 0x2c2   : > { %v11173_v53 = vld [vmem:[%s15047_s30 + $0x840] sm:$0xf]  ;;  %v10406_v63 = vor.u32 %v13563_v52, %v10405_v51  ;;  %7497 = vmatpush.bf16.msra.mxu3 %v12806_v55  ;;  %v11463_v51 = vld [vmem:[%s15047_s30 + $0xae0] sm:$0xf0] }
 0x2c3   : > { %v13755_v56 = vld [vmem:[%s15047_s30 + $0x89c] sm:$0xf0]  ;;  %v14007_v52 = vld [vmem:[%s15047_s30 + $0x1084] sm:$0xf] }
 0x2c4   : > { %v11941_v58 = vld [vmem:[%s15047_s30 + $0xe40] sm:$0xf]  ;;  %v11174_v0 = vor.u32 %v13755_v56, %v11173_v53  ;;  %7459 = vmatpush.bf16.msra.mxu0 %v10406_v63  ;;  %v12231_v53 = vld [vmem:[%s15047_s30 + $0x10e0] sm:$0xf0] }
 0x2c5   : > { %v13947_v59 = vld [vmem:[%s15047_s30 + $0xe9c] sm:$0xf0]  ;;  %v14199_v55 = vld [vmem:[%s15047_s30 + $0x1684] sm:$0xf] }
 0x2c6   : > { %v12709_v60 = vld [vmem:[%s15047_s30 + $0x1440] sm:$0xf]  ;;  %v11942_v1 = vor.u32 %v13947_v59, %v11941_v58  ;;  %7472 = vmatpush.bf16.msra.mxu1 %v11174_v0  ;;  %v12999_v56 = vld [vmem:[%s15047_s30 + $0x16e0] sm:$0xf0]  ;;  %v10698_v58 = vor.u32 %v13623_v47, %v10695_v48 }
 0x2c7   : > { %v14139_v61 = vld [vmem:[%s15047_s30 + $0x149c] sm:$0xf0]  ;;  %v13599_v59 = vld [vmem:[%s15047_s30 + $0x3c4] sm:$0xf] }
 0x2c8   : > { %v10309_v2 = vld [vmem:[%s15047_s30 + $0x180] sm:$0xf]  ;;  %v12710_v6 = vor.u32 %v14139_v61, %v12709_v60  ;;  %7485 = vmatpush.bf16.msra.mxu2 %v11942_v1  ;;  %v11466_v60 = vor.u32 %v13815_v50, %v11463_v51  ;;  %v12234_v61 = vor.u32 %v14007_v52, %v12231_v53  ;;  %v10599_v63 = vld [vmem:[%s15047_s30 + $0x420] sm:$0xf0] }
 0x2c9   : > { %v13539_v4 = vld [vmem:[%s15047_s30 + $0x1dc] sm:$0xf0]  ;;  %v13791_v0 = vld [vmem:[%s15047_s30 + $0x9c4] sm:$0xf] }
 0x2ca   : > { %v11077_v5 = vld [vmem:[%s15047_s30 + $0x780] sm:$0xf]  ;;  %v10310_v11 = vor.u32 %v13539_v4, %v10309_v2  ;;  %7498 = vmatpush.bf16.msra.mxu3 %v12710_v6  ;;  %v11367_v1 = vld [vmem:[%s15047_s30 + $0xa20] sm:$0xf0]  ;;  %v13002_v2 = vor.u32 %v14199_v55, %v12999_v56 }
 0x2cb   : > { %v13731_v7 = vld [vmem:[%s15047_s30 + $0x7dc] sm:$0xf0]  ;;  %v13983_v4 = vld [vmem:[%s15047_s30 + $0xfc4] sm:$0xf] }
 0x2cc   : > { %v11845_v8 = vld [vmem:[%s15047_s30 + $0xd80] sm:$0xf]  ;;  %v11078_v13 = vor.u32 %v13731_v7, %v11077_v5  ;;  %7460 = vmatpush.bf16.msra.mxu0 %v10310_v11  ;;  %v12135_v5 = vld [vmem:[%s15047_s30 + $0x1020] sm:$0xf0] }
 0x2cd   : > { %v13923_v9 = vld [vmem:[%s15047_s30 + $0xddc] sm:$0xf0]  ;;  %v14175_v6 = vld [vmem:[%s15047_s30 + $0x15c4] sm:$0xf]  ;;  %v12138_v11 = vor.u32 %v13983_v4, %v12135_v5 }
 0x2ce   : > { %v12613_v10 = vld [vmem:[%s15047_s30 + $0x1380] sm:$0xf]  ;;  %v11846_v14 = vor.u32 %v13923_v9, %v11845_v8  ;;  %7473 = vmatpush.bf16.msra.mxu1 %v11078_v13  ;;  %v12903_v7 = vld [vmem:[%s15047_s30 + $0x1620] sm:$0xf0]  ;;  %v10602_v8 = vor.u32 %v13599_v59, %v10599_v63  ;;  %v11370_v9 = vor.u32 %v13791_v0, %v11367_v1 }
 0x2cf   : > { %v14115_v38 = vld [vmem:[%s15047_s30 + $0x13dc] sm:$0xf0]  ;;  %v13575_v13 = vld [vmem:[%s15047_s30 + $0x304] sm:$0xf] }
 0x2d0   : > { %v10213_v15 = vld [vmem:[%s15047_s30 + $0xc0] sm:$0xf]  ;;  %v12614_v17 = vor.u32 %v14115_v38, %v12613_v10  ;;  %7486 = vmatpush.bf16.msra.mxu2 %v11846_v14  ;;  %v2778_v10 = vld [vmem:[#allocation2 + $0x8] sm:$0xff] }
 0x2d1   : > { %v13515_v16 = vld [vmem:[%s15047_s30 + $0x11c] sm:$0xf0]  ;;  %v10503_v14 = vld [vmem:[%s15047_s30 + $0x360] sm:$0xf0] }
 0x2d2   : > { %v10981_v62 = vld [vmem:[%s15047_s30 + $0x6c0] sm:$0xf]  ;;  %v10214_v23 = vor.u32 %v13515_v16, %v10213_v15  ;;  %7499 = vmatpush.bf16.msra.mxu3 %v12614_v17  ;;  %v13767_v15 = vld [vmem:[%s15047_s30 + $0x904] sm:$0xf]  ;;  %v3605_v16 = vunpack.c.l.b16 %v2778_v10  ;;  %v3606_v17 = vunpack.c.h.b16 %v2778_v10 }
 0x2d3   : > { %v13707_v19 = vld [vmem:[%s15047_s30 + $0x71c] sm:$0xf0]  ;;  %v14127_v36 = vld [vmem:[%s15047_s30 + $0x1444] sm:$0xf] }
 0x2d4   : > { %v11749_v20 = vld [vmem:[%s15047_s30 + $0xcc0] sm:$0xf]  ;;  %v10982_v26 = vor.u32 %v13707_v19, %v10981_v62  ;;  %7461 = vmatpush.bf16.msra.mxu0 %v10214_v23  ;;  %v12906_v19 = vor.u32 %v14175_v6, %v12903_v7  ;;  %v14151_v23 = vld [vmem:[%s15047_s30 + $0x1504] sm:$0xf] }
 0x2d5   : > { %v13899_v21 = vld [vmem:[%s15047_s30 + $0xd1c] sm:$0xf0]  ;;  %v12711_v37 = vld [vmem:[%s15047_s30 + $0x14a0] sm:$0xf0] }
 0x2d6   : > { %v12517_v3 = vld [vmem:[%s15047_s30 + $0x12c0] sm:$0xf]  ;;  %v11750_v27 = vor.u32 %v13899_v21, %v11749_v20  ;;  %7474 = vmatpush.bf16.msra.mxu1 %v10982_v26  ;;  %v11271_v20 = vld [vmem:[%s15047_s30 + $0x960] sm:$0xf0] }
 0x2d7   : > { %v14091_v22 = vld [vmem:[%s15047_s30 + $0x131c] sm:$0xf0]  ;;  %v13959_v21 = vld [vmem:[%s15047_s30 + $0xf04] sm:$0xf] }
 0x2d8   : > { %v10117_v24 = vld [vmem:[%s15047_s30] sm:$0xf]  ;;  %v12518_v57 = vor.u32 %v14091_v22, %v12517_v3  ;;  %7487 = vmatpush.bf16.msra.mxu2 %v11750_v27  ;;  %v12039_v3 = vld [vmem:[%s15047_s30 + $0xf60] sm:$0xf0]  ;;  %v15214_v27 = vpack.c.b16 %v3606_v17, %v3606_v17  ;;  %v13852_v17 = vld [vmem:[%s15047_s30 + $0xba4] sm:$0xf0] }
 0x2d9   : > { %v13491_v25 = vld [vmem:[%s15047_s30 + $0x5c] sm:$0xf0]  ;;  %v13527_v42 = vld [vmem:[%s15047_s30 + $0x184] sm:$0xf] }
 0x2da   : > { %v10885_v28 = vld [vmem:[%s15047_s30 + $0x600] sm:$0xf]  ;;  %v10118_v35 = vor.u32 %v13491_v25, %v10117_v24  ;;  %7500 = vmatpush.bf16.msra.mxu3 %v12518_v57  ;;  %v12807_v24 = vld [vmem:[%s15047_s30 + $0x1560] sm:$0xf0]  ;;  %v15210_v25 = vpack.c.b16 %v3605_v16, %v3605_v16  ;;  %v12042_v57 = vor.u32 %v13959_v21, %v12039_v3  ;;  %v11565_v16 = vld [vmem:[%s15047_s30 + $0xb48] sm:$0xf] }
 0x2db   : > { %v13683_v29 = vld [vmem:[%s15047_s30 + $0x65c] sm:$0xf0]  ;;  %v12810_v49 = vor.u32 %v14151_v23, %v12807_v24  ;;  %v10311_v43 = vld [vmem:[%s15047_s30 + $0x1e0] sm:$0xf0]  ;;  %v14236_v23 = vld [vmem:[%s15047_s30 + $0x17a4] sm:$0xf0] }
 0x2dc   : > { %v11653_v30 = vld [vmem:[%s15047_s30 + $0xc00] sm:$0xf]  ;;  %v10886_v40 = vor.u32 %v13683_v29, %v10885_v28  ;;  %7462 = vmatpush.bf16.msra.mxu0 %v10118_v35  ;;  %v10506_v28 = vor.u32 %v13575_v13, %v10503_v14  ;;  %v11943_v35 = vld [vmem:[%s15047_s30 + $0xea0] sm:$0xf0]  ;;  %v10797_v14 = vld [vmem:[%s15047_s30 + $0x548] sm:$0xf] }
 0x2dd   : > { %v13875_v31 = vld [vmem:[%s15047_s30 + $0xc5c] sm:$0xf0]  ;;  %v11847_v47 = vld [vmem:[%s15047_s30 + $0xde0] sm:$0xf0] }
 0x2de   : > { %v12421_v32 = vld [vmem:[%s15047_s30 + $0x1200] sm:$0xf]  ;;  %v11654_v41 = vor.u32 %v13875_v31, %v11653_v30  ;;  %7475 = vmatpush.bf16.msra.mxu1 %v10886_v40  ;;  %v11274_v30 = vor.u32 %v13767_v15, %v11271_v20  ;;  %v13551_v31 = vld [vmem:[%s15047_s30 + $0x244] sm:$0xf]  ;;  %v13660_v15 = vld [vmem:[%s15047_s30 + $0x5a4] sm:$0xf0] }
 0x2df   : > { %v14067_v33 = vld [vmem:[%s15047_s30 + $0x125c] sm:$0xf0]  ;;  %v14103_v48 = vld [vmem:[%s15047_s30 + $0x1384] sm:$0xf]  ;;  %v14044_v20 = vld [vmem:[%s15047_s30 + $0x11a4] sm:$0xf0] }
 0x2e0   : > { %v12422_v44 = vor.u32 %v14067_v33, %v12421_v32  ;;  %7488 = vmatpush.bf16.msra.mxu2 %v11654_v41  ;;  %7507 = vmatpush.bf16.msrb.mxu0 %v10794_v45  ;;  %v2777_v38 = vld [vmem:[#allocation2] sm:$0xff]  ;;  %v10407_v32 = vld [vmem:[%s15047_s30 + $0x2a0] sm:$0xf0]  ;;  %v11946_v41 = vor.u32 %v13935_v54, %v11943_v35  ;;  %v12714_v45 = vor.u32 %v14127_v36, %v12711_v37  ;;  %v12237_v54 = vld [vmem:[%s15047_s30 + $0x1088] sm:$0xf] }
 0x2e1   : > { %v3603_v62 = vunpack.c.l.b16 %v2777_v38  ;;  %v3604_v22 = vunpack.c.h.b16 %v2777_v38  ;;  %v13743_v33 = vld [vmem:[%s15047_s30 + $0x844] sm:$0xf]  ;;  %v10410_v39 = vor.u32 %v13551_v31, %v10407_v32  ;;  %v10701_v31 = vld [vmem:[%s15047_s30 + $0x488] sm:$0xf] }
 0x2e2   : > { %7501 = vmatpush.bf16.msra.mxu3 %v12422_v44  ;;  %7520 = vmatpush.bf16.msrb.mxu1 %v11562_v46  ;;  %v11178_v40 = vor.u32 %v13743_v33, %v11175_v34  ;;  %v13719_v44 = vld [vmem:[%s15047_s30 + $0x784] sm:$0xf]  ;;  %v13636_v32 = vld [vmem:[%s15047_s30 + $0x4e4] sm:$0xf0] }
 0x2e3   : > { %v15212_v26 = vpack.c.b16 %v3603_v62, %v3603_v62  ;;  %v15216_v29 = vpack.c.b16 %v3604_v22, %v3604_v22  ;;  %7489 = vmatmul.bf16.vlgmr.msra.gmra.mxu2 %v15210_v25  ;;  %v11079_v46 = vld [vmem:[%s15047_s30 + $0x7e0] sm:$0xf0]  ;;  %v13101_v22 = vld [vmem:[%s15047_s30 + $0x1748] sm:$0xf] }
 0x2e4   : > { %7533 = vmatpush.bf16.msrb.mxu2 %v12330_v18  ;;  %7508 = vmatpush.bf16.msrb.mxu0 %v10698_v58  ;;  %v13911_v18 = vld [vmem:[%s15047_s30 + $0xd84] sm:$0xf]  ;;  %v11082_v51 = vor.u32 %v13719_v44, %v11079_v46  ;;  %v11469_v33 = vld [vmem:[%s15047_s30 + $0xa88] sm:$0xf] }
 0x2e5   : > { %7463 = vmatmul.bf16.vlgmr.msra.gmra.mxu0 %v15212_v26  ;;  %7502 = vmatmul.bf16.vlgmr.msra.gmra.mxu3 %v15214_v27  ;;  %v12615_v50 = vld [vmem:[%s15047_s30 + $0x13e0] sm:$0xf0]  ;;  %v11850_v52 = vor.u32 %v13911_v18, %v11847_v47  ;;  %v13828_v34 = vld [vmem:[%s15047_s30 + $0xae4] sm:$0xf0] }
 0x2e6   : > { %7546 = vmatpush.bf16.msrb.mxu3 %v13098_v12  ;;  %7521 = vmatpush.bf16.msrb.mxu1 %v11466_v60  ;;  %v10314_v12 = vor.u32 %v13527_v42, %v10311_v43  ;;  %v13503_v53 = vld [vmem:[%s15047_s30 + $0xc4] sm:$0xf]  ;;  %v12618_v58 = vor.u32 %v14103_v48, %v12615_v50  ;;  %v14020_v35 = vld [vmem:[%s15047_s30 + $0x10e4] sm:$0xf0] }
 0x2e7   : > { %7476 = vmatmul.bf16.vlgmr.msra.gmra.mxu1 %v15216_v29  ;;  %v10215_v55 = vld [vmem:[%s15047_s30 + $0x120] sm:$0xf0]  ;;  %v13005_v36 = vld [vmem:[%s15047_s30 + $0x1688] sm:$0xf] }
 0x2e8   : > { %7534 = vmatpush.bf16.msrb.mxu2 %v12234_v61  ;;  %7509 = vmatpush.bf16.msrb.mxu0 %v10602_v8  ;;  %v13695_v56 = vld [vmem:[%s15047_s30 + $0x6c4] sm:$0xf]  ;;  %v10218_v1 = vor.u32 %v13503_v53, %v10215_v55  ;;  %v14212_v37 = vld [vmem:[%s15047_s30 + $0x16e4] sm:$0xf0] }
 0x2e9   : > { %v10983_v59 = vld [vmem:[%s15047_s30 + $0x720] sm:$0xf0]  ;;  %v10605_v42 = vld [vmem:[%s15047_s30 + $0x3c8] sm:$0xf] }
 0x2ea   : > { %7547 = vmatpush.bf16.msrb.mxu3 %v13002_v2  ;;  %7522 = vmatpush.bf16.msrb.mxu1 %v11370_v9  ;;  %v13887_v60 = vld [vmem:[%s15047_s30 + $0xcc4] sm:$0xf]  ;;  %v10986_v5 = vor.u32 %v13695_v56, %v10983_v59  ;;  %v13612_v43 = vld [vmem:[%s15047_s30 + $0x424] sm:$0xf0] }
 0x2eb   : > { %v11751_v61 = vld [vmem:[%s15047_s30 + $0xd20] sm:$0xf0]  ;;  %v11373_v44 = vld [vmem:[%s15047_s30 + $0x9c8] sm:$0xf] }
 0x2ec   : > { %7535 = vmatpush.bf16.msrb.mxu2 %v12138_v11  ;;  %7510 = vmatpush.bf16.msrb.mxu0 %v10506_v28  ;;  %v14079_v63 = vld [vmem:[%s15047_s30 + $0x12c4] sm:$0xf]  ;;  %v11754_v6 = vor.u32 %v13887_v60, %v11751_v61  ;;  %v10798_v28 = vor.u32 %v13660_v15, %v10797_v14  ;;  %v13804_v46 = vld [vmem:[%s15047_s30 + $0xa24] sm:$0xf0] }
 0x2ed   : > { %v12519_v0 = vld [vmem:[%s15047_s30 + $0x1320] sm:$0xf0]  ;;  %v12141_v18 = vld [vmem:[%s15047_s30 + $0xfc8] sm:$0xf] }
 0x2ee   : > { %7548 = vmatpush.bf16.msrb.mxu3 %v12906_v19  ;;  %7523 = vmatpush.bf16.msrb.mxu1 %v11274_v30  ;;  %v13479_v2 = vld [vmem:[%s15047_s30 + $0x4] sm:$0xf]  ;;  %v12522_v10 = vor.u32 %v14079_v63, %v12519_v0  ;;  %v12333_v19 = vld [vmem:[%s15047_s30 + $0x1148] sm:$0xf]  ;;  %v11566_v30 = vor.u32 %v13852_v17, %v11565_v16 }
 0x2ef   : > { %v10119_v4 = vld [vmem:[%s15047_s30 + $0x60] sm:$0xf0]  ;;  %v13996_v47 = vld [vmem:[%s15047_s30 + $0x1024] sm:$0xf0] }
 0x2f0   : > { %7536 = vmatpush.bf16.msrb.mxu2 %v12042_v57  ;;  %7511 = vmatpush.bf16.msrb.mxu0 %v10410_v39  ;;  %v13671_v7 = vld [vmem:[%s15047_s30 + $0x604] sm:$0xf]  ;;  %v10122_v62 = vor.u32 %v13479_v2, %v10119_v4  ;;  %v12334_v57 = vor.u32 %v14044_v20, %v12333_v19  ;;  %v10702_v39 = vor.u32 %v13636_v32, %v10701_v31  ;;  %v12909_v48 = vld [vmem:[%s15047_s30 + $0x15c8] sm:$0xf] }
 0x2f1   : > { %v10887_v8 = vld [vmem:[%s15047_s30 + $0x660] sm:$0xf0]  ;;  %v14188_v50 = vld [vmem:[%s15047_s30 + $0x1624] sm:$0xf0] }
 0x2f2   : > { %7549 = vmatpush.bf16.msrb.mxu3 %v12810_v49  ;;  %7524 = vmatpush.bf16.msrb.mxu1 %v11178_v40  ;;  %v13863_v9 = vld [vmem:[%s15047_s30 + $0xc04] sm:$0xf]  ;;  %v10890_v21 = vor.u32 %v13671_v7, %v10887_v8  ;;  %v13102_v49 = vor.u32 %v14236_v23, %v13101_v22  ;;  %v11470_v40 = vor.u32 %v13828_v34, %v11469_v33  ;;  %v10509_v53 = vld [vmem:[%s15047_s30 + $0x308] sm:$0xf] }
 0x2f3   : > { %v11655_v38 = vld [vmem:[%s15047_s30 + $0xc60] sm:$0xf0]  ;;  %v13588_v55 = vld [vmem:[%s15047_s30 + $0x364] sm:$0xf0] }
 0x2f4   : > { %7537 = vmatpush.bf16.msrb.mxu2 %v11946_v41  ;;  %7512 = vmatpush.bf16.msrb.mxu0 %v10314_v12  ;;  %v14055_v11 = vld [vmem:[%s15047_s30 + $0x1204] sm:$0xf]  ;;  %v11658_v3 = vor.u32 %v13863_v9, %v11655_v38  ;;  %v12238_v41 = vor.u32 %v14020_v35, %v12237_v54  ;;  %v10606_v12 = vor.u32 %v13612_v43, %v10605_v42  ;;  %v11277_v56 = vld [vmem:[%s15047_s30 + $0x908] sm:$0xf] }
 0x2f5   : > { %v12423_v13 = vld [vmem:[%s15047_s30 + $0x1260] sm:$0xf0]  ;;  %v13780_v59 = vld [vmem:[%s15047_s30 + $0x964] sm:$0xf0] }
 0x2f6   : > { %7550 = vmatpush.bf16.msrb.mxu3 %v12714_v45  ;;  %7525 = vmatpush.bf16.msrb.mxu1 %v11082_v51  ;;  %v12426_v24 = vor.u32 %v14055_v11, %v12423_v13  ;;  %v13006_v45 = vor.u32 %v14212_v37, %v13005_v36  ;;  %v11374_v51 = vor.u32 %v13804_v46, %v11373_v44  ;;  %v12045_v60 = vld [vmem:[%s15047_s30 + $0xf08] sm:$0xf] }
 0x2f7   : > { %v13972_v61 = vld [vmem:[%s15047_s30 + $0xf64] sm:$0xf0]  ;;  %v11278_v2 = vor.u32 %v13780_v59, %v11277_v56  ;;  %v14032_v56 = vld [vmem:[%s15047_s30 + $0x114c] sm:$0xf] }
 0x2f8   : > { %7538 = vmatpush.bf16.msrb.mxu2 %v11850_v52  ;;  %7513 = vmatpush.bf16.msrb.mxu0 %v10218_v1  ;;  %v12142_v52 = vor.u32 %v13996_v47, %v12141_v18  ;;  %v12813_v63 = vld [vmem:[%s15047_s30 + $0x1508] sm:$0xf]  ;;  %v10510_v1 = vor.u32 %v13588_v55, %v10509_v53  ;;  %v12046_v4 = vor.u32 %v13972_v61, %v12045_v60  ;;  %v11567_v55 = vld [vmem:[%s15047_s30 + $0xba8] sm:$0xf0] }
 0x2f9   : > { %v14164_v0 = vld [vmem:[%s15047_s30 + $0x1564] sm:$0xf0]  ;;  %v14224_v61 = vld [vmem:[%s15047_s30 + $0x174c] sm:$0xf] }
 0x2fa   : > { %7551 = vmatpush.bf16.msrb.mxu3 %v12618_v58  ;;  %7526 = vmatpush.bf16.msrb.mxu1 %v10986_v5  ;;  %v12910_v58 = vor.u32 %v14188_v50, %v12909_v48  ;;  %v10413_v5 = vld [vmem:[%s15047_s30 + $0x248] sm:$0xf]  ;;  %v12814_v8 = vor.u32 %v14164_v0, %v12813_v63  ;;  %v13103_v63 = vld [vmem:[%s15047_s30 + $0x17a8] sm:$0xf0] }
 0x2fb   : > { %v11181_v7 = vld [vmem:[%s15047_s30 + $0x848] sm:$0xf] }
 0x2fc   : > { %7539 = vmatpush.bf16.msrb.mxu2 %v11754_v6  ;;  %7514 = vmatpush.bf16.msrb.mxu0 %v10122_v62  ;;  %v13564_v6 = vld [vmem:[%s15047_s30 + $0x2a4] sm:$0xf0] }
 0x2fd   : > { %v13756_v9 = vld [vmem:[%s15047_s30 + $0x8a4] sm:$0xf0]  ;;  %v10414_v14 = vor.u32 %v13564_v6, %v10413_v5  ;;  %v13624_v5 = vld [vmem:[%s15047_s30 + $0x48c] sm:$0xf] }
 0x2fe   : > { %7552 = vmatpush.bf16.msrb.mxu3 %v12522_v10  ;;  %7527 = vmatpush.bf16.msrb.mxu1 %v10890_v21  ;;  %v11949_v10 = vld [vmem:[%s15047_s30 + $0xe48] sm:$0xf]  ;;  %v11182_v15 = vor.u32 %v13756_v9, %v11181_v7  ;;  %v10703_v6 = vld [vmem:[%s15047_s30 + $0x4e8] sm:$0xf0] }
 0x2ff   : > { %7515 = vmatmul.bf16.vlgmr.msrb.gmra.mxu0 %v15212_v26  ;;  %v13948_v38 = vld [vmem:[%s15047_s30 + $0xea4] sm:$0xf0]  ;;  %v13816_v7 = vld [vmem:[%s15047_s30 + $0xa8c] sm:$0xf] }
 0x300   : > { %7540 = vmatpush.bf16.msrb.mxu2 %v11658_v3  ;;  %7559 = vmatpush.bf16.msra.mxu0 %v10798_v28  ;;  %v12717_v11 = vld [vmem:[%s15047_s30 + $0x1448] sm:$0xf]  ;;  %v11950_v16 = vor.u32 %v13948_v38, %v11949_v10  ;;  %v11471_v9 = vld [vmem:[%s15047_s30 + $0xae8] sm:$0xf0] }
 0x301   : > { %7528 = vmatmul.bf16.vlgmr.msrb.gmra.mxu1 %v15216_v29  ;;  %v14140_v13 = vld [vmem:[%s15047_s30 + $0x14a4] sm:$0xf0]  ;;  %v14008_v10 = vld [vmem:[%s15047_s30 + $0x108c] sm:$0xf] }
 0x302   : > { %7553 = vmatpush.bf16.msrb.mxu3 %v12426_v24  ;;  %7572 = vmatpush.bf16.msra.mxu1 %v11566_v30  ;;  %v10317_v62 = vld [vmem:[%s15047_s30 + $0x188] sm:$0xf]  ;;  %v12718_v20 = vor.u32 %v14140_v13, %v12717_v11  ;;  %v12239_v38 = vld [vmem:[%s15047_s30 + $0x10e8] sm:$0xf0] }
 0x303   : > { %7541 = vmatmul.bf16.vlgmr.msrb.gmra.mxu2 %v15210_v25  ;;  %v13540_v17 = vld [vmem:[%s15047_s30 + $0x1e4] sm:$0xf0]  ;;  %v14200_v11 = vld [vmem:[%s15047_s30 + $0x168c] sm:$0xf] }
 0x304   : > { %7585 = vmatpush.bf16.msra.mxu2 %v12334_v57  ;;  %7560 = vmatpush.bf16.msra.mxu0 %v10702_v39  ;;  %v11085_v19 = vld [vmem:[%s15047_s30 + $0x788] sm:$0xf]  ;;  %v10318_v28 = vor.u32 %v13540_v17, %v10317_v62  ;;  %v13007_v13 = vld [vmem:[%s15047_s30 + $0x16e8] sm:$0xf0] }
 0x305   : > { %7554 = vmatmul.bf16.vlgmr.msrb.gmra.mxu3 %v15214_v27  ;;  %v13732_v21 = vld [vmem:[%s15047_s30 + $0x7e4] sm:$0xf0]  ;;  %v13600_v62 = vld [vmem:[%s15047_s30 + $0x3cc] sm:$0xf] }
 0x306   : > { %7598 = vmatpush.bf16.msra.mxu3 %v13102_v49  ;;  %7573 = vmatpush.bf16.msra.mxu1 %v11470_v40  ;;  %v11853_v3 = vld [vmem:[%s15047_s30 + $0xd88] sm:$0xf]  ;;  %v11086_v30 = vor.u32 %v13732_v21, %v11085_v19  ;;  %v10607_v17 = vld [vmem:[%s15047_s30 + $0x428] sm:$0xf0] }
 0x307   : > { %v13924_v22 = vld [vmem:[%s15047_s30 + $0xde4] sm:$0xf0]  ;;  %v13792_v19 = vld [vmem:[%s15047_s30 + $0x9cc] sm:$0xf] }
 0x308   : > { %7586 = vmatpush.bf16.msra.mxu2 %v12238_v41  ;;  %7561 = vmatpush.bf16.msra.mxu0 %v10606_v12  ;;  %v12621_v23 = vld [vmem:[%s15047_s30 + $0x1388] sm:$0xf]  ;;  %v11854_v57 = vor.u32 %v13924_v22, %v11853_v3  ;;  %v13648_v12 = vld [vmem:[%s15047_s30 + $0x54c] sm:$0xf] }
 0x309   : > { %v14116_v24 = vld [vmem:[%s15047_s30 + $0x13e4] sm:$0xf0]  ;;  %v11375_v21 = vld [vmem:[%s15047_s30 + $0xa28] sm:$0xf0] }
 0x30a   : > { %7599 = vmatpush.bf16.msra.mxu3 %v13006_v45  ;;  %7574 = vmatpush.bf16.msra.mxu1 %v11374_v51  ;;  %v10221_v31 = vld [vmem:[%s15047_s30 + $0xc8] sm:$0xf]  ;;  %v12622_v49 = vor.u32 %v14116_v24, %v12621_v23  ;;  %v10799_v51 = vld [vmem:[%s15047_s30 + $0x5a8] sm:$0xf0] }
 0x30b   : > { %v13516_v32 = vld [vmem:[%s15047_s30 + $0x124] sm:$0xf0]  ;;  %v13984_v3 = vld [vmem:[%s15047_s30 + $0xfcc] sm:$0xf] }
 0x30c   : > { %7587 = vmatpush.bf16.msra.mxu2 %v12142_v52  ;;  %7562 = vmatpush.bf16.msra.mxu0 %v10510_v1  ;;  %v10989_v33 = vld [vmem:[%s15047_s30 + $0x6c8] sm:$0xf]  ;;  %v10222_v39 = vor.u32 %v13516_v32, %v10221_v31  ;;  %v13840_v52 = vld [vmem:[%s15047_s30 + $0xb4c] sm:$0xf]  ;;  %v10802_v1 = vor.u32 %v13648_v12, %v10799_v51 }
 0x30d   : > { %v13708_v34 = vld [vmem:[%s15047_s30 + $0x724] sm:$0xf0]  ;;  %v12143_v22 = vld [vmem:[%s15047_s30 + $0x1028] sm:$0xf0] }
 0x30e   : > { %7600 = vmatpush.bf16.msra.mxu3 %v12910_v58  ;;  %7575 = vmatpush.bf16.msra.mxu1 %v11278_v2  ;;  %v11757_v54 = vld [vmem:[%s15047_s30 + $0xcc8] sm:$0xf]  ;;  %v10990_v42 = vor.u32 %v13708_v34, %v10989_v33  ;;  %v12335_v58 = vld [vmem:[%s15047_s30 + $0x11a8] sm:$0xf0]  ;;  %v11570_v2 = vor.u32 %v13840_v52, %v11567_v55 }
 0x30f   : > { %v13900_v35 = vld [vmem:[%s15047_s30 + $0xd24] sm:$0xf0]  ;;  %v14176_v23 = vld [vmem:[%s15047_s30 + $0x15cc] sm:$0xf] }
 0x310   : > { %7588 = vmatpush.bf16.msra.mxu2 %v12046_v4  ;;  %7563 = vmatpush.bf16.msra.mxu0 %v10414_v14  ;;  %v12525_v36 = vld [vmem:[%s15047_s30 + $0x12c8] sm:$0xf]  ;;  %v11758_v43 = vor.u32 %v13900_v35, %v11757_v54  ;;  %v12338_v4 = vor.u32 %v14032_v56, %v12335_v58  ;;  %v10706_v14 = vor.u32 %v13624_v5, %v10703_v6  ;;  %v12911_v24 = vld [vmem:[%s15047_s30 + $0x1628] sm:$0xf0] }
 0x311   : > { %v14092_v37 = vld [vmem:[%s15047_s30 + $0x1324] sm:$0xf0]  ;;  %v13576_v31 = vld [vmem:[%s15047_s30 + $0x30c] sm:$0xf] }
 0x312   : > { %7601 = vmatpush.bf16.msra.mxu3 %v12814_v8  ;;  %7576 = vmatpush.bf16.msra.mxu1 %v11182_v15  ;;  %v10125_v40 = vld [vmem:[%s15047_s30 + $0x8] sm:$0xf]  ;;  %v12526_v18 = vor.u32 %v14092_v37, %v12525_v36  ;;  %v13106_v8 = vor.u32 %v14224_v61, %v13103_v63  ;;  %v11474_v15 = vor.u32 %v13816_v7, %v11471_v9  ;;  %v10511_v32 = vld [vmem:[%s15047_s30 + $0x368] sm:$0xf0] }
 0x313   : > { %v13492_v41 = vld [vmem:[%s15047_s30 + $0x64] sm:$0xf0]  ;;  %v13768_v33 = vld [vmem:[%s15047_s30 + $0x90c] sm:$0xf] }
 0x314   : > { %7589 = vmatpush.bf16.msra.mxu2 %v11950_v16  ;;  %7564 = vmatpush.bf16.msra.mxu0 %v10318_v28  ;;  %v10893_v44 = vld [vmem:[%s15047_s30 + $0x608] sm:$0xf]  ;;  %v10126_v53 = vor.u32 %v13492_v41, %v10125_v40  ;;  %v12242_v16 = vor.u32 %v14008_v10, %v12239_v38  ;;  %v10610_v28 = vor.u32 %v13600_v62, %v10607_v17  ;;  %v11279_v34 = vld [vmem:[%s15047_s30 + $0x968] sm:$0xf0] }
 0x315   : > { %v13684_v45 = vld [vmem:[%s15047_s30 + $0x664] sm:$0xf0]  ;;  %v13960_v54 = vld [vmem:[%s15047_s30 + $0xf0c] sm:$0xf]  ;;  %v11282_v40 = vor.u32 %v13768_v33, %v11279_v34  ;;  %v12341_v33 = vld [vmem:[%s15047_s30 + $0x1150] sm:$0xf] }
 0x316   : > { %7602 = vmatpush.bf16.msra.mxu3 %v12718_v20  ;;  %7577 = vmatpush.bf16.msra.mxu1 %v11086_v30  ;;  %v11661_v46 = vld [vmem:[%s15047_s30 + $0xc08] sm:$0xf]  ;;  %v10894_v59 = vor.u32 %v13684_v45, %v10893_v44  ;;  %v13010_v20 = vor.u32 %v14200_v11, %v13007_v13  ;;  %v11378_v30 = vor.u32 %v13792_v19, %v11375_v21  ;;  %v12047_v35 = vld [vmem:[%s15047_s30 + $0xf68] sm:$0xf0] }
 0x317   : > { %v13876_v47 = vld [vmem:[%s15047_s30 + $0xc64] sm:$0xf0]  ;;  %v14152_v36 = vld [vmem:[%s15047_s30 + $0x150c] sm:$0xf]  ;;  %v12050_v41 = vor.u32 %v13960_v54, %v12047_v35  ;;  %v13109_v35 = vld [vmem:[%s15047_s30 + $0x1750] sm:$0xf] }
 0x318   : > { %7590 = vmatpush.bf16.msra.mxu2 %v11854_v57  ;;  %v12429_v48 = vld [vmem:[%s15047_s30 + $0x1208] sm:$0xf]  ;;  %7565 = vmatpush.bf16.msra.mxu0 %v10222_v39  ;;  %v11662_v60 = vor.u32 %v13876_v47, %v11661_v46  ;;  %v12146_v57 = vor.u32 %v13984_v3, %v12143_v22  ;;  %v12815_v37 = vld [vmem:[%s15047_s30 + $0x1568] sm:$0xf0]  ;;  %v10514_v39 = vor.u32 %v13576_v31, %v10511_v32  ;;  %v13853_v32 = vld [vmem:[%s15047_s30 + $0xbac] sm:$0xf0] }
 0x319   : > { %v14068_v50 = vld [vmem:[%s15047_s30 + $0x1264] sm:$0xf0]  ;;  %v13744_v44 = vld [vmem:[%s15047_s30 + $0x84c] sm:$0xf]  ;;  %v12818_v45 = vor.u32 %v14152_v36, %v12815_v37  ;;  %v14237_v36 = vld [vmem:[%s15047_s30 + $0x17ac] sm:$0xf0] }
 0x31a   : > { %7603 = vmatpush.bf16.msra.mxu3 %v12622_v49  ;;  %7578 = vmatpush.bf16.msra.mxu1 %v10990_v42  ;;  %v12430_v0 = vor.u32 %v14068_v50, %v12429_v48  ;;  %v12914_v49 = vor.u32 %v14176_v23, %v12911_v24  ;;  %v13552_v42 = vld [vmem:[%s15047_s30 + $0x24c] sm:$0xf] }
 0x31b   : > { %v11183_v46 = vld [vmem:[%s15047_s30 + $0x8a8] sm:$0xf0] }
 0x31c   : > { %7591 = vmatpush.bf16.msra.mxu2 %v11758_v43  ;;  %7566 = vmatpush.bf16.msra.mxu0 %v10126_v53  ;;  %v10415_v43 = vld [vmem:[%s15047_s30 + $0x2a8] sm:$0xf0]  ;;  %v11186_v51 = vor.u32 %v13744_v44, %v11183_v46  ;;  %v11477_v44 = vld [vmem:[%s15047_s30 + $0xa90] sm:$0xf] }
 0x31d   : > { %v11951_v47 = vld [vmem:[%s15047_s30 + $0xea8] sm:$0xf0]  ;;  %v10418_v12 = vor.u32 %v13552_v42, %v10415_v43  ;;  %v10709_v42 = vld [vmem:[%s15047_s30 + $0x490] sm:$0xf] }
 0x31e   : > { %7604 = vmatpush.bf16.msra.mxu3 %v12526_v18  ;;  %7579 = vmatpush.bf16.msra.mxu1 %v10894_v59  ;;  %v13936_v18 = vld [vmem:[%s15047_s30 + $0xe4c] sm:$0xf]  ;;  %v13637_v43 = vld [vmem:[%s15047_s30 + $0x4ec] sm:$0xf0] }
 0x31f   : > { %7567 = vmatmul.bf16.vlgmr.msra.gmra.mxu0 %v15212_v26  ;;  %v14128_v48 = vld [vmem:[%s15047_s30 + $0x144c] sm:$0xf]  ;;  %v11954_v52 = vor.u32 %v13936_v18, %v11951_v47  ;;  %v13829_v46 = vld [vmem:[%s15047_s30 + $0xaec] sm:$0xf0] }
 0x320   : > { %7592 = vmatpush.bf16.msra.mxu2 %v11662_v60  ;;  %7611 = vmatpush.bf16.msrb.mxu0 %v10802_v1  ;;  %v12719_v50 = vld [vmem:[%s15047_s30 + $0x14a8] sm:$0xf0]  ;;  %v12245_v18 = vld [vmem:[%s15047_s30 + $0x1090] sm:$0xf] }
 0x321   : > { %7580 = vmatmul.bf16.vlgmr.msra.gmra.mxu1 %v15216_v29  ;;  %v13528_v53 = vld [vmem:[%s15047_s30 + $0x18c] sm:$0xf]  ;;  %v12722_v58 = vor.u32 %v14128_v48, %v12719_v50  ;;  %v14021_v47 = vld [vmem:[%s15047_s30 + $0x10ec] sm:$0xf0] }
 0x322   : > { %7605 = vmatpush.bf16.msra.mxu3 %v12430_v0  ;;  %7624 = vmatpush.bf16.msrb.mxu1 %v11570_v2  ;;  %v10319_v55 = vld [vmem:[%s15047_s30 + $0x1e8] sm:$0xf0]  ;;  %v13013_v48 = vld [vmem:[%s15047_s30 + $0x1690] sm:$0xf] }
 0x323   : > { %7593 = vmatmul.bf16.vlgmr.msra.gmra.mxu2 %v15210_v25  ;;  %v13720_v56 = vld [vmem:[%s15047_s30 + $0x78c] sm:$0xf]  ;;  %v10322_v1 = vor.u32 %v13528_v53, %v10319_v55  ;;  %v14213_v50 = vld [vmem:[%s15047_s30 + $0x16ec] sm:$0xf0] }
 0x324   : > { %7637 = vmatpush.bf16.msrb.mxu2 %v12338_v4  ;;  %7612 = vmatpush.bf16.msrb.mxu0 %v10706_v14  ;;  %v11087_v59 = vld [vmem:[%s15047_s30 + $0x7e8] sm:$0xf0]  ;;  %v10613_v53 = vld [vmem:[%s15047_s30 + $0x3d0] sm:$0xf] }
 0x325   : > { %7606 = vmatmul.bf16.vlgmr.msra.gmra.mxu3 %v15214_v27  ;;  %v13912_v60 = vld [vmem:[%s15047_s30 + $0xd8c] sm:$0xf]  ;;  %v11090_v2 = vor.u32 %v13720_v56, %v11087_v59  ;;  %v13613_v55 = vld [vmem:[%s15047_s30 + $0x42c] sm:$0xf0] }
 0x326   : > { %7650 = vmatpush.bf16.msrb.mxu3 %v13106_v8  ;;  %7625 = vmatpush.bf16.msrb.mxu1 %v11474_v15  ;;  %v11855_v61 = vld [vmem:[%s15047_s30 + $0xde8] sm:$0xf0]  ;;  %v11381_v56 = vld [vmem:[%s15047_s30 + $0x9d0] sm:$0xf] }
 0x327   : > { %v14104_v63 = vld [vmem:[%s15047_s30 + $0x138c] sm:$0xf]  ;;  %v11858_v4 = vor.u32 %v13912_v60, %v11855_v61  ;;  %v13805_v59 = vld [vmem:[%s15047_s30 + $0xa2c] sm:$0xf0] }
 0x328   : > { %7638 = vmatpush.bf16.msrb.mxu2 %v12242_v16  ;;  %7613 = vmatpush.bf16.msrb.mxu0 %v10610_v28  ;;  %v12623_v0 = vld [vmem:[%s15047_s30 + $0x13e8] sm:$0xf0]  ;;  %v10805_v28 = vld [vmem:[%s15047_s30 + $0x550] sm:$0xf] }
 0x329   : > { %v13504_v5 = vld [vmem:[%s15047_s30 + $0xcc] sm:$0xf]  ;;  %v12626_v8 = vor.u32 %v14104_v63, %v12623_v0  ;;  %v12149_v60 = vld [vmem:[%s15047_s30 + $0xfd0] sm:$0xf] }
 0x32a   : > { %7651 = vmatpush.bf16.msrb.mxu3 %v13010_v20  ;;  %7626 = vmatpush.bf16.msrb.mxu1 %v11378_v30  ;;  %v10223_v6 = vld [vmem:[%s15047_s30 + $0x128] sm:$0xf0]  ;;  %v13661_v30 = vld [vmem:[%s15047_s30 + $0x5ac] sm:$0xf0] }
 0x32b   : > { %v13696_v7 = vld [vmem:[%s15047_s30 + $0x6cc] sm:$0xf]  ;;  %v10226_v14 = vor.u32 %v13504_v5, %v10223_v6  ;;  %v13997_v61 = vld [vmem:[%s15047_s30 + $0x102c] sm:$0xf0] }
 0x32c   : > { %7639 = vmatpush.bf16.msrb.mxu2 %v12146_v57  ;;  %7614 = vmatpush.bf16.msrb.mxu0 %v10514_v39  ;;  %v10991_v9 = vld [vmem:[%s15047_s30 + $0x728] sm:$0xf0]  ;;  %v11573_v57 = vld [vmem:[%s15047_s30 + $0xb50] sm:$0xf]  ;;  %v10806_v39 = vor.u32 %v13661_v30, %v10805_v28 }
 0x32d   : > { %v13888_v10 = vld [vmem:[%s15047_s30 + $0xccc] sm:$0xf]  ;;  %v10994_v62 = vor.u32 %v13696_v7, %v10991_v9  ;;  %v12917_v63 = vld [vmem:[%s15047_s30 + $0x15d0] sm:$0xf] }
 0x32e   : > { %7652 = vmatpush.bf16.msrb.mxu3 %v12914_v49  ;;  %7627 = vmatpush.bf16.msrb.mxu1 %v11282_v40  ;;  %v11759_v38 = vld [vmem:[%s15047_s30 + $0xd28] sm:$0xf0]  ;;  %v14045_v49 = vld [vmem:[%s15047_s30 + $0x11ac] sm:$0xf0]  ;;  %v11574_v40 = vor.u32 %v13853_v32, %v11573_v57 }
 0x32f   : > { %v14080_v11 = vld [vmem:[%s15047_s30 + $0x12cc] sm:$0xf]  ;;  %v11762_v17 = vor.u32 %v13888_v10, %v11759_v38  ;;  %v14189_v0 = vld [vmem:[%s15047_s30 + $0x162c] sm:$0xf0] }
 0x330   : > { %7640 = vmatpush.bf16.msrb.mxu2 %v12050_v41  ;;  %7615 = vmatpush.bf16.msrb.mxu0 %v10418_v12  ;;  %v12527_v13 = vld [vmem:[%s15047_s30 + $0x1328] sm:$0xf0]  ;;  %v12342_v41 = vor.u32 %v14045_v49, %v12341_v33  ;;  %v10710_v12 = vor.u32 %v13637_v43, %v10709_v42  ;;  %v10517_v5 = vld [vmem:[%s15047_s30 + $0x310] sm:$0xf] }
 0x331   : > { %v13480_v15 = vld [vmem:[%s15047_s30 + $0xc] sm:$0xf]  ;;  %v12530_v3 = vor.u32 %v14080_v11, %v12527_v13  ;;  %v13589_v6 = vld [vmem:[%s15047_s30 + $0x36c] sm:$0xf0] }
 0x332   : > { %7653 = vmatpush.bf16.msrb.mxu3 %v12818_v45  ;;  %7628 = vmatpush.bf16.msrb.mxu1 %v11186_v51  ;;  %v10127_v16 = vld [vmem:[%s15047_s30 + $0x68] sm:$0xf0]  ;;  %v13110_v45 = vor.u32 %v14237_v36, %v13109_v35  ;;  %v11478_v51 = vor.u32 %v13829_v46, %v11477_v44  ;;  %v11285_v7 = vld [vmem:[%s15047_s30 + $0x910] sm:$0xf] }
 0x333   : > { %v13672_v19 = vld [vmem:[%s15047_s30 + $0x60c] sm:$0xf]  ;;  %v10130_v31 = vor.u32 %v13480_v15, %v10127_v16  ;;  %v13781_v9 = vld [vmem:[%s15047_s30 + $0x96c] sm:$0xf0] }
 0x334   : > { %7641 = vmatpush.bf16.msrb.mxu2 %v11954_v52  ;;  %7616 = vmatpush.bf16.msrb.mxu0 %v10322_v1  ;;  %v10895_v20 = vld [vmem:[%s15047_s30 + $0x668] sm:$0xf0]  ;;  %v12246_v52 = vor.u32 %v14021_v47, %v12245_v18  ;;  %v10614_v1 = vor.u32 %v13613_v55, %v10613_v53  ;;  %v12053_v10 = vld [vmem:[%s15047_s30 + $0xf10] sm:$0xf]  ;;  %v11286_v15 = vor.u32 %v13781_v9, %v11285_v7  ;;  %v14033_v7 = vld [vmem:[%s15047_s30 + $0x1154] sm:$0xf] }
 0x335   : > { %v13864_v21 = vld [vmem:[%s15047_s30 + $0xc0c] sm:$0xf]  ;;  %v10898_v34 = vor.u32 %v13672_v19, %v10895_v20  ;;  %v13973_v38 = vld [vmem:[%s15047_s30 + $0xf6c] sm:$0xf0] }
 0x336   : > { %7654 = vmatpush.bf16.msrb.mxu3 %v12722_v58  ;;  %7629 = vmatpush.bf16.msrb.mxu1 %v11090_v2  ;;  %v11663_v22 = vld [vmem:[%s15047_s30 + $0xc68] sm:$0xf0]  ;;  %v13014_v58 = vor.u32 %v14213_v50, %v13013_v48  ;;  %v11382_v2 = vor.u32 %v13805_v59, %v11381_v56  ;;  %v12821_v11 = vld [vmem:[%s15047_s30 + $0x1510] sm:$0xf]  ;;  %v12054_v16 = vor.u32 %v13973_v38, %v12053_v10  ;;  %v14225_v38 = vld [vmem:[%s15047_s30 + $0x1754] sm:$0xf] }
 0x337   : > { %v14056_v23 = vld [vmem:[%s15047_s30 + $0x120c] sm:$0xf]  ;;  %v11666_v54 = vor.u32 %v13864_v21, %v11663_v22  ;;  %v14165_v13 = vld [vmem:[%s15047_s30 + $0x156c] sm:$0xf0] }
 0x338   : > { %7642 = vmatpush.bf16.msrb.mxu2 %v11858_v4  ;;  %v12431_v24 = vld [vmem:[%s15047_s30 + $0x1268] sm:$0xf0]  ;;  %7617 = vmatpush.bf16.msrb.mxu0 %v10226_v14  ;;  %v12150_v4 = vor.u32 %v13997_v61, %v12149_v60  ;;  %v10518_v14 = vor.u32 %v13589_v6, %v10517_v5  ;;  %v11189_v19 = vld [vmem:[%s15047_s30 + $0x850] sm:$0xf]  ;;  %v12822_v20 = vor.u32 %v14165_v13, %v12821_v11  ;;  %v11575_v6 = vld [vmem:[%s15047_s30 + $0xbb0] sm:$0xf0] }
 0x339   : > { %v12434_v37 = vor.u32 %v14056_v23, %v12431_v24  ;;  %v13757_v21 = vld [vmem:[%s15047_s30 + $0x8ac] sm:$0xf0]  ;;  %v13111_v11 = vld [vmem:[%s15047_s30 + $0x17b0] sm:$0xf0] }
 0x33a   : > { %7655 = vmatpush.bf16.msrb.mxu3 %v12626_v8  ;;  %7630 = vmatpush.bf16.msrb.mxu1 %v10994_v62  ;;  %v12918_v8 = vor.u32 %v14189_v0, %v12917_v63  ;;  %v10421_v62 = vld [vmem:[%s15047_s30 + $0x250] sm:$0xf]  ;;  %v11190_v30 = vor.u32 %v13757_v21, %v11189_v19  ;;  %v13817_v19 = vld [vmem:[%s15047_s30 + $0xa94] sm:$0xf] }
 0x33b   : > { %v13949_v22 = vld [vmem:[%s15047_s30 + $0xeac] sm:$0xf0]  ;;  %v11479_v21 = vld [vmem:[%s15047_s30 + $0xaf0] sm:$0xf0] }
 0x33c   : > { %7643 = vmatpush.bf16.msrb.mxu2 %v11762_v17  ;;  %7618 = vmatpush.bf16.msrb.mxu0 %v10130_v31  ;;  %v13565_v17 = vld [vmem:[%s15047_s30 + $0x2ac] sm:$0xf0] }
 0x33d   : > { %v12725_v23 = vld [vmem:[%s15047_s30 + $0x1450] sm:$0xf]  ;;  %v10422_v28 = vor.u32 %v13565_v17, %v10421_v62  ;;  %v13625_v62 = vld [vmem:[%s15047_s30 + $0x494] sm:$0xf] }
 0x33e   : > { %7656 = vmatpush.bf16.msrb.mxu3 %v12530_v3  ;;  %7631 = vmatpush.bf16.msrb.mxu1 %v10898_v34  ;;  %v11957_v3 = vld [vmem:[%s15047_s30 + $0xe50] sm:$0xf]  ;;  %v10711_v17 = vld [vmem:[%s15047_s30 + $0x4f0] sm:$0xf0] }
 0x33f   : > { %7619 = vmatmul.bf16.vlgmr.msrb.gmra.mxu0 %v15212_v26  ;;  %v14141_v24 = vld [vmem:[%s15047_s30 + $0x14ac] sm:$0xf0]  ;;  %v11958_v57 = vor.u32 %v13949_v22, %v11957_v3  ;;  %v14009_v3 = vld [vmem:[%s15047_s30 + $0x1094] sm:$0xf] }
 0x340   : > { %7644 = vmatpush.bf16.msrb.mxu2 %v11666_v54  ;;  %7663 = vmatpush.bf16.msra.mxu0 %v10806_v39  ;;  %v10325_v31 = vld [vmem:[%s15047_s30 + $0x190] sm:$0xf]  ;;  %v12726_v49 = vor.u32 %v14141_v24, %v12725_v23  ;;  %v12247_v22 = vld [vmem:[%s15047_s30 + $0x10f0] sm:$0xf0] }
 0x341   : > { %7632 = vmatmul.bf16.vlgmr.msrb.gmra.mxu1 %v15216_v29  ;;  %v13541_v32 = vld [vmem:[%s15047_s30 + $0x1ec] sm:$0xf0]  ;;  %v14201_v23 = vld [vmem:[%s15047_s30 + $0x1694] sm:$0xf] }
 0x342   : > { %7657 = vmatpush.bf16.msrb.mxu3 %v12434_v37  ;;  %7676 = vmatpush.bf16.msra.mxu1 %v11574_v40  ;;  %v11093_v33 = vld [vmem:[%s15047_s30 + $0x790] sm:$0xf]  ;;  %v10326_v39 = vor.u32 %v13541_v32, %v10325_v31  ;;  %v13015_v24 = vld [vmem:[%s15047_s30 + $0x16f0] sm:$0xf0] }
 0x343   : > { %7645 = vmatmul.bf16.vlgmr.msrb.gmra.mxu2 %v15210_v25  ;;  %v13733_v34 = vld [vmem:[%s15047_s30 + $0x7ec] sm:$0xf0]  ;;  %v13601_v31 = vld [vmem:[%s15047_s30 + $0x3d4] sm:$0xf] }
 0x344   : > { %7689 = vmatpush.bf16.msra.mxu2 %v12342_v41  ;;  %7664 = vmatpush.bf16.msra.mxu0 %v10710_v12  ;;  %v11861_v54 = vld [vmem:[%s15047_s30 + $0xd90] sm:$0xf]  ;;  %v11094_v40 = vor.u32 %v13733_v34, %v11093_v33  ;;  %v10615_v32 = vld [vmem:[%s15047_s30 + $0x430] sm:$0xf0] }
 0x345   : > { %7658 = vmatmul.bf16.vlgmr.msrb.gmra.mxu3 %v15214_v27  ;;  %v13925_v35 = vld [vmem:[%s15047_s30 + $0xdec] sm:$0xf0]  ;;  %v13793_v33 = vld [vmem:[%s15047_s30 + $0x9d4] sm:$0xf] }
 0x346   : > { %7702 = vmatpush.bf16.msra.mxu3 %v13110_v45  ;;  %7677 = vmatpush.bf16.msra.mxu1 %v11478_v51  ;;  %v12629_v36 = vld [vmem:[%s15047_s30 + $0x1390] sm:$0xf]  ;;  %v11862_v41 = vor.u32 %v13925_v35, %v11861_v54  ;;  %v11383_v34 = vld [vmem:[%s15047_s30 + $0xa30] sm:$0xf0] }
 0x347   : > { %v14117_v37 = vld [vmem:[%s15047_s30 + $0x13ec] sm:$0xf0]  ;;  %v13985_v54 = vld [vmem:[%s15047_s30 + $0xfd4] sm:$0xf] }
 0x348   : > { %7690 = vmatpush.bf16.msra.mxu2 %v12246_v52  ;;  %7665 = vmatpush.bf16.msra.mxu0 %v10614_v1  ;;  %v10229_v42 = vld [vmem:[%s15047_s30 + $0xd0] sm:$0xf]  ;;  %v12630_v45 = vor.u32 %v14117_v37, %v12629_v36  ;;  %v13649_v1 = vld [vmem:[%s15047_s30 + $0x554] sm:$0xf] }
 0x349   : > { %v13517_v43 = vld [vmem:[%s15047_s30 + $0x12c] sm:$0xf0]  ;;  %v12151_v35 = vld [vmem:[%s15047_s30 + $0x1030] sm:$0xf0] }
 0x34a   : > { %7703 = vmatpush.bf16.msra.mxu3 %v13014_v58  ;;  %7678 = vmatpush.bf16.msra.mxu1 %v11382_v2  ;;  %v10997_v44 = vld [vmem:[%s15047_s30 + $0x6d0] sm:$0xf]  ;;  %v10230_v12 = vor.u32 %v13517_v43, %v10229_v42  ;;  %v10807_v2 = vld [vmem:[%s15047_s30 + $0x5b0] sm:$0xf0] }
 0x34b   : > { %v13709_v46 = vld [vmem:[%s15047_s30 + $0x72c] sm:$0xf0]  ;;  %v14177_v36 = vld [vmem:[%s15047_s30 + $0x15d4] sm:$0xf] }
 0x34c   : > { %7691 = vmatpush.bf16.msra.mxu2 %v12150_v4  ;;  %7666 = vmatpush.bf16.msra.mxu0 %v10518_v14  ;;  %v11765_v18 = vld [vmem:[%s15047_s30 + $0xcd0] sm:$0xf]  ;;  %v10998_v53 = vor.u32 %v13709_v46, %v10997_v44  ;;  %v13841_v4 = vld [vmem:[%s15047_s30 + $0xb54] sm:$0xf]  ;;  %v10810_v14 = vor.u32 %v13649_v1, %v10807_v2 }
 0x34d   : > { %v13901_v47 = vld [vmem:[%s15047_s30 + $0xd2c] sm:$0xf0]  ;;  %v12919_v37 = vld [vmem:[%s15047_s30 + $0x1630] sm:$0xf0] }
 0x34e   : > { %7704 = vmatpush.bf16.msra.mxu3 %v12918_v8  ;;  %7679 = vmatpush.bf16.msra.mxu1 %v11286_v15  ;;  %v12533_v48 = vld [vmem:[%s15047_s30 + $0x12d0] sm:$0xf]  ;;  %v11766_v55 = vor.u32 %v13901_v47, %v11765_v18  ;;  %v12343_v8 = vld [vmem:[%s15047_s30 + $0x11b0] sm:$0xf0]  ;;  %v11578_v15 = vor.u32 %v13841_v4, %v11575_v6 }
 0x34f   : > { %v14093_v50 = vld [vmem:[%s15047_s30 + $0x132c] sm:$0xf0]  ;;  %v13577_v42 = vld [vmem:[%s15047_s30 + $0x314] sm:$0xf] }
 0x350   : > { %7692 = vmatpush.bf16.msra.mxu2 %v12054_v16  ;;  %7667 = vmatpush.bf16.msra.mxu0 %v10422_v28  ;;  %v10133_v51 = vld [vmem:[%s15047_s30 + $0x10] sm:$0xf]  ;;  %v12534_v60 = vor.u32 %v14093_v50, %v12533_v48  ;;  %v12346_v16 = vor.u32 %v14033_v7, %v12343_v8  ;;  %v10714_v28 = vor.u32 %v13625_v62, %v10711_v17  ;;  %v10519_v43 = vld [vmem:[%s15047_s30 + $0x370] sm:$0xf0] }
 0x351   : > { %v13493_v52 = vld [vmem:[%s15047_s30 + $0x6c] sm:$0xf0]  ;;  %v13769_v44 = vld [vmem:[%s15047_s30 + $0x914] sm:$0xf] }
 0x352   : > { %7705 = vmatpush.bf16.msra.mxu3 %v12822_v20  ;;  %7680 = vmatpush.bf16.msra.mxu1 %v11190_v30  ;;  %v10901_v56 = vld [vmem:[%s15047_s30 + $0x610] sm:$0xf]  ;;  %v10134_v5 = vor.u32 %v13493_v52, %v10133_v51  ;;  %v13114_v20 = vor.u32 %v14225_v38, %v13111_v11  ;;  %v11482_v30 = vor.u32 %v13817_v19, %v11479_v21  ;;  %v11287_v46 = vld [vmem:[%s15047_s30 + $0x970] sm:$0xf0] }
 0x353   : > { %v13685_v58 = vld [vmem:[%s15047_s30 + $0x66c] sm:$0xf0]  ;;  %v13961_v18 = vld [vmem:[%s15047_s30 + $0xf14] sm:$0xf]  ;;  %v11290_v52 = vor.u32 %v13769_v44, %v11287_v46 }
 0x354   : > { %7693 = vmatpush.bf16.msra.mxu2 %v11958_v57  ;;  %7668 = vmatpush.bf16.msra.mxu0 %v10326_v39  ;;  %v11669_v59 = vld [vmem:[%s15047_s30 + $0xc10] sm:$0xf]  ;;  %v10902_v9 = vor.u32 %v13685_v58, %v10901_v56  ;;  %v12250_v57 = vor.u32 %v14009_v3, %v12247_v22  ;;  %v10618_v39 = vor.u32 %v13601_v31, %v10615_v32  ;;  %v12055_v47 = vld [vmem:[%s15047_s30 + $0xf70] sm:$0xf0] }
 0x355   : > { %v13877_v61 = vld [vmem:[%s15047_s30 + $0xc6c] sm:$0xf0]  ;;  %v14153_v48 = vld [vmem:[%s15047_s30 + $0x1514] sm:$0xf] }
 0x356   : > { %7706 = vmatpush.bf16.msra.mxu3 %v12726_v49  ;;  %7681 = vmatpush.bf16.msra.mxu1 %v11094_v40  ;;  %v12437_v63 = vld [vmem:[%s15047_s30 + $0x1210] sm:$0xf]  ;;  %v11670_v10 = vor.u32 %v13877_v61, %v11669_v59  ;;  %v13018_v49 = vor.u32 %v14201_v23, %v13015_v24  ;;  %v11386_v40 = vor.u32 %v13793_v33, %v11383_v34  ;;  %v12823_v50 = vld [vmem:[%s15047_s30 + $0x1570] sm:$0xf0] }
 0x357   : > { %v14069_v0 = vld [vmem:[%s15047_s30 + $0x126c] sm:$0xf0]  ;;  %v13553_v51 = vld [vmem:[%s15047_s30 + $0x254] sm:$0xf]  ;;  %v12826_v59 = vor.u32 %v14153_v48, %v12823_v50  ;;  %v13662_v48 = vld [vmem:[%s15047_s30 + $0x5b4] sm:$0xf0] }
 0x358   : > { %7694 = vmatpush.bf16.msra.mxu2 %v11862_v41  ;;  %7669 = vmatpush.bf16.msra.mxu0 %v10230_v12  ;;  %v12438_v13 = vor.u32 %v14069_v0, %v12437_v63  ;;  %v12154_v41 = vor.u32 %v13985_v54, %v12151_v35  ;;  %v10522_v12 = vor.u32 %v13577_v42, %v10519_v43  ;;  %v13745_v56 = vld [vmem:[%s15047_s30 + $0x854] sm:$0xf]  ;;  %v15501_v63 = vld [vmem:[%s15055_s23] sm:$0xff] }
 0x359   : > { %v11191_v58 = vld [vmem:[%s15047_s30 + $0x8b0] sm:$0xf0]  ;;  %v11581_v50 = vld [vmem:[%s15047_s30 + $0xb58] sm:$0xf] }
 0x35a   : > { %7707 = vmatpush.bf16.msra.mxu3 %v12630_v45  ;;  %7682 = vmatpush.bf16.msra.mxu1 %v10998_v53  ;;  %v12922_v45 = vor.u32 %v14177_v36, %v12919_v37  ;;  %v12058_v53 = vor.u32 %v13961_v18, %v12055_v47  ;;  %v11959_v61 = vld [vmem:[%s15047_s30 + $0xeb0] sm:$0xf0]  ;;  %v10813_v47 = vld [vmem:[%s15047_s30 + $0x558] sm:$0xf] }
 0x35b   : > { %v14129_v0 = vld [vmem:[%s15047_s30 + $0x1454] sm:$0xf] }
 0x35c   : > { %7695 = vmatpush.bf16.msra.mxu2 %v11766_v55  ;;  %7670 = vmatpush.bf16.msra.mxu0 %v10134_v5  ;;  %v10423_v55 = vld [vmem:[%s15047_s30 + $0x2b0] sm:$0xf0]  ;;  %v11194_v5 = vor.u32 %v13745_v56, %v11191_v58 }
 0x35d   : > { %v12727_v1 = vld [vmem:[%s15047_s30 + $0x14b0] sm:$0xf0]  ;;  %v10426_v2 = vor.u32 %v13553_v51, %v10423_v55  ;;  %v13854_v51 = vld [vmem:[%s15047_s30 + $0xbb4] sm:$0xf0] }
 0x35e   : > { %7708 = vmatpush.bf16.msra.mxu3 %v12534_v60  ;;  %7683 = vmatpush.bf16.msra.mxu1 %v10902_v9  ;;  %v13937_v60 = vld [vmem:[%s15047_s30 + $0xe54] sm:$0xf]  ;;  %v3553_v9 = vperm.slane %v15501_v63, 0 }
 0x35f   : > { %7671 = vmatmul.bf16.vlgmr.msra.gmra.mxu0 %v15212_v26  ;;  %v13529_v4 = vld [vmem:[%s15047_s30 + $0x194] sm:$0xf]  ;;  %v11962_v6 = vor.u32 %v13937_v60, %v11959_v61  ;;  %v13117_v60 = vld [vmem:[%s15047_s30 + $0x1758] sm:$0xf] }
 0x360   : > { %7696 = vmatpush.bf16.msra.mxu2 %v11670_v10  ;;  %7715 = vmatpush.bf16.msrb.mxu0 %v10810_v14  ;;  %v10327_v7 = vld [vmem:[%s15047_s30 + $0x1f0] sm:$0xf0]  ;;  %v12730_v10 = vor.u32 %v14129_v0, %v12727_v1  ;;  %v14238_v61 = vld [vmem:[%s15047_s30 + $0x17b4] sm:$0xf0] }
 0x361   : > { %7684 = vmatmul.bf16.vlgmr.msra.gmra.mxu1 %v15216_v29  ;;  %v13721_v8 = vld [vmem:[%s15047_s30 + $0x794] sm:$0xf] }
 0x362   : > { %7709 = vmatpush.bf16.msra.mxu3 %v12438_v13  ;;  %7728 = vmatpush.bf16.msrb.mxu1 %v11578_v15  ;;  %v11095_v38 = vld [vmem:[%s15047_s30 + $0x7f0] sm:$0xf0]  ;;  %v7464_v62 = vpop.f32.mrf.mxu0 }
 0x363   : > { %7697 = vmatmul.bf16.vlgmr.msra.gmra.mxu2 %v15210_v25  ;;  %v13913_v11 = vld [vmem:[%s15047_s30 + $0xd94] sm:$0xf]  ;;  %v11098_v17 = vor.u32 %v13721_v8, %v11095_v38  ;;  %v7465_v22 = vadd.f32 %v7464_v62, %v3553_v9  ;;  %v11485_v8 = vld [vmem:[%s15047_s30 + $0xa98] sm:$0xf]  ;;  %v13118_v9 = vor.u32 %v14238_v61, %v13117_v60 }
 0x364   : > { %7741 = vmatpush.bf16.msrb.mxu2 %v12346_v16  ;;  %7716 = vmatpush.bf16.msrb.mxu0 %v10714_v28  ;;  %v11863_v13 = vld [vmem:[%s15047_s30 + $0xdf0] sm:$0xf0]  ;;  %v10330_v16 = vor.u32 %v13529_v4, %v10327_v7  ;;  %v7477_v23 = vpop.f32.mrf.mxu1  ;;  %v11582_v4 = vor.u32 %v13854_v51, %v11581_v50  ;;  %v13638_v7 = vld [vmem:[%s15047_s30 + $0x4f4] sm:$0xf0] }
 0x365   : > { %7710 = vmatmul.bf16.vlgmr.msra.gmra.mxu3 %v15214_v27  ;;  %v14105_v14 = vld [vmem:[%s15047_s30 + $0x1394] sm:$0xf]  ;;  %v11866_v19 = vor.u32 %v13913_v11, %v11863_v13  ;;  %v7478_v33 = vadd.f32 %v7477_v23, %v7465_v22  ;;  %v12253_v38 = vld [vmem:[%s15047_s30 + $0x1098] sm:$0xf] }
 0x366   : > { %7754 = vmatpush.bf16.msrb.mxu3 %v13114_v20  ;;  %7729 = vmatpush.bf16.msrb.mxu1 %v11482_v30  ;;  %v12631_v15 = vld [vmem:[%s15047_s30 + $0x13f0] sm:$0xf0]  ;;  %v14022_v11 = vld [vmem:[%s15047_s30 + $0x10f4] sm:$0xf0] }
 0x367   : > { %v13505_v20 = vld [vmem:[%s15047_s30 + $0xd4] sm:$0xf]  ;;  %v12634_v24 = vor.u32 %v14105_v14, %v12631_v15  ;;  %v13021_v13 = vld [vmem:[%s15047_s30 + $0x1698] sm:$0xf] }
 0x368   : > { %7742 = vmatpush.bf16.msrb.mxu2 %v12250_v57  ;;  %7717 = vmatpush.bf16.msrb.mxu0 %v10618_v39  ;;  %v10231_v21 = vld [vmem:[%s15047_s30 + $0x130] sm:$0xf0]  ;;  %v7503_v18 = vpop.f32.mrf.mxu3  ;;  %v14214_v14 = vld [vmem:[%s15047_s30 + $0x16f4] sm:$0xf0] }
 0x369   : > { %v13697_v3 = vld [vmem:[%s15047_s30 + $0x6d4] sm:$0xf]  ;;  %v13022_v23 = vor.u32 %v14214_v14, %v13021_v13  ;;  %v11197_v50 = vld [vmem:[%s15047_s30 + $0x858] sm:$0xf] }
 0x36a   : > { %7755 = vmatpush.bf16.msrb.mxu3 %v13018_v49  ;;  %7730 = vmatpush.bf16.msrb.mxu1 %v11386_v40  ;;  %v10999_v28 = vld [vmem:[%s15047_s30 + $0x730] sm:$0xf0]  ;;  %v10234_v49 = vor.u32 %v13505_v20, %v10231_v21  ;;  %v7466_v56 = vpop.f32.mrf.mxu0  ;;  %v10621_v20 = vld [vmem:[%s15047_s30 + $0x3d8] sm:$0xf] }
 0x36b   : > { %v13889_v30 = vld [vmem:[%s15047_s30 + $0xcd4] sm:$0xf]  ;;  %v11002_v35 = vor.u32 %v13697_v3, %v10999_v28  ;;  %v13614_v21 = vld [vmem:[%s15047_s30 + $0x434] sm:$0xf0] }
 0x36c   : > { %7743 = vmatpush.bf16.msrb.mxu2 %v12154_v41  ;;  %7718 = vmatpush.bf16.msrb.mxu0 %v10522_v12  ;;  %v11767_v57 = vld [vmem:[%s15047_s30 + $0xd30] sm:$0xf0]  ;;  %v7490_v41 = vpop.f32.mrf.mxu2  ;;  %v7479_v0 = vpop.f32.mrf.mxu1  ;;  %v11389_v3 = vld [vmem:[%s15047_s30 + $0x9d8] sm:$0xf] }
 0x36d   : > { %v14081_v31 = vld [vmem:[%s15047_s30 + $0x12d4] sm:$0xf]  ;;  %v11770_v36 = vor.u32 %v13889_v30, %v11767_v57  ;;  %v7491_v46 = vadd.f32 %v7490_v41, %v7478_v33  ;;  %v12157_v28 = vld [vmem:[%s15047_s30 + $0xfd8] sm:$0xf] }
 0x36e   : > { %7756 = vmatpush.bf16.msrb.mxu3 %v12922_v45  ;;  %7731 = vmatpush.bf16.msrb.mxu1 %v11290_v52  ;;  %v12535_v32 = vld [vmem:[%s15047_s30 + $0x1330] sm:$0xf0]  ;;  %v12349_v52 = vld [vmem:[%s15047_s30 + $0x1158] sm:$0xf] }
 0x36f   : > { %v13481_v34 = vld [vmem:[%s15047_s30 + $0x14] sm:$0xf]  ;;  %v12538_v42 = vor.u32 %v14081_v31, %v12535_v32  ;;  %v7504_v55 = vadd.f32 %v7503_v18, %v7491_v46  ;;  %v13998_v30 = vld [vmem:[%s15047_s30 + $0x1034] sm:$0xf0]  ;;  %v10622_v32 = vor.u32 %v13614_v21, %v10621_v20 }
 0x370   : > { %7744 = vmatpush.bf16.msrb.mxu2 %v12058_v53  ;;  %7719 = vmatpush.bf16.msrb.mxu0 %v10426_v2  ;;  %v10135_v54 = vld [vmem:[%s15047_s30 + $0x70] sm:$0xf0]  ;;  %v14046_v53 = vld [vmem:[%s15047_s30 + $0x11b4] sm:$0xf0]  ;;  %v10814_v2 = vor.u32 %v13662_v48, %v10813_v47  ;;  %v7505_v62 = vpop.f32.mrf.mxu3 }
 0x371   : > { %v13673_v37 = vld [vmem:[%s15047_s30 + $0x614] sm:$0xf]  ;;  %v10138_v12 = vor.u32 %v13481_v34, %v10135_v54  ;;  %14396 = vtanh.f32 %v7504_v55  ;;  %v12925_v57 = vld [vmem:[%s15047_s30 + $0x15d8] sm:$0xf]  ;;  %v12158_v34 = vor.u32 %v13998_v30, %v12157_v28 }
 0x372   : > { %7757 = vmatpush.bf16.msrb.mxu3 %v12826_v59  ;;  %7732 = vmatpush.bf16.msrb.mxu1 %v11194_v5  ;;  %v10903_v39 = vld [vmem:[%s15047_s30 + $0x670] sm:$0xf0]  ;;  %v12350_v5 = vor.u32 %v14046_v53, %v12349_v52  ;;  %v14190_v31 = vld [vmem:[%s15047_s30 + $0x1634] sm:$0xf0] }
 0x373   : > { %v13865_v40 = vld [vmem:[%s15047_s30 + $0xc14] sm:$0xf]  ;;  %v10906_v58 = vor.u32 %v13673_v37, %v10903_v39  ;;  %v10525_v33 = vld [vmem:[%s15047_s30 + $0x318] sm:$0xf]  ;;  %v12926_v37 = vor.u32 %v14190_v31, %v12925_v57 }
 0x374   : > { %7745 = vmatpush.bf16.msrb.mxu2 %v11962_v6  ;;  %7720 = vmatpush.bf16.msrb.mxu0 %v10330_v16  ;;  %v11671_v43 = vld [vmem:[%s15047_s30 + $0xc70] sm:$0xf0]  ;;  %v10717_v6 = vld [vmem:[%s15047_s30 + $0x498] sm:$0xf]  ;;  %v7492_v15 = vpop.f32.mrf.mxu2 }
 0x375   : > { %v14057_v44 = vld [vmem:[%s15047_s30 + $0x1214] sm:$0xf]  ;;  %v11674_v59 = vor.u32 %v13865_v40, %v11671_v43  ;;  %v10718_v16 = vor.u32 %v13638_v7, %v10717_v6  ;;  %v13590_v54 = vld [vmem:[%s15047_s30 + $0x374] sm:$0xf0] }
 0x376   : > { %7758 = vmatpush.bf16.msrb.mxu3 %v12730_v10  ;;  %7733 = vmatpush.bf16.msrb.mxu1 %v11098_v17  ;;  %v12439_v45 = vld [vmem:[%s15047_s30 + $0x1270] sm:$0xf0]  ;;  %v13830_v10 = vld [vmem:[%s15047_s30 + $0xaf4] sm:$0xf0] }
 0x377   : > { %v12442_v1 = vor.u32 %v14057_v44, %v12439_v45  ;;  %v11486_v17 = vor.u32 %v13830_v10, %v11485_v8  ;;  %v14397_v22 = vpop.eup %14396  ;;  %v13782_v39 = vld [vmem:[%s15047_s30 + $0x974] sm:$0xf0]  ;;  %v10526_v44 = vor.u32 %v13590_v54, %v10525_v33 }
 0x378   : > { %7746 = vmatpush.bf16.msrb.mxu2 %v11866_v19  ;;  %7721 = vmatpush.bf16.msrb.mxu0 %v10234_v49  ;;  %v12254_v19 = vor.u32 %v14022_v11, %v12253_v38  ;;  %8727 = vst [vmem:[%s15057_s7] sm:$0xff] %v14397_v22  ;;  %v12061_v40 = vld [vmem:[%s15047_s30 + $0xf18] sm:$0xf] }
 0x379   : > { %v13974_v41 = vld [vmem:[%s15047_s30 + $0xf74] sm:$0xf0] }
 0x37a   : > { %7759 = vmatpush.bf16.msrb.mxu3 %v12634_v24  ;;  %7734 = vmatpush.bf16.msrb.mxu1 %v11002_v35  ;;  %v13806_v24 = vld [vmem:[%s15047_s30 + $0xa34] sm:$0xf0]  ;;  %v12062_v18 = vor.u32 %v13974_v41, %v12061_v40 }
 0x37b   : > { %v11390_v49 = vor.u32 %v13806_v24, %v11389_v3  ;;  %v11293_v35 = vld [vmem:[%s15047_s30 + $0x918] sm:$0xf] }
 0x37c   : > { %7747 = vmatpush.bf16.msrb.mxu2 %v11770_v36  ;;  %7722 = vmatpush.bf16.msrb.mxu0 %v10138_v12  ;;  %v3554_v36 = vperm.slane %v15501_v63, 1  ;;  %v14166_v43 = vld [vmem:[%s15047_s30 + $0x1574] sm:$0xf0]  ;;  %v7516_v45 = vpop.f32.mrf.mxu0  ;;  %v11294_v46 = vor.u32 %v13782_v39, %v11293_v35 }
 0x37d   : > { %v10429_v47 = vld [vmem:[%s15047_s30 + $0x258] sm:$0xf] }
 0x37e   : > { %7760 = vmatpush.bf16.msrb.mxu3 %v12538_v42  ;;  %7735 = vmatpush.bf16.msrb.mxu1 %v10906_v58  ;;  %v12829_v42 = vld [vmem:[%s15047_s30 + $0x1518] sm:$0xf]  ;;  %v7517_v12 = vadd.f32 %v7516_v45, %v3554_v36  ;;  %v7529_v51 = vpop.f32.mrf.mxu1  ;;  %v13650_v45 = vld [vmem:[%s15047_s30 + $0x55c] sm:$0xf] }
 0x37f   : > { %7723 = vmatmul.bf16.vlgmr.msrb.gmra.mxu0 %v15212_v26  ;;  %v13566_v48 = vld [vmem:[%s15047_s30 + $0x2b4] sm:$0xf0]  ;;  %v12830_v52 = vor.u32 %v14166_v43, %v12829_v42 }
 0x380   : > { %7748 = vmatpush.bf16.msrb.mxu2 %v11674_v59  ;;  %7767 = vmatpush.bf16.msra.mxu0 %v10814_v2  ;;  %v13758_v53 = vld [vmem:[%s15047_s30 + $0x8b4] sm:$0xf0]  ;;  %v7530_v60 = vadd.f32 %v7529_v51, %v7517_v12  ;;  %v10430_v61 = vor.u32 %v13566_v48, %v10429_v47  ;;  %v14034_v12 = vld [vmem:[%s15047_s30 + $0x115c] sm:$0xf] }
 0x381   : > { %7736 = vmatmul.bf16.vlgmr.msrb.gmra.mxu1 %v15216_v29  ;;  %v11965_v55 = vld [vmem:[%s15047_s30 + $0xe58] sm:$0xf]  ;;  %v11198_v0 = vor.u32 %v13758_v53, %v11197_v50  ;;  %v11583_v50 = vld [vmem:[%s15047_s30 + $0xbb8] sm:$0xf0] }
 0x382   : > { %7761 = vmatpush.bf16.msrb.mxu3 %v12442_v1  ;;  %7780 = vmatpush.bf16.msra.mxu1 %v11582_v4  ;;  %v13950_v56 = vld [vmem:[%s15047_s30 + $0xeb4] sm:$0xf0]  ;;  %v12351_v51 = vld [vmem:[%s15047_s30 + $0x11b8] sm:$0xf0] }
 0x383   : > { %7749 = vmatmul.bf16.vlgmr.msrb.gmra.mxu2 %v15210_v25  ;;  %v12733_v58 = vld [vmem:[%s15047_s30 + $0x1458] sm:$0xf]  ;;  %v11966_v1 = vor.u32 %v13950_v56, %v11965_v55  ;;  %v14226_v55 = vld [vmem:[%s15047_s30 + $0x175c] sm:$0xf] }
 0x384   : > { %7793 = vmatpush.bf16.msra.mxu2 %v12350_v5  ;;  %7768 = vmatpush.bf16.msra.mxu0 %v10718_v16  ;;  %v14142_v59 = vld [vmem:[%s15047_s30 + $0x14b4] sm:$0xf0]  ;;  %v7518_v62 = vpop.f32.mrf.mxu0  ;;  %v13119_v56 = vld [vmem:[%s15047_s30 + $0x17b8] sm:$0xf0] }
 0x385   : > { %7762 = vmatmul.bf16.vlgmr.msrb.gmra.mxu3 %v15214_v27  ;;  %v10333_v2 = vld [vmem:[%s15047_s30 + $0x198] sm:$0xf]  ;;  %v12734_v7 = vor.u32 %v14142_v59, %v12733_v58  ;;  %v11391_v62 = vld [vmem:[%s15047_s30 + $0xa38] sm:$0xf0] }
 0x386   : > { %7806 = vmatpush.bf16.msra.mxu3 %v13118_v9  ;;  %7781 = vmatpush.bf16.msra.mxu1 %v11486_v17  ;;  %v13542_v4 = vld [vmem:[%s15047_s30 + $0x1f4] sm:$0xf0]  ;;  %v7542_v6 = vpop.f32.mrf.mxu2  ;;  %v7531_v22 = vpop.f32.mrf.mxu1 }
 0x387   : > { %v11101_v5 = vld [vmem:[%s15047_s30 + $0x798] sm:$0xf]  ;;  %v7543_v38 = vadd.f32 %v7542_v6, %v7530_v60  ;;  %v10334_v15 = vor.u32 %v13542_v4, %v10333_v2  ;;  %v13818_v2 = vld [vmem:[%s15047_s30 + $0xa9c] sm:$0xf]  ;;  %v13122_v4 = vor.u32 %v14226_v55, %v13119_v56 }
 0x388   : > { %7794 = vmatpush.bf16.msra.mxu2 %v12254_v19  ;;  %7769 = vmatpush.bf16.msra.mxu0 %v10622_v32  ;;  %v13734_v8 = vld [vmem:[%s15047_s30 + $0x7f4] sm:$0xf0]  ;;  %v7555_v11 = vpop.f32.mrf.mxu3  ;;  %v14010_v6 = vld [vmem:[%s15047_s30 + $0x109c] sm:$0xf] }
 0x389   : > { %v11869_v9 = vld [vmem:[%s15047_s30 + $0xd98] sm:$0xf]  ;;  %v7556_v16 = vadd.f32 %v7555_v11, %v7543_v38  ;;  %v11102_v17 = vor.u32 %v13734_v8, %v11101_v5  ;;  %v11487_v5 = vld [vmem:[%s15047_s30 + $0xaf8] sm:$0xf0] }
 0x38a   : > { %7807 = vmatpush.bf16.msra.mxu3 %v13022_v23  ;;  %7782 = vmatpush.bf16.msra.mxu1 %v11390_v49  ;;  %v13926_v10 = vld [vmem:[%s15047_s30 + $0xdf4] sm:$0xf0]  ;;  %v14202_v8 = vld [vmem:[%s15047_s30 + $0x169c] sm:$0xf]  ;;  %v11490_v38 = vor.u32 %v13818_v2, %v11487_v5 }
 0x38b   : > { %v12637_v13 = vld [vmem:[%s15047_s30 + $0x1398] sm:$0xf]  ;;  %v11870_v19 = vor.u32 %v13926_v10, %v11869_v9  ;;  %14398 = vtanh.f32 %v7556_v16  ;;  %v13023_v9 = vld [vmem:[%s15047_s30 + $0x16f8] sm:$0xf0] }
 0x38c   : > { %7795 = vmatpush.bf16.msra.mxu2 %v12158_v34  ;;  %7770 = vmatpush.bf16.msra.mxu0 %v10526_v44  ;;  %v14118_v14 = vld [vmem:[%s15047_s30 + $0x13f4] sm:$0xf0]  ;;  %v13026_v16 = vor.u32 %v14202_v8, %v13023_v9  ;;  %v13578_v22 = vld [vmem:[%s15047_s30 + $0x31c] sm:$0xf] }
 0x38d   : > { %v10237_v20 = vld [vmem:[%s15047_s30 + $0xd8] sm:$0xf]  ;;  %v12638_v23 = vor.u32 %v14118_v14, %v12637_v13  ;;  %v13602_v13 = vld [vmem:[%s15047_s30 + $0x3dc] sm:$0xf] }
 0x38e   : > { %7808 = vmatpush.bf16.msra.mxu3 %v12926_v37  ;;  %7783 = vmatpush.bf16.msra.mxu1 %v11294_v46  ;;  %v13518_v21 = vld [vmem:[%s15047_s30 + $0x134] sm:$0xf0]  ;;  %v7544_v39 = vpop.f32.mrf.mxu2  ;;  %v10815_v46 = vld [vmem:[%s15047_s30 + $0x5b8] sm:$0xf0] }
 0x38f   : > { %v11005_v3 = vld [vmem:[%s15047_s30 + $0x6d8] sm:$0xf]  ;;  %v10238_v32 = vor.u32 %v13518_v21, %v10237_v20  ;;  %v10818_v59 = vor.u32 %v13650_v45, %v10815_v46  ;;  %v10623_v14 = vld [vmem:[%s15047_s30 + $0x438] sm:$0xf0] }
 0x390   : > { %7796 = vmatpush.bf16.msra.mxu2 %v12062_v18  ;;  %7771 = vmatpush.bf16.msra.mxu0 %v10430_v61  ;;  %v13710_v24 = vld [vmem:[%s15047_s30 + $0x734] sm:$0xf0]  ;;  %v7557_v44 = vpop.f32.mrf.mxu3  ;;  %v13842_v18 = vld [vmem:[%s15047_s30 + $0xb5c] sm:$0xf]  ;;  %v12354_v61 = vor.u32 %v14034_v12, %v12351_v51 }
 0x391   : > { %v11773_v28 = vld [vmem:[%s15047_s30 + $0xcd8] sm:$0xf]  ;;  %v11006_v34 = vor.u32 %v13710_v24, %v11005_v3  ;;  %v14399_v47 = vpop.eup %14398  ;;  %v11586_v60 = vor.u32 %v13842_v18, %v11583_v50  ;;  %v14178_v20 = vld [vmem:[%s15047_s30 + $0x15dc] sm:$0xf]  ;;  %v10626_v3 = vor.u32 %v13602_v13, %v10623_v14 }
 0x392   : > { %7809 = vmatpush.bf16.msra.mxu3 %v12830_v52  ;;  %7784 = vmatpush.bf16.msra.mxu1 %v11198_v0  ;;  %v13902_v30 = vld [vmem:[%s15047_s30 + $0xd34] sm:$0xf0]  ;;  %8728 = vst [vmem:[%s15057_s7 + $0x8] sm:$0xff] %v14399_v47  ;;  %v13626_v0 = vld [vmem:[%s15047_s30 + $0x49c] sm:$0xf] }
 0x393   : > { %v12541_v57 = vld [vmem:[%s15047_s30 + $0x12d8] sm:$0xf]  ;;  %v11774_v54 = vor.u32 %v13902_v30, %v11773_v28  ;;  %v12927_v21 = vld [vmem:[%s15047_s30 + $0x1638] sm:$0xf0] }
 0x394   : > { %7797 = vmatpush.bf16.msra.mxu2 %v11966_v1  ;;  %v14094_v31 = vld [vmem:[%s15047_s30 + $0x1334] sm:$0xf0]  ;;  %7772 = vmatpush.bf16.msra.mxu0 %v10334_v15  ;;  %v10719_v1 = vld [vmem:[%s15047_s30 + $0x4f8] sm:$0xf0] }
 0x395   : > { %v10141_v33 = vld [vmem:[%s15047_s30 + $0x18] sm:$0xf]  ;;  %v12542_v40 = vor.u32 %v14094_v31, %v12541_v57  ;;  %v10722_v10 = vor.u32 %v13626_v0, %v10719_v1  ;;  %v13794_v15 = vld [vmem:[%s15047_s30 + $0x9dc] sm:$0xf]  ;;  %v3555_v57 = vperm.slane %v15501_v63, 2  ;;  %v12930_v31 = vor.u32 %v14178_v20, %v12927_v21 }
 0x396   : > { %7810 = vmatpush.bf16.msra.mxu3 %v12734_v7  ;;  %v13494_v49 = vld [vmem:[%s15047_s30 + $0x74] sm:$0xf0]  ;;  %7785 = vmatpush.bf16.msra.mxu1 %v11102_v17  ;;  %v12255_v7 = vld [vmem:[%s15047_s30 + $0x10f8] sm:$0xf0] }
 0x397   : > { %v10909_v35 = vld [vmem:[%s15047_s30 + $0x618] sm:$0xf]  ;;  %v10142_v48 = vor.u32 %v13494_v49, %v10141_v33  ;;  %v12258_v11 = vor.u32 %v14010_v6, %v12255_v7  ;;  %v13986_v17 = vld [vmem:[%s15047_s30 + $0xfdc] sm:$0xf] }
 0x398   : > { %7798 = vmatpush.bf16.msra.mxu2 %v11870_v19  ;;  %v13686_v36 = vld [vmem:[%s15047_s30 + $0x674] sm:$0xf0]  ;;  %7773 = vmatpush.bf16.msra.mxu0 %v10238_v32  ;;  %v12159_v19 = vld [vmem:[%s15047_s30 + $0x1038] sm:$0xf0] }
 0x399   : > { %v11677_v37 = vld [vmem:[%s15047_s30 + $0xc18] sm:$0xf]  ;;  %v10910_v52 = vor.u32 %v13686_v36, %v10909_v35  ;;  %v12162_v24 = vor.u32 %v13986_v17, %v12159_v19  ;;  %v10527_v28 = vld [vmem:[%s15047_s30 + $0x378] sm:$0xf0] }
 0x39a   : > { %7811 = vmatpush.bf16.msra.mxu3 %v12638_v23  ;;  %v13878_v41 = vld [vmem:[%s15047_s30 + $0xc74] sm:$0xf0]  ;;  %7786 = vmatpush.bf16.msra.mxu1 %v11006_v34  ;;  %v11394_v23 = vor.u32 %v13794_v15, %v11391_v62  ;;  %v13770_v30 = vld [vmem:[%s15047_s30 + $0x91c] sm:$0xf]  ;;  %v10530_v35 = vor.u32 %v13578_v22, %v10527_v28 }
 0x39b   : > { %v12445_v42 = vld [vmem:[%s15047_s30 + $0x1218] sm:$0xf]  ;;  %v11678_v53 = vor.u32 %v13878_v41, %v11677_v37  ;;  %v11295_v32 = vld [vmem:[%s15047_s30 + $0x978] sm:$0xf0] }
 0x39c   : > { %v14070_v43 = vld [vmem:[%s15047_s30 + $0x1274] sm:$0xf0]  ;;  %7799 = vmatpush.bf16.msra.mxu2 %v11774_v54  ;;  %7774 = vmatpush.bf16.msra.mxu0 %v10142_v48  ;;  %v13962_v33 = vld [vmem:[%s15047_s30 + $0xf1c] sm:$0xf]  ;;  %v7568_v36 = vpop.f32.mrf.mxu0  ;;  %v11298_v37 = vor.u32 %v13770_v30, %v11295_v32 }
 0x39d   : > { %v12446_v58 = vor.u32 %v14070_v43, %v12445_v42  ;;  %v12063_v49 = vld [vmem:[%s15047_s30 + $0xf78] sm:$0xf0]  ;;  %v7569_v43 = vadd.f32 %v7568_v36, %v3555_v57  ;;  %v10821_v36 = vld [vmem:[%s15047_s30 + $0x560] sm:$0xf] }
 0x39e   : > { %7812 = vmatpush.bf16.msra.mxu3 %v12542_v40  ;;  %7787 = vmatpush.bf16.msra.mxu1 %v10910_v52  ;;  %v14154_v34 = vld [vmem:[%s15047_s30 + $0x151c] sm:$0xf]  ;;  %v12066_v39 = vor.u32 %v13962_v33, %v12063_v49  ;;  %v7581_v44 = vpop.f32.mrf.mxu1 }
 0x39f   : > { %7775 = vmatmul.bf16.vlgmr.msra.gmra.mxu0 %v15212_v26  ;;  %v12831_v54 = vld [vmem:[%s15047_s30 + $0x1578] sm:$0xf0]  ;;  %v7582_v12 = vadd.f32 %v7581_v44, %v7569_v43  ;;  %v12357_v43 = vld [vmem:[%s15047_s30 + $0x1160] sm:$0xf] }
 0x3a0   : > { %7800 = vmatpush.bf16.msra.mxu2 %v11678_v53  ;;  %7819 = vmatpush.bf16.msrb.mxu0 %v10818_v59  ;;  %v13554_v40 = vld [vmem:[%s15047_s30 + $0x25c] sm:$0xf]  ;;  %v12834_v45 = vor.u32 %v14154_v34, %v12831_v54  ;;  %v14047_v44 = vld [vmem:[%s15047_s30 + $0x11bc] sm:$0xf0] }
 0x3a1   : > { %7788 = vmatmul.bf16.vlgmr.msra.gmra.mxu1 %v15216_v29  ;;  %v10431_v41 = vld [vmem:[%s15047_s30 + $0x2b8] sm:$0xf0] }
 0x3a2   : > { %7813 = vmatpush.bf16.msra.mxu3 %v12446_v58  ;;  %7832 = vmatpush.bf16.msrb.mxu1 %v11586_v60  ;;  %v13746_v42 = vld [vmem:[%s15047_s30 + $0x85c] sm:$0xf]  ;;  %v10434_v51 = vor.u32 %v13554_v40, %v10431_v41 }
 0x3a3   : > { %7801 = vmatmul.bf16.vlgmr.msra.gmra.mxu2 %v15210_v25  ;;  %v11199_v46 = vld [vmem:[%s15047_s30 + $0x8b8] sm:$0xf0] }
 0x3a4   : > { %7845 = vmatpush.bf16.msrb.mxu2 %v12354_v61  ;;  %7820 = vmatpush.bf16.msrb.mxu0 %v10722_v10  ;;  %v13938_v18 = vld [vmem:[%s15047_s30 + $0xe5c] sm:$0xf]  ;;  %v11202_v52 = vor.u32 %v13746_v42, %v11199_v46  ;;  %v7570_v9 = vpop.f32.mrf.mxu0  ;;  %v13855_v42 = vld [vmem:[%s15047_s30 + $0xbbc] sm:$0xf0] }
 0x3a5   : > { %7814 = vmatmul.bf16.vlgmr.msra.gmra.mxu3 %v15214_v27  ;;  %v11967_v47 = vld [vmem:[%s15047_s30 + $0xeb8] sm:$0xf0]  ;;  %v13807_v9 = vld [vmem:[%s15047_s30 + $0xa3c] sm:$0xf0] }
 0x3a6   : > { %7858 = vmatpush.bf16.msrb.mxu3 %v13122_v4  ;;  %7833 = vmatpush.bf16.msrb.mxu1 %v11490_v38  ;;  %v14130_v48 = vld [vmem:[%s15047_s30 + $0x145c] sm:$0xf]  ;;  %v11970_v53 = vor.u32 %v13938_v18, %v11967_v47  ;;  %v7594_v59 = vpop.f32.mrf.mxu2  ;;  %v7583_v15 = vpop.f32.mrf.mxu1  ;;  %v13125_v18 = vld [vmem:[%s15047_s30 + $0x1760] sm:$0xf] }
 0x3a7   : > { %v12735_v50 = vld [vmem:[%s15047_s30 + $0x14b8] sm:$0xf0]  ;;  %v7595_v2 = vadd.f32 %v7594_v59, %v7582_v12  ;;  %v14239_v47 = vld [vmem:[%s15047_s30 + $0x17bc] sm:$0xf0] }
 0x3a8   : > { %7846 = vmatpush.bf16.msrb.mxu2 %v12258_v11  ;;  %7821 = vmatpush.bf16.msrb.mxu0 %v10626_v3  ;;  %v13530_v55 = vld [vmem:[%s15047_s30 + $0x19c] sm:$0xf]  ;;  %v12738_v60 = vor.u32 %v14130_v48, %v12735_v50  ;;  %v7607_v4 = vpop.f32.mrf.mxu3  ;;  %v12261_v59 = vld [vmem:[%s15047_s30 + $0x10a0] sm:$0xf] }
 0x3a9   : > { %v10335_v56 = vld [vmem:[%s15047_s30 + $0x1f8] sm:$0xf0]  ;;  %v7608_v8 = vadd.f32 %v7607_v4, %v7595_v2  ;;  %v10533_v15 = vld [vmem:[%s15047_s30 + $0x320] sm:$0xf] }
 0x3aa   : > { %7859 = vmatpush.bf16.msrb.mxu3 %v13026_v16  ;;  %7834 = vmatpush.bf16.msrb.mxu1 %v11394_v23  ;;  %v13722_v58 = vld [vmem:[%s15047_s30 + $0x79c] sm:$0xf]  ;;  %v10338_v7 = vor.u32 %v13530_v55, %v10335_v56  ;;  %v11493_v55 = vld [vmem:[%s15047_s30 + $0xaa0] sm:$0xf]  ;;  %v13126_v56 = vor.u32 %v14239_v47, %v13125_v18 }
 0x3ab   : > { %v11103_v61 = vld [vmem:[%s15047_s30 + $0x7f8] sm:$0xf0]  ;;  %14400 = vtanh.f32 %v7608_v8  ;;  %v13543_v18 = vld [vmem:[%s15047_s30 + $0x1fc] sm:$0xf0] }
 0x3ac   : > { %7847 = vmatpush.bf16.msrb.mxu2 %v12162_v24  ;;  %7822 = vmatpush.bf16.msrb.mxu0 %v10530_v35  ;;  %v13914_v0 = vld [vmem:[%s15047_s30 + $0xd9c] sm:$0xf]  ;;  %v11106_v10 = vor.u32 %v13722_v58, %v11103_v61  ;;  %v13831_v58 = vld [vmem:[%s15047_s30 + $0xafc] sm:$0xf0] }
 0x3ad   : > { %v11871_v1 = vld [vmem:[%s15047_s30 + $0xdf8] sm:$0xf0]  ;;  %v13029_v61 = vld [vmem:[%s15047_s30 + $0x16a0] sm:$0xf]  ;;  %v11494_v2 = vor.u32 %v13831_v58, %v11493_v55 }
 0x3ae   : > { %7860 = vmatpush.bf16.msrb.mxu3 %v12930_v31  ;;  %7835 = vmatpush.bf16.msrb.mxu1 %v11298_v37  ;;  %v14106_v5 = vld [vmem:[%s15047_s30 + $0x139c] sm:$0xf]  ;;  %v11874_v38 = vor.u32 %v13914_v0, %v11871_v1  ;;  %v7596_v32 = vpop.f32.mrf.mxu2  ;;  %v13663_v37 = vld [vmem:[%s15047_s30 + $0x5bc] sm:$0xf0] }
 0x3af   : > { %v12639_v6 = vld [vmem:[%s15047_s30 + $0x13f8] sm:$0xf0]  ;;  %v10822_v50 = vor.u32 %v13663_v37, %v10821_v36  ;;  %v14215_v0 = vld [vmem:[%s15047_s30 + $0x16fc] sm:$0xf0] }
 0x3b0   : > { %7848 = vmatpush.bf16.msrb.mxu2 %v12066_v39  ;;  %7823 = vmatpush.bf16.msrb.mxu0 %v10434_v51  ;;  %v13506_v11 = vld [vmem:[%s15047_s30 + $0xdc] sm:$0xf]  ;;  %v12642_v16 = vor.u32 %v14106_v5, %v12639_v6  ;;  %v7609_v35 = vpop.f32.mrf.mxu3  ;;  %v11589_v39 = vld [vmem:[%s15047_s30 + $0xb60] sm:$0xf]  ;;  %v12358_v51 = vor.u32 %v14047_v44, %v12357_v43  ;;  %v13030_v8 = vor.u32 %v14215_v0, %v13029_v61 }
 0x3b1   : > { %v10239_v13 = vld [vmem:[%s15047_s30 + $0x138] sm:$0xf0]  ;;  %v14401_v40 = vpop.eup %14400  ;;  %v11590_v12 = vor.u32 %v13855_v42, %v11589_v39  ;;  %v10629_v5 = vld [vmem:[%s15047_s30 + $0x3e0] sm:$0xf] }
 0x3b2   : > { %7861 = vmatpush.bf16.msrb.mxu3 %v12834_v45  ;;  %7836 = vmatpush.bf16.msrb.mxu1 %v11202_v52  ;;  %v13698_v14 = vld [vmem:[%s15047_s30 + $0x6dc] sm:$0xf]  ;;  %v10242_v3 = vor.u32 %v13506_v11, %v10239_v13  ;;  %8729 = vst [vmem:[%s15057_s7 + $0x10] sm:$0xff] %v14401_v40  ;;  %v10725_v52 = vld [vmem:[%s15047_s30 + $0x4a0] sm:$0xf] }
 0x3b3   : > { %v11007_v62 = vld [vmem:[%s15047_s30 + $0x738] sm:$0xf0]  ;;  %v13615_v6 = vld [vmem:[%s15047_s30 + $0x43c] sm:$0xf0] }
 0x3b4   : > { %7849 = vmatpush.bf16.msrb.mxu2 %v11970_v53  ;;  %v13890_v17 = vld [vmem:[%s15047_s30 + $0xcdc] sm:$0xf]  ;;  %7824 = vmatpush.bf16.msrb.mxu0 %v10338_v7  ;;  %v11010_v24 = vor.u32 %v13698_v14, %v11007_v62  ;;  %v13639_v53 = vld [vmem:[%s15047_s30 + $0x4fc] sm:$0xf0]  ;;  %v10630_v14 = vor.u32 %v13615_v6, %v10629_v5 }
 0x3b5   : > { %v11775_v19 = vld [vmem:[%s15047_s30 + $0xd38] sm:$0xf0]  ;;  %v10726_v1 = vor.u32 %v13639_v53, %v10725_v52  ;;  %v11397_v7 = vld [vmem:[%s15047_s30 + $0x9e0] sm:$0xf] }
 0x3b6   : > { %7862 = vmatpush.bf16.msrb.mxu3 %v12738_v60  ;;  %v14082_v20 = vld [vmem:[%s15047_s30 + $0x12dc] sm:$0xf]  ;;  %7837 = vmatpush.bf16.msrb.mxu1 %v11106_v10  ;;  %v11778_v28 = vor.u32 %v13890_v17, %v11775_v19  ;;  %v14023_v60 = vld [vmem:[%s15047_s30 + $0x10fc] sm:$0xf0] }
 0x3b7   : > { %v12543_v21 = vld [vmem:[%s15047_s30 + $0x1338] sm:$0xf0]  ;;  %v12262_v4 = vor.u32 %v14023_v60, %v12261_v59  ;;  %v12165_v10 = vld [vmem:[%s15047_s30 + $0xfe0] sm:$0xf] }
 0x3b8   : > { %v13482_v22 = vld [vmem:[%s15047_s30 + $0x1c] sm:$0xf]  ;;  %7850 = vmatpush.bf16.msrb.mxu2 %v11874_v38  ;;  %v12546_v33 = vor.u32 %v14082_v20, %v12543_v21  ;;  %7825 = vmatpush.bf16.msrb.mxu0 %v10242_v3  ;;  %v13999_v38 = vld [vmem:[%s15047_s30 + $0x103c] sm:$0xf0]  ;;  %v3556_v20 = vperm.slane %v15501_v63, 3 }
 0x3b9   : > { %v10143_v23 = vld [vmem:[%s15047_s30 + $0x78] sm:$0xf0]  ;;  %v12933_v11 = vld [vmem:[%s15047_s30 + $0x15e0] sm:$0xf]  ;;  %v12166_v62 = vor.u32 %v13999_v38, %v12165_v10 }
 0x3ba   : > { %v13674_v30 = vld [vmem:[%s15047_s30 + $0x61c] sm:$0xf]  ;;  %7863 = vmatpush.bf16.msrb.mxu3 %v12642_v16  ;;  %v10146_v41 = vor.u32 %v13482_v22, %v10143_v23  ;;  %7838 = vmatpush.bf16.msrb.mxu1 %v11010_v24  ;;  %v14191_v13 = vld [vmem:[%s15047_s30 + $0x163c] sm:$0xf0]  ;;  %v11398_v16 = vor.u32 %v13807_v9, %v11397_v7 }
 0x3bb   : > { %v10911_v57 = vld [vmem:[%s15047_s30 + $0x678] sm:$0xf0]  ;;  %v13591_v17 = vld [vmem:[%s15047_s30 + $0x37c] sm:$0xf0]  ;;  %v12934_v21 = vor.u32 %v14191_v13, %v12933_v11 }
 0x3bc   : > { %v13866_v31 = vld [vmem:[%s15047_s30 + $0xc1c] sm:$0xf]  ;;  %7851 = vmatpush.bf16.msrb.mxu2 %v11778_v28  ;;  %v10914_v45 = vor.u32 %v13674_v30, %v10911_v57  ;;  %7826 = vmatpush.bf16.msrb.mxu0 %v10146_v41  ;;  %v11301_v19 = vld [vmem:[%s15047_s30 + $0x920] sm:$0xf]  ;;  %v10534_v30 = vor.u32 %v13591_v17, %v10533_v15  ;;  %v7620_v57 = vpop.f32.mrf.mxu0 }
 0x3bd   : > { %v11679_v49 = vld [vmem:[%s15047_s30 + $0xc78] sm:$0xf0]  ;;  %v13783_v3 = vld [vmem:[%s15047_s30 + $0x97c] sm:$0xf0] }
 0x3be   : > { %v14058_v34 = vld [vmem:[%s15047_s30 + $0x121c] sm:$0xf]  ;;  %v11682_v46 = vor.u32 %v13866_v31, %v11679_v49  ;;  %7864 = vmatpush.bf16.msrb.mxu3 %v12546_v33  ;;  %7839 = vmatpush.bf16.msrb.mxu1 %v10914_v45  ;;  %v12069_v22 = vld [vmem:[%s15047_s30 + $0xf20] sm:$0xf]  ;;  %v11302_v63 = vor.u32 %v13783_v3, %v11301_v19 }
 0x3bf   : > { %v12447_v54 = vld [vmem:[%s15047_s30 + $0x1278] sm:$0xf0]  ;;  %7827 = vmatmul.bf16.vlgmr.msrb.gmra.mxu0 %v15212_v26  ;;  %v13975_v23 = vld [vmem:[%s15047_s30 + $0xf7c] sm:$0xf0] }
 0x3c0   : > { %v12450_v48 = vor.u32 %v14058_v34, %v12447_v54  ;;  %7852 = vmatpush.bf16.msrb.mxu2 %v11682_v46  ;;  %7871 = vmatpush.bf16.msra.mxu0 %v10822_v50  ;;  %v12837_v24 = vld [vmem:[%s15047_s30 + $0x1520] sm:$0xf]  ;;  %v12070_v31 = vor.u32 %v13975_v23, %v12069_v22  ;;  %v7621_v34 = vadd.f32 %v7620_v57, %v3556_v20  ;;  %v7633_v54 = vpop.f32.mrf.mxu1  ;;  %v10823_v57 = vld [vmem:[%s15047_s30 + $0x5c0] sm:$0xf0] }
 0x3c1   : > { %7840 = vmatmul.bf16.vlgmr.msrb.gmra.mxu1 %v15216_v29  ;;  %v14167_v28 = vld [vmem:[%s15047_s30 + $0x157c] sm:$0xf0] }
 0x3c2   : > { %7865 = vmatpush.bf16.msrb.mxu3 %v12450_v48  ;;  %7884 = vmatpush.bf16.msra.mxu1 %v11590_v12  ;;  %v10437_v32 = vld [vmem:[%s15047_s30 + $0x260] sm:$0xf]  ;;  %v12838_v35 = vor.u32 %v14167_v28, %v12837_v24  ;;  %v7634_v42 = vadd.f32 %v7633_v54, %v7621_v34  ;;  %v12359_v34 = vld [vmem:[%s15047_s30 + $0x11c0] sm:$0xf0] }
 0x3c3   : > { %7853 = vmatmul.bf16.vlgmr.msrb.gmra.mxu2 %v15210_v25  ;;  %v13567_v33 = vld [vmem:[%s15047_s30 + $0x2bc] sm:$0xf0] }
 0x3c4   : > { %7897 = vmatpush.bf16.msra.mxu2 %v12358_v51  ;;  %7872 = vmatpush.bf16.msra.mxu0 %v10726_v1  ;;  %v11205_v49 = vld [vmem:[%s15047_s30 + $0x860] sm:$0xf]  ;;  %v10438_v43 = vor.u32 %v13567_v33, %v10437_v32  ;;  %v7622_v61 = vpop.f32.mrf.mxu0  ;;  %v11591_v33 = vld [vmem:[%s15047_s30 + $0xbc0] sm:$0xf0] }
 0x3c5   : > { %7866 = vmatmul.bf16.vlgmr.msrb.gmra.mxu3 %v15214_v27  ;;  %v13759_v36 = vld [vmem:[%s15047_s30 + $0x8bc] sm:$0xf0]  ;;  %v13987_v61 = vld [vmem:[%s15047_s30 + $0xfe4] sm:$0xf] }
 0x3c6   : > { %7910 = vmatpush.bf16.msra.mxu3 %v13126_v56  ;;  %7885 = vmatpush.bf16.msra.mxu1 %v11494_v2  ;;  %v11973_v37 = vld [vmem:[%s15047_s30 + $0xe60] sm:$0xf]  ;;  %v11206_v44 = vor.u32 %v13759_v36, %v11205_v49  ;;  %v7646_v48 = vpop.f32.mrf.mxu2  ;;  %v14035_v49 = vld [vmem:[%s15047_s30 + $0x1164] sm:$0xf] }
 0x3c7   : > { %v13951_v39 = vld [vmem:[%s15047_s30 + $0xebc] sm:$0xf0]  ;;  %v7647_v53 = vadd.f32 %v7646_v48, %v7634_v42  ;;  %v14227_v36 = vld [vmem:[%s15047_s30 + $0x1764] sm:$0xf]  ;;  %v12362_v42 = vor.u32 %v14035_v49, %v12359_v34 }
 0x3c8   : > { %7898 = vmatpush.bf16.msra.mxu2 %v12262_v4  ;;  %7873 = vmatpush.bf16.msra.mxu0 %v10630_v14  ;;  %v12741_v40 = vld [vmem:[%s15047_s30 + $0x1460] sm:$0xf]  ;;  %v11974_v45 = vor.u32 %v13951_v39, %v11973_v37  ;;  %v7659_v55 = vpop.f32.mrf.mxu3  ;;  %v7635_v6 = vpop.f32.mrf.mxu1  ;;  %v13127_v37 = vld [vmem:[%s15047_s30 + $0x17c0] sm:$0xf0] }
 0x3c9   : > { %v14143_v41 = vld [vmem:[%s15047_s30 + $0x14bc] sm:$0xf0]  ;;  %v7660_v60 = vadd.f32 %v7659_v55, %v7647_v53  ;;  %v12263_v48 = vld [vmem:[%s15047_s30 + $0x1100] sm:$0xf0] }
 0x3ca   : > { %7911 = vmatpush.bf16.msra.mxu3 %v13030_v8  ;;  %7886 = vmatpush.bf16.msra.mxu1 %v11398_v16  ;;  %v10341_v46 = vld [vmem:[%s15047_s30 + $0x1a0] sm:$0xf]  ;;  %v12742_v50 = vor.u32 %v14143_v41, %v12741_v40  ;;  %v13603_v55 = vld [vmem:[%s15047_s30 + $0x3e4] sm:$0xf] }
 0x3cb   : > { %v11109_v47 = vld [vmem:[%s15047_s30 + $0x7a0] sm:$0xf]  ;;  %v10342_v59 = vor.u32 %v13543_v18, %v10341_v46  ;;  %14402 = vtanh.f32 %v7660_v60  ;;  %v13130_v46 = vor.u32 %v14227_v36, %v13127_v37  ;;  %v11495_v18 = vld [vmem:[%s15047_s30 + $0xb00] sm:$0xf0] }
 0x3cc   : > { %7899 = vmatpush.bf16.msra.mxu2 %v12166_v62  ;;  %7874 = vmatpush.bf16.msra.mxu0 %v10534_v30  ;;  %v13735_v12 = vld [vmem:[%s15047_s30 + $0x7fc] sm:$0xf0]  ;;  %v13651_v30 = vld [vmem:[%s15047_s30 + $0x564] sm:$0xf] }
 0x3cd   : > { %v11877_v51 = vld [vmem:[%s15047_s30 + $0xda0] sm:$0xf]  ;;  %v11110_v0 = vor.u32 %v13735_v12, %v11109_v47  ;;  %v10826_v40 = vor.u32 %v13651_v30, %v10823_v57  ;;  %v14011_v47 = vld [vmem:[%s15047_s30 + $0x10a4] sm:$0xf] }
 0x3ce   : > { %7912 = vmatpush.bf16.msra.mxu3 %v12934_v21  ;;  %7887 = vmatpush.bf16.msra.mxu1 %v11302_v63  ;;  %v13927_v52 = vld [vmem:[%s15047_s30 + $0xdfc] sm:$0xf0]  ;;  %v7648_v21 = vpop.f32.mrf.mxu2  ;;  %v13843_v63 = vld [vmem:[%s15047_s30 + $0xb64] sm:$0xf]  ;;  %v12266_v53 = vor.u32 %v14011_v47, %v12263_v48 }
 0x3cf   : > { %v12645_v56 = vld [vmem:[%s15047_s30 + $0x13a0] sm:$0xf]  ;;  %v11878_v1 = vor.u32 %v13927_v52, %v11877_v51  ;;  %v11594_v41 = vor.u32 %v13843_v63, %v11591_v33  ;;  %v13031_v12 = vld [vmem:[%s15047_s30 + $0x1700] sm:$0xf0] }
 0x3d0   : > { %7900 = vmatpush.bf16.msra.mxu2 %v12070_v31  ;;  %v14119_v58 = vld [vmem:[%s15047_s30 + $0x13fc] sm:$0xf0]  ;;  %7875 = vmatpush.bf16.msra.mxu0 %v10438_v43  ;;  %v7661_v28 = vpop.f32.mrf.mxu3  ;;  %v13627_v43 = vld [vmem:[%s15047_s30 + $0x4a4] sm:$0xf] }
 0x3d1   : > { %v10245_v2 = vld [vmem:[%s15047_s30 + $0xe0] sm:$0xf]  ;;  %v12646_v7 = vor.u32 %v14119_v58, %v12645_v56  ;;  %v14403_v31 = vpop.eup %14402  ;;  %v10631_v56 = vld [vmem:[%s15047_s30 + $0x440] sm:$0xf0] }
 0x3d2   : > { %7913 = vmatpush.bf16.msra.mxu3 %v12838_v35  ;;  %7888 = vmatpush.bf16.msra.mxu1 %v11206_v44  ;;  %v13519_v4 = vld [vmem:[%s15047_s30 + $0x13c] sm:$0xf0]  ;;  %8730 = vst [vmem:[%s15057_s7 + $0x18] sm:$0xff] %v14403_v31  ;;  %v10727_v44 = vld [vmem:[%s15047_s30 + $0x500] sm:$0xf0] }
 0x3d3   : > { %v11013_v5 = vld [vmem:[%s15047_s30 + $0x6e0] sm:$0xf]  ;;  %v10246_v13 = vor.u32 %v13519_v4, %v10245_v2  ;;  %v10730_v51 = vor.u32 %v13627_v43, %v10727_v44  ;;  %v13795_v58 = vld [vmem:[%s15047_s30 + $0x9e4] sm:$0xf]  ;;  %v10634_v4 = vor.u32 %v13603_v55, %v10631_v56 }
 0x3d4   : > { %7901 = vmatpush.bf16.msra.mxu2 %v11974_v45  ;;  %v13711_v8 = vld [vmem:[%s15047_s30 + $0x73c] sm:$0xf0]  ;;  %7876 = vmatpush.bf16.msra.mxu0 %v10342_v59  ;;  %v13819_v45 = vld [vmem:[%s15047_s30 + $0xaa4] sm:$0xf] }
 0x3d5   : > { %v11781_v9 = vld [vmem:[%s15047_s30 + $0xce0] sm:$0xf]  ;;  %v11014_v16 = vor.u32 %v13711_v8, %v11013_v5  ;;  %v11498_v52 = vor.u32 %v13819_v45, %v11495_v18  ;;  %v11399_v60 = vld [vmem:[%s15047_s30 + $0xa40] sm:$0xf0] }
 0x3d6   : > { %7914 = vmatpush.bf16.msra.mxu3 %v12742_v50  ;;  %v13903_v10 = vld [vmem:[%s15047_s30 + $0xd3c] sm:$0xf0]  ;;  %7889 = vmatpush.bf16.msra.mxu1 %v11110_v0  ;;  %v14203_v50 = vld [vmem:[%s15047_s30 + $0x16a4] sm:$0xf]  ;;  %v11402_v6 = vor.u32 %v13795_v58, %v11399_v60 }
 0x3d7   : > { %v12549_v38 = vld [vmem:[%s15047_s30 + $0x12e0] sm:$0xf]  ;;  %v11782_v62 = vor.u32 %v13903_v10, %v11781_v9  ;;  %v13034_v59 = vor.u32 %v14203_v50, %v13031_v12  ;;  %v12167_v0 = vld [vmem:[%s15047_s30 + $0x1040] sm:$0xf0] }
 0x3d8   : > { %v14095_v11 = vld [vmem:[%s15047_s30 + $0x133c] sm:$0xf0]  ;;  %7902 = vmatpush.bf16.msra.mxu2 %v11878_v1  ;;  %7877 = vmatpush.bf16.msra.mxu0 %v10246_v13  ;;  %v14179_v1 = vld [vmem:[%s15047_s30 + $0x15e4] sm:$0xf] }
 0x3d9   : > { %v10149_v14 = vld [vmem:[%s15047_s30 + $0x20] sm:$0xf]  ;;  %v12550_v3 = vor.u32 %v14095_v11, %v12549_v38  ;;  %v12935_v2 = vld [vmem:[%s15047_s30 + $0x1640] sm:$0xf0] }
 0x3da   : > { %v13495_v15 = vld [vmem:[%s15047_s30 + $0x7c] sm:$0xf0]  ;;  %7915 = vmatpush.bf16.msra.mxu3 %v12646_v7  ;;  %7890 = vmatpush.bf16.msra.mxu1 %v11014_v16  ;;  %v13579_v5 = vld [vmem:[%s15047_s30 + $0x324] sm:$0xf]  ;;  %v12170_v7 = vor.u32 %v13987_v61, %v12167_v0  ;;  %v12938_v11 = vor.u32 %v14179_v1, %v12935_v2 }
 0x3db   : > { %v10917_v17 = vld [vmem:[%s15047_s30 + $0x620] sm:$0xf]  ;;  %v10150_v32 = vor.u32 %v13495_v15, %v10149_v14  ;;  %v10535_v8 = vld [vmem:[%s15047_s30 + $0x380] sm:$0xf0] }
 0x3dc   : > { %v13687_v19 = vld [vmem:[%s15047_s30 + $0x67c] sm:$0xf0]  ;;  %7903 = vmatpush.bf16.msra.mxu2 %v11782_v62  ;;  %v13771_v9 = vld [vmem:[%s15047_s30 + $0x924] sm:$0xf] }
 0x3dd   : > { %v11685_v20 = vld [vmem:[%s15047_s30 + $0xc20] sm:$0xf]  ;;  %v10918_v54 = vor.u32 %v13687_v19, %v10917_v17  ;;  %7878 = vmatpush.bf16.msra.mxu0 %v10150_v32  ;;  %v11303_v13 = vld [vmem:[%s15047_s30 + $0x980] sm:$0xf0]  ;;  %v10538_v17 = vor.u32 %v13579_v5, %v10535_v8  ;;  %v7672_v19 = vpop.f32.mrf.mxu0 }
 0x3de   : > { %v13879_v22 = vld [vmem:[%s15047_s30 + $0xc7c] sm:$0xf0]  ;;  %7916 = vmatpush.bf16.msra.mxu3 %v12550_v3  ;;  %v13963_v14 = vld [vmem:[%s15047_s30 + $0xf24] sm:$0xf]  ;;  %v7685_v28 = vpop.f32.mrf.mxu1 }
 0x3df   : > { %v12453_v23 = vld [vmem:[%s15047_s30 + $0x1220] sm:$0xf]  ;;  %v11686_v35 = vor.u32 %v13879_v22, %v11685_v20  ;;  %7891 = vmatpush.bf16.msra.mxu1 %v10918_v54  ;;  %v12071_v15 = vld [vmem:[%s15047_s30 + $0xf80] sm:$0xf0]  ;;  %v11306_v20 = vor.u32 %v13771_v9, %v11303_v13 }
 0x3e0   : > { %v14071_v24 = vld [vmem:[%s15047_s30 + $0x127c] sm:$0xf0]  ;;  %7879 = vmatmul.bf16.vlgmr.msra.gmra.mxu0 %v15212_v26  ;;  %v14155_v16 = vld [vmem:[%s15047_s30 + $0x1524] sm:$0xf]  ;;  %v12074_v21 = vor.u32 %v13963_v14, %v12071_v15 }
 0x3e1   : > { %v12454_v39 = vor.u32 %v14071_v24, %v12453_v23  ;;  %7904 = vmatpush.bf16.msra.mxu2 %v11686_v35  ;;  %7923 = vmatpush.bf16.msrb.mxu0 %v10826_v40  ;;  %v15773_v10 = vld [vmem:[%s15055_s23] sm:$0xff] }
 0x3e2   : > { %7892 = vmatmul.bf16.vlgmr.msra.gmra.mxu1 %v15216_v29  ;;  %v3557_v38 = vperm.slane %v15773_v10, 4  ;;  %v12839_v62 = vld [vmem:[%s15047_s30 + $0x1580] sm:$0xf0] }
 0x3e3   : > { %7917 = vmatpush.bf16.msra.mxu3 %v12454_v39  ;;  %7936 = vmatpush.bf16.msrb.mxu1 %v11594_v41  ;;  %v13555_v3 = vld [vmem:[%s15047_s30 + $0x264] sm:$0xf]  ;;  %v12842_v30 = vor.u32 %v14155_v16, %v12839_v62 }
 0x3e4   : > { %7905 = vmatmul.bf16.vlgmr.msra.gmra.mxu2 %v15210_v25  ;;  %v10439_v22 = vld [vmem:[%s15047_s30 + $0x2c0] sm:$0xf0]  ;;  %v7673_v24 = vadd.f32 %v7672_v19, %v3557_v38  ;;  %v10829_v19 = vld [vmem:[%s15047_s30 + $0x568] sm:$0xf] }
 0x3e5   : > { %7949 = vmatpush.bf16.msrb.mxu2 %v12362_v42  ;;  %7924 = vmatpush.bf16.msrb.mxu0 %v10730_v51  ;;  %v13747_v23 = vld [vmem:[%s15047_s30 + $0x864] sm:$0xf]  ;;  %v10442_v34 = vor.u32 %v13555_v3, %v10439_v22  ;;  %v7674_v12 = vpop.f32.mrf.mxu0 }
 0x3e6   : > { %7918 = vmatmul.bf16.vlgmr.msra.gmra.mxu3 %v15214_v27  ;;  %v11207_v57 = vld [vmem:[%s15047_s30 + $0x8c0] sm:$0xf0]  ;;  %v7686_v49 = vadd.f32 %v7685_v28, %v7673_v24  ;;  %v7698_v40 = vpop.f32.mrf.mxu2  ;;  %v7687_v58 = vpop.f32.mrf.mxu1  ;;  %v12365_v24 = vld [vmem:[%s15047_s30 + $0x1168] sm:$0xf] }
 0x3e7   : > { %7962 = vmatpush.bf16.msrb.mxu3 %v13130_v46  ;;  %7937 = vmatpush.bf16.msrb.mxu1 %v11498_v52  ;;  %v13939_v63 = vld [vmem:[%s15047_s30 + $0xe64] sm:$0xf]  ;;  %v11210_v54 = vor.u32 %v13747_v23, %v11207_v57  ;;  %v13856_v23 = vld [vmem:[%s15047_s30 + $0xbc4] sm:$0xf0] }
 0x3e8   : > { %v11975_v31 = vld [vmem:[%s15047_s30 + $0xec0] sm:$0xf0]  ;;  %v7699_v45 = vadd.f32 %v7698_v40, %v7686_v49  ;;  %v7711_v46 = vpop.f32.mrf.mxu3  ;;  %v14048_v28 = vld [vmem:[%s15047_s30 + $0x11c4] sm:$0xf0] }
 0x3e9   : > { %7950 = vmatpush.bf16.msrb.mxu2 %v12266_v53  ;;  %7925 = vmatpush.bf16.msrb.mxu0 %v10634_v4  ;;  %v14131_v32 = vld [vmem:[%s15047_s30 + $0x1464] sm:$0xf]  ;;  %v11978_v35 = vor.u32 %v13939_v63, %v11975_v31  ;;  %v13133_v63 = vld [vmem:[%s15047_s30 + $0x1768] sm:$0xf] }
 0x3ea   : > { %v12743_v33 = vld [vmem:[%s15047_s30 + $0x14c0] sm:$0xf0]  ;;  %v7712_v50 = vadd.f32 %v7711_v46, %v7699_v45  ;;  %v14240_v31 = vld [vmem:[%s15047_s30 + $0x17c4] sm:$0xf0] }
 0x3eb   : > { %7963 = vmatpush.bf16.msrb.mxu3 %v13034_v59  ;;  %7938 = vmatpush.bf16.msrb.mxu1 %v11402_v6  ;;  %v13531_v36 = vld [vmem:[%s15047_s30 + $0x1a4] sm:$0xf]  ;;  %v12746_v41 = vor.u32 %v14131_v32, %v12743_v33  ;;  %v12269_v40 = vld [vmem:[%s15047_s30 + $0x10a8] sm:$0xf] }
 0x3ec   : > { %v10343_v37 = vld [vmem:[%s15047_s30 + $0x200] sm:$0xf0]  ;;  %14404 = vtanh.f32 %v7712_v50  ;;  %v13808_v12 = vld [vmem:[%s15047_s30 + $0xa44] sm:$0xf0] }
 0x3ed   : > { %7951 = vmatpush.bf16.msrb.mxu2 %v12170_v7  ;;  %7926 = vmatpush.bf16.msrb.mxu0 %v10538_v17  ;;  %v13723_v39 = vld [vmem:[%s15047_s30 + $0x7a4] sm:$0xf]  ;;  %v10346_v48 = vor.u32 %v13531_v36, %v10343_v37  ;;  %v11501_v36 = vld [vmem:[%s15047_s30 + $0xaa8] sm:$0xf]  ;;  %v13134_v37 = vor.u32 %v14240_v31, %v13133_v63 }
 0x3ee   : > { %v11111_v42 = vld [vmem:[%s15047_s30 + $0x800] sm:$0xf0]  ;;  %v7700_v13 = vpop.f32.mrf.mxu2  ;;  %v10541_v58 = vld [vmem:[%s15047_s30 + $0x328] sm:$0xf] }
 0x3ef   : > { %7964 = vmatpush.bf16.msrb.mxu3 %v12938_v11  ;;  %7939 = vmatpush.bf16.msrb.mxu1 %v11306_v20  ;;  %v13915_v43 = vld [vmem:[%s15047_s30 + $0xda4] sm:$0xf]  ;;  %v11114_v51 = vor.u32 %v13723_v39, %v11111_v42  ;;  %v13664_v20 = vld [vmem:[%s15047_s30 + $0x5c4] sm:$0xf0] }
 0x3f0   : > { %v11879_v44 = vld [vmem:[%s15047_s30 + $0xe00] sm:$0xf0]  ;;  %v7713_v17 = vpop.f32.mrf.mxu3  ;;  %v10830_v33 = vor.u32 %v13664_v20, %v10829_v19  ;;  %v13832_v39 = vld [vmem:[%s15047_s30 + $0xb04] sm:$0xf0] }
 0x3f1   : > { %7952 = vmatpush.bf16.msrb.mxu2 %v12074_v21  ;;  %v14107_v18 = vld [vmem:[%s15047_s30 + $0x13a4] sm:$0xf]  ;;  %7927 = vmatpush.bf16.msrb.mxu0 %v10442_v34  ;;  %v11882_v52 = vor.u32 %v13915_v43, %v11879_v44  ;;  %v11597_v21 = vld [vmem:[%s15047_s30 + $0xb68] sm:$0xf]  ;;  %v12366_v34 = vor.u32 %v14048_v28, %v12365_v24  ;;  %v11502_v45 = vor.u32 %v13832_v39, %v11501_v36 }
 0x3f2   : > { %v12647_v47 = vld [vmem:[%s15047_s30 + $0x1400] sm:$0xf0]  ;;  %v14405_v3 = vpop.eup %14404  ;;  %v11598_v49 = vor.u32 %v13856_v23, %v11597_v21  ;;  %v13037_v42 = vld [vmem:[%s15047_s30 + $0x16a8] sm:$0xf] }
 0x3f3   : > { %7965 = vmatpush.bf16.msrb.mxu3 %v12842_v30  ;;  %7940 = vmatpush.bf16.msrb.mxu1 %v11210_v54  ;;  %v13507_v53 = vld [vmem:[%s15047_s30 + $0xe4] sm:$0xf]  ;;  %v12650_v59 = vor.u32 %v14107_v18, %v12647_v47  ;;  %8731 = vst [vmem:[%s15057_s7 + $0x20] sm:$0xff] %v14405_v3  ;;  %v10733_v54 = vld [vmem:[%s15047_s30 + $0x4a8] sm:$0xf] }
 0x3f4   : > { %v10247_v55 = vld [vmem:[%s15047_s30 + $0x140] sm:$0xf0]  ;;  %v14216_v43 = vld [vmem:[%s15047_s30 + $0x1704] sm:$0xf0] }
 0x3f5   : > { %7953 = vmatpush.bf16.msrb.mxu2 %v11978_v35  ;;  %v13699_v56 = vld [vmem:[%s15047_s30 + $0x6e4] sm:$0xf]  ;;  %7928 = vmatpush.bf16.msrb.mxu0 %v10346_v48  ;;  %v10250_v4 = vor.u32 %v13507_v53, %v10247_v55  ;;  %v13640_v35 = vld [vmem:[%s15047_s30 + $0x504] sm:$0xf0]  ;;  %v13038_v50 = vor.u32 %v14216_v43, %v13037_v42 }
 0x3f6   : > { %v11015_v60 = vld [vmem:[%s15047_s30 + $0x740] sm:$0xf0]  ;;  %v10734_v44 = vor.u32 %v13640_v35, %v10733_v54  ;;  %v10637_v18 = vld [vmem:[%s15047_s30 + $0x3e8] sm:$0xf] }
 0x3f7   : > { %7966 = vmatpush.bf16.msrb.mxu3 %v12746_v41  ;;  %v13891_v61 = vld [vmem:[%s15047_s30 + $0xce4] sm:$0xf]  ;;  %7941 = vmatpush.bf16.msrb.mxu1 %v11114_v51  ;;  %v11018_v7 = vor.u32 %v13699_v56, %v11015_v60  ;;  %v14024_v41 = vld [vmem:[%s15047_s30 + $0x1104] sm:$0xf0] }
 0x3f8   : > { %v11783_v0 = vld [vmem:[%s15047_s30 + $0xd40] sm:$0xf0]  ;;  %v12270_v46 = vor.u32 %v14024_v41, %v12269_v40  ;;  %v13616_v47 = vld [vmem:[%s15047_s30 + $0x444] sm:$0xf0] }
 0x3f9   : > { %v14083_v1 = vld [vmem:[%s15047_s30 + $0x12e4] sm:$0xf]  ;;  %7954 = vmatpush.bf16.msrb.mxu2 %v11882_v52  ;;  %v11786_v8 = vor.u32 %v13891_v61, %v11783_v0  ;;  %7929 = vmatpush.bf16.msrb.mxu0 %v10250_v4  ;;  %v11405_v48 = vld [vmem:[%s15047_s30 + $0x9e8] sm:$0xf]  ;;  %v10638_v56 = vor.u32 %v13616_v47, %v10637_v18 }
 0x3fa   : > { %v12551_v2 = vld [vmem:[%s15047_s30 + $0x1340] sm:$0xf0]  ;;  %v12173_v51 = vld [vmem:[%s15047_s30 + $0xfe8] sm:$0xf] }
 0x3fb   : > { %v13483_v5 = vld [vmem:[%s15047_s30 + $0x24] sm:$0xf]  ;;  %7967 = vmatpush.bf16.msrb.mxu3 %v12650_v59  ;;  %v12554_v14 = vor.u32 %v14083_v1, %v12551_v2  ;;  %7942 = vmatpush.bf16.msrb.mxu1 %v11018_v7  ;;  %v14000_v52 = vld [vmem:[%s15047_s30 + $0x1044] sm:$0xf0]  ;;  %v11406_v59 = vor.u32 %v13808_v12, %v11405_v48  ;;  %v3558_v1 = vperm.slane %v15773_v10, 5 }
 0x3fc   : > { %v10151_v6 = vld [vmem:[%s15047_s30 + $0x80] sm:$0xf0]  ;;  %v12941_v53 = vld [vmem:[%s15047_s30 + $0x15e8] sm:$0xf]  ;;  %v12174_v60 = vor.u32 %v14000_v52, %v12173_v51 }
 0x3fd   : > { %v13675_v9 = vld [vmem:[%s15047_s30 + $0x624] sm:$0xf]  ;;  %v10154_v22 = vor.u32 %v13483_v5, %v10151_v6  ;;  %7955 = vmatpush.bf16.msrb.mxu2 %v11786_v8  ;;  %v14192_v55 = vld [vmem:[%s15047_s30 + $0x1644] sm:$0xf0] }
 0x3fe   : > { %v10919_v38 = vld [vmem:[%s15047_s30 + $0x680] sm:$0xf0]  ;;  %v13592_v61 = vld [vmem:[%s15047_s30 + $0x384] sm:$0xf0]  ;;  %v12942_v2 = vor.u32 %v14192_v55, %v12941_v53  ;;  %v7737_v17 = vpop.f32.mrf.mxu1 }
 0x3ff   : > { %v13867_v11 = vld [vmem:[%s15047_s30 + $0xc24] sm:$0xf]  ;;  %v10922_v30 = vor.u32 %v13675_v9, %v10919_v38  ;;  %7968 = vmatpush.bf16.msrb.mxu3 %v12554_v14  ;;  %7930 = vmatpush.bf16.msrb.mxu0 %v10154_v22  ;;  %v11309_v0 = vld [vmem:[%s15047_s30 + $0x928] sm:$0xf]  ;;  %v10542_v9 = vor.u32 %v13592_v61, %v10541_v58  ;;  %v7724_v38 = vpop.f32.mrf.mxu0 }
 0x400   : > { %v11687_v15 = vld [vmem:[%s15047_s30 + $0xc80] sm:$0xf0]  ;;  %v13784_v4 = vld [vmem:[%s15047_s30 + $0x984] sm:$0xf0] }
 0x401   : > { %v14059_v16 = vld [vmem:[%s15047_s30 + $0x1224] sm:$0xf]  ;;  %v11690_v57 = vor.u32 %v13867_v11, %v11687_v15  ;;  %7943 = vmatpush.bf16.msrb.mxu1 %v10922_v30  ;;  %v12077_v5 = vld [vmem:[%s15047_s30 + $0xf28] sm:$0xf]  ;;  %v11310_v11 = vor.u32 %v13784_v4, %v11309_v0 }
 0x402   : > { %v12455_v62 = vld [vmem:[%s15047_s30 + $0x1280] sm:$0xf0]  ;;  %7931 = vmatmul.bf16.vlgmr.msrb.gmra.mxu0 %v15212_v26  ;;  %v13976_v6 = vld [vmem:[%s15047_s30 + $0xf84] sm:$0xf0] }
 0x403   : > { %v12458_v32 = vor.u32 %v14059_v16, %v12455_v62  ;;  %7956 = vmatpush.bf16.msrb.mxu2 %v11690_v57  ;;  %7975 = vmatpush.bf16.msra.mxu0 %v10830_v33  ;;  %v12845_v7 = vld [vmem:[%s15047_s30 + $0x1528] sm:$0xf]  ;;  %v12078_v13 = vor.u32 %v13976_v6, %v12077_v5  ;;  %v7725_v62 = vadd.f32 %v7724_v38, %v3558_v1  ;;  %v13652_v38 = vld [vmem:[%s15047_s30 + $0x56c] sm:$0xf] }
 0x404   : > { %7944 = vmatmul.bf16.vlgmr.msrb.gmra.mxu1 %v15216_v29  ;;  %v14168_v8 = vld [vmem:[%s15047_s30 + $0x1584] sm:$0xf0] }
 0x405   : > { %7969 = vmatpush.bf16.msrb.mxu3 %v12458_v32  ;;  %7988 = vmatpush.bf16.msra.mxu1 %v11598_v49  ;;  %v10445_v14 = vld [vmem:[%s15047_s30 + $0x268] sm:$0xf]  ;;  %v12846_v19 = vor.u32 %v14168_v8, %v12845_v7  ;;  %v7738_v24 = vadd.f32 %v7737_v17, %v7725_v62  ;;  %v14036_v62 = vld [vmem:[%s15047_s30 + $0x116c] sm:$0xf] }
 0x406   : > { %7957 = vmatmul.bf16.vlgmr.msrb.gmra.mxu2 %v15210_v25  ;;  %v13568_v15 = vld [vmem:[%s15047_s30 + $0x2c4] sm:$0xf0]  ;;  %v7750_v33 = vpop.f32.mrf.mxu2  ;;  %v7739_v48 = vpop.f32.mrf.mxu1  ;;  %v12367_v17 = vld [vmem:[%s15047_s30 + $0x11c8] sm:$0xf0] }
 0x407   : > { %8001 = vmatpush.bf16.msra.mxu2 %v12366_v34  ;;  %7976 = vmatpush.bf16.msra.mxu0 %v10734_v44  ;;  %v11213_v16 = vld [vmem:[%s15047_s30 + $0x868] sm:$0xf]  ;;  %v10446_v28 = vor.u32 %v13568_v15, %v10445_v14  ;;  %v7751_v36 = vadd.f32 %v7750_v33, %v7738_v24  ;;  %v7726_v43 = vpop.f32.mrf.mxu0  ;;  %v14012_v33 = vld [vmem:[%s15047_s30 + $0x10ac] sm:$0xf] }
 0x408   : > { %7970 = vmatmul.bf16.vlgmr.msrb.gmra.mxu3 %v15214_v27  ;;  %v13760_v20 = vld [vmem:[%s15047_s30 + $0x8c4] sm:$0xf0]  ;;  %v11407_v43 = vld [vmem:[%s15047_s30 + $0xa48] sm:$0xf0] }
 0x409   : > { %8014 = vmatpush.bf16.msra.mxu3 %v13134_v37  ;;  %7989 = vmatpush.bf16.msra.mxu1 %v11502_v45  ;;  %v11981_v21 = vld [vmem:[%s15047_s30 + $0xe68] sm:$0xf]  ;;  %v11214_v30 = vor.u32 %v13760_v20, %v11213_v16  ;;  %v7763_v37 = vpop.f32.mrf.mxu3  ;;  %v11599_v16 = vld [vmem:[%s15047_s30 + $0xbc8] sm:$0xf0] }
 0x40a   : > { %v13952_v3 = vld [vmem:[%s15047_s30 + $0xec4] sm:$0xf0]  ;;  %v7764_v42 = vadd.f32 %v7763_v37, %v7751_v36  ;;  %v13580_v48 = vld [vmem:[%s15047_s30 + $0x32c] sm:$0xf] }
 0x40b   : > { %8002 = vmatpush.bf16.msra.mxu2 %v12270_v46  ;;  %7977 = vmatpush.bf16.msra.mxu0 %v10638_v56  ;;  %v12749_v22 = vld [vmem:[%s15047_s30 + $0x1468] sm:$0xf]  ;;  %v11982_v57 = vor.u32 %v13952_v3, %v11981_v21  ;;  %v14228_v21 = vld [vmem:[%s15047_s30 + $0x176c] sm:$0xf] }
 0x40c   : > { %v14144_v23 = vld [vmem:[%s15047_s30 + $0x14c4] sm:$0xf0]  ;;  %14406 = vtanh.f32 %v7764_v42  ;;  %v13135_v3 = vld [vmem:[%s15047_s30 + $0x17c8] sm:$0xf0] }
 0x40d   : > { %8015 = vmatpush.bf16.msra.mxu3 %v13038_v50  ;;  %7990 = vmatpush.bf16.msra.mxu1 %v11406_v59  ;;  %v10349_v63 = vld [vmem:[%s15047_s30 + $0x1a8] sm:$0xf]  ;;  %v12750_v49 = vor.u32 %v14144_v23, %v12749_v22 }
 0x40e   : > { %v13544_v31 = vld [vmem:[%s15047_s30 + $0x204] sm:$0xf0]  ;;  %v7752_v4 = vpop.f32.mrf.mxu2 }
 0x40f   : > { %8003 = vmatpush.bf16.msra.mxu2 %v12174_v60  ;;  %7978 = vmatpush.bf16.msra.mxu0 %v10542_v9  ;;  %v11117_v32 = vld [vmem:[%s15047_s30 + $0x7a8] sm:$0xf]  ;;  %v10350_v41 = vor.u32 %v13544_v31, %v10349_v63  ;;  %v13820_v63 = vld [vmem:[%s15047_s30 + $0xaac] sm:$0xf]  ;;  %v13138_v31 = vor.u32 %v14228_v21, %v13135_v3 }
 0x410   : > { %v13736_v34 = vld [vmem:[%s15047_s30 + $0x804] sm:$0xf0]  ;;  %v13532_v21 = vld [vmem:[%s15047_s30 + $0x1ac] sm:$0xf] }
 0x411   : > { %8016 = vmatpush.bf16.msra.mxu3 %v12942_v2  ;;  %7991 = vmatpush.bf16.msra.mxu1 %v11310_v11  ;;  %v11885_v54 = vld [vmem:[%s15047_s30 + $0xda8] sm:$0xf]  ;;  %v11118_v44 = vor.u32 %v13736_v34, %v11117_v32  ;;  %v7765_v9 = vpop.f32.mrf.mxu3  ;;  %v10831_v11 = vld [vmem:[%s15047_s30 + $0x5c8] sm:$0xf0] }
 0x412   : > { %v13928_v35 = vld [vmem:[%s15047_s30 + $0xe04] sm:$0xf0]  ;;  %v14407_v14 = vpop.eup %14406  ;;  %v10834_v23 = vor.u32 %v13652_v38, %v10831_v11  ;;  %v11503_v32 = vld [vmem:[%s15047_s30 + $0xb08] sm:$0xf0] }
 0x413   : > { %8004 = vmatpush.bf16.msra.mxu2 %v12078_v13  ;;  %v12653_v39 = vld [vmem:[%s15047_s30 + $0x13a8] sm:$0xf]  ;;  %7979 = vmatpush.bf16.msra.mxu0 %v10446_v28  ;;  %v11886_v45 = vor.u32 %v13928_v35, %v11885_v54  ;;  %v13844_v13 = vld [vmem:[%s15047_s30 + $0xb6c] sm:$0xf]  ;;  %8732 = vst [vmem:[%s15057_s7 + $0x28] sm:$0xff] %v14407_v14  ;;  %v12370_v28 = vor.u32 %v14036_v62, %v12367_v17 }
 0x414   : > { %v14120_v40 = vld [vmem:[%s15047_s30 + $0x1404] sm:$0xf0]  ;;  %v11602_v24 = vor.u32 %v13844_v13, %v11599_v16  ;;  %v14204_v34 = vld [vmem:[%s15047_s30 + $0x16ac] sm:$0xf]  ;;  %v11506_v36 = vor.u32 %v13820_v63, %v11503_v32 }
 0x415   : > { %8017 = vmatpush.bf16.msra.mxu3 %v12846_v19  ;;  %7992 = vmatpush.bf16.msra.mxu1 %v11214_v30  ;;  %v10253_v46 = vld [vmem:[%s15047_s30 + $0xe8] sm:$0xf]  ;;  %v12654_v50 = vor.u32 %v14120_v40, %v12653_v39  ;;  %v13628_v30 = vld [vmem:[%s15047_s30 + $0x4ac] sm:$0xf] }
 0x416   : > { %v13520_v18 = vld [vmem:[%s15047_s30 + $0x144] sm:$0xf0]  ;;  %v13039_v54 = vld [vmem:[%s15047_s30 + $0x1708] sm:$0xf0] }
 0x417   : > { %8005 = vmatpush.bf16.msra.mxu2 %v11982_v57  ;;  %v11021_v47 = vld [vmem:[%s15047_s30 + $0x6e8] sm:$0xf]  ;;  %7980 = vmatpush.bf16.msra.mxu0 %v10350_v41  ;;  %v10254_v56 = vor.u32 %v13520_v18, %v10253_v46  ;;  %v10735_v57 = vld [vmem:[%s15047_s30 + $0x508] sm:$0xf0]  ;;  %v13042_v42 = vor.u32 %v14204_v34, %v13039_v54 }
 0x418   : > { %v13712_v12 = vld [vmem:[%s15047_s30 + $0x744] sm:$0xf0]  ;;  %v10738_v35 = vor.u32 %v13628_v30, %v10735_v57  ;;  %v13604_v39 = vld [vmem:[%s15047_s30 + $0x3ec] sm:$0xf] }
 0x419   : > { %8018 = vmatpush.bf16.msra.mxu3 %v12750_v49  ;;  %v11789_v51 = vld [vmem:[%s15047_s30 + $0xce8] sm:$0xf]  ;;  %7993 = vmatpush.bf16.msra.mxu1 %v11118_v44  ;;  %v11022_v60 = vor.u32 %v13712_v12, %v11021_v47  ;;  %v12271_v49 = vld [vmem:[%s15047_s30 + $0x1108] sm:$0xf0] }
 0x41a   : > { %v13904_v52 = vld [vmem:[%s15047_s30 + $0xd44] sm:$0xf0]  ;;  %v12274_v37 = vor.u32 %v14012_v33, %v12271_v49  ;;  %v10639_v40 = vld [vmem:[%s15047_s30 + $0x448] sm:$0xf0] }
 0x41b   : > { %v12557_v53 = vld [vmem:[%s15047_s30 + $0x12e8] sm:$0xf]  ;;  %8006 = vmatpush.bf16.msra.mxu2 %v11886_v45  ;;  %v11790_v61 = vor.u32 %v13904_v52, %v11789_v51  ;;  %7981 = vmatpush.bf16.msra.mxu0 %v10254_v56  ;;  %v13796_v41 = vld [vmem:[%s15047_s30 + $0x9ec] sm:$0xf]  ;;  %v10642_v47 = vor.u32 %v13604_v39, %v10639_v40 }
 0x41c   : > { %v14096_v55 = vld [vmem:[%s15047_s30 + $0x1344] sm:$0xf0]  ;;  %v13988_v44 = vld [vmem:[%s15047_s30 + $0xfec] sm:$0xf] }
 0x41d   : > { %v10157_v58 = vld [vmem:[%s15047_s30 + $0x28] sm:$0xf]  ;;  %8019 = vmatpush.bf16.msra.mxu3 %v12654_v50  ;;  %v12558_v5 = vor.u32 %v14096_v55, %v12557_v53  ;;  %7994 = vmatpush.bf16.msra.mxu1 %v11022_v60  ;;  %v12175_v45 = vld [vmem:[%s15047_s30 + $0x1048] sm:$0xf0]  ;;  %v11410_v50 = vor.u32 %v13796_v41, %v11407_v43  ;;  %v3559_v53 = vperm.slane %v15773_v10, 6 }
 0x41e   : > { %v13496_v59 = vld [vmem:[%s15047_s30 + $0x84] sm:$0xf0]  ;;  %v14180_v46 = vld [vmem:[%s15047_s30 + $0x15ec] sm:$0xf]  ;;  %v12178_v12 = vor.u32 %v13988_v44, %v12175_v45  ;;  %v7789_v9 = vpop.f32.mrf.mxu1 }
 0x41f   : > { %v10925_v0 = vld [vmem:[%s15047_s30 + $0x628] sm:$0xf]  ;;  %v10158_v15 = vor.u32 %v13496_v59, %v10157_v58  ;;  %8007 = vmatpush.bf16.msra.mxu2 %v11790_v61  ;;  %v12943_v18 = vld [vmem:[%s15047_s30 + $0x1648] sm:$0xf0] }
 0x420   : > { %v13688_v1 = vld [vmem:[%s15047_s30 + $0x684] sm:$0xf0]  ;;  %v10543_v51 = vld [vmem:[%s15047_s30 + $0x388] sm:$0xf0]  ;;  %v12946_v55 = vor.u32 %v14180_v46, %v12943_v18 }
 0x421   : > { %v11693_v2 = vld [vmem:[%s15047_s30 + $0xc28] sm:$0xf]  ;;  %v10926_v19 = vor.u32 %v13688_v1, %v10925_v0  ;;  %8020 = vmatpush.bf16.msra.mxu3 %v12558_v5  ;;  %7982 = vmatpush.bf16.msra.mxu0 %v10158_v15  ;;  %v13772_v52 = vld [vmem:[%s15047_s30 + $0x92c] sm:$0xf]  ;;  %v10546_v0 = vor.u32 %v13580_v48, %v10543_v51  ;;  %v7776_v1 = vpop.f32.mrf.mxu0 }
 0x422   : > { %v13880_v6 = vld [vmem:[%s15047_s30 + $0xc84] sm:$0xf0]  ;;  %v11311_v56 = vld [vmem:[%s15047_s30 + $0x988] sm:$0xf0] }
 0x423   : > { %v12461_v7 = vld [vmem:[%s15047_s30 + $0x1228] sm:$0xf]  ;;  %v11694_v20 = vor.u32 %v13880_v6, %v11693_v2  ;;  %7995 = vmatpush.bf16.msra.mxu1 %v10926_v19  ;;  %v13964_v58 = vld [vmem:[%s15047_s30 + $0xf2c] sm:$0xf]  ;;  %v11314_v2 = vor.u32 %v13772_v52, %v11311_v56 }
 0x424   : > { %v14072_v8 = vld [vmem:[%s15047_s30 + $0x1284] sm:$0xf0]  ;;  %7983 = vmatmul.bf16.vlgmr.msra.gmra.mxu0 %v15212_v26  ;;  %v12079_v59 = vld [vmem:[%s15047_s30 + $0xf88] sm:$0xf0] }
 0x425   : > { %v12462_v22 = vor.u32 %v14072_v8, %v12461_v7  ;;  %8008 = vmatpush.bf16.msra.mxu2 %v11694_v20  ;;  %8027 = vmatpush.bf16.msrb.mxu0 %v10834_v23  ;;  %v14156_v60 = vld [vmem:[%s15047_s30 + $0x152c] sm:$0xf]  ;;  %v12082_v4 = vor.u32 %v13964_v58, %v12079_v59  ;;  %v7777_v8 = vadd.f32 %v7776_v1, %v3559_v53  ;;  %v10837_v1 = vld [vmem:[%s15047_s30 + $0x570] sm:$0xf] }
 0x426   : > { %7996 = vmatmul.bf16.vlgmr.msra.gmra.mxu1 %v15216_v29  ;;  %v12847_v61 = vld [vmem:[%s15047_s30 + $0x1588] sm:$0xf0]  ;;  %v7802_v23 = vpop.f32.mrf.mxu2  ;;  %v7791_v41 = vpop.f32.mrf.mxu1 }
 0x427   : > { %8021 = vmatpush.bf16.msra.mxu3 %v12462_v22  ;;  %8040 = vmatpush.bf16.msrb.mxu1 %v11602_v24  ;;  %v13556_v5 = vld [vmem:[%s15047_s30 + $0x26c] sm:$0xf]  ;;  %v12850_v38 = vor.u32 %v14156_v60, %v12847_v61  ;;  %v7790_v62 = vadd.f32 %v7789_v9, %v7777_v8  ;;  %v12373_v8 = vld [vmem:[%s15047_s30 + $0x1170] sm:$0xf] }
 0x428   : > { %8009 = vmatmul.bf16.vlgmr.msra.gmra.mxu2 %v15210_v25  ;;  %v10447_v6 = vld [vmem:[%s15047_s30 + $0x2c8] sm:$0xf0]  ;;  %v14049_v9 = vld [vmem:[%s15047_s30 + $0x11cc] sm:$0xf0] }
 0x429   : > { %8053 = vmatpush.bf16.msrb.mxu2 %v12370_v28  ;;  %8028 = vmatpush.bf16.msrb.mxu0 %v10738_v35  ;;  %v13748_v7 = vld [vmem:[%s15047_s30 + $0x86c] sm:$0xf]  ;;  %v10450_v17 = vor.u32 %v13556_v5, %v10447_v6  ;;  %v7803_v63 = vadd.f32 %v7802_v23, %v7790_v62  ;;  %v7778_v54 = vpop.f32.mrf.mxu0  ;;  %v12277_v23 = vld [vmem:[%s15047_s30 + $0x10b0] sm:$0xf] }
 0x42a   : > { %8022 = vmatmul.bf16.vlgmr.msra.gmra.mxu3 %v15214_v27  ;;  %v11215_v11 = vld [vmem:[%s15047_s30 + $0x8c8] sm:$0xf0]  ;;  %v13809_v54 = vld [vmem:[%s15047_s30 + $0xa4c] sm:$0xf0] }
 0x42b   : > { %8066 = vmatpush.bf16.msrb.mxu3 %v13138_v31  ;;  %8041 = vmatpush.bf16.msrb.mxu1 %v11506_v36  ;;  %v13940_v13 = vld [vmem:[%s15047_s30 + $0xe6c] sm:$0xf]  ;;  %v11218_v19 = vor.u32 %v13748_v7, %v11215_v11  ;;  %v7815_v31 = vpop.f32.mrf.mxu3  ;;  %v13857_v7 = vld [vmem:[%s15047_s30 + $0xbcc] sm:$0xf0] }
 0x42c   : > { %v11983_v14 = vld [vmem:[%s15047_s30 + $0xec8] sm:$0xf0]  ;;  %v7816_v34 = vadd.f32 %v7815_v31, %v7803_v63  ;;  %v10549_v41 = vld [vmem:[%s15047_s30 + $0x330] sm:$0xf] }
 0x42d   : > { %8054 = vmatpush.bf16.msrb.mxu2 %v12274_v37  ;;  %8029 = vmatpush.bf16.msrb.mxu0 %v10642_v47  ;;  %v14132_v15 = vld [vmem:[%s15047_s30 + $0x146c] sm:$0xf]  ;;  %v11986_v20 = vor.u32 %v13940_v13, %v11983_v14  ;;  %v13141_v13 = vld [vmem:[%s15047_s30 + $0x1770] sm:$0xf] }
 0x42e   : > { %v12751_v16 = vld [vmem:[%s15047_s30 + $0x14c8] sm:$0xf0]  ;;  %14408 = vtanh.f32 %v7816_v34  ;;  %v7804_v56 = vpop.f32.mrf.mxu2  ;;  %v14241_v14 = vld [vmem:[%s15047_s30 + $0x17cc] sm:$0xf0] }
 0x42f   : > { %8067 = vmatpush.bf16.msrb.mxu3 %v13042_v42  ;;  %8042 = vmatpush.bf16.msrb.mxu1 %v11410_v50  ;;  %v10351_v3 = vld [vmem:[%s15047_s30 + $0x208] sm:$0xf0]  ;;  %v12754_v24 = vor.u32 %v14132_v15, %v12751_v16  ;;  %v10453_v56 = vld [vmem:[%s15047_s30 + $0x270] sm:$0xf] }
 0x430   : > { %v13724_v22 = vld [vmem:[%s15047_s30 + $0x7ac] sm:$0xf]  ;;  %v10354_v49 = vor.u32 %v13532_v21, %v10351_v3  ;;  %v11509_v21 = vld [vmem:[%s15047_s30 + $0xab0] sm:$0xf]  ;;  %v13142_v3 = vor.u32 %v14241_v14, %v13141_v13 }
 0x431   : > { %8055 = vmatpush.bf16.msrb.mxu2 %v12178_v12  ;;  %8030 = vmatpush.bf16.msrb.mxu0 %v10546_v0  ;;  %v11119_v28 = vld [vmem:[%s15047_s30 + $0x808] sm:$0xf0]  ;;  %v13545_v13 = vld [vmem:[%s15047_s30 + $0x20c] sm:$0xf0] }
 0x432   : > { %v13916_v30 = vld [vmem:[%s15047_s30 + $0xdac] sm:$0xf]  ;;  %v11122_v35 = vor.u32 %v13724_v22, %v11119_v28  ;;  %v13833_v22 = vld [vmem:[%s15047_s30 + $0xb0c] sm:$0xf0] }
 0x433   : > { %8068 = vmatpush.bf16.msrb.mxu3 %v12946_v55  ;;  %8043 = vmatpush.bf16.msrb.mxu1 %v11314_v2  ;;  %v11887_v57 = vld [vmem:[%s15047_s30 + $0xe08] sm:$0xf0]  ;;  %v7817_v0 = vpop.f32.mrf.mxu3  ;;  %v13665_v2 = vld [vmem:[%s15047_s30 + $0x5cc] sm:$0xf0]  ;;  %v11510_v63 = vor.u32 %v13833_v22, %v11509_v21 }
 0x434   : > { %v14108_v32 = vld [vmem:[%s15047_s30 + $0x13ac] sm:$0xf]  ;;  %v11890_v36 = vor.u32 %v13916_v30, %v11887_v57  ;;  %v14409_v5 = vpop.eup %14408  ;;  %v10838_v16 = vor.u32 %v13665_v2, %v10837_v1  ;;  %v13045_v28 = vld [vmem:[%s15047_s30 + $0x16b0] sm:$0xf] }
 0x435   : > { %8056 = vmatpush.bf16.msrb.mxu2 %v12082_v4  ;;  %v12655_v33 = vld [vmem:[%s15047_s30 + $0x1408] sm:$0xf0]  ;;  %8031 = vmatpush.bf16.msrb.mxu0 %v10450_v17  ;;  %v11605_v4 = vld [vmem:[%s15047_s30 + $0xb70] sm:$0xf]  ;;  %8733 = vst [vmem:[%s15057_s7 + $0x30] sm:$0xff] %v14409_v5  ;;  %v12374_v17 = vor.u32 %v14049_v9, %v12373_v8 }
 0x436   : > { %v13508_v37 = vld [vmem:[%s15047_s30 + $0xec] sm:$0xf]  ;;  %v12658_v42 = vor.u32 %v14108_v32, %v12655_v33  ;;  %v11606_v62 = vor.u32 %v13857_v7, %v11605_v4  ;;  %v14217_v30 = vld [vmem:[%s15047_s30 + $0x170c] sm:$0xf0] }
 0x437   : > { %8069 = vmatpush.bf16.msrb.mxu3 %v12850_v38  ;;  %8044 = vmatpush.bf16.msrb.mxu1 %v11218_v19  ;;  %v10255_v39 = vld [vmem:[%s15047_s30 + $0x148] sm:$0xf0]  ;;  %v10741_v19 = vld [vmem:[%s15047_s30 + $0x4b0] sm:$0xf]  ;;  %v13046_v34 = vor.u32 %v14217_v30, %v13045_v28 }
 0x438   : > { %v13700_v40 = vld [vmem:[%s15047_s30 + $0x6ec] sm:$0xf]  ;;  %v10258_v47 = vor.u32 %v13508_v37, %v10255_v39  ;;  %v10645_v32 = vld [vmem:[%s15047_s30 + $0x3f0] sm:$0xf] }
 0x439   : > { %8057 = vmatpush.bf16.msrb.mxu2 %v11986_v20  ;;  %v11023_v43 = vld [vmem:[%s15047_s30 + $0x748] sm:$0xf0]  ;;  %8032 = vmatpush.bf16.msrb.mxu0 %v10354_v49  ;;  %v13641_v20 = vld [vmem:[%s15047_s30 + $0x50c] sm:$0xf0] }
 0x43a   : > { %v13892_v44 = vld [vmem:[%s15047_s30 + $0xcec] sm:$0xf]  ;;  %v11026_v12 = vor.u32 %v13700_v40, %v11023_v43  ;;  %v10742_v57 = vor.u32 %v13641_v20, %v10741_v19  ;;  %v13617_v33 = vld [vmem:[%s15047_s30 + $0x44c] sm:$0xf0] }
 0x43b   : > { %8070 = vmatpush.bf16.msrb.mxu3 %v12754_v24  ;;  %v11791_v45 = vld [vmem:[%s15047_s30 + $0xd48] sm:$0xf0]  ;;  %8045 = vmatpush.bf16.msrb.mxu1 %v11122_v35  ;;  %v14025_v24 = vld [vmem:[%s15047_s30 + $0x110c] sm:$0xf0]  ;;  %v10646_v40 = vor.u32 %v13617_v33, %v10645_v32 }
 0x43c   : > { %v14084_v46 = vld [vmem:[%s15047_s30 + $0x12ec] sm:$0xf]  ;;  %v11794_v51 = vor.u32 %v13892_v44, %v11791_v45  ;;  %v12278_v31 = vor.u32 %v14025_v24, %v12277_v23  ;;  %v11413_v49 = vld [vmem:[%s15047_s30 + $0x9f0] sm:$0xf] }
 0x43d   : > { %v12559_v18 = vld [vmem:[%s15047_s30 + $0x1348] sm:$0xf0]  ;;  %8058 = vmatpush.bf16.msrb.mxu2 %v11890_v36  ;;  %8033 = vmatpush.bf16.msrb.mxu0 %v10258_v47  ;;  %v12181_v35 = vld [vmem:[%s15047_s30 + $0xff0] sm:$0xf] }
 0x43e   : > { %v13484_v48 = vld [vmem:[%s15047_s30 + $0x2c] sm:$0xf]  ;;  %v12562_v58 = vor.u32 %v14084_v46, %v12559_v18  ;;  %v14001_v36 = vld [vmem:[%s15047_s30 + $0x104c] sm:$0xf0]  ;;  %v3560_v46 = vperm.slane %v15773_v10, 7 }
 0x43f   : > { %v10159_v50 = vld [vmem:[%s15047_s30 + $0x88] sm:$0xf0]  ;;  %8071 = vmatpush.bf16.msrb.mxu3 %v12658_v42  ;;  %8046 = vmatpush.bf16.msrb.mxu1 %v11026_v12  ;;  %v12949_v37 = vld [vmem:[%s15047_s30 + $0x15f0] sm:$0xf]  ;;  %v11414_v42 = vor.u32 %v13809_v54, %v11413_v49  ;;  %v12182_v43 = vor.u32 %v14001_v36, %v12181_v35 }
 0x440   : > { %v13676_v52 = vld [vmem:[%s15047_s30 + $0x62c] sm:$0xf]  ;;  %v10162_v6 = vor.u32 %v13484_v48, %v10159_v50  ;;  %v14193_v39 = vld [vmem:[%s15047_s30 + $0x164c] sm:$0xf0] }
 0x441   : > { %v10927_v53 = vld [vmem:[%s15047_s30 + $0x688] sm:$0xf0]  ;;  %8059 = vmatpush.bf16.msrb.mxu2 %v11794_v51  ;;  %v13593_v44 = vld [vmem:[%s15047_s30 + $0x38c] sm:$0xf0]  ;;  %v12950_v18 = vor.u32 %v14193_v39, %v12949_v37 }
 0x442   : > { %v13868_v55 = vld [vmem:[%s15047_s30 + $0xc2c] sm:$0xf]  ;;  %v10930_v38 = vor.u32 %v13676_v52, %v10927_v53  ;;  %8034 = vmatpush.bf16.msrb.mxu0 %v10162_v6  ;;  %v11317_v45 = vld [vmem:[%s15047_s30 + $0x930] sm:$0xf]  ;;  %v10550_v52 = vor.u32 %v13593_v44, %v10549_v41  ;;  %v7828_v53 = vpop.f32.mrf.mxu0 }
 0x443   : > { %v11695_v59 = vld [vmem:[%s15047_s30 + $0xc88] sm:$0xf0]  ;;  %8072 = vmatpush.bf16.msrb.mxu3 %v12562_v58  ;;  %v13785_v47 = vld [vmem:[%s15047_s30 + $0x98c] sm:$0xf0] }
 0x444   : > { %v14060_v60 = vld [vmem:[%s15047_s30 + $0x122c] sm:$0xf]  ;;  %v11698_v11 = vor.u32 %v13868_v55, %v11695_v59  ;;  %8047 = vmatpush.bf16.msrb.mxu1 %v10930_v38  ;;  %v12085_v48 = vld [vmem:[%s15047_s30 + $0xf30] sm:$0xf]  ;;  %v11318_v10 = vor.u32 %v13785_v47, %v11317_v45 }
 0x445   : > { %v12463_v61 = vld [vmem:[%s15047_s30 + $0x1288] sm:$0xf0]  ;;  %8035 = vmatmul.bf16.vlgmr.msrb.gmra.mxu0 %v15212_v26  ;;  %v13977_v50 = vld [vmem:[%s15047_s30 + $0xf8c] sm:$0xf0] }
 0x446   : > { %v12466_v15 = vor.u32 %v14060_v60, %v12463_v61  ;;  %8060 = vmatpush.bf16.msrb.mxu2 %v11698_v11  ;;  %8079 = vmatpush.bf16.msra.mxu0 %v10838_v16  ;;  %v12853_v12 = vld [vmem:[%s15047_s30 + $0x1530] sm:$0xf]  ;;  %v12086_v55 = vor.u32 %v13977_v50, %v12085_v48  ;;  %v7829_v60 = vadd.f32 %v7828_v53, %v3560_v46  ;;  %v7841_v61 = vpop.f32.mrf.mxu1  ;;  %v10839_v53 = vld [vmem:[%s15047_s30 + $0x5d0] sm:$0xf0] }
 0x447   : > { %8048 = vmatmul.bf16.vlgmr.msrb.gmra.mxu1 %v15216_v29  ;;  %v14169_v51 = vld [vmem:[%s15047_s30 + $0x158c] sm:$0xf0] }
 0x448   : > { %8073 = vmatpush.bf16.msrb.mxu3 %v12466_v15  ;;  %8092 = vmatpush.bf16.msra.mxu1 %v11606_v62  ;;  %v13569_v58 = vld [vmem:[%s15047_s30 + $0x2cc] sm:$0xf0]  ;;  %v12854_v0 = vor.u32 %v14169_v51, %v12853_v12  ;;  %v7842_v7 = vadd.f32 %v7841_v61, %v7829_v60  ;;  %v7854_v15 = vpop.f32.mrf.mxu2  ;;  %v7867_v21 = vpop.f32.mrf.mxu3  ;;  %v12375_v60 = vld [vmem:[%s15047_s30 + $0x11d0] sm:$0xf0] }
 0x449   : > { %8061 = vmatmul.bf16.vlgmr.msrb.gmra.mxu2 %v15210_v25  ;;  %v11221_v59 = vld [vmem:[%s15047_s30 + $0x870] sm:$0xf]  ;;  %v10454_v8 = vor.u32 %v13569_v58, %v10453_v56  ;;  %v11607_v58 = vld [vmem:[%s15047_s30 + $0xbd0] sm:$0xf0] }
 0x44a   : > { %8105 = vmatpush.bf16.msra.mxu2 %v12374_v17  ;;  %8080 = vmatpush.bf16.msra.mxu0 %v10742_v57  ;;  %v13761_v1 = vld [vmem:[%s15047_s30 + $0x8cc] sm:$0xf0]  ;;  %v7855_v20 = vadd.f32 %v7854_v15, %v7842_v7  ;;  %v7830_v28 = vpop.f32.mrf.mxu0  ;;  %v12279_v15 = vld [vmem:[%s15047_s30 + $0x1110] sm:$0xf0] }
 0x44b   : > { %8074 = vmatmul.bf16.vlgmr.msrb.gmra.mxu3 %v15214_v27  ;;  %v11989_v2 = vld [vmem:[%s15047_s30 + $0xe70] sm:$0xf]  ;;  %v11222_v9 = vor.u32 %v13761_v1, %v11221_v59  ;;  %v14037_v59 = vld [vmem:[%s15047_s30 + $0x1174] sm:$0xf] }
 0x44c   : > { %8118 = vmatpush.bf16.msra.mxu3 %v13142_v3  ;;  %8093 = vmatpush.bf16.msra.mxu1 %v11510_v63  ;;  %v13953_v4 = vld [vmem:[%s15047_s30 + $0xecc] sm:$0xf0]  ;;  %v7868_v24 = vadd.f32 %v7867_v21, %v7855_v20  ;;  %v14229_v1 = vld [vmem:[%s15047_s30 + $0x1774] sm:$0xf]  ;;  %v12378_v7 = vor.u32 %v14037_v59, %v12375_v60 }
 0x44d   : > { %v12757_v5 = vld [vmem:[%s15047_s30 + $0x1470] sm:$0xf]  ;;  %v11990_v38 = vor.u32 %v13953_v4, %v11989_v2  ;;  %v13143_v2 = vld [vmem:[%s15047_s30 + $0x17d0] sm:$0xf0] }
 0x44e   : > { %8106 = vmatpush.bf16.msra.mxu2 %v12278_v31  ;;  %8081 = vmatpush.bf16.msra.mxu0 %v10646_v40  ;;  %v14145_v6 = vld [vmem:[%s15047_s30 + $0x14cc] sm:$0xf0]  ;;  %v7843_v33 = vpop.f32.mrf.mxu1  ;;  %14410 = vtanh.f32 %v7868_v24  ;;  %v13989_v28 = vld [vmem:[%s15047_s30 + $0xff4] sm:$0xf] }
 0x44f   : > { %v10357_v11 = vld [vmem:[%s15047_s30 + $0x1b0] sm:$0xf]  ;;  %v12758_v16 = vor.u32 %v14145_v6, %v12757_v5  ;;  %v13581_v33 = vld [vmem:[%s15047_s30 + $0x334] sm:$0xf] }
 0x450   : > { %8119 = vmatpush.bf16.msra.mxu3 %v13046_v34  ;;  %8094 = vmatpush.bf16.msra.mxu1 %v11414_v42  ;;  %v11125_v14 = vld [vmem:[%s15047_s30 + $0x7b0] sm:$0xf]  ;;  %v10358_v23 = vor.u32 %v13545_v13, %v10357_v11  ;;  %v7869_v51 = vpop.f32.mrf.mxu3  ;;  %v13146_v11 = vor.u32 %v14229_v1, %v13143_v2  ;;  %v11511_v13 = vld [vmem:[%s15047_s30 + $0xb10] sm:$0xf0] }
 0x451   : > { %v13737_v62 = vld [vmem:[%s15047_s30 + $0x80c] sm:$0xf0]  ;;  %v13533_v1 = vld [vmem:[%s15047_s30 + $0x1b4] sm:$0xf] }
 0x452   : > { %8107 = vmatpush.bf16.msra.mxu2 %v12182_v43  ;;  %8082 = vmatpush.bf16.msra.mxu0 %v10550_v52  ;;  %v11893_v17 = vld [vmem:[%s15047_s30 + $0xdb0] sm:$0xf]  ;;  %v11126_v30 = vor.u32 %v13737_v62, %v11125_v14  ;;  %v13653_v52 = vld [vmem:[%s15047_s30 + $0x574] sm:$0xf] }
 0x453   : > { %v13929_v19 = vld [vmem:[%s15047_s30 + $0xe0c] sm:$0xf0]  ;;  %v10842_v5 = vor.u32 %v13653_v52, %v10839_v53  ;;  %v14013_v14 = vld [vmem:[%s15047_s30 + $0x10b4] sm:$0xf] }
 0x454   : > { %8120 = vmatpush.bf16.msra.mxu3 %v12950_v18  ;;  %8095 = vmatpush.bf16.msra.mxu1 %v11318_v10  ;;  %v12661_v3 = vld [vmem:[%s15047_s30 + $0x13b0] sm:$0xf]  ;;  %v11894_v57 = vor.u32 %v13929_v19, %v11893_v17  ;;  %v7856_v18 = vpop.f32.mrf.mxu2  ;;  %v13845_v10 = vld [vmem:[%s15047_s30 + $0xb74] sm:$0xf]  ;;  %v12282_v21 = vor.u32 %v14013_v14, %v12279_v15 }
 0x455   : > { %v14121_v22 = vld [vmem:[%s15047_s30 + $0x140c] sm:$0xf0]  ;;  %v11610_v6 = vor.u32 %v13845_v10, %v11607_v58  ;;  %v13047_v62 = vld [vmem:[%s15047_s30 + $0x1710] sm:$0xf0] }
 0x456   : > { %8108 = vmatpush.bf16.msra.mxu2 %v12086_v55  ;;  %8083 = vmatpush.bf16.msra.mxu0 %v10454_v8  ;;  %v10261_v63 = vld [vmem:[%s15047_s30 + $0xf0] sm:$0xf]  ;;  %v12662_v49 = vor.u32 %v14121_v22, %v12661_v3  ;;  %v14411_v55 = vpop.eup %14410  ;;  %v13629_v8 = vld [vmem:[%s15047_s30 + $0x4b4] sm:$0xf] }
 0x457   : > { %v13521_v31 = vld [vmem:[%s15047_s30 + $0x14c] sm:$0xf0]  ;;  %8734 = vst [vmem:[%s15057_s7 + $0x38] sm:$0xff] %v14411_v55  ;;  %v13605_v19 = vld [vmem:[%s15047_s30 + $0x3f4] sm:$0xf] }
 0x458   : > { %8121 = vmatpush.bf16.msra.mxu3 %v12854_v0  ;;  %8096 = vmatpush.bf16.msra.mxu1 %v11222_v9  ;;  %v11029_v32 = vld [vmem:[%s15047_s30 + $0x6f0] sm:$0xf]  ;;  %v10262_v39 = vor.u32 %v13521_v31, %v10261_v63  ;;  %v10743_v9 = vld [vmem:[%s15047_s30 + $0x510] sm:$0xf0] }
 0x459   : > { %v13713_v34 = vld [vmem:[%s15047_s30 + $0x74c] sm:$0xf0]  ;;  %v10746_v17 = vor.u32 %v13629_v8, %v10743_v9  ;;  %v10647_v3 = vld [vmem:[%s15047_s30 + $0x450] sm:$0xf0] }
 0x45a   : > { %8109 = vmatpush.bf16.msra.mxu2 %v11990_v38  ;;  %v11797_v54 = vld [vmem:[%s15047_s30 + $0xcf0] sm:$0xf]  ;;  %8084 = vmatpush.bf16.msra.mxu0 %v10358_v23  ;;  %v11030_v42 = vor.u32 %v13713_v34, %v11029_v32  ;;  %v13821_v38 = vld [vmem:[%s15047_s30 + $0xab4] sm:$0xf]  ;;  %v10650_v32 = vor.u32 %v13605_v19, %v10647_v3 }
 0x45b   : > { %v13905_v35 = vld [vmem:[%s15047_s30 + $0xd4c] sm:$0xf0]  ;;  %v11514_v20 = vor.u32 %v13821_v38, %v11511_v13  ;;  %v13797_v22 = vld [vmem:[%s15047_s30 + $0x9f4] sm:$0xf] }
 0x45c   : > { %8122 = vmatpush.bf16.msra.mxu3 %v12758_v16  ;;  %v12565_v36 = vld [vmem:[%s15047_s30 + $0x12f0] sm:$0xf]  ;;  %8097 = vmatpush.bf16.msra.mxu1 %v11126_v30  ;;  %v11798_v43 = vor.u32 %v13905_v35, %v11797_v54  ;;  %v14205_v16 = vld [vmem:[%s15047_s30 + $0x16b4] sm:$0xf] }
 0x45d   : > { %v14097_v37 = vld [vmem:[%s15047_s30 + $0x134c] sm:$0xf0]  ;;  %v11415_v23 = vld [vmem:[%s15047_s30 + $0xa50] sm:$0xf0]  ;;  %v13050_v24 = vor.u32 %v14205_v16, %v13047_v62 }
 0x45e   : > { %v10165_v40 = vld [vmem:[%s15047_s30 + $0x30] sm:$0xf]  ;;  %8110 = vmatpush.bf16.msra.mxu2 %v11894_v57  ;;  %v12566_v47 = vor.u32 %v14097_v37, %v12565_v36  ;;  %8085 = vmatpush.bf16.msra.mxu0 %v10262_v39  ;;  %v12183_v30 = vld [vmem:[%s15047_s30 + $0x1050] sm:$0xf0]  ;;  %v16048_v57 = vld [vmem:[%s15055_s23 + $0x8] sm:$0xff] }
 0x45f   : > { %v13497_v41 = vld [vmem:[%s15047_s30 + $0x8c] sm:$0xf0]  ;;  %v14181_v63 = vld [vmem:[%s15047_s30 + $0x15f4] sm:$0xf]  ;;  %v12186_v34 = vor.u32 %v13989_v28, %v12183_v30  ;;  %v3561_v36 = vperm.slane %v16048_v57, 0  ;;  %v7893_v51 = vpop.f32.mrf.mxu1 }
 0x460   : > { %v10933_v44 = vld [vmem:[%s15047_s30 + $0x630] sm:$0xf]  ;;  %8123 = vmatpush.bf16.msra.mxu3 %v12662_v49  ;;  %v10166_v56 = vor.u32 %v13497_v41, %v10165_v40  ;;  %8098 = vmatpush.bf16.msra.mxu1 %v11030_v42  ;;  %v12951_v31 = vld [vmem:[%s15047_s30 + $0x1650] sm:$0xf0]  ;;  %v11418_v49 = vor.u32 %v13797_v22, %v11415_v23 }
 0x461   : > { %v13689_v45 = vld [vmem:[%s15047_s30 + $0x68c] sm:$0xf0]  ;;  %v10551_v54 = vld [vmem:[%s15047_s30 + $0x390] sm:$0xf0]  ;;  %v12954_v37 = vor.u32 %v14181_v63, %v12951_v31 }
 0x462   : > { %v11701_v46 = vld [vmem:[%s15047_s30 + $0xc30] sm:$0xf]  ;;  %8111 = vmatpush.bf16.msra.mxu2 %v11798_v43  ;;  %v10934_v61 = vor.u32 %v13689_v45, %v10933_v44  ;;  %8086 = vmatpush.bf16.msra.mxu0 %v10166_v56  ;;  %v13773_v35 = vld [vmem:[%s15047_s30 + $0x934] sm:$0xf]  ;;  %v10554_v44 = vor.u32 %v13581_v33, %v10551_v54  ;;  %v7880_v45 = vpop.f32.mrf.mxu0 }
 0x463   : > { %v13881_v48 = vld [vmem:[%s15047_s30 + $0xc8c] sm:$0xf0]  ;;  %v11319_v39 = vld [vmem:[%s15047_s30 + $0x990] sm:$0xf0] }
 0x464   : > { %v12469_v50 = vld [vmem:[%s15047_s30 + $0x1230] sm:$0xf]  ;;  %v11702_v0 = vor.u32 %v13881_v48, %v11701_v46  ;;  %8124 = vmatpush.bf16.msra.mxu3 %v12566_v47  ;;  %8099 = vmatpush.bf16.msra.mxu1 %v10934_v61  ;;  %v13965_v40 = vld [vmem:[%s15047_s30 + $0xf34] sm:$0xf]  ;;  %v11322_v46 = vor.u32 %v13773_v35, %v11319_v39 }
 0x465   : > { %v14073_v12 = vld [vmem:[%s15047_s30 + $0x128c] sm:$0xf0]  ;;  %8087 = vmatmul.bf16.vlgmr.msra.gmra.mxu0 %v15212_v26  ;;  %v12087_v41 = vld [vmem:[%s15047_s30 + $0xf90] sm:$0xf0] }
 0x466   : > { %v12470_v4 = vor.u32 %v14073_v12, %v12469_v50  ;;  %8112 = vmatpush.bf16.msra.mxu2 %v11702_v0  ;;  %8131 = vmatpush.bf16.msrb.mxu0 %v10842_v5  ;;  %v14157_v42 = vld [vmem:[%s15047_s30 + $0x1534] sm:$0xf]  ;;  %v12090_v18 = vor.u32 %v13965_v40, %v12087_v41  ;;  %v7881_v12 = vadd.f32 %v7880_v45, %v3561_v36  ;;  %v10845_v45 = vld [vmem:[%s15047_s30 + $0x578] sm:$0xf] }
 0x467   : > { %8100 = vmatmul.bf16.vlgmr.msra.gmra.mxu1 %v15216_v29  ;;  %v12855_v43 = vld [vmem:[%s15047_s30 + $0x1590] sm:$0xf0]  ;;  %v7906_v5 = vpop.f32.mrf.mxu2  ;;  %v7895_v22 = vpop.f32.mrf.mxu1 }
 0x468   : > { %8125 = vmatpush.bf16.msra.mxu3 %v12470_v4  ;;  %8144 = vmatpush.bf16.msrb.mxu1 %v11610_v6  ;;  %v13557_v47 = vld [vmem:[%s15047_s30 + $0x274] sm:$0xf]  ;;  %v12858_v52 = vor.u32 %v14157_v42, %v12855_v43  ;;  %v7894_v59 = vadd.f32 %v7893_v51, %v7881_v12  ;;  %v12381_v12 = vld [vmem:[%s15047_s30 + $0x1178] sm:$0xf] }
 0x469   : > { %8113 = vmatmul.bf16.vlgmr.msra.gmra.mxu2 %v15210_v25  ;;  %v10455_v48 = vld [vmem:[%s15047_s30 + $0x2d0] sm:$0xf0]  ;;  %v14050_v51 = vld [vmem:[%s15047_s30 + $0x11d4] sm:$0xf0] }
 0x46a   : > { %8157 = vmatpush.bf16.msrb.mxu2 %v12378_v7  ;;  %8132 = vmatpush.bf16.msrb.mxu0 %v10746_v17  ;;  %v13749_v50 = vld [vmem:[%s15047_s30 + $0x874] sm:$0xf]  ;;  %v10458_v60 = vor.u32 %v13557_v47, %v10455_v48  ;;  %v7907_v38 = vadd.f32 %v7906_v5, %v7894_v59  ;;  %v7882_v62 = vpop.f32.mrf.mxu0  ;;  %v12285_v5 = vld [vmem:[%s15047_s30 + $0x10b8] sm:$0xf] }
 0x46b   : > { %8126 = vmatmul.bf16.vlgmr.msra.gmra.mxu3 %v15214_v27  ;;  %v11223_v53 = vld [vmem:[%s15047_s30 + $0x8d0] sm:$0xf0]  ;;  %v13810_v62 = vld [vmem:[%s15047_s30 + $0xa54] sm:$0xf0] }
 0x46c   : > { %8170 = vmatpush.bf16.msrb.mxu3 %v13146_v11  ;;  %8145 = vmatpush.bf16.msrb.mxu1 %v11514_v20  ;;  %v13941_v10 = vld [vmem:[%s15047_s30 + $0xe74] sm:$0xf]  ;;  %v11226_v61 = vor.u32 %v13749_v50, %v11223_v53  ;;  %v7919_v11 = vpop.f32.mrf.mxu3  ;;  %v13858_v50 = vld [vmem:[%s15047_s30 + $0xbd4] sm:$0xf0] }
 0x46d   : > { %v11991_v55 = vld [vmem:[%s15047_s30 + $0xed0] sm:$0xf0]  ;;  %v7920_v16 = vadd.f32 %v7919_v11, %v7907_v38  ;;  %v10557_v22 = vld [vmem:[%s15047_s30 + $0x338] sm:$0xf] }
 0x46e   : > { %8158 = vmatpush.bf16.msrb.mxu2 %v12282_v21  ;;  %8133 = vmatpush.bf16.msrb.mxu0 %v10650_v32  ;;  %v14133_v56 = vld [vmem:[%s15047_s30 + $0x1474] sm:$0xf]  ;;  %v11994_v0 = vor.u32 %v13941_v10, %v11991_v55  ;;  %v13149_v10 = vld [vmem:[%s15047_s30 + $0x1778] sm:$0xf] }
 0x46f   : > { %v12759_v58 = vld [vmem:[%s15047_s30 + $0x14d0] sm:$0xf0]  ;;  %14412 = vtanh.f32 %v7920_v16  ;;  %v7908_v39 = vpop.f32.mrf.mxu2  ;;  %v14242_v55 = vld [vmem:[%s15047_s30 + $0x17d4] sm:$0xf0] }
 0x470   : > { %8171 = vmatpush.bf16.msrb.mxu3 %v13050_v24  ;;  %8146 = vmatpush.bf16.msrb.mxu1 %v11418_v49  ;;  %v10359_v2 = vld [vmem:[%s15047_s30 + $0x210] sm:$0xf0]  ;;  %v12762_v6 = vor.u32 %v14133_v56, %v12759_v58 }
 0x471   : > { %v13725_v4 = vld [vmem:[%s15047_s30 + $0x7b4] sm:$0xf]  ;;  %v10362_v15 = vor.u32 %v13533_v1, %v10359_v2  ;;  %v11517_v1 = vld [vmem:[%s15047_s30 + $0xab8] sm:$0xf]  ;;  %v13150_v2 = vor.u32 %v14242_v55, %v13149_v10 }
 0x472   : > { %8159 = vmatpush.bf16.msrb.mxu2 %v12186_v34  ;;  %8134 = vmatpush.bf16.msrb.mxu0 %v10554_v44  ;;  %v11127_v7 = vld [vmem:[%s15047_s30 + $0x810] sm:$0xf0]  ;;  %v10365_v10 = vld [vmem:[%s15047_s30 + $0x1b8] sm:$0xf] }
 0x473   : > { %v13917_v8 = vld [vmem:[%s15047_s30 + $0xdb4] sm:$0xf]  ;;  %v11130_v17 = vor.u32 %v13725_v4, %v11127_v7  ;;  %v13834_v4 = vld [vmem:[%s15047_s30 + $0xb14] sm:$0xf0] }
 0x474   : > { %8172 = vmatpush.bf16.msrb.mxu3 %v12954_v37  ;;  %8147 = vmatpush.bf16.msrb.mxu1 %v11322_v46  ;;  %v11895_v9 = vld [vmem:[%s15047_s30 + $0xe10] sm:$0xf0]  ;;  %v7921_v44 = vpop.f32.mrf.mxu3  ;;  %v13666_v46 = vld [vmem:[%s15047_s30 + $0x5d4] sm:$0xf0]  ;;  %v11518_v38 = vor.u32 %v13834_v4, %v11517_v1 }
 0x475   : > { %v14109_v13 = vld [vmem:[%s15047_s30 + $0x13b4] sm:$0xf]  ;;  %v11898_v19 = vor.u32 %v13917_v8, %v11895_v9  ;;  %v14413_v47 = vpop.eup %14412  ;;  %v10846_v58 = vor.u32 %v13666_v46, %v10845_v45  ;;  %v13053_v7 = vld [vmem:[%s15047_s30 + $0x16b8] sm:$0xf] }
 0x476   : > { %8160 = vmatpush.bf16.msrb.mxu2 %v12090_v18  ;;  %v12663_v14 = vld [vmem:[%s15047_s30 + $0x1410] sm:$0xf0]  ;;  %8135 = vmatpush.bf16.msrb.mxu0 %v10458_v60  ;;  %v11613_v18 = vld [vmem:[%s15047_s30 + $0xb78] sm:$0xf]  ;;  %8735 = vst [vmem:[%s15057_s7 + $0x40] sm:$0xff] %v14413_v47  ;;  %v12382_v60 = vor.u32 %v14050_v51, %v12381_v12 }
 0x477   : > { %v13509_v20 = vld [vmem:[%s15047_s30 + $0xf4] sm:$0xf]  ;;  %v12666_v23 = vor.u32 %v14109_v13, %v12663_v14  ;;  %v11614_v59 = vor.u32 %v13858_v50, %v11613_v18  ;;  %v14218_v8 = vld [vmem:[%s15047_s30 + $0x1714] sm:$0xf0] }
 0x478   : > { %8173 = vmatpush.bf16.msrb.mxu3 %v12858_v52  ;;  %8148 = vmatpush.bf16.msrb.mxu1 %v11226_v61  ;;  %v10263_v21 = vld [vmem:[%s15047_s30 + $0x150] sm:$0xf0]  ;;  %v10749_v61 = vld [vmem:[%s15047_s30 + $0x4b8] sm:$0xf]  ;;  %v13054_v16 = vor.u32 %v14218_v8, %v13053_v7 }
 0x479   : > { %v13701_v3 = vld [vmem:[%s15047_s30 + $0x6f4] sm:$0xf]  ;;  %v10266_v32 = vor.u32 %v13509_v20, %v10263_v21  ;;  %v10653_v13 = vld [vmem:[%s15047_s30 + $0x3f8] sm:$0xf] }
 0x47a   : > { %8161 = vmatpush.bf16.msrb.mxu2 %v11994_v0  ;;  %v11031_v24 = vld [vmem:[%s15047_s30 + $0x750] sm:$0xf0]  ;;  %8136 = vmatpush.bf16.msrb.mxu0 %v10362_v15  ;;  %v13642_v0 = vld [vmem:[%s15047_s30 + $0x514] sm:$0xf0] }
 0x47b   : > { %v13893_v28 = vld [vmem:[%s15047_s30 + $0xcf4] sm:$0xf]  ;;  %v11034_v34 = vor.u32 %v13701_v3, %v11031_v24  ;;  %v10750_v9 = vor.u32 %v13642_v0, %v10749_v61  ;;  %v13618_v14 = vld [vmem:[%s15047_s30 + $0x454] sm:$0xf0] }
 0x47c   : > { %8174 = vmatpush.bf16.msrb.mxu3 %v12762_v6  ;;  %v11799_v30 = vld [vmem:[%s15047_s30 + $0xd50] sm:$0xf0]  ;;  %8149 = vmatpush.bf16.msrb.mxu1 %v11130_v17  ;;  %v14026_v6 = vld [vmem:[%s15047_s30 + $0x1114] sm:$0xf0]  ;;  %v10654_v3 = vor.u32 %v13618_v14, %v10653_v13 }
 0x47d   : > { %v14085_v63 = vld [vmem:[%s15047_s30 + $0x12f4] sm:$0xf]  ;;  %v11802_v54 = vor.u32 %v13893_v28, %v11799_v30  ;;  %v12286_v11 = vor.u32 %v14026_v6, %v12285_v5  ;;  %v11421_v15 = vld [vmem:[%s15047_s30 + $0x9f8] sm:$0xf] }
 0x47e   : > { %v12567_v31 = vld [vmem:[%s15047_s30 + $0x1350] sm:$0xf0]  ;;  %8162 = vmatpush.bf16.msrb.mxu2 %v11898_v19  ;;  %8137 = vmatpush.bf16.msrb.mxu0 %v10266_v32  ;;  %v12189_v17 = vld [vmem:[%s15047_s30 + $0xff8] sm:$0xf] }
 0x47f   : > { %v13485_v33 = vld [vmem:[%s15047_s30 + $0x34] sm:$0xf]  ;;  %v12570_v40 = vor.u32 %v14085_v63, %v12567_v31  ;;  %v14002_v19 = vld [vmem:[%s15047_s30 + $0x1054] sm:$0xf0]  ;;  %v3562_v63 = vperm.slane %v16048_v57, 1 }
 0x480   : > { %v10167_v49 = vld [vmem:[%s15047_s30 + $0x90] sm:$0xf0]  ;;  %8175 = vmatpush.bf16.msrb.mxu3 %v12666_v23  ;;  %8150 = vmatpush.bf16.msrb.mxu1 %v11034_v34  ;;  %v12957_v20 = vld [vmem:[%s15047_s30 + $0x15f8] sm:$0xf]  ;;  %v11422_v23 = vor.u32 %v13810_v62, %v11421_v15  ;;  %v12190_v24 = vor.u32 %v14002_v19, %v12189_v17 }
 0x481   : > { %v13677_v35 = vld [vmem:[%s15047_s30 + $0x634] sm:$0xf]  ;;  %v10170_v48 = vor.u32 %v13485_v33, %v10167_v49  ;;  %v14194_v21 = vld [vmem:[%s15047_s30 + $0x1654] sm:$0xf0]  ;;  %v7945_v44 = vpop.f32.mrf.mxu1 }
 0x482   : > { %v10935_v36 = vld [vmem:[%s15047_s30 + $0x690] sm:$0xf0]  ;;  %8163 = vmatpush.bf16.msrb.mxu2 %v11802_v54  ;;  %v13594_v28 = vld [vmem:[%s15047_s30 + $0x394] sm:$0xf0]  ;;  %v12958_v31 = vor.u32 %v14194_v21, %v12957_v20 }
 0x483   : > { %v13869_v37 = vld [vmem:[%s15047_s30 + $0xc34] sm:$0xf]  ;;  %v10938_v52 = vor.u32 %v13677_v35, %v10935_v36  ;;  %8138 = vmatpush.bf16.msrb.mxu0 %v10170_v48  ;;  %v11325_v30 = vld [vmem:[%s15047_s30 + $0x938] sm:$0xf]  ;;  %v10558_v35 = vor.u32 %v13594_v28, %v10557_v22  ;;  %v7932_v36 = vpop.f32.mrf.mxu0 }
 0x484   : > { %v11703_v41 = vld [vmem:[%s15047_s30 + $0xc90] sm:$0xf0]  ;;  %8176 = vmatpush.bf16.msrb.mxu3 %v12570_v40  ;;  %v13786_v32 = vld [vmem:[%s15047_s30 + $0x994] sm:$0xf0] }
 0x485   : > { %v14061_v42 = vld [vmem:[%s15047_s30 + $0x1234] sm:$0xf]  ;;  %v11706_v53 = vor.u32 %v13869_v37, %v11703_v41  ;;  %8151 = vmatpush.bf16.msrb.mxu1 %v10938_v52  ;;  %v12093_v33 = vld [vmem:[%s15047_s30 + $0xf38] sm:$0xf]  ;;  %v11326_v37 = vor.u32 %v13786_v32, %v11325_v30 }
 0x486   : > { %v12471_v43 = vld [vmem:[%s15047_s30 + $0x1290] sm:$0xf0]  ;;  %8139 = vmatmul.bf16.vlgmr.msrb.gmra.mxu0 %v15212_v26  ;;  %v13978_v49 = vld [vmem:[%s15047_s30 + $0xf94] sm:$0xf0] }
 0x487   : > { %v12474_v56 = vor.u32 %v14061_v42, %v12471_v43  ;;  %8164 = vmatpush.bf16.msrb.mxu2 %v11706_v53  ;;  %8183 = vmatpush.bf16.msra.mxu0 %v10846_v58  ;;  %v12861_v34 = vld [vmem:[%s15047_s30 + $0x1538] sm:$0xf]  ;;  %v12094_v39 = vor.u32 %v13978_v49, %v12093_v33  ;;  %v7933_v43 = vadd.f32 %v7932_v36, %v3562_v63  ;;  %v13654_v36 = vld [vmem:[%s15047_s30 + $0x57c] sm:$0xf] }
 0x488   : > { %8152 = vmatmul.bf16.vlgmr.msrb.gmra.mxu1 %v15216_v29  ;;  %v14170_v54 = vld [vmem:[%s15047_s30 + $0x1594] sm:$0xf0] }
 0x489   : > { %8177 = vmatpush.bf16.msrb.mxu3 %v12474_v56  ;;  %8196 = vmatpush.bf16.msra.mxu1 %v11614_v59  ;;  %v10461_v40 = vld [vmem:[%s15047_s30 + $0x278] sm:$0xf]  ;;  %v12862_v45 = vor.u32 %v14170_v54, %v12861_v34  ;;  %v7946_v12 = vadd.f32 %v7945_v44, %v7933_v43  ;;  %v7958_v58 = vpop.f32.mrf.mxu2  ;;  %v7947_v15 = vpop.f32.mrf.mxu1  ;;  %v14038_v43 = vld [vmem:[%s15047_s30 + $0x117c] sm:$0xf] }
 0x48a   : > { %8165 = vmatmul.bf16.vlgmr.msrb.gmra.mxu2 %v15210_v25  ;;  %v13570_v41 = vld [vmem:[%s15047_s30 + $0x2d4] sm:$0xf0]  ;;  %v12383_v44 = vld [vmem:[%s15047_s30 + $0x11d8] sm:$0xf0] }
 0x48b   : > { %8209 = vmatpush.bf16.msra.mxu2 %v12382_v60  ;;  %8184 = vmatpush.bf16.msra.mxu0 %v10750_v9  ;;  %v11229_v42 = vld [vmem:[%s15047_s30 + $0x878] sm:$0xf]  ;;  %v10462_v51 = vor.u32 %v13570_v41, %v10461_v40  ;;  %v7959_v1 = vadd.f32 %v7958_v58, %v7946_v12  ;;  %v7934_v8 = vpop.f32.mrf.mxu0  ;;  %v14014_v58 = vld [vmem:[%s15047_s30 + $0x10bc] sm:$0xf] }
 0x48c   : > { %8178 = vmatmul.bf16.vlgmr.msrb.gmra.mxu3 %v15214_v27  ;;  %v13762_v46 = vld [vmem:[%s15047_s30 + $0x8d4] sm:$0xf0]  ;;  %v11423_v8 = vld [vmem:[%s15047_s30 + $0xa58] sm:$0xf0] }
 0x48d   : > { %8222 = vmatpush.bf16.msra.mxu3 %v13150_v2  ;;  %8197 = vmatpush.bf16.msra.mxu1 %v11518_v38  ;;  %v11997_v18 = vld [vmem:[%s15047_s30 + $0xe78] sm:$0xf]  ;;  %v11230_v52 = vor.u32 %v13762_v46, %v11229_v42  ;;  %v7971_v2 = vpop.f32.mrf.mxu3  ;;  %v11615_v42 = vld [vmem:[%s15047_s30 + $0xbd8] sm:$0xf0] }
 0x48e   : > { %v13954_v47 = vld [vmem:[%s15047_s30 + $0xed4] sm:$0xf0]  ;;  %v7972_v7 = vadd.f32 %v7971_v2, %v7959_v1  ;;  %v13582_v15 = vld [vmem:[%s15047_s30 + $0x33c] sm:$0xf] }
 0x48f   : > { %8210 = vmatpush.bf16.msra.mxu2 %v12286_v11  ;;  %8185 = vmatpush.bf16.msra.mxu0 %v10654_v3  ;;  %v12765_v48 = vld [vmem:[%s15047_s30 + $0x1478] sm:$0xf]  ;;  %v11998_v53 = vor.u32 %v13954_v47, %v11997_v18  ;;  %v14230_v18 = vld [vmem:[%s15047_s30 + $0x177c] sm:$0xf] }
 0x490   : > { %v14146_v50 = vld [vmem:[%s15047_s30 + $0x14d4] sm:$0xf0]  ;;  %14414 = vtanh.f32 %v7972_v7  ;;  %v13151_v47 = vld [vmem:[%s15047_s30 + $0x17d8] sm:$0xf0] }
 0x491   : > { %8223 = vmatpush.bf16.msra.mxu3 %v13054_v16  ;;  %8198 = vmatpush.bf16.msra.mxu1 %v11422_v23  ;;  %v13546_v55 = vld [vmem:[%s15047_s30 + $0x214] sm:$0xf0]  ;;  %v12766_v59 = vor.u32 %v14146_v50, %v12765_v48  ;;  %v7960_v32 = vpop.f32.mrf.mxu2 }
 0x492   : > { %v11133_v56 = vld [vmem:[%s15047_s30 + $0x7b8] sm:$0xf]  ;;  %v10366_v6 = vor.u32 %v13546_v55, %v10365_v10  ;;  %v13822_v10 = vld [vmem:[%s15047_s30 + $0xabc] sm:$0xf]  ;;  %v13154_v55 = vor.u32 %v14230_v18, %v13151_v47 }
 0x493   : > { %8211 = vmatpush.bf16.msra.mxu2 %v12190_v24  ;;  %8186 = vmatpush.bf16.msra.mxu0 %v10558_v35  ;;  %v13738_v60 = vld [vmem:[%s15047_s30 + $0x814] sm:$0xf0]  ;;  %v13534_v18 = vld [vmem:[%s15047_s30 + $0x1bc] sm:$0xf] }
 0x494   : > { %v11901_v61 = vld [vmem:[%s15047_s30 + $0xdb8] sm:$0xf]  ;;  %v11134_v9 = vor.u32 %v13738_v60, %v11133_v56  ;;  %v11519_v56 = vld [vmem:[%s15047_s30 + $0xb18] sm:$0xf0] }
 0x495   : > { %8224 = vmatpush.bf16.msra.mxu3 %v12958_v31  ;;  %8199 = vmatpush.bf16.msra.mxu1 %v11326_v37  ;;  %v13930_v0 = vld [vmem:[%s15047_s30 + $0xe14] sm:$0xf0]  ;;  %v7973_v35 = vpop.f32.mrf.mxu3  ;;  %v10847_v37 = vld [vmem:[%s15047_s30 + $0x5d8] sm:$0xf0]  ;;  %v11522_v1 = vor.u32 %v13822_v10, %v11519_v56 }
 0x496   : > { %v12669_v4 = vld [vmem:[%s15047_s30 + $0x13b8] sm:$0xf]  ;;  %v11902_v38 = vor.u32 %v13930_v0, %v11901_v61  ;;  %v14415_v40 = vpop.eup %14414  ;;  %v10850_v50 = vor.u32 %v13654_v36, %v10847_v37  ;;  %v14206_v60 = vld [vmem:[%s15047_s30 + $0x16bc] sm:$0xf] }
 0x497   : > { %8212 = vmatpush.bf16.msra.mxu2 %v12094_v39  ;;  %v14122_v5 = vld [vmem:[%s15047_s30 + $0x1414] sm:$0xf0]  ;;  %8187 = vmatpush.bf16.msra.mxu0 %v10462_v51  ;;  %v13846_v39 = vld [vmem:[%s15047_s30 + $0xb7c] sm:$0xf]  ;;  %8736 = vst [vmem:[%s15057_s7 + $0x48] sm:$0xff] %v14415_v40  ;;  %v12386_v51 = vor.u32 %v14038_v43, %v12383_v44 }
 0x498   : > { %v10269_v11 = vld [vmem:[%s15047_s30 + $0xf8] sm:$0xf]  ;;  %v12670_v16 = vor.u32 %v14122_v5, %v12669_v4  ;;  %v11618_v12 = vor.u32 %v13846_v39, %v11615_v42  ;;  %v13055_v61 = vld [vmem:[%s15047_s30 + $0x1718] sm:$0xf0] }
 0x499   : > { %8225 = vmatpush.bf16.msra.mxu3 %v12862_v45  ;;  %8200 = vmatpush.bf16.msra.mxu1 %v11230_v52  ;;  %v13522_v13 = vld [vmem:[%s15047_s30 + $0x154] sm:$0xf0]  ;;  %v13630_v52 = vld [vmem:[%s15047_s30 + $0x4bc] sm:$0xf]  ;;  %v13058_v7 = vor.u32 %v14206_v60, %v13055_v61 }
 0x49a   : > { %v11037_v14 = vld [vmem:[%s15047_s30 + $0x6f8] sm:$0xf]  ;;  %v10270_v3 = vor.u32 %v13522_v13, %v10269_v11  ;;  %v13606_v4 = vld [vmem:[%s15047_s30 + $0x3fc] sm:$0xf] }
 0x49b   : > { %8213 = vmatpush.bf16.msra.mxu2 %v11998_v53  ;;  %v13714_v62 = vld [vmem:[%s15047_s30 + $0x754] sm:$0xf0]  ;;  %8188 = vmatpush.bf16.msra.mxu0 %v10366_v6  ;;  %v10751_v53 = vld [vmem:[%s15047_s30 + $0x518] sm:$0xf0] }
 0x49c   : > { %v11805_v17 = vld [vmem:[%s15047_s30 + $0xcf8] sm:$0xf]  ;;  %v11038_v24 = vor.u32 %v13714_v62, %v11037_v14  ;;  %v10754_v0 = vor.u32 %v13630_v52, %v10751_v53  ;;  %v10655_v5 = vld [vmem:[%s15047_s30 + $0x458] sm:$0xf0] }
 0x49d   : > { %8226 = vmatpush.bf16.msra.mxu3 %v12766_v59  ;;  %v13906_v19 = vld [vmem:[%s15047_s30 + $0xd54] sm:$0xf0]  ;;  %8201 = vmatpush.bf16.msra.mxu1 %v11134_v9  ;;  %v12287_v59 = vld [vmem:[%s15047_s30 + $0x1118] sm:$0xf0]  ;;  %v10658_v14 = vor.u32 %v13606_v4, %v10655_v5 }
 0x49e   : > { %v12573_v20 = vld [vmem:[%s15047_s30 + $0x12f8] sm:$0xf]  ;;  %v11806_v28 = vor.u32 %v13906_v19, %v11805_v17  ;;  %v12290_v2 = vor.u32 %v14014_v58, %v12287_v59  ;;  %v13798_v6 = vld [vmem:[%s15047_s30 + $0x9fc] sm:$0xf] }
 0x49f   : > { %v14098_v21 = vld [vmem:[%s15047_s30 + $0x1354] sm:$0xf0]  ;;  %8214 = vmatpush.bf16.msra.mxu2 %v11902_v38  ;;  %8189 = vmatpush.bf16.msra.mxu0 %v10270_v3  ;;  %v13990_v9 = vld [vmem:[%s15047_s30 + $0xffc] sm:$0xf] }
 0x4a0   : > { %v10173_v22 = vld [vmem:[%s15047_s30 + $0x38] sm:$0xf]  ;;  %v12574_v33 = vor.u32 %v14098_v21, %v12573_v20  ;;  %v12191_v38 = vld [vmem:[%s15047_s30 + $0x1058] sm:$0xf0]  ;;  %v3563_v20 = vperm.slane %v16048_v57, 2 }
 0x4a1   : > { %v13498_v23 = vld [vmem:[%s15047_s30 + $0x94] sm:$0xf0]  ;;  %8227 = vmatpush.bf16.msra.mxu3 %v12670_v16  ;;  %8202 = vmatpush.bf16.msra.mxu1 %v11038_v24  ;;  %v14182_v11 = vld [vmem:[%s15047_s30 + $0x15fc] sm:$0xf]  ;;  %v11426_v16 = vor.u32 %v13798_v6, %v11423_v8  ;;  %v12194_v62 = vor.u32 %v13990_v9, %v12191_v38 }
 0x4a2   : > { %v10941_v30 = vld [vmem:[%s15047_s30 + $0x638] sm:$0xf]  ;;  %v10174_v41 = vor.u32 %v13498_v23, %v10173_v22  ;;  %v12959_v13 = vld [vmem:[%s15047_s30 + $0x1658] sm:$0xf0] }
 0x4a3   : > { %v13690_v63 = vld [vmem:[%s15047_s30 + $0x694] sm:$0xf0]  ;;  %8215 = vmatpush.bf16.msra.mxu2 %v11806_v28  ;;  %v10559_v17 = vld [vmem:[%s15047_s30 + $0x398] sm:$0xf0]  ;;  %v12962_v21 = vor.u32 %v14182_v11, %v12959_v13  ;;  %v7997_v35 = vpop.f32.mrf.mxu1 }
 0x4a4   : > { %v11709_v31 = vld [vmem:[%s15047_s30 + $0xc38] sm:$0xf]  ;;  %v10942_v45 = vor.u32 %v13690_v63, %v10941_v30  ;;  %8190 = vmatpush.bf16.msra.mxu0 %v10174_v41  ;;  %v13774_v19 = vld [vmem:[%s15047_s30 + $0x93c] sm:$0xf]  ;;  %v10562_v30 = vor.u32 %v13582_v15, %v10559_v17  ;;  %v7984_v63 = vpop.f32.mrf.mxu0 }
 0x4a5   : > { %v13882_v49 = vld [vmem:[%s15047_s30 + $0xc94] sm:$0xf0]  ;;  %8228 = vmatpush.bf16.msra.mxu3 %v12574_v33  ;;  %v11327_v3 = vld [vmem:[%s15047_s30 + $0x998] sm:$0xf0] }
 0x4a6   : > { %v12477_v34 = vld [vmem:[%s15047_s30 + $0x1238] sm:$0xf]  ;;  %v11710_v46 = vor.u32 %v13882_v49, %v11709_v31  ;;  %8203 = vmatpush.bf16.msra.mxu1 %v10942_v45  ;;  %v13966_v22 = vld [vmem:[%s15047_s30 + $0xf3c] sm:$0xf]  ;;  %v11330_v31 = vor.u32 %v13774_v19, %v11327_v3 }
 0x4a7   : > { %v14074_v54 = vld [vmem:[%s15047_s30 + $0x1294] sm:$0xf0]  ;;  %8191 = vmatmul.bf16.vlgmr.msra.gmra.mxu0 %v15212_v26  ;;  %v12095_v23 = vld [vmem:[%s15047_s30 + $0xf98] sm:$0xf0] }
 0x4a8   : > { %v12478_v48 = vor.u32 %v14074_v54, %v12477_v34  ;;  %8216 = vmatpush.bf16.msra.mxu2 %v11710_v46  ;;  %8235 = vmatpush.bf16.msrb.mxu0 %v10850_v50  ;;  %v14158_v24 = vld [vmem:[%s15047_s30 + $0x153c] sm:$0xf]  ;;  %v12098_v32 = vor.u32 %v13966_v22, %v12095_v23  ;;  %v7985_v54 = vadd.f32 %v7984_v63, %v3563_v20  ;;  %v10853_v63 = vld [vmem:[%s15047_s30 + $0x580] sm:$0xf] }
 0x4a9   : > { %8204 = vmatmul.bf16.vlgmr.msra.gmra.mxu1 %v15216_v29  ;;  %v12863_v28 = vld [vmem:[%s15047_s30 + $0x1598] sm:$0xf0] }
 0x4aa   : > { %8229 = vmatpush.bf16.msra.mxu3 %v12478_v48  ;;  %8248 = vmatpush.bf16.msrb.mxu1 %v11618_v12  ;;  %v13558_v33 = vld [vmem:[%s15047_s30 + $0x27c] sm:$0xf]  ;;  %v12866_v36 = vor.u32 %v14158_v24, %v12863_v28  ;;  %v7998_v43 = vadd.f32 %v7997_v35, %v7985_v54  ;;  %v12389_v54 = vld [vmem:[%s15047_s30 + $0x1180] sm:$0xf] }
 0x4ab   : > { %8217 = vmatmul.bf16.vlgmr.msra.gmra.mxu2 %v15210_v25  ;;  %v10463_v49 = vld [vmem:[%s15047_s30 + $0x2d8] sm:$0xf0]  ;;  %v8010_v50 = vpop.f32.mrf.mxu2  ;;  %v7999_v6 = vpop.f32.mrf.mxu1  ;;  %v14051_v35 = vld [vmem:[%s15047_s30 + $0x11dc] sm:$0xf0] }
 0x4ac   : > { %8261 = vmatpush.bf16.msrb.mxu2 %v12386_v51  ;;  %8236 = vmatpush.bf16.msrb.mxu0 %v10754_v0  ;;  %v13750_v34 = vld [vmem:[%s15047_s30 + $0x87c] sm:$0xf]  ;;  %v10466_v44 = vor.u32 %v13558_v33, %v10463_v49  ;;  %v8011_v10 = vadd.f32 %v8010_v50, %v7998_v43  ;;  %v7986_v61 = vpop.f32.mrf.mxu0  ;;  %v12293_v50 = vld [vmem:[%s15047_s30 + $0x10c0] sm:$0xf] }
 0x4ad   : > { %8230 = vmatmul.bf16.vlgmr.msra.gmra.mxu3 %v15214_v27  ;;  %v11231_v37 = vld [vmem:[%s15047_s30 + $0x8d8] sm:$0xf0]  ;;  %v13811_v61 = vld [vmem:[%s15047_s30 + $0xa5c] sm:$0xf0] }
 0x4ae   : > { %8274 = vmatpush.bf16.msrb.mxu3 %v13154_v55  ;;  %8249 = vmatpush.bf16.msrb.mxu1 %v11522_v1  ;;  %v13942_v39 = vld [vmem:[%s15047_s30 + $0xe7c] sm:$0xf]  ;;  %v11234_v45 = vor.u32 %v13750_v34, %v11231_v37  ;;  %v8023_v55 = vpop.f32.mrf.mxu3  ;;  %v13859_v34 = vld [vmem:[%s15047_s30 + $0xbdc] sm:$0xf0] }
 0x4af   : > { %v11999_v40 = vld [vmem:[%s15047_s30 + $0xed8] sm:$0xf0]  ;;  %v8024_v60 = vadd.f32 %v8023_v55, %v8011_v10  ;;  %v10565_v6 = vld [vmem:[%s15047_s30 + $0x340] sm:$0xf] }
 0x4b0   : > { %8262 = vmatpush.bf16.msrb.mxu2 %v12290_v2  ;;  %8237 = vmatpush.bf16.msrb.mxu0 %v10658_v14  ;;  %v14134_v41 = vld [vmem:[%s15047_s30 + $0x147c] sm:$0xf]  ;;  %v12002_v46 = vor.u32 %v13942_v39, %v11999_v40  ;;  %v13157_v39 = vld [vmem:[%s15047_s30 + $0x1780] sm:$0xf] }
 0x4b1   : > { %v12767_v42 = vld [vmem:[%s15047_s30 + $0x14d8] sm:$0xf0]  ;;  %14416 = vtanh.f32 %v8024_v60  ;;  %v14243_v40 = vld [vmem:[%s15047_s30 + $0x17dc] sm:$0xf0] }
 0x4b2   : > { %8275 = vmatpush.bf16.msrb.mxu3 %v13058_v7  ;;  %8250 = vmatpush.bf16.msrb.mxu1 %v11426_v16  ;;  %v10367_v47 = vld [vmem:[%s15047_s30 + $0x218] sm:$0xf0]  ;;  %v12770_v12 = vor.u32 %v14134_v41, %v12767_v42 }
 0x4b3   : > { %v13726_v48 = vld [vmem:[%s15047_s30 + $0x7bc] sm:$0xf]  ;;  %v10370_v59 = vor.u32 %v13534_v18, %v10367_v47  ;;  %v8012_v3 = vpop.f32.mrf.mxu2  ;;  %v11525_v18 = vld [vmem:[%s15047_s30 + $0xac0] sm:$0xf]  ;;  %v13158_v47 = vor.u32 %v14243_v40, %v13157_v39 }
 0x4b4   : > { %8263 = vmatpush.bf16.msrb.mxu2 %v12194_v62  ;;  %8238 = vmatpush.bf16.msrb.mxu0 %v10562_v30  ;;  %v11135_v51 = vld [vmem:[%s15047_s30 + $0x818] sm:$0xf0]  ;;  %v10469_v3 = vld [vmem:[%s15047_s30 + $0x280] sm:$0xf] }
 0x4b5   : > { %v13918_v52 = vld [vmem:[%s15047_s30 + $0xdbc] sm:$0xf]  ;;  %v11138_v0 = vor.u32 %v13726_v48, %v11135_v51  ;;  %v13835_v48 = vld [vmem:[%s15047_s30 + $0xb1c] sm:$0xf0] }
 0x4b6   : > { %8276 = vmatpush.bf16.msrb.mxu3 %v12962_v21  ;;  %8251 = vmatpush.bf16.msrb.mxu1 %v11330_v31  ;;  %v11903_v53 = vld [vmem:[%s15047_s30 + $0xe18] sm:$0xf0]  ;;  %v8025_v30 = vpop.f32.mrf.mxu3  ;;  %v13667_v31 = vld [vmem:[%s15047_s30 + $0x5dc] sm:$0xf0]  ;;  %v11526_v10 = vor.u32 %v13835_v48, %v11525_v18 }
 0x4b7   : > { %v14110_v56 = vld [vmem:[%s15047_s30 + $0x13bc] sm:$0xf]  ;;  %v11906_v1 = vor.u32 %v13918_v52, %v11903_v53  ;;  %v14417_v33 = vpop.eup %14416  ;;  %v10854_v42 = vor.u32 %v13667_v31, %v10853_v63  ;;  %v13061_v51 = vld [vmem:[%s15047_s30 + $0x16c0] sm:$0xf] }
 0x4b8   : > { %8264 = vmatpush.bf16.msrb.mxu2 %v12098_v32  ;;  %v12671_v58 = vld [vmem:[%s15047_s30 + $0x1418] sm:$0xf0]  ;;  %8239 = vmatpush.bf16.msrb.mxu0 %v10466_v44  ;;  %v11621_v32 = vld [vmem:[%s15047_s30 + $0xb80] sm:$0xf]  ;;  %8737 = vst [vmem:[%s15057_s7 + $0x50] sm:$0xff] %v14417_v33  ;;  %v12390_v44 = vor.u32 %v14051_v35, %v12389_v54 }
 0x4b9   : > { %v13510_v2 = vld [vmem:[%s15047_s30 + $0xfc] sm:$0xf]  ;;  %v12674_v7 = vor.u32 %v14110_v56, %v12671_v58  ;;  %v11622_v43 = vor.u32 %v13859_v34, %v11621_v32  ;;  %v14219_v52 = vld [vmem:[%s15047_s30 + $0x171c] sm:$0xf0] }
 0x4ba   : > { %8277 = vmatpush.bf16.msrb.mxu3 %v12866_v36  ;;  %8252 = vmatpush.bf16.msrb.mxu1 %v11234_v45  ;;  %v10271_v4 = vld [vmem:[%s15047_s30 + $0x158] sm:$0xf0]  ;;  %v10757_v45 = vld [vmem:[%s15047_s30 + $0x4c0] sm:$0xf]  ;;  %v13062_v60 = vor.u32 %v14219_v52, %v13061_v51 }
 0x4bb   : > { %v13702_v5 = vld [vmem:[%s15047_s30 + $0x6fc] sm:$0xf]  ;;  %v10274_v14 = vor.u32 %v13510_v2, %v10271_v4  ;;  %v10661_v56 = vld [vmem:[%s15047_s30 + $0x400] sm:$0xf] }
 0x4bc   : > { %8265 = vmatpush.bf16.msrb.mxu2 %v12002_v46  ;;  %v11039_v8 = vld [vmem:[%s15047_s30 + $0x758] sm:$0xf0]  ;;  %8240 = vmatpush.bf16.msrb.mxu0 %v10370_v59  ;;  %v13643_v46 = vld [vmem:[%s15047_s30 + $0x51c] sm:$0xf0] }
 0x4bd   : > { %v13894_v9 = vld [vmem:[%s15047_s30 + $0xcfc] sm:$0xf]  ;;  %v11042_v62 = vor.u32 %v13702_v5, %v11039_v8  ;;  %v10758_v53 = vor.u32 %v13643_v46, %v10757_v45  ;;  %v13619_v58 = vld [vmem:[%s15047_s30 + $0x45c] sm:$0xf0] }
 0x4be   : > { %8278 = vmatpush.bf16.msrb.mxu3 %v12770_v12  ;;  %v11807_v38 = vld [vmem:[%s15047_s30 + $0xd58] sm:$0xf0]  ;;  %8253 = vmatpush.bf16.msrb.mxu1 %v11138_v0  ;;  %v14027_v12 = vld [vmem:[%s15047_s30 + $0x111c] sm:$0xf0]  ;;  %v10662_v5 = vor.u32 %v13619_v58, %v10661_v56 }
 0x4bf   : > { %v14086_v11 = vld [vmem:[%s15047_s30 + $0x12fc] sm:$0xf]  ;;  %v11810_v17 = vor.u32 %v13894_v9, %v11807_v38  ;;  %v12294_v55 = vor.u32 %v14027_v12, %v12293_v50  ;;  %v11429_v59 = vld [vmem:[%s15047_s30 + $0xa00] sm:$0xf] }
 0x4c0   : > { %v12575_v13 = vld [vmem:[%s15047_s30 + $0x1358] sm:$0xf0]  ;;  %8266 = vmatpush.bf16.msrb.mxu2 %v11906_v1  ;;  %8241 = vmatpush.bf16.msrb.mxu0 %v10274_v14  ;;  %v12197_v0 = vld [vmem:[%s15047_s30 + $0x1000] sm:$0xf] }
 0x4c1   : > { %v13486_v15 = vld [vmem:[%s15047_s30 + $0x3c] sm:$0xf]  ;;  %v12578_v22 = vor.u32 %v14086_v11, %v12575_v13  ;;  %v14003_v1 = vld [vmem:[%s15047_s30 + $0x105c] sm:$0xf0]  ;;  %v3564_v11 = vperm.slane %v16048_v57, 3 }
 0x4c2   : > { %v10175_v16 = vld [vmem:[%s15047_s30 + $0x98] sm:$0xf0]  ;;  %8279 = vmatpush.bf16.msrb.mxu3 %v12674_v7  ;;  %8254 = vmatpush.bf16.msrb.mxu1 %v11042_v62  ;;  %v12965_v2 = vld [vmem:[%s15047_s30 + $0x1600] sm:$0xf]  ;;  %v11430_v7 = vor.u32 %v13811_v61, %v11429_v59  ;;  %v12198_v8 = vor.u32 %v14003_v1, %v12197_v0 }
 0x4c3   : > { %v13678_v19 = vld [vmem:[%s15047_s30 + $0x63c] sm:$0xf]  ;;  %v10178_v49 = vor.u32 %v13486_v15, %v10175_v16  ;;  %v14195_v4 = vld [vmem:[%s15047_s30 + $0x165c] sm:$0xf0] }
 0x4c4   : > { %v10943_v20 = vld [vmem:[%s15047_s30 + $0x698] sm:$0xf0]  ;;  %8267 = vmatpush.bf16.msrb.mxu2 %v11810_v17  ;;  %v13595_v9 = vld [vmem:[%s15047_s30 + $0x39c] sm:$0xf0]  ;;  %v12966_v13 = vor.u32 %v14195_v4, %v12965_v2 }
 0x4c5   : > { %v13870_v21 = vld [vmem:[%s15047_s30 + $0xc3c] sm:$0xf]  ;;  %v10946_v36 = vor.u32 %v13678_v19, %v10943_v20  ;;  %8242 = vmatpush.bf16.msrb.mxu0 %v10178_v49  ;;  %v11333_v38 = vld [vmem:[%s15047_s30 + $0x940] sm:$0xf]  ;;  %v10566_v19 = vor.u32 %v13595_v9, %v10565_v6  ;;  %v8036_v20 = vpop.f32.mrf.mxu0 }
 0x4c6   : > { %v11711_v23 = vld [vmem:[%s15047_s30 + $0xc98] sm:$0xf0]  ;;  %8280 = vmatpush.bf16.msrb.mxu3 %v12578_v22  ;;  %v13787_v14 = vld [vmem:[%s15047_s30 + $0x99c] sm:$0xf0] }
 0x4c7   : > { %v14062_v24 = vld [vmem:[%s15047_s30 + $0x123c] sm:$0xf]  ;;  %v11714_v37 = vor.u32 %v13870_v21, %v11711_v23  ;;  %8255 = vmatpush.bf16.msrb.mxu1 %v10946_v36  ;;  %v12101_v15 = vld [vmem:[%s15047_s30 + $0xf40] sm:$0xf]  ;;  %v11334_v57 = vor.u32 %v13787_v14, %v11333_v38 }
 0x4c8   : > { %v12479_v28 = vld [vmem:[%s15047_s30 + $0x1298] sm:$0xf0]  ;;  %8243 = vmatmul.bf16.vlgmr.msrb.gmra.mxu0 %v15212_v26  ;;  %v13979_v16 = vld [vmem:[%s15047_s30 + $0xf9c] sm:$0xf0] }
 0x4c9   : > { %v12482_v41 = vor.u32 %v14062_v24, %v12479_v28  ;;  %8268 = vmatpush.bf16.msrb.mxu2 %v11714_v37  ;;  %8287 = vmatpush.bf16.msra.mxu0 %v10854_v42  ;;  %v12869_v62 = vld [vmem:[%s15047_s30 + $0x1540] sm:$0xf]  ;;  %v12102_v21 = vor.u32 %v13979_v16, %v12101_v15  ;;  %v8037_v24 = vadd.f32 %v8036_v20, %v3564_v11  ;;  %v8049_v28 = vpop.f32.mrf.mxu1  ;;  %v10855_v20 = vld [vmem:[%s15047_s30 + $0x5e0] sm:$0xf0] }
 0x4ca   : > { %8256 = vmatmul.bf16.vlgmr.msrb.gmra.mxu1 %v15216_v29  ;;  %v14171_v17 = vld [vmem:[%s15047_s30 + $0x159c] sm:$0xf0] }
 0x4cb   : > { %8281 = vmatpush.bf16.msrb.mxu3 %v12482_v41  ;;  %8300 = vmatpush.bf16.msra.mxu1 %v11622_v43  ;;  %v13571_v22 = vld [vmem:[%s15047_s30 + $0x2dc] sm:$0xf0]  ;;  %v12870_v30 = vor.u32 %v14171_v17, %v12869_v62  ;;  %v8050_v34 = vadd.f32 %v8049_v28, %v8037_v24  ;;  %v12391_v24 = vld [vmem:[%s15047_s30 + $0x11e0] sm:$0xf0] }
 0x4cc   : > { %8269 = vmatmul.bf16.vlgmr.msrb.gmra.mxu2 %v15210_v25  ;;  %v11237_v23 = vld [vmem:[%s15047_s30 + $0x880] sm:$0xf]  ;;  %v10470_v54 = vor.u32 %v13571_v22, %v10469_v3  ;;  %v8062_v41 = vpop.f32.mrf.mxu2  ;;  %v11623_v22 = vld [vmem:[%s15047_s30 + $0xbe0] sm:$0xf0] }
 0x4cd   : > { %8313 = vmatpush.bf16.msra.mxu2 %v12390_v44  ;;  %8288 = vmatpush.bf16.msra.mxu0 %v10758_v53  ;;  %v13763_v63 = vld [vmem:[%s15047_s30 + $0x8dc] sm:$0xf0]  ;;  %v8063_v46 = vadd.f32 %v8062_v41, %v8050_v34  ;;  %v8038_v51 = vpop.f32.mrf.mxu0  ;;  %v12295_v41 = vld [vmem:[%s15047_s30 + $0x1120] sm:$0xf0] }
 0x4ce   : > { %8282 = vmatmul.bf16.vlgmr.msrb.gmra.mxu3 %v15214_v27  ;;  %v12005_v31 = vld [vmem:[%s15047_s30 + $0xe80] sm:$0xf]  ;;  %v11238_v35 = vor.u32 %v13763_v63, %v11237_v23  ;;  %v8075_v18 = vpop.f32.mrf.mxu3  ;;  %v14039_v23 = vld [vmem:[%s15047_s30 + $0x1184] sm:$0xf] }
 0x4cf   : > { %8326 = vmatpush.bf16.msra.mxu3 %v13158_v47  ;;  %8301 = vmatpush.bf16.msra.mxu1 %v11526_v10  ;;  %v13955_v32 = vld [vmem:[%s15047_s30 + $0xedc] sm:$0xf0]  ;;  %v8076_v12 = vadd.f32 %v8075_v18, %v8063_v46  ;;  %v14231_v63 = vld [vmem:[%s15047_s30 + $0x1784] sm:$0xf]  ;;  %v12394_v34 = vor.u32 %v14039_v23, %v12391_v24 }
 0x4d0   : > { %v12773_v33 = vld [vmem:[%s15047_s30 + $0x1480] sm:$0xf]  ;;  %v12006_v36 = vor.u32 %v13955_v32, %v12005_v31  ;;  %v13159_v31 = vld [vmem:[%s15047_s30 + $0x17e0] sm:$0xf0] }
 0x4d1   : > { %8314 = vmatpush.bf16.msra.mxu2 %v12294_v55  ;;  %8289 = vmatpush.bf16.msra.mxu0 %v10662_v5  ;;  %v14147_v49 = vld [vmem:[%s15047_s30 + $0x14dc] sm:$0xf0]  ;;  %v8051_v58 = vpop.f32.mrf.mxu1  ;;  %14418 = vtanh.f32 %v8076_v12  ;;  %v13607_v18 = vld [vmem:[%s15047_s30 + $0x404] sm:$0xf] }
 0x4d2   : > { %v10373_v37 = vld [vmem:[%s15047_s30 + $0x1c0] sm:$0xf]  ;;  %v12774_v42 = vor.u32 %v14147_v49, %v12773_v33  ;;  %v11431_v12 = vld [vmem:[%s15047_s30 + $0xa60] sm:$0xf0] }
 0x4d3   : > { %8327 = vmatpush.bf16.msra.mxu3 %v13062_v60  ;;  %8302 = vmatpush.bf16.msra.mxu1 %v11430_v7  ;;  %v13547_v39 = vld [vmem:[%s15047_s30 + $0x21c] sm:$0xf0]  ;;  %v13991_v51 = vld [vmem:[%s15047_s30 + $0x1004] sm:$0xf] }
 0x4d4   : > { %v11141_v40 = vld [vmem:[%s15047_s30 + $0x7c0] sm:$0xf]  ;;  %v10374_v50 = vor.u32 %v13547_v39, %v10373_v37  ;;  %v13162_v37 = vor.u32 %v14231_v63, %v13159_v31  ;;  %v11527_v39 = vld [vmem:[%s15047_s30 + $0xb20] sm:$0xf0] }
 0x4d5   : > { %8315 = vmatpush.bf16.msra.mxu2 %v12198_v8  ;;  %8290 = vmatpush.bf16.msra.mxu0 %v10566_v19  ;;  %v13739_v43 = vld [vmem:[%s15047_s30 + $0x81c] sm:$0xf0]  ;;  %v13655_v19 = vld [vmem:[%s15047_s30 + $0x584] sm:$0xf] }
 0x4d6   : > { %v11909_v44 = vld [vmem:[%s15047_s30 + $0xdc0] sm:$0xf]  ;;  %v11142_v52 = vor.u32 %v13739_v43, %v11141_v40  ;;  %v8077_v17 = vpop.f32.mrf.mxu3  ;;  %v10858_v33 = vor.u32 %v13655_v19, %v10855_v20  ;;  %v14015_v40 = vld [vmem:[%s15047_s30 + $0x10c4] sm:$0xf] }
 0x4d7   : > { %8328 = vmatpush.bf16.msra.mxu3 %v12966_v13  ;;  %8303 = vmatpush.bf16.msra.mxu1 %v11334_v57  ;;  %v13931_v45 = vld [vmem:[%s15047_s30 + $0xe1c] sm:$0xf0]  ;;  %v8064_v13 = vpop.f32.mrf.mxu2  ;;  %v13847_v57 = vld [vmem:[%s15047_s30 + $0xb84] sm:$0xf]  ;;  %v12298_v46 = vor.u32 %v14015_v40, %v12295_v41 }
 0x4d8   : > { %v12677_v47 = vld [vmem:[%s15047_s30 + $0x13c0] sm:$0xf]  ;;  %v11910_v53 = vor.u32 %v13931_v45, %v11909_v44  ;;  %v11626_v49 = vor.u32 %v13847_v57, %v11623_v22  ;;  %v13063_v43 = vld [vmem:[%s15047_s30 + $0x1720] sm:$0xf0] }
 0x4d9   : > { %8316 = vmatpush.bf16.msra.mxu2 %v12102_v21  ;;  %v14123_v48 = vld [vmem:[%s15047_s30 + $0x141c] sm:$0xf0]  ;;  %8291 = vmatpush.bf16.msra.mxu0 %v10470_v54  ;;  %v14419_v21 = vpop.eup %14418  ;;  %v13631_v54 = vld [vmem:[%s15047_s30 + $0x4c4] sm:$0xf] }
 0x4da   : > { %v10277_v10 = vld [vmem:[%s15047_s30 + $0x100] sm:$0xf]  ;;  %v12678_v59 = vor.u32 %v14123_v48, %v12677_v47  ;;  %8738 = vst [vmem:[%s15057_s7 + $0x58] sm:$0xff] %v14419_v21  ;;  %v10663_v47 = vld [vmem:[%s15047_s30 + $0x460] sm:$0xf0] }
 0x4db   : > { %8329 = vmatpush.bf16.msra.mxu3 %v12870_v30  ;;  %8304 = vmatpush.bf16.msra.mxu1 %v11238_v35  ;;  %v13523_v55 = vld [vmem:[%s15047_s30 + $0x15c] sm:$0xf0]  ;;  %v10759_v35 = vld [vmem:[%s15047_s30 + $0x520] sm:$0xf0] }
 0x4dc   : > { %v11045_v56 = vld [vmem:[%s15047_s30 + $0x700] sm:$0xf]  ;;  %v10278_v4 = vor.u32 %v13523_v55, %v10277_v10  ;;  %v10762_v44 = vor.u32 %v13631_v54, %v10759_v35  ;;  %v13799_v48 = vld [vmem:[%s15047_s30 + $0xa04] sm:$0xf]  ;;  %v10666_v55 = vor.u32 %v13607_v18, %v10663_v47 }
 0x4dd   : > { %8317 = vmatpush.bf16.msra.mxu2 %v12006_v36  ;;  %v13715_v60 = vld [vmem:[%s15047_s30 + $0x75c] sm:$0xf0]  ;;  %8292 = vmatpush.bf16.msra.mxu0 %v10374_v50  ;;  %v13823_v36 = vld [vmem:[%s15047_s30 + $0xac4] sm:$0xf]  ;;  %v11434_v58 = vor.u32 %v13799_v48, %v11431_v12 }
 0x4de   : > { %v11813_v61 = vld [vmem:[%s15047_s30 + $0xd00] sm:$0xf]  ;;  %v11046_v7 = vor.u32 %v13715_v60, %v11045_v56  ;;  %v11530_v45 = vor.u32 %v13823_v36, %v11527_v39  ;;  %v12967_v10 = vld [vmem:[%s15047_s30 + $0x1660] sm:$0xf0] }
 0x4df   : > { %8330 = vmatpush.bf16.msra.mxu3 %v12774_v42  ;;  %v13907_v0 = vld [vmem:[%s15047_s30 + $0xd5c] sm:$0xf0]  ;;  %8305 = vmatpush.bf16.msra.mxu1 %v11142_v52  ;;  %v14207_v42 = vld [vmem:[%s15047_s30 + $0x16c4] sm:$0xf] }
 0x4e0   : > { %v12581_v1 = vld [vmem:[%s15047_s30 + $0x1300] sm:$0xf]  ;;  %v11814_v8 = vor.u32 %v13907_v0, %v11813_v61  ;;  %v13066_v50 = vor.u32 %v14207_v42, %v13063_v43  ;;  %v12199_v52 = vld [vmem:[%s15047_s30 + $0x1060] sm:$0xf0] }
 0x4e1   : > { %v14099_v2 = vld [vmem:[%s15047_s30 + $0x135c] sm:$0xf0]  ;;  %8318 = vmatpush.bf16.msra.mxu2 %v11910_v53  ;;  %8293 = vmatpush.bf16.msra.mxu0 %v10278_v4  ;;  %v14183_v53 = vld [vmem:[%s15047_s30 + $0x1604] sm:$0xf] }
 0x4e2   : > { %v10181_v5 = vld [vmem:[%s15047_s30 + $0x40] sm:$0xf]  ;;  %v12582_v14 = vor.u32 %v14099_v2, %v12581_v1  ;;  %v13583_v56 = vld [vmem:[%s15047_s30 + $0x344] sm:$0xf]  ;;  %v12970_v2 = vor.u32 %v14183_v53, %v12967_v10 }
 0x4e3   : > { %v13499_v6 = vld [vmem:[%s15047_s30 + $0x9c] sm:$0xf0]  ;;  %8331 = vmatpush.bf16.msra.mxu3 %v12678_v59  ;;  %8306 = vmatpush.bf16.msra.mxu1 %v11046_v7  ;;  %v12202_v59 = vor.u32 %v13991_v51, %v12199_v52  ;;  %v10567_v60 = vld [vmem:[%s15047_s30 + $0x3a0] sm:$0xf0] }
 0x4e4   : > { %v10949_v9 = vld [vmem:[%s15047_s30 + $0x640] sm:$0xf]  ;;  %v10182_v3 = vor.u32 %v13499_v6, %v10181_v5  ;;  %v13775_v61 = vld [vmem:[%s15047_s30 + $0x944] sm:$0xf]  ;;  %v8101_v17 = vpop.f32.mrf.mxu1 }
 0x4e5   : > { %v13691_v38 = vld [vmem:[%s15047_s30 + $0x69c] sm:$0xf0]  ;;  %8319 = vmatpush.bf16.msra.mxu2 %v11814_v8  ;;  %v11335_v4 = vld [vmem:[%s15047_s30 + $0x9a0] sm:$0xf0] }
 0x4e6   : > { %v11717_v11 = vld [vmem:[%s15047_s30 + $0xc40] sm:$0xf]  ;;  %v10950_v28 = vor.u32 %v13691_v38, %v10949_v9  ;;  %8294 = vmatpush.bf16.msra.mxu0 %v10182_v3  ;;  %v13967_v5 = vld [vmem:[%s15047_s30 + $0xf44] sm:$0xf]  ;;  %v10570_v9 = vor.u32 %v13583_v56, %v10567_v60  ;;  %v8088_v38 = vpop.f32.mrf.mxu0 }
 0x4e7   : > { %v13883_v15 = vld [vmem:[%s15047_s30 + $0xc9c] sm:$0xf0]  ;;  %8332 = vmatpush.bf16.msra.mxu3 %v12582_v14  ;;  %v12103_v6 = vld [vmem:[%s15047_s30 + $0xfa0] sm:$0xf0] }
 0x4e8   : > { %v12485_v16 = vld [vmem:[%s15047_s30 + $0x1240] sm:$0xf]  ;;  %v11718_v30 = vor.u32 %v13883_v15, %v11717_v11  ;;  %8307 = vmatpush.bf16.msra.mxu1 %v10950_v28  ;;  %v14159_v7 = vld [vmem:[%s15047_s30 + $0x1544] sm:$0xf]  ;;  %v11338_v11 = vor.u32 %v13775_v61, %v11335_v4  ;;  %v12106_v13 = vor.u32 %v13967_v5, %v12103_v6 }
 0x4e9   : > { %v14075_v62 = vld [vmem:[%s15047_s30 + $0x129c] sm:$0xf0]  ;;  %8295 = vmatmul.bf16.vlgmr.msra.gmra.mxu0 %v15212_v26  ;;  %v12871_v8 = vld [vmem:[%s15047_s30 + $0x15a0] sm:$0xf0] }
 0x4ea   : > { %v12486_v32 = vor.u32 %v14075_v62, %v12485_v16  ;;  %8320 = vmatpush.bf16.msra.mxu2 %v11718_v30  ;;  %8339 = vmatpush.bf16.msrb.mxu0 %v10858_v33  ;;  %v16339_v0 = vld [vmem:[%s15055_s23 + $0x8] sm:$0xff]  ;;  %v12874_v19 = vor.u32 %v14159_v7, %v12871_v8 }
 0x4eb   : > { %8308 = vmatmul.bf16.vlgmr.msra.gmra.mxu1 %v15216_v29  ;;  %v3565_v1 = vperm.slane %v16339_v0, 4  ;;  %v13559_v14 = vld [vmem:[%s15047_s30 + $0x284] sm:$0xf] }
 0x4ec   : > { %8333 = vmatpush.bf16.msra.mxu3 %v12486_v32  ;;  %8352 = vmatpush.bf16.msrb.mxu1 %v11626_v49  ;;  %v10471_v15 = vld [vmem:[%s15047_s30 + $0x2e0] sm:$0xf0]  ;;  %v8114_v33 = vpop.f32.mrf.mxu2  ;;  %v8103_v48 = vpop.f32.mrf.mxu1 }
 0x4ed   : > { %8321 = vmatmul.bf16.vlgmr.msra.gmra.mxu2 %v15210_v25  ;;  %v13751_v16 = vld [vmem:[%s15047_s30 + $0x884] sm:$0xf]  ;;  %v8089_v62 = vadd.f32 %v8088_v38, %v3565_v1  ;;  %v10474_v24 = vor.u32 %v13559_v14, %v10471_v15  ;;  %v10861_v38 = vld [vmem:[%s15047_s30 + $0x588] sm:$0xf] }
 0x4ee   : > { %8365 = vmatpush.bf16.msrb.mxu2 %v12394_v34  ;;  %8340 = vmatpush.bf16.msrb.mxu0 %v10762_v44  ;;  %v11239_v20 = vld [vmem:[%s15047_s30 + $0x8e0] sm:$0xf0]  ;;  %v8090_v43 = vpop.f32.mrf.mxu0  ;;  %v10573_v48 = vld [vmem:[%s15047_s30 + $0x348] sm:$0xf] }
 0x4ef   : > { %8334 = vmatmul.bf16.vlgmr.msra.gmra.mxu3 %v15214_v27  ;;  %v13943_v57 = vld [vmem:[%s15047_s30 + $0xe84] sm:$0xf]  ;;  %v8102_v23 = vadd.f32 %v8101_v17, %v8089_v62  ;;  %v11242_v28 = vor.u32 %v13751_v16, %v11239_v20  ;;  %v13860_v16 = vld [vmem:[%s15047_s30 + $0xbe4] sm:$0xf0] }
 0x4f0   : > { %8378 = vmatpush.bf16.msrb.mxu3 %v13162_v37  ;;  %8353 = vmatpush.bf16.msrb.mxu1 %v11530_v45  ;;  %v12007_v21 = vld [vmem:[%s15047_s30 + $0xee0] sm:$0xf0]  ;;  %v8127_v37 = vpop.f32.mrf.mxu3  ;;  %v12397_v62 = vld [vmem:[%s15047_s30 + $0x1188] sm:$0xf] }
 0x4f1   : > { %v14135_v3 = vld [vmem:[%s15047_s30 + $0x1484] sm:$0xf]  ;;  %v12010_v30 = vor.u32 %v13943_v57, %v12007_v21  ;;  %v8115_v36 = vadd.f32 %v8114_v33, %v8102_v23  ;;  %v14052_v17 = vld [vmem:[%s15047_s30 + $0x11e4] sm:$0xf0] }
 0x4f2   : > { %8366 = vmatpush.bf16.msrb.mxu2 %v12298_v46  ;;  %8341 = vmatpush.bf16.msrb.mxu0 %v10666_v55  ;;  %v12775_v22 = vld [vmem:[%s15047_s30 + $0x14e0] sm:$0xf0]  ;;  %v13165_v57 = vld [vmem:[%s15047_s30 + $0x1788] sm:$0xf] }
 0x4f3   : > { %v13535_v63 = vld [vmem:[%s15047_s30 + $0x1c4] sm:$0xf]  ;;  %v12778_v49 = vor.u32 %v14135_v3, %v12775_v22  ;;  %v8128_v42 = vadd.f32 %v8127_v37, %v8115_v36  ;;  %v14244_v21 = vld [vmem:[%s15047_s30 + $0x17e4] sm:$0xf0] }
 0x4f4   : > { %8379 = vmatpush.bf16.msrb.mxu3 %v13066_v50  ;;  %8354 = vmatpush.bf16.msrb.mxu1 %v11434_v58  ;;  %v10375_v31 = vld [vmem:[%s15047_s30 + $0x220] sm:$0xf0]  ;;  %v8116_v4 = vpop.f32.mrf.mxu2  ;;  %v12301_v33 = vld [vmem:[%s15047_s30 + $0x10c8] sm:$0xf] }
 0x4f5   : > { %v13727_v32 = vld [vmem:[%s15047_s30 + $0x7c4] sm:$0xf]  ;;  %v10378_v41 = vor.u32 %v13535_v63, %v10375_v31  ;;  %14420 = vtanh.f32 %v8128_v42  ;;  %v11533_v63 = vld [vmem:[%s15047_s30 + $0xac8] sm:$0xf]  ;;  %v13166_v31 = vor.u32 %v14244_v21, %v13165_v57 }
 0x4f6   : > { %8367 = vmatpush.bf16.msrb.mxu2 %v12202_v59  ;;  %8342 = vmatpush.bf16.msrb.mxu0 %v10570_v9  ;;  %v11143_v34 = vld [vmem:[%s15047_s30 + $0x820] sm:$0xf0]  ;;  %v13812_v43 = vld [vmem:[%s15047_s30 + $0xa64] sm:$0xf0] }
 0x4f7   : > { %v13919_v54 = vld [vmem:[%s15047_s30 + $0xdc4] sm:$0xf]  ;;  %v11146_v44 = vor.u32 %v13727_v32, %v11143_v34  ;;  %v13836_v32 = vld [vmem:[%s15047_s30 + $0xb24] sm:$0xf0] }
 0x4f8   : > { %8380 = vmatpush.bf16.msrb.mxu3 %v12970_v2  ;;  %8355 = vmatpush.bf16.msrb.mxu1 %v11338_v11  ;;  %v11911_v35 = vld [vmem:[%s15047_s30 + $0xe20] sm:$0xf0]  ;;  %v8129_v9 = vpop.f32.mrf.mxu3  ;;  %v13668_v11 = vld [vmem:[%s15047_s30 + $0x5e4] sm:$0xf0]  ;;  %v11534_v36 = vor.u32 %v13836_v32, %v11533_v63 }
 0x4f9   : > { %v14111_v39 = vld [vmem:[%s15047_s30 + $0x13c4] sm:$0xf]  ;;  %v11914_v45 = vor.u32 %v13919_v54, %v11911_v35  ;;  %v10862_v22 = vor.u32 %v13668_v11, %v10861_v38  ;;  %v13069_v34 = vld [vmem:[%s15047_s30 + $0x16c8] sm:$0xf] }
 0x4fa   : > { %8368 = vmatpush.bf16.msrb.mxu2 %v12106_v13  ;;  %v12679_v40 = vld [vmem:[%s15047_s30 + $0x1420] sm:$0xf0]  ;;  %8343 = vmatpush.bf16.msrb.mxu0 %v10474_v24  ;;  %v11629_v13 = vld [vmem:[%s15047_s30 + $0xb88] sm:$0xf]  ;;  %v12398_v24 = vor.u32 %v14052_v17, %v12397_v62 }
 0x4fb   : > { %v13511_v46 = vld [vmem:[%s15047_s30 + $0x104] sm:$0xf]  ;;  %v12682_v50 = vor.u32 %v14111_v39, %v12679_v40  ;;  %v14421_v14 = vpop.eup %14420  ;;  %v11630_v23 = vor.u32 %v13860_v16, %v11629_v13  ;;  %v14220_v54 = vld [vmem:[%s15047_s30 + $0x1724] sm:$0xf0] }
 0x4fc   : > { %8381 = vmatpush.bf16.msrb.mxu3 %v12874_v19  ;;  %8356 = vmatpush.bf16.msrb.mxu1 %v11242_v28  ;;  %v10279_v18 = vld [vmem:[%s15047_s30 + $0x160] sm:$0xf0]  ;;  %8739 = vst [vmem:[%s15057_s7 + $0x60] sm:$0xff] %v14421_v14  ;;  %v10765_v28 = vld [vmem:[%s15047_s30 + $0x4c8] sm:$0xf]  ;;  %v13070_v42 = vor.u32 %v14220_v54, %v13069_v34 }
 0x4fd   : > { %v13703_v47 = vld [vmem:[%s15047_s30 + $0x704] sm:$0xf]  ;;  %v10282_v55 = vor.u32 %v13511_v46, %v10279_v18  ;;  %v10669_v39 = vld [vmem:[%s15047_s30 + $0x408] sm:$0xf] }
 0x4fe   : > { %8369 = vmatpush.bf16.msrb.mxu2 %v12010_v30  ;;  %v11047_v12 = vld [vmem:[%s15047_s30 + $0x760] sm:$0xf0]  ;;  %8344 = vmatpush.bf16.msrb.mxu0 %v10378_v41  ;;  %v13644_v30 = vld [vmem:[%s15047_s30 + $0x524] sm:$0xf0] }
 0x4ff   : > { %v13895_v51 = vld [vmem:[%s15047_s30 + $0xd04] sm:$0xf]  ;;  %v11050_v59 = vor.u32 %v13703_v47, %v11047_v12  ;;  %v10766_v35 = vor.u32 %v13644_v30, %v10765_v28  ;;  %v13620_v40 = vld [vmem:[%s15047_s30 + $0x464] sm:$0xf0] }
 0x500   : > { %8382 = vmatpush.bf16.msrb.mxu3 %v12778_v49  ;;  %v11815_v52 = vld [vmem:[%s15047_s30 + $0xd60] sm:$0xf0]  ;;  %8357 = vmatpush.bf16.msrb.mxu1 %v11146_v44  ;;  %v14028_v49 = vld [vmem:[%s15047_s30 + $0x1124] sm:$0xf0]  ;;  %v10670_v47 = vor.u32 %v13620_v40, %v10669_v39 }
 0x501   : > { %v14087_v53 = vld [vmem:[%s15047_s30 + $0x1304] sm:$0xf]  ;;  %v11818_v60 = vor.u32 %v13895_v51, %v11815_v52  ;;  %v12302_v37 = vor.u32 %v14028_v49, %v12301_v33  ;;  %v11437_v41 = vld [vmem:[%s15047_s30 + $0xa08] sm:$0xf] }
 0x502   : > { %v12583_v10 = vld [vmem:[%s15047_s30 + $0x1360] sm:$0xf0]  ;;  %8370 = vmatpush.bf16.msrb.mxu2 %v11914_v45  ;;  %8345 = vmatpush.bf16.msrb.mxu0 %v10282_v55  ;;  %v12205_v44 = vld [vmem:[%s15047_s30 + $0x1008] sm:$0xf] }
 0x503   : > { %v13487_v56 = vld [vmem:[%s15047_s30 + $0x44] sm:$0xf]  ;;  %v12586_v5 = vor.u32 %v14087_v53, %v12583_v10  ;;  %v14004_v45 = vld [vmem:[%s15047_s30 + $0x1064] sm:$0xf0]  ;;  %v3566_v53 = vperm.slane %v16339_v0, 5 }
 0x504   : > { %v10183_v58 = vld [vmem:[%s15047_s30 + $0xa0] sm:$0xf0]  ;;  %8383 = vmatpush.bf16.msrb.mxu3 %v12682_v50  ;;  %8358 = vmatpush.bf16.msrb.mxu1 %v11050_v59  ;;  %v12973_v46 = vld [vmem:[%s15047_s30 + $0x1608] sm:$0xf]  ;;  %v11438_v50 = vor.u32 %v13812_v43, %v11437_v41  ;;  %v12206_v12 = vor.u32 %v14004_v45, %v12205_v44 }
 0x505   : > { %v13679_v61 = vld [vmem:[%s15047_s30 + $0x644] sm:$0xf]  ;;  %v10186_v15 = vor.u32 %v13487_v56, %v10183_v58  ;;  %v14196_v18 = vld [vmem:[%s15047_s30 + $0x1664] sm:$0xf0]  ;;  %v8153_v9 = vpop.f32.mrf.mxu1 }
 0x506   : > { %v10951_v1 = vld [vmem:[%s15047_s30 + $0x6a0] sm:$0xf0]  ;;  %8371 = vmatpush.bf16.msrb.mxu2 %v11818_v60  ;;  %v13596_v51 = vld [vmem:[%s15047_s30 + $0x3a4] sm:$0xf0]  ;;  %v12974_v10 = vor.u32 %v14196_v18, %v12973_v46 }
 0x507   : > { %v13871_v2 = vld [vmem:[%s15047_s30 + $0xc44] sm:$0xf]  ;;  %v10954_v19 = vor.u32 %v13679_v61, %v10951_v1  ;;  %8346 = vmatpush.bf16.msrb.mxu0 %v10186_v15  ;;  %v11341_v52 = vld [vmem:[%s15047_s30 + $0x948] sm:$0xf]  ;;  %v10574_v61 = vor.u32 %v13596_v51, %v10573_v48  ;;  %v8140_v1 = vpop.f32.mrf.mxu0 }
 0x508   : > { %v11719_v6 = vld [vmem:[%s15047_s30 + $0xca0] sm:$0xf0]  ;;  %8384 = vmatpush.bf16.msrb.mxu3 %v12586_v5  ;;  %v13788_v55 = vld [vmem:[%s15047_s30 + $0x9a4] sm:$0xf0] }
 0x509   : > { %v14063_v7 = vld [vmem:[%s15047_s30 + $0x1244] sm:$0xf]  ;;  %v11722_v20 = vor.u32 %v13871_v2, %v11719_v6  ;;  %8359 = vmatpush.bf16.msrb.mxu1 %v10954_v19  ;;  %v12109_v56 = vld [vmem:[%s15047_s30 + $0xf48] sm:$0xf]  ;;  %v11342_v2 = vor.u32 %v13788_v55, %v11341_v52 }
 0x50a   : > { %v12487_v8 = vld [vmem:[%s15047_s30 + $0x12a0] sm:$0xf0]  ;;  %8347 = vmatmul.bf16.vlgmr.msrb.gmra.mxu0 %v15212_v26  ;;  %v13980_v58 = vld [vmem:[%s15047_s30 + $0xfa4] sm:$0xf0] }
 0x50b   : > { %v12490_v3 = vor.u32 %v14063_v7, %v12487_v8  ;;  %8372 = vmatpush.bf16.msrb.mxu2 %v11722_v20  ;;  %8391 = vmatpush.bf16.msra.mxu0 %v10862_v22  ;;  %v12877_v59 = vld [vmem:[%s15047_s30 + $0x1548] sm:$0xf]  ;;  %v12110_v4 = vor.u32 %v13980_v58, %v12109_v56  ;;  %v8141_v8 = vadd.f32 %v8140_v1, %v3566_v53  ;;  %v13656_v1 = vld [vmem:[%s15047_s30 + $0x58c] sm:$0xf] }
 0x50c   : > { %8360 = vmatmul.bf16.vlgmr.msrb.gmra.mxu1 %v15216_v29  ;;  %v14172_v60 = vld [vmem:[%s15047_s30 + $0x15a4] sm:$0xf0] }
 0x50d   : > { %8385 = vmatpush.bf16.msrb.mxu3 %v12490_v3  ;;  %8404 = vmatpush.bf16.msra.mxu1 %v11630_v23  ;;  %v10477_v5 = vld [vmem:[%s15047_s30 + $0x288] sm:$0xf]  ;;  %v12878_v38 = vor.u32 %v14172_v60, %v12877_v59  ;;  %v8154_v62 = vadd.f32 %v8153_v9, %v8141_v8  ;;  %v8166_v22 = vpop.f32.mrf.mxu2  ;;  %v8155_v41 = vpop.f32.mrf.mxu1  ;;  %v14040_v8 = vld [vmem:[%s15047_s30 + $0x118c] sm:$0xf] }
 0x50e   : > { %8373 = vmatmul.bf16.vlgmr.msrb.gmra.mxu2 %v15210_v25  ;;  %v13572_v6 = vld [vmem:[%s15047_s30 + $0x2e4] sm:$0xf0]  ;;  %v12399_v9 = vld [vmem:[%s15047_s30 + $0x11e8] sm:$0xf0] }
 0x50f   : > { %8417 = vmatpush.bf16.msra.mxu2 %v12398_v24  ;;  %8392 = vmatpush.bf16.msra.mxu0 %v10766_v35  ;;  %v11245_v7 = vld [vmem:[%s15047_s30 + $0x888] sm:$0xf]  ;;  %v10478_v17 = vor.u32 %v13572_v6, %v10477_v5  ;;  %v8167_v63 = vadd.f32 %v8166_v22, %v8154_v62  ;;  %v8142_v54 = vpop.f32.mrf.mxu0  ;;  %v14016_v22 = vld [vmem:[%s15047_s30 + $0x10cc] sm:$0xf] }
 0x510   : > { %8386 = vmatmul.bf16.vlgmr.msrb.gmra.mxu3 %v15214_v27  ;;  %v13764_v11 = vld [vmem:[%s15047_s30 + $0x8e4] sm:$0xf0]  ;;  %v11439_v54 = vld [vmem:[%s15047_s30 + $0xa68] sm:$0xf0] }
 0x511   : > { %8430 = vmatpush.bf16.msra.mxu3 %v13166_v31  ;;  %8405 = vmatpush.bf16.msra.mxu1 %v11534_v36  ;;  %v12013_v13 = vld [vmem:[%s15047_s30 + $0xe88] sm:$0xf]  ;;  %v11246_v19 = vor.u32 %v13764_v11, %v11245_v7  ;;  %v8179_v31 = vpop.f32.mrf.mxu3  ;;  %v11631_v7 = vld [vmem:[%s15047_s30 + $0xbe8] sm:$0xf0] }
 0x512   : > { %v13956_v14 = vld [vmem:[%s15047_s30 + $0xee4] sm:$0xf0]  ;;  %v8180_v34 = vadd.f32 %v8179_v31, %v8167_v63  ;;  %v13584_v41 = vld [vmem:[%s15047_s30 + $0x34c] sm:$0xf] }
 0x513   : > { %8418 = vmatpush.bf16.msra.mxu2 %v12302_v37  ;;  %8393 = vmatpush.bf16.msra.mxu0 %v10670_v47  ;;  %v12781_v15 = vld [vmem:[%s15047_s30 + $0x1488] sm:$0xf]  ;;  %v12014_v20 = vor.u32 %v13956_v14, %v12013_v13  ;;  %v14232_v13 = vld [vmem:[%s15047_s30 + $0x178c] sm:$0xf] }
 0x514   : > { %v14148_v16 = vld [vmem:[%s15047_s30 + $0x14e4] sm:$0xf0]  ;;  %14422 = vtanh.f32 %v8180_v34  ;;  %v13167_v14 = vld [vmem:[%s15047_s30 + $0x17e8] sm:$0xf0] }
 0x515   : > { %8431 = vmatpush.bf16.msra.mxu3 %v13070_v42  ;;  %8406 = vmatpush.bf16.msra.mxu1 %v11438_v50  ;;  %v10381_v57 = vld [vmem:[%s15047_s30 + $0x1c8] sm:$0xf]  ;;  %v12782_v23 = vor.u32 %v14148_v16, %v12781_v15  ;;  %v8168_v55 = vpop.f32.mrf.mxu2 }
 0x516   : > { %v13548_v21 = vld [vmem:[%s15047_s30 + $0x224] sm:$0xf0] }
 0x517   : > { %8419 = vmatpush.bf16.msra.mxu2 %v12206_v12  ;;  %8394 = vmatpush.bf16.msra.mxu0 %v10574_v61  ;;  %v11149_v3 = vld [vmem:[%s15047_s30 + $0x7c8] sm:$0xf]  ;;  %v10382_v49 = vor.u32 %v13548_v21, %v10381_v57  ;;  %v13824_v57 = vld [vmem:[%s15047_s30 + $0xacc] sm:$0xf]  ;;  %v13170_v21 = vor.u32 %v14232_v13, %v13167_v14 }
 0x518   : > { %v13740_v24 = vld [vmem:[%s15047_s30 + $0x824] sm:$0xf0]  ;;  %v13536_v13 = vld [vmem:[%s15047_s30 + $0x1cc] sm:$0xf] }
 0x519   : > { %8432 = vmatpush.bf16.msra.mxu3 %v12974_v10  ;;  %8407 = vmatpush.bf16.msra.mxu1 %v11342_v2  ;;  %v11917_v28 = vld [vmem:[%s15047_s30 + $0xdc8] sm:$0xf]  ;;  %v11150_v35 = vor.u32 %v13740_v24, %v11149_v3  ;;  %v8181_v61 = vpop.f32.mrf.mxu3  ;;  %v10863_v2 = vld [vmem:[%s15047_s30 + $0x5e8] sm:$0xf0] }
 0x51a   : > { %v13932_v30 = vld [vmem:[%s15047_s30 + $0xe24] sm:$0xf0]  ;;  %v14423_v5 = vpop.eup %14422  ;;  %v10866_v16 = vor.u32 %v13656_v1, %v10863_v2  ;;  %v11535_v3 = vld [vmem:[%s15047_s30 + $0xb28] sm:$0xf0] }
 0x51b   : > { %8420 = vmatpush.bf16.msra.mxu2 %v12110_v4  ;;  %v12685_v32 = vld [vmem:[%s15047_s30 + $0x13c8] sm:$0xf]  ;;  %8395 = vmatpush.bf16.msra.mxu0 %v10478_v17  ;;  %v11918_v36 = vor.u32 %v13932_v30, %v11917_v28  ;;  %v13848_v4 = vld [vmem:[%s15047_s30 + $0xb8c] sm:$0xf]  ;;  %8740 = vst [vmem:[%s15057_s7 + $0x68] sm:$0xff] %v14423_v5  ;;  %v12402_v17 = vor.u32 %v14040_v8, %v12399_v9 }
 0x51c   : > { %v14124_v33 = vld [vmem:[%s15047_s30 + $0x1424] sm:$0xf0]  ;;  %v11634_v62 = vor.u32 %v13848_v4, %v11631_v7  ;;  %v14208_v24 = vld [vmem:[%s15047_s30 + $0x16cc] sm:$0xf]  ;;  %v11538_v63 = vor.u32 %v13824_v57, %v11535_v3 }
 0x51d   : > { %8433 = vmatpush.bf16.msra.mxu3 %v12878_v38  ;;  %8408 = vmatpush.bf16.msra.mxu1 %v11246_v19  ;;  %v10285_v37 = vld [vmem:[%s15047_s30 + $0x108] sm:$0xf]  ;;  %v12686_v42 = vor.u32 %v14124_v33, %v12685_v32  ;;  %v13632_v19 = vld [vmem:[%s15047_s30 + $0x4cc] sm:$0xf] }
 0x51e   : > { %v13524_v39 = vld [vmem:[%s15047_s30 + $0x164] sm:$0xf0]  ;;  %v13071_v28 = vld [vmem:[%s15047_s30 + $0x1728] sm:$0xf0] }
 0x51f   : > { %8421 = vmatpush.bf16.msra.mxu2 %v12014_v20  ;;  %v11053_v40 = vld [vmem:[%s15047_s30 + $0x708] sm:$0xf]  ;;  %8396 = vmatpush.bf16.msra.mxu0 %v10382_v49  ;;  %v10286_v47 = vor.u32 %v13524_v39, %v10285_v37  ;;  %v10767_v20 = vld [vmem:[%s15047_s30 + $0x528] sm:$0xf0]  ;;  %v13074_v34 = vor.u32 %v14208_v24, %v13071_v28 }
 0x520   : > { %v13716_v43 = vld [vmem:[%s15047_s30 + $0x764] sm:$0xf0]  ;;  %v10770_v30 = vor.u32 %v13632_v19, %v10767_v20  ;;  %v13608_v32 = vld [vmem:[%s15047_s30 + $0x40c] sm:$0xf] }
 0x521   : > { %8434 = vmatpush.bf16.msra.mxu3 %v12782_v23  ;;  %v11821_v44 = vld [vmem:[%s15047_s30 + $0xd08] sm:$0xf]  ;;  %8409 = vmatpush.bf16.msra.mxu1 %v11150_v35  ;;  %v11054_v12 = vor.u32 %v13716_v43, %v11053_v40  ;;  %v12303_v23 = vld [vmem:[%s15047_s30 + $0x1128] sm:$0xf0] }
 0x522   : > { %v13908_v45 = vld [vmem:[%s15047_s30 + $0xd64] sm:$0xf0]  ;;  %v12306_v31 = vor.u32 %v14016_v22, %v12303_v23  ;;  %v10671_v33 = vld [vmem:[%s15047_s30 + $0x468] sm:$0xf0] }
 0x523   : > { %v12589_v46 = vld [vmem:[%s15047_s30 + $0x1308] sm:$0xf]  ;;  %8422 = vmatpush.bf16.msra.mxu2 %v11918_v36  ;;  %v11822_v51 = vor.u32 %v13908_v45, %v11821_v44  ;;  %8397 = vmatpush.bf16.msra.mxu0 %v10286_v47  ;;  %v13800_v49 = vld [vmem:[%s15047_s30 + $0xa0c] sm:$0xf]  ;;  %v10674_v40 = vor.u32 %v13608_v32, %v10671_v33 }
 0x524   : > { %v14100_v18 = vld [vmem:[%s15047_s30 + $0x1364] sm:$0xf0]  ;;  %v13992_v35 = vld [vmem:[%s15047_s30 + $0x100c] sm:$0xf] }
 0x525   : > { %v10189_v48 = vld [vmem:[%s15047_s30 + $0x48] sm:$0xf]  ;;  %8435 = vmatpush.bf16.msra.mxu3 %v12686_v42  ;;  %v12590_v56 = vor.u32 %v14100_v18, %v12589_v46  ;;  %8410 = vmatpush.bf16.msra.mxu1 %v11054_v12  ;;  %v12207_v36 = vld [vmem:[%s15047_s30 + $0x1068] sm:$0xf0]  ;;  %v11442_v42 = vor.u32 %v13800_v49, %v11439_v54  ;;  %v3567_v46 = vperm.slane %v16339_v0, 6 }
 0x526   : > { %v13500_v50 = vld [vmem:[%s15047_s30 + $0xa4] sm:$0xf0]  ;;  %v14184_v37 = vld [vmem:[%s15047_s30 + $0x160c] sm:$0xf]  ;;  %v12210_v43 = vor.u32 %v13992_v35, %v12207_v36  ;;  %v8205_v61 = vpop.f32.mrf.mxu1 }
 0x527   : > { %v10957_v52 = vld [vmem:[%s15047_s30 + $0x648] sm:$0xf]  ;;  %v10190_v6 = vor.u32 %v13500_v50, %v10189_v48  ;;  %8423 = vmatpush.bf16.msra.mxu2 %v11822_v51  ;;  %v12975_v39 = vld [vmem:[%s15047_s30 + $0x1668] sm:$0xf0] }
 0x528   : > { %v13692_v53 = vld [vmem:[%s15047_s30 + $0x6a4] sm:$0xf0]  ;;  %v10575_v44 = vld [vmem:[%s15047_s30 + $0x3a8] sm:$0xf0]  ;;  %v12978_v18 = vor.u32 %v14184_v37, %v12975_v39 }
 0x529   : > { %v11725_v10 = vld [vmem:[%s15047_s30 + $0xc48] sm:$0xf]  ;;  %v10958_v38 = vor.u32 %v13692_v53, %v10957_v52  ;;  %8436 = vmatpush.bf16.msra.mxu3 %v12590_v56  ;;  %8398 = vmatpush.bf16.msra.mxu0 %v10190_v6  ;;  %v13776_v45 = vld [vmem:[%s15047_s30 + $0x94c] sm:$0xf]  ;;  %v10578_v52 = vor.u32 %v13584_v41, %v10575_v44  ;;  %v8192_v53 = vpop.f32.mrf.mxu0 }
 0x52a   : > { %v13884_v58 = vld [vmem:[%s15047_s30 + $0xca4] sm:$0xf0]  ;;  %v11343_v47 = vld [vmem:[%s15047_s30 + $0x9a8] sm:$0xf0] }
 0x52b   : > { %v12493_v59 = vld [vmem:[%s15047_s30 + $0x1248] sm:$0xf]  ;;  %v11726_v11 = vor.u32 %v13884_v58, %v11725_v10  ;;  %8411 = vmatpush.bf16.msra.mxu1 %v10958_v38  ;;  %v13968_v48 = vld [vmem:[%s15047_s30 + $0xf4c] sm:$0xf]  ;;  %v11346_v10 = vor.u32 %v13776_v45, %v11343_v47 }
 0x52c   : > { %v14076_v60 = vld [vmem:[%s15047_s30 + $0x12a4] sm:$0xf0]  ;;  %8399 = vmatmul.bf16.vlgmr.msra.gmra.mxu0 %v15212_v26  ;;  %v12111_v50 = vld [vmem:[%s15047_s30 + $0xfa8] sm:$0xf0] }
 0x52d   : > { %v12494_v15 = vor.u32 %v14076_v60, %v12493_v59  ;;  %8424 = vmatpush.bf16.msra.mxu2 %v11726_v11  ;;  %8443 = vmatpush.bf16.msrb.mxu0 %v10866_v16  ;;  %v14160_v12 = vld [vmem:[%s15047_s30 + $0x154c] sm:$0xf]  ;;  %v12114_v55 = vor.u32 %v13968_v48, %v12111_v50  ;;  %v8193_v60 = vadd.f32 %v8192_v53, %v3567_v46  ;;  %v10869_v53 = vld [vmem:[%s15047_s30 + $0x590] sm:$0xf] }
 0x52e   : > { %8412 = vmatmul.bf16.vlgmr.msra.gmra.mxu1 %v15216_v29  ;;  %v12879_v51 = vld [vmem:[%s15047_s30 + $0x15a8] sm:$0xf0]  ;;  %v8218_v16 = vpop.f32.mrf.mxu2  ;;  %v8207_v49 = vpop.f32.mrf.mxu1 }
 0x52f   : > { %8437 = vmatpush.bf16.msra.mxu3 %v12494_v15  ;;  %8456 = vmatpush.bf16.msrb.mxu1 %v11634_v62  ;;  %v13560_v56 = vld [vmem:[%s15047_s30 + $0x28c] sm:$0xf]  ;;  %v12882_v1 = vor.u32 %v14160_v12, %v12879_v51  ;;  %v8206_v8 = vadd.f32 %v8205_v61, %v8193_v60  ;;  %v12405_v60 = vld [vmem:[%s15047_s30 + $0x1190] sm:$0xf] }
 0x530   : > { %8425 = vmatmul.bf16.vlgmr.msra.gmra.mxu2 %v15210_v25  ;;  %v10479_v58 = vld [vmem:[%s15047_s30 + $0x2e8] sm:$0xf0]  ;;  %v14053_v61 = vld [vmem:[%s15047_s30 + $0x11ec] sm:$0xf0] }
 0x531   : > { %8469 = vmatpush.bf16.msrb.mxu2 %v12402_v17  ;;  %8444 = vmatpush.bf16.msrb.mxu0 %v10770_v30  ;;  %v13752_v59 = vld [vmem:[%s15047_s30 + $0x88c] sm:$0xf]  ;;  %v10482_v9 = vor.u32 %v13560_v56, %v10479_v58  ;;  %v8219_v57 = vadd.f32 %v8218_v16, %v8206_v8  ;;  %v8194_v28 = vpop.f32.mrf.mxu0  ;;  %v12309_v16 = vld [vmem:[%s15047_s30 + $0x10d0] sm:$0xf] }
 0x532   : > { %8438 = vmatmul.bf16.vlgmr.msra.gmra.mxu3 %v15214_v27  ;;  %v11247_v2 = vld [vmem:[%s15047_s30 + $0x8e8] sm:$0xf0]  ;;  %v13813_v28 = vld [vmem:[%s15047_s30 + $0xa6c] sm:$0xf0] }
 0x533   : > { %8482 = vmatpush.bf16.msrb.mxu3 %v13170_v21  ;;  %8457 = vmatpush.bf16.msrb.mxu1 %v11538_v63  ;;  %v13944_v4 = vld [vmem:[%s15047_s30 + $0xe8c] sm:$0xf]  ;;  %v11250_v38 = vor.u32 %v13752_v59, %v11247_v2  ;;  %v8231_v21 = vpop.f32.mrf.mxu3  ;;  %v13861_v59 = vld [vmem:[%s15047_s30 + $0xbec] sm:$0xf0] }
 0x534   : > { %v12015_v5 = vld [vmem:[%s15047_s30 + $0xee8] sm:$0xf0]  ;;  %v8232_v24 = vadd.f32 %v8231_v21, %v8219_v57  ;;  %v10581_v49 = vld [vmem:[%s15047_s30 + $0x350] sm:$0xf] }
 0x535   : > { %8470 = vmatpush.bf16.msrb.mxu2 %v12306_v31  ;;  %8445 = vmatpush.bf16.msrb.mxu0 %v10674_v40  ;;  %v14136_v6 = vld [vmem:[%s15047_s30 + $0x148c] sm:$0xf]  ;;  %v12018_v11 = vor.u32 %v13944_v4, %v12015_v5  ;;  %v13173_v4 = vld [vmem:[%s15047_s30 + $0x1790] sm:$0xf] }
 0x536   : > { %v12783_v7 = vld [vmem:[%s15047_s30 + $0x14e8] sm:$0xf0]  ;;  %14424 = vtanh.f32 %v8232_v24  ;;  %v8220_v47 = vpop.f32.mrf.mxu2  ;;  %v14245_v5 = vld [vmem:[%s15047_s30 + $0x17ec] sm:$0xf0] }
 0x537   : > { %8483 = vmatpush.bf16.msrb.mxu3 %v13074_v34  ;;  %8458 = vmatpush.bf16.msrb.mxu1 %v11442_v42  ;;  %v10383_v14 = vld [vmem:[%s15047_s30 + $0x228] sm:$0xf0]  ;;  %v12786_v62 = vor.u32 %v14136_v6, %v12783_v7  ;;  %v10485_v47 = vld [vmem:[%s15047_s30 + $0x290] sm:$0xf] }
 0x538   : > { %v13728_v15 = vld [vmem:[%s15047_s30 + $0x7cc] sm:$0xf]  ;;  %v10386_v23 = vor.u32 %v13536_v13, %v10383_v14  ;;  %v11541_v13 = vld [vmem:[%s15047_s30 + $0xad0] sm:$0xf]  ;;  %v13174_v14 = vor.u32 %v14245_v5, %v13173_v4 }
 0x539   : > { %8471 = vmatpush.bf16.msrb.mxu2 %v12210_v43  ;;  %8446 = vmatpush.bf16.msrb.mxu0 %v10578_v52  ;;  %v11151_v17 = vld [vmem:[%s15047_s30 + $0x828] sm:$0xf0]  ;;  %v13549_v4 = vld [vmem:[%s15047_s30 + $0x22c] sm:$0xf0] }
 0x53a   : > { %v13920_v19 = vld [vmem:[%s15047_s30 + $0xdcc] sm:$0xf]  ;;  %v11154_v30 = vor.u32 %v13728_v15, %v11151_v17  ;;  %v13837_v15 = vld [vmem:[%s15047_s30 + $0xb2c] sm:$0xf0] }
 0x53b   : > { %8484 = vmatpush.bf16.msrb.mxu3 %v12978_v18  ;;  %8459 = vmatpush.bf16.msrb.mxu1 %v11346_v10  ;;  %v11919_v20 = vld [vmem:[%s15047_s30 + $0xe28] sm:$0xf0]  ;;  %v8233_v52 = vpop.f32.mrf.mxu3  ;;  %v13669_v10 = vld [vmem:[%s15047_s30 + $0x5ec] sm:$0xf0]  ;;  %v11542_v57 = vor.u32 %v13837_v15, %v11541_v13 }
 0x53c   : > { %v14112_v3 = vld [vmem:[%s15047_s30 + $0x13cc] sm:$0xf]  ;;  %v11922_v63 = vor.u32 %v13920_v19, %v11919_v20  ;;  %v14425_v56 = vpop.eup %14424  ;;  %v10870_v7 = vor.u32 %v13669_v10, %v10869_v53  ;;  %v13077_v17 = vld [vmem:[%s15047_s30 + $0x16d0] sm:$0xf] }
 0x53d   : > { %8472 = vmatpush.bf16.msrb.mxu2 %v12114_v55  ;;  %v12687_v22 = vld [vmem:[%s15047_s30 + $0x1428] sm:$0xf0]  ;;  %8447 = vmatpush.bf16.msrb.mxu0 %v10482_v9  ;;  %v11637_v55 = vld [vmem:[%s15047_s30 + $0xb90] sm:$0xf]  ;;  %8741 = vst [vmem:[%s15057_s7 + $0x70] sm:$0xff] %v14425_v56  ;;  %v12406_v9 = vor.u32 %v14053_v61, %v12405_v60 }
 0x53e   : > { %v13512_v31 = vld [vmem:[%s15047_s30 + $0x10c] sm:$0xf]  ;;  %v12690_v34 = vor.u32 %v14112_v3, %v12687_v22  ;;  %v11638_v8 = vor.u32 %v13861_v59, %v11637_v55  ;;  %v14221_v19 = vld [vmem:[%s15047_s30 + $0x172c] sm:$0xf0] }
 0x53f   : > { %8485 = vmatpush.bf16.msrb.mxu3 %v12882_v1  ;;  %8460 = vmatpush.bf16.msrb.mxu1 %v11250_v38  ;;  %v10287_v32 = vld [vmem:[%s15047_s30 + $0x168] sm:$0xf0]  ;;  %v10773_v38 = vld [vmem:[%s15047_s30 + $0x4d0] sm:$0xf]  ;;  %v13078_v24 = vor.u32 %v14221_v19, %v13077_v17 }
 0x540   : > { %v13704_v33 = vld [vmem:[%s15047_s30 + $0x70c] sm:$0xf]  ;;  %v10290_v40 = vor.u32 %v13512_v31, %v10287_v32  ;;  %v10677_v3 = vld [vmem:[%s15047_s30 + $0x410] sm:$0xf] }
 0x541   : > { %8473 = vmatpush.bf16.msrb.mxu2 %v12018_v11  ;;  %v11055_v54 = vld [vmem:[%s15047_s30 + $0x768] sm:$0xf0]  ;;  %8448 = vmatpush.bf16.msrb.mxu0 %v10386_v23  ;;  %v13645_v11 = vld [vmem:[%s15047_s30 + $0x52c] sm:$0xf0] }
 0x542   : > { %v13896_v35 = vld [vmem:[%s15047_s30 + $0xd0c] sm:$0xf]  ;;  %v11058_v43 = vor.u32 %v13704_v33, %v11055_v54  ;;  %v10774_v20 = vor.u32 %v13645_v11, %v10773_v38  ;;  %v13621_v22 = vld [vmem:[%s15047_s30 + $0x46c] sm:$0xf0] }
 0x543   : > { %8486 = vmatpush.bf16.msrb.mxu3 %v12786_v62  ;;  %v11823_v36 = vld [vmem:[%s15047_s30 + $0xd68] sm:$0xf0]  ;;  %8461 = vmatpush.bf16.msrb.mxu1 %v11154_v30  ;;  %v14029_v62 = vld [vmem:[%s15047_s30 + $0x112c] sm:$0xf0]  ;;  %v10678_v33 = vor.u32 %v13621_v22, %v10677_v3 }
 0x544   : > { %v14088_v37 = vld [vmem:[%s15047_s30 + $0x130c] sm:$0xf]  ;;  %v11826_v44 = vor.u32 %v13896_v35, %v11823_v36  ;;  %v12310_v21 = vor.u32 %v14029_v62, %v12309_v16  ;;  %v11445_v23 = vld [vmem:[%s15047_s30 + $0xa10] sm:$0xf] }
 0x545   : > { %v12591_v39 = vld [vmem:[%s15047_s30 + $0x1368] sm:$0xf0]  ;;  %8474 = vmatpush.bf16.msrb.mxu2 %v11922_v63  ;;  %8449 = vmatpush.bf16.msrb.mxu0 %v10290_v40  ;;  %v12213_v30 = vld [vmem:[%s15047_s30 + $0x1010] sm:$0xf] }
 0x546   : > { %v13488_v41 = vld [vmem:[%s15047_s30 + $0x4c] sm:$0xf]  ;;  %v12594_v48 = vor.u32 %v14088_v37, %v12591_v39  ;;  %v14005_v63 = vld [vmem:[%s15047_s30 + $0x106c] sm:$0xf0]  ;;  %v3568_v37 = vperm.slane %v16339_v0, 7 }
 0x547   : > { %v10191_v42 = vld [vmem:[%s15047_s30 + $0xa8] sm:$0xf0]  ;;  %8487 = vmatpush.bf16.msrb.mxu3 %v12690_v34  ;;  %8462 = vmatpush.bf16.msrb.mxu1 %v11058_v43  ;;  %v12981_v31 = vld [vmem:[%s15047_s30 + $0x1610] sm:$0xf]  ;;  %v11446_v34 = vor.u32 %v13813_v28, %v11445_v23  ;;  %v12214_v54 = vor.u32 %v14005_v63, %v12213_v30 }
 0x548   : > { %v13680_v45 = vld [vmem:[%s15047_s30 + $0x64c] sm:$0xf]  ;;  %v10194_v58 = vor.u32 %v13488_v41, %v10191_v42  ;;  %v14197_v32 = vld [vmem:[%s15047_s30 + $0x166c] sm:$0xf0] }
 0x549   : > { %v10959_v46 = vld [vmem:[%s15047_s30 + $0x6a8] sm:$0xf0]  ;;  %8475 = vmatpush.bf16.msrb.mxu2 %v11826_v44  ;;  %v13597_v35 = vld [vmem:[%s15047_s30 + $0x3ac] sm:$0xf0]  ;;  %v12982_v39 = vor.u32 %v14197_v32, %v12981_v31 }
 0x54a   : > { %v13872_v18 = vld [vmem:[%s15047_s30 + $0xc4c] sm:$0xf]  ;;  %v10962_v1 = vor.u32 %v13680_v45, %v10959_v46  ;;  %8450 = vmatpush.bf16.msrb.mxu0 %v10194_v58  ;;  %v11349_v36 = vld [vmem:[%s15047_s30 + $0x950] sm:$0xf]  ;;  %v10582_v45 = vor.u32 %v13597_v35, %v10581_v49  ;;  %v8244_v46 = vpop.f32.mrf.mxu0 }
 0x54b   : > { %v11727_v50 = vld [vmem:[%s15047_s30 + $0xca8] sm:$0xf0]  ;;  %8488 = vmatpush.bf16.msrb.mxu3 %v12594_v48  ;;  %v13789_v40 = vld [vmem:[%s15047_s30 + $0x9ac] sm:$0xf0] }
 0x54c   : > { %v14064_v12 = vld [vmem:[%s15047_s30 + $0x124c] sm:$0xf]  ;;  %v11730_v2 = vor.u32 %v13872_v18, %v11727_v50  ;;  %8463 = vmatpush.bf16.msrb.mxu1 %v10962_v1  ;;  %v12117_v41 = vld [vmem:[%s15047_s30 + $0xf50] sm:$0xf]  ;;  %v11350_v0 = vor.u32 %v13789_v40, %v11349_v36 }
 0x54d   : > { %v12495_v51 = vld [vmem:[%s15047_s30 + $0x12a8] sm:$0xf0]  ;;  %8451 = vmatmul.bf16.vlgmr.msrb.gmra.mxu0 %v15212_v26  ;;  %v13981_v42 = vld [vmem:[%s15047_s30 + $0xfac] sm:$0xf0] }
 0x54e   : > { %v12498_v6 = vor.u32 %v14064_v12, %v12495_v51  ;;  %8476 = vmatpush.bf16.msrb.mxu2 %v11730_v2  ;;  %8495 = vmatpush.bf16.msra.mxu0 %v10870_v7  ;;  %v12885_v43 = vld [vmem:[%s15047_s30 + $0x1550] sm:$0xf]  ;;  %v12118_v18 = vor.u32 %v13981_v42, %v12117_v41  ;;  %v8245_v12 = vadd.f32 %v8244_v46, %v3568_v37  ;;  %v8257_v51 = vpop.f32.mrf.mxu1  ;;  %v10871_v46 = vld [vmem:[%s15047_s30 + $0x5f0] sm:$0xf0] }
 0x54f   : > { %8464 = vmatmul.bf16.vlgmr.msrb.gmra.mxu1 %v15216_v29  ;;  %v14173_v44 = vld [vmem:[%s15047_s30 + $0x15ac] sm:$0xf0] }
 0x550   : > { %8489 = vmatpush.bf16.msrb.mxu3 %v12498_v6  ;;  %8508 = vmatpush.bf16.msra.mxu1 %v11638_v8  ;;  %v13573_v48 = vld [vmem:[%s15047_s30 + $0x2ec] sm:$0xf0]  ;;  %v12886_v52 = vor.u32 %v14173_v44, %v12885_v43  ;;  %v8258_v59 = vadd.f32 %v8257_v51, %v8245_v12  ;;  %v8270_v6 = vpop.f32.mrf.mxu2  ;;  %v12407_v12 = vld [vmem:[%s15047_s30 + $0x11f0] sm:$0xf0] }
 0x551   : > { %8477 = vmatmul.bf16.vlgmr.msrb.gmra.mxu2 %v15210_v25  ;;  %v11253_v50 = vld [vmem:[%s15047_s30 + $0x890] sm:$0xf]  ;;  %v10486_v60 = vor.u32 %v13573_v48, %v10485_v47  ;;  %v8283_v13 = vpop.f32.mrf.mxu3  ;;  %v11639_v48 = vld [vmem:[%s15047_s30 + $0xbf0] sm:$0xf0] }
 0x552   : > { %8521 = vmatpush.bf16.msra.mxu2 %v12406_v9  ;;  %8496 = vmatpush.bf16.msra.mxu0 %v10774_v20  ;;  %v13765_v53 = vld [vmem:[%s15047_s30 + $0x8ec] sm:$0xf0]  ;;  %v8271_v11 = vadd.f32 %v8270_v6, %v8258_v59  ;;  %v8246_v17 = vpop.f32.mrf.mxu0  ;;  %v12311_v6 = vld [vmem:[%s15047_s30 + $0x1130] sm:$0xf0] }
 0x553   : > { %8490 = vmatmul.bf16.vlgmr.msrb.gmra.mxu3 %v15214_v27  ;;  %v12021_v10 = vld [vmem:[%s15047_s30 + $0xe90] sm:$0xf]  ;;  %v11254_v61 = vor.u32 %v13765_v53, %v11253_v50  ;;  %v14041_v50 = vld [vmem:[%s15047_s30 + $0x1194] sm:$0xf] }
 0x554   : > { %8534 = vmatpush.bf16.msra.mxu3 %v13174_v14  ;;  %8509 = vmatpush.bf16.msra.mxu1 %v11542_v57  ;;  %v13957_v55 = vld [vmem:[%s15047_s30 + $0xeec] sm:$0xf0]  ;;  %v8284_v62 = vadd.f32 %v8283_v13, %v8271_v11  ;;  %v14233_v53 = vld [vmem:[%s15047_s30 + $0x1794] sm:$0xf]  ;;  %v12410_v59 = vor.u32 %v14041_v50, %v12407_v12 }
 0x555   : > { %v12789_v56 = vld [vmem:[%s15047_s30 + $0x1490] sm:$0xf]  ;;  %v12022_v1 = vor.u32 %v13957_v55, %v12021_v10  ;;  %v13175_v10 = vld [vmem:[%s15047_s30 + $0x17f0] sm:$0xf0] }
 0x556   : > { %8522 = vmatpush.bf16.msra.mxu2 %v12310_v21  ;;  %8497 = vmatpush.bf16.msra.mxu0 %v10678_v33  ;;  %v14149_v58 = vld [vmem:[%s15047_s30 + $0x14ec] sm:$0xf0]  ;;  %v8259_v22 = vpop.f32.mrf.mxu1  ;;  %14426 = vtanh.f32 %v8284_v62  ;;  %v13993_v17 = vld [vmem:[%s15047_s30 + $0x1014] sm:$0xf] }
 0x557   : > { %v10389_v2 = vld [vmem:[%s15047_s30 + $0x1d0] sm:$0xf]  ;;  %v12790_v7 = vor.u32 %v14149_v58, %v12789_v56  ;;  %v13585_v22 = vld [vmem:[%s15047_s30 + $0x354] sm:$0xf] }
 0x558   : > { %8535 = vmatpush.bf16.msra.mxu3 %v13078_v24  ;;  %8510 = vmatpush.bf16.msra.mxu1 %v11446_v34  ;;  %v11157_v5 = vld [vmem:[%s15047_s30 + $0x7d0] sm:$0xf]  ;;  %v10390_v16 = vor.u32 %v13549_v4, %v10389_v2  ;;  %v13178_v2 = vor.u32 %v14233_v53, %v13175_v10  ;;  %v11543_v4 = vld [vmem:[%s15047_s30 + $0xb30] sm:$0xf0] }
 0x559   : > { %v13741_v8 = vld [vmem:[%s15047_s30 + $0x82c] sm:$0xf0]  ;;  %v8285_v44 = vpop.f32.mrf.mxu3  ;;  %v13537_v53 = vld [vmem:[%s15047_s30 + $0x1d4] sm:$0xf] }
 0x55a   : > { %8523 = vmatpush.bf16.msra.mxu2 %v12214_v54  ;;  %8498 = vmatpush.bf16.msra.mxu0 %v10582_v45  ;;  %v11925_v9 = vld [vmem:[%s15047_s30 + $0xdd0] sm:$0xf]  ;;  %v11158_v19 = vor.u32 %v13741_v8, %v11157_v5  ;;  %v13657_v45 = vld [vmem:[%s15047_s30 + $0x594] sm:$0xf] }
 0x55b   : > { %v13933_v38 = vld [vmem:[%s15047_s30 + $0xe2c] sm:$0xf0]  ;;  %v10874_v56 = vor.u32 %v13657_v45, %v10871_v46  ;;  %v14017_v5 = vld [vmem:[%s15047_s30 + $0x10d4] sm:$0xf] }
 0x55c   : > { %8536 = vmatpush.bf16.msra.mxu3 %v12982_v39  ;;  %8511 = vmatpush.bf16.msra.mxu1 %v11350_v0  ;;  %v12693_v14 = vld [vmem:[%s15047_s30 + $0x13d0] sm:$0xf]  ;;  %v11926_v20 = vor.u32 %v13933_v38, %v11925_v9  ;;  %v8272_v39 = vpop.f32.mrf.mxu2  ;;  %v13849_v0 = vld [vmem:[%s15047_s30 + $0xb94] sm:$0xf]  ;;  %v12314_v13 = vor.u32 %v14017_v5, %v12311_v6 }
 0x55d   : > { %v14125_v15 = vld [vmem:[%s15047_s30 + $0x142c] sm:$0xf0]  ;;  %v11642_v58 = vor.u32 %v13849_v0, %v11639_v48  ;;  %v13079_v8 = vld [vmem:[%s15047_s30 + $0x1730] sm:$0xf0] }
 0x55e   : > { %8524 = vmatpush.bf16.msra.mxu2 %v12118_v18  ;;  %8499 = vmatpush.bf16.msra.mxu0 %v10486_v60  ;;  %v10293_v57 = vld [vmem:[%s15047_s30 + $0x110] sm:$0xf]  ;;  %v12694_v23 = vor.u32 %v14125_v15, %v12693_v14  ;;  %v14427_v18 = vpop.eup %14426  ;;  %v13633_v60 = vld [vmem:[%s15047_s30 + $0x4d4] sm:$0xf] }
 0x55f   : > { %v13525_v21 = vld [vmem:[%s15047_s30 + $0x16c] sm:$0xf0]  ;;  %8742 = vst [vmem:[%s15057_s7 + $0x78] sm:$0xff] %v14427_v18  ;;  %v13609_v38 = vld [vmem:[%s15047_s30 + $0x414] sm:$0xf] }
 0x560   : > { %8537 = vmatpush.bf16.msra.mxu3 %v12886_v52  ;;  %8512 = vmatpush.bf16.msra.mxu1 %v11254_v61  ;;  %v11061_v3 = vld [vmem:[%s15047_s30 + $0x710] sm:$0xf]  ;;  %v10294_v32 = vor.u32 %v13525_v21, %v10293_v57  ;;  %v10775_v61 = vld [vmem:[%s15047_s30 + $0x530] sm:$0xf0] }
 0x561   : > { %v13717_v24 = vld [vmem:[%s15047_s30 + $0x76c] sm:$0xf0]  ;;  %v10778_v9 = vor.u32 %v13633_v60, %v10775_v61  ;;  %v10679_v14 = vld [vmem:[%s15047_s30 + $0x470] sm:$0xf0] }
 0x562   : > { %8525 = vmatpush.bf16.msra.mxu2 %v12022_v1  ;;  %v11829_v28 = vld [vmem:[%s15047_s30 + $0xd10] sm:$0xf]  ;;  %8500 = vmatpush.bf16.msra.mxu0 %v10390_v16  ;;  %v11062_v34 = vor.u32 %v13717_v24, %v11061_v3  ;;  %v13825_v1 = vld [vmem:[%s15047_s30 + $0xad4] sm:$0xf]  ;;  %v10682_v3 = vor.u32 %v13609_v38, %v10679_v14 }
 0x563   : > { %v13909_v30 = vld [vmem:[%s15047_s30 + $0xd6c] sm:$0xf0]  ;;  %v11546_v11 = vor.u32 %v13825_v1, %v11543_v4  ;;  %v13801_v15 = vld [vmem:[%s15047_s30 + $0xa14] sm:$0xf] }
 0x564   : > { %8538 = vmatpush.bf16.msra.mxu3 %v12790_v7  ;;  %v12597_v63 = vld [vmem:[%s15047_s30 + $0x1310] sm:$0xf]  ;;  %8513 = vmatpush.bf16.msra.mxu1 %v11158_v19  ;;  %v11830_v54 = vor.u32 %v13909_v30, %v11829_v28  ;;  %v14209_v7 = vld [vmem:[%s15047_s30 + $0x16d4] sm:$0xf] }
 0x565   : > { %v14101_v31 = vld [vmem:[%s15047_s30 + $0x136c] sm:$0xf0]  ;;  %v11447_v16 = vld [vmem:[%s15047_s30 + $0xa70] sm:$0xf0]  ;;  %v13082_v62 = vor.u32 %v14209_v7, %v13079_v8 }
 0x566   : > { %v10197_v33 = vld [vmem:[%s15047_s30 + $0x50] sm:$0xf]  ;;  %8526 = vmatpush.bf16.msra.mxu2 %v11926_v20  ;;  %v12598_v40 = vor.u32 %v14101_v31, %v12597_v63  ;;  %8501 = vmatpush.bf16.msra.mxu0 %v10294_v32  ;;  %v12215_v19 = vld [vmem:[%s15047_s30 + $0x1070] sm:$0xf0] }
 0x567   : > { %v13501_v49 = vld [vmem:[%s15047_s30 + $0xac] sm:$0xf0]  ;;  %v14185_v57 = vld [vmem:[%s15047_s30 + $0x1614] sm:$0xf]  ;;  %v12218_v24 = vor.u32 %v13993_v17, %v12215_v19 }
 0x568   : > { %v10965_v35 = vld [vmem:[%s15047_s30 + $0x650] sm:$0xf]  ;;  %8539 = vmatpush.bf16.msra.mxu3 %v12694_v23  ;;  %v10198_v47 = vor.u32 %v13501_v49, %v10197_v33  ;;  %8514 = vmatpush.bf16.msra.mxu1 %v11062_v34  ;;  %v12983_v21 = vld [vmem:[%s15047_s30 + $0x1670] sm:$0xf0]  ;;  %v11450_v23 = vor.u32 %v13801_v15, %v11447_v16  ;;  %v8309_v44 = vpop.f32.mrf.mxu1 }
 0x569   : > { %v13693_v36 = vld [vmem:[%s15047_s30 + $0x6ac] sm:$0xf0]  ;;  %v10583_v28 = vld [vmem:[%s15047_s30 + $0x3b0] sm:$0xf0]  ;;  %v12986_v31 = vor.u32 %v14185_v57, %v12983_v21 }
 0x56a   : > { %v11733_v37 = vld [vmem:[%s15047_s30 + $0xc50] sm:$0xf]  ;;  %8527 = vmatpush.bf16.msra.mxu2 %v11830_v54  ;;  %v10966_v51 = vor.u32 %v13693_v36, %v10965_v35  ;;  %8502 = vmatpush.bf16.msra.mxu0 %v10198_v47  ;;  %v13777_v30 = vld [vmem:[%s15047_s30 + $0x954] sm:$0xf]  ;;  %v10586_v35 = vor.u32 %v13585_v22, %v10583_v28  ;;  %v8296_v36 = vpop.f32.mrf.mxu0 }
 0x56b   : > { %v13885_v41 = vld [vmem:[%s15047_s30 + $0xcac] sm:$0xf0]  ;;  %v11351_v32 = vld [vmem:[%s15047_s30 + $0x9b0] sm:$0xf0] }
 0x56c   : > { %v12501_v42 = vld [vmem:[%s15047_s30 + $0x1250] sm:$0xf]  ;;  %v11734_v52 = vor.u32 %v13885_v41, %v11733_v37  ;;  %8540 = vmatpush.bf16.msra.mxu3 %v12598_v40  ;;  %8515 = vmatpush.bf16.msra.mxu1 %v10966_v51  ;;  %v13969_v33 = vld [vmem:[%s15047_s30 + $0xf54] sm:$0xf]  ;;  %v11354_v37 = vor.u32 %v13777_v30, %v11351_v32 }
 0x56d   : > { %v14077_v43 = vld [vmem:[%s15047_s30 + $0x12ac] sm:$0xf0]  ;;  %8503 = vmatmul.bf16.vlgmr.msra.gmra.mxu0 %v15212_v26  ;;  %v12119_v49 = vld [vmem:[%s15047_s30 + $0xfb0] sm:$0xf0] }
 0x56e   : > { %v12502_v55 = vor.u32 %v14077_v43, %v12501_v42  ;;  %8528 = vmatpush.bf16.msra.mxu2 %v11734_v52  ;;  %8547 = vmatpush.bf16.msrb.mxu0 %v10874_v56  ;;  %v16614_v20 = vld [vmem:[%s15055_s23 + $0x10] sm:$0xff]  ;;  %v12122_v39 = vor.u32 %v13969_v33, %v12119_v49 }
 0x56f   : > { %8516 = vmatmul.bf16.vlgmr.msra.gmra.mxu1 %v15216_v29  ;;  %v3569_v63 = vperm.slane %v16614_v20, 0  ;;  %v14161_v34 = vld [vmem:[%s15047_s30 + $0x1554] sm:$0xf] }
 0x570   : > { %8541 = vmatpush.bf16.msra.mxu3 %v12502_v55  ;;  %8560 = vmatpush.bf16.msrb.mxu1 %v11642_v58  ;;  %v12887_v54 = vld [vmem:[%s15047_s30 + $0x15b0] sm:$0xf0]  ;;  %v8322_v56 = vpop.f32.mrf.mxu2  ;;  %v8311_v15 = vpop.f32.mrf.mxu1 }
 0x571   : > { %8529 = vmatmul.bf16.vlgmr.msra.gmra.mxu2 %v15210_v25  ;;  %v13561_v40 = vld [vmem:[%s15047_s30 + $0x294] sm:$0xf]  ;;  %v8297_v43 = vadd.f32 %v8296_v36, %v3569_v63  ;;  %v12890_v45 = vor.u32 %v14161_v34, %v12887_v54  ;;  %v10877_v36 = vld [vmem:[%s15047_s30 + $0x598] sm:$0xf] }
 0x572   : > { %8573 = vmatpush.bf16.msrb.mxu2 %v12410_v59  ;;  %8548 = vmatpush.bf16.msrb.mxu0 %v10778_v9  ;;  %v10487_v41 = vld [vmem:[%s15047_s30 + $0x2f0] sm:$0xf0]  ;;  %v8298_v8 = vpop.f32.mrf.mxu0  ;;  %v10589_v15 = vld [vmem:[%s15047_s30 + $0x358] sm:$0xf] }
 0x573   : > { %8542 = vmatmul.bf16.vlgmr.msra.gmra.mxu3 %v15214_v27  ;;  %v13753_v42 = vld [vmem:[%s15047_s30 + $0x894] sm:$0xf]  ;;  %v8310_v50 = vadd.f32 %v8309_v44, %v8297_v43  ;;  %v10490_v12 = vor.u32 %v13561_v40, %v10487_v41  ;;  %v12413_v43 = vld [vmem:[%s15047_s30 + $0x1198] sm:$0xf] }
 0x574   : > { %8586 = vmatpush.bf16.msrb.mxu3 %v13178_v2  ;;  %8561 = vmatpush.bf16.msrb.mxu1 %v11546_v11  ;;  %v11255_v46 = vld [vmem:[%s15047_s30 + $0x8f0] sm:$0xf0]  ;;  %v8335_v2 = vpop.f32.mrf.mxu3  ;;  %v14054_v44 = vld [vmem:[%s15047_s30 + $0x11f4] sm:$0xf0] }
 0x575   : > { %v13945_v0 = vld [vmem:[%s15047_s30 + $0xe94] sm:$0xf]  ;;  %v11258_v51 = vor.u32 %v13753_v42, %v11255_v46  ;;  %v8323_v1 = vadd.f32 %v8322_v56, %v8310_v50  ;;  %v13862_v42 = vld [vmem:[%s15047_s30 + $0xbf4] sm:$0xf0] }
 0x576   : > { %8574 = vmatpush.bf16.msrb.mxu2 %v12314_v13  ;;  %8549 = vmatpush.bf16.msrb.mxu0 %v10682_v3  ;;  %v12023_v18 = vld [vmem:[%s15047_s30 + $0xef0] sm:$0xf0]  ;;  %v12317_v56 = vld [vmem:[%s15047_s30 + $0x10d8] sm:$0xf] }
 0x577   : > { %v14137_v47 = vld [vmem:[%s15047_s30 + $0x1494] sm:$0xf]  ;;  %v12026_v52 = vor.u32 %v13945_v0, %v12023_v18  ;;  %v8336_v7 = vadd.f32 %v8335_v2, %v8323_v1  ;;  %v13181_v0 = vld [vmem:[%s15047_s30 + $0x1798] sm:$0xf] }
 0x578   : > { %8587 = vmatpush.bf16.msrb.mxu3 %v13082_v62  ;;  %8562 = vmatpush.bf16.msrb.mxu1 %v11450_v23  ;;  %v12791_v48 = vld [vmem:[%s15047_s30 + $0x14f0] sm:$0xf0]  ;;  %v8324_v32 = vpop.f32.mrf.mxu2  ;;  %v14246_v18 = vld [vmem:[%s15047_s30 + $0x17f4] sm:$0xf0] }
 0x579   : > { %v10391_v10 = vld [vmem:[%s15047_s30 + $0x230] sm:$0xf0]  ;;  %v12794_v58 = vor.u32 %v14137_v47, %v12791_v48  ;;  %14428 = vtanh.f32 %v8336_v7  ;;  %v13814_v8 = vld [vmem:[%s15047_s30 + $0xa74] sm:$0xf0] }
 0x57a   : > { %8575 = vmatpush.bf16.msrb.mxu2 %v12218_v24  ;;  %8550 = vmatpush.bf16.msrb.mxu0 %v10586_v35  ;;  %v13729_v55 = vld [vmem:[%s15047_s30 + $0x7d4] sm:$0xf]  ;;  %v10394_v6 = vor.u32 %v13537_v53, %v10391_v10  ;;  %v11549_v53 = vld [vmem:[%s15047_s30 + $0xad8] sm:$0xf]  ;;  %v13182_v10 = vor.u32 %v14246_v18, %v13181_v0 }
 0x57b   : > { %v11159_v59 = vld [vmem:[%s15047_s30 + $0x830] sm:$0xf0]  ;;  %v10397_v0 = vld [vmem:[%s15047_s30 + $0x1d8] sm:$0xf] }
 0x57c   : > { %8588 = vmatpush.bf16.msrb.mxu3 %v12986_v31  ;;  %8563 = vmatpush.bf16.msrb.mxu1 %v11354_v37  ;;  %v13921_v60 = vld [vmem:[%s15047_s30 + $0xdd4] sm:$0xf]  ;;  %v11162_v9 = vor.u32 %v13729_v55, %v11159_v59  ;;  %v8337_v35 = vpop.f32.mrf.mxu3  ;;  %v13670_v37 = vld [vmem:[%s15047_s30 + $0x5f4] sm:$0xf0] }
 0x57d   : > { %v11927_v61 = vld [vmem:[%s15047_s30 + $0xe30] sm:$0xf0]  ;;  %v10878_v48 = vor.u32 %v13670_v37, %v10877_v36  ;;  %v13838_v55 = vld [vmem:[%s15047_s30 + $0xb34] sm:$0xf0] }
 0x57e   : > { %8576 = vmatpush.bf16.msrb.mxu2 %v12122_v39  ;;  %v14113_v4 = vld [vmem:[%s15047_s30 + $0x13d4] sm:$0xf]  ;;  %8551 = vmatpush.bf16.msrb.mxu0 %v10490_v12  ;;  %v11930_v38 = vor.u32 %v13921_v60, %v11927_v61  ;;  %v11645_v39 = vld [vmem:[%s15047_s30 + $0xb98] sm:$0xf]  ;;  %v12414_v12 = vor.u32 %v14054_v44, %v12413_v43  ;;  %v11550_v1 = vor.u32 %v13838_v55, %v11549_v53 }
 0x57f   : > { %v12695_v5 = vld [vmem:[%s15047_s30 + $0x1430] sm:$0xf0]  ;;  %v14429_v40 = vpop.eup %14428  ;;  %v11646_v50 = vor.u32 %v13862_v42, %v11645_v39  ;;  %v13085_v59 = vld [vmem:[%s15047_s30 + $0x16d8] sm:$0xf] }
 0x580   : > { %8589 = vmatpush.bf16.msrb.mxu3 %v12890_v45  ;;  %8564 = vmatpush.bf16.msrb.mxu1 %v11258_v51  ;;  %v13513_v11 = vld [vmem:[%s15047_s30 + $0x114] sm:$0xf]  ;;  %v12698_v16 = vor.u32 %v14113_v4, %v12695_v5  ;;  %8743 = vst [vmem:[%s15057_s7 + $0x80] sm:$0xff] %v14429_v40  ;;  %v10781_v51 = vld [vmem:[%s15047_s30 + $0x4d8] sm:$0xf] }
 0x581   : > { %v10295_v13 = vld [vmem:[%s15047_s30 + $0x170] sm:$0xf0]  ;;  %v14222_v60 = vld [vmem:[%s15047_s30 + $0x1734] sm:$0xf0] }
 0x582   : > { %8577 = vmatpush.bf16.msrb.mxu2 %v12026_v52  ;;  %v13705_v14 = vld [vmem:[%s15047_s30 + $0x714] sm:$0xf]  ;;  %8552 = vmatpush.bf16.msrb.mxu0 %v10394_v6  ;;  %v10298_v3 = vor.u32 %v13513_v11, %v10295_v13  ;;  %v13646_v52 = vld [vmem:[%s15047_s30 + $0x534] sm:$0xf0]  ;;  %v13086_v7 = vor.u32 %v14222_v60, %v13085_v59 }
 0x583   : > { %v11063_v62 = vld [vmem:[%s15047_s30 + $0x770] sm:$0xf0]  ;;  %v10782_v61 = vor.u32 %v13646_v52, %v10781_v51  ;;  %v10685_v4 = vld [vmem:[%s15047_s30 + $0x418] sm:$0xf] }
 0x584   : > { %8590 = vmatpush.bf16.msrb.mxu3 %v12794_v58  ;;  %v13897_v17 = vld [vmem:[%s15047_s30 + $0xd14] sm:$0xf]  ;;  %8565 = vmatpush.bf16.msrb.mxu1 %v11162_v9  ;;  %v11066_v24 = vor.u32 %v13705_v14, %v11063_v62  ;;  %v14030_v58 = vld [vmem:[%s15047_s30 + $0x1134] sm:$0xf0] }
 0x585   : > { %v11831_v19 = vld [vmem:[%s15047_s30 + $0xd70] sm:$0xf0]  ;;  %v12318_v2 = vor.u32 %v14030_v58, %v12317_v56  ;;  %v13622_v5 = vld [vmem:[%s15047_s30 + $0x474] sm:$0xf0] }
 0x586   : > { %v14089_v57 = vld [vmem:[%s15047_s30 + $0x1314] sm:$0xf]  ;;  %8578 = vmatpush.bf16.msrb.mxu2 %v11930_v38  ;;  %v11834_v28 = vor.u32 %v13897_v17, %v11831_v19  ;;  %8553 = vmatpush.bf16.msrb.mxu0 %v10298_v3  ;;  %v11453_v6 = vld [vmem:[%s15047_s30 + $0xa18] sm:$0xf]  ;;  %v10686_v14 = vor.u32 %v13622_v5, %v10685_v4 }
 0x587   : > { %v12599_v21 = vld [vmem:[%s15047_s30 + $0x1370] sm:$0xf0]  ;;  %v12221_v9 = vld [vmem:[%s15047_s30 + $0x1018] sm:$0xf] }
 0x588   : > { %v13489_v22 = vld [vmem:[%s15047_s30 + $0x54] sm:$0xf]  ;;  %8591 = vmatpush.bf16.msrb.mxu3 %v12698_v16  ;;  %v12602_v33 = vor.u32 %v14089_v57, %v12599_v21  ;;  %8566 = vmatpush.bf16.msrb.mxu1 %v11066_v24  ;;  %v14006_v38 = vld [vmem:[%s15047_s30 + $0x1074] sm:$0xf0]  ;;  %v11454_v16 = vor.u32 %v13814_v8, %v11453_v6  ;;  %v3570_v57 = vperm.slane %v16614_v20, 1 }
 0x589   : > { %v10199_v23 = vld [vmem:[%s15047_s30 + $0xb0] sm:$0xf0]  ;;  %v12989_v11 = vld [vmem:[%s15047_s30 + $0x1618] sm:$0xf]  ;;  %v12222_v62 = vor.u32 %v14006_v38, %v12221_v9  ;;  %v8361_v35 = vpop.f32.mrf.mxu1 }
 0x58a   : > { %v13681_v30 = vld [vmem:[%s15047_s30 + $0x654] sm:$0xf]  ;;  %v10202_v41 = vor.u32 %v13489_v22, %v10199_v23  ;;  %8579 = vmatpush.bf16.msrb.mxu2 %v11834_v28  ;;  %v14198_v13 = vld [vmem:[%s15047_s30 + $0x1674] sm:$0xf0] }
 0x58b   : > { %v10967_v63 = vld [vmem:[%s15047_s30 + $0x6b0] sm:$0xf0]  ;;  %v13598_v17 = vld [vmem:[%s15047_s30 + $0x3b4] sm:$0xf0]  ;;  %v12990_v21 = vor.u32 %v14198_v13, %v12989_v11 }
 0x58c   : > { %v13873_v31 = vld [vmem:[%s15047_s30 + $0xc54] sm:$0xf]  ;;  %v10970_v45 = vor.u32 %v13681_v30, %v10967_v63  ;;  %8592 = vmatpush.bf16.msrb.mxu3 %v12602_v33  ;;  %8554 = vmatpush.bf16.msrb.mxu0 %v10202_v41  ;;  %v11357_v19 = vld [vmem:[%s15047_s30 + $0x958] sm:$0xf]  ;;  %v10590_v30 = vor.u32 %v13598_v17, %v10589_v15  ;;  %v8348_v63 = vpop.f32.mrf.mxu0 }
 0x58d   : > { %v11735_v49 = vld [vmem:[%s15047_s30 + $0xcb0] sm:$0xf0]  ;;  %v13790_v3 = vld [vmem:[%s15047_s30 + $0x9b4] sm:$0xf0] }
 0x58e   : > { %v14065_v34 = vld [vmem:[%s15047_s30 + $0x1254] sm:$0xf]  ;;  %v11738_v46 = vor.u32 %v13873_v31, %v11735_v49  ;;  %8567 = vmatpush.bf16.msrb.mxu1 %v10970_v45  ;;  %v12125_v22 = vld [vmem:[%s15047_s30 + $0xf58] sm:$0xf]  ;;  %v11358_v31 = vor.u32 %v13790_v3, %v11357_v19 }
 0x58f   : > { %v12503_v54 = vld [vmem:[%s15047_s30 + $0x12b0] sm:$0xf0]  ;;  %8555 = vmatmul.bf16.vlgmr.msrb.gmra.mxu0 %v15212_v26  ;;  %v13982_v23 = vld [vmem:[%s15047_s30 + $0xfb4] sm:$0xf0] }
 0x590   : > { %v12506_v47 = vor.u32 %v14065_v34, %v12503_v54  ;;  %8580 = vmatpush.bf16.msrb.mxu2 %v11738_v46  ;;  %8599 = vmatpush.bf16.msra.mxu0 %v10878_v48  ;;  %v12893_v24 = vld [vmem:[%s15047_s30 + $0x1558] sm:$0xf]  ;;  %v12126_v32 = vor.u32 %v13982_v23, %v12125_v22  ;;  %v8349_v54 = vadd.f32 %v8348_v63, %v3570_v57  ;;  %v13658_v63 = vld [vmem:[%s15047_s30 + $0x59c] sm:$0xf] }
 0x591   : > { %8568 = vmatmul.bf16.vlgmr.msrb.gmra.mxu1 %v15216_v29  ;;  %v14174_v28 = vld [vmem:[%s15047_s30 + $0x15b4] sm:$0xf0]  ;;  %v8374_v48 = vpop.f32.mrf.mxu2  ;;  %v8363_v6 = vpop.f32.mrf.mxu1 }
 0x592   : > { %8593 = vmatpush.bf16.msrb.mxu3 %v12506_v47  ;;  %8612 = vmatpush.bf16.msra.mxu1 %v11646_v50  ;;  %v10493_v33 = vld [vmem:[%s15047_s30 + $0x298] sm:$0xf]  ;;  %v12894_v36 = vor.u32 %v14174_v28, %v12893_v24  ;;  %v8362_v43 = vadd.f32 %v8361_v35, %v8349_v54  ;;  %v14042_v54 = vld [vmem:[%s15047_s30 + $0x119c] sm:$0xf] }
 0x593   : > { %8581 = vmatmul.bf16.vlgmr.msrb.gmra.mxu2 %v15210_v25  ;;  %v13574_v49 = vld [vmem:[%s15047_s30 + $0x2f4] sm:$0xf0]  ;;  %v12415_v35 = vld [vmem:[%s15047_s30 + $0x11f8] sm:$0xf0] }
 0x594   : > { %8625 = vmatpush.bf16.msra.mxu2 %v12414_v12  ;;  %8600 = vmatpush.bf16.msra.mxu0 %v10782_v61  ;;  %v11261_v34 = vld [vmem:[%s15047_s30 + $0x898] sm:$0xf]  ;;  %v10494_v44 = vor.u32 %v13574_v49, %v10493_v33  ;;  %v8375_v53 = vadd.f32 %v8374_v48, %v8362_v43  ;;  %v8350_v60 = vpop.f32.mrf.mxu0  ;;  %v14018_v48 = vld [vmem:[%s15047_s30 + $0x10dc] sm:$0xf] }
 0x595   : > { %8594 = vmatmul.bf16.vlgmr.msrb.gmra.mxu3 %v15214_v27  ;;  %v13766_v37 = vld [vmem:[%s15047_s30 + $0x8f4] sm:$0xf0]  ;;  %v11455_v60 = vld [vmem:[%s15047_s30 + $0xa78] sm:$0xf0] }
 0x596   : > { %8638 = vmatpush.bf16.msra.mxu3 %v13182_v10  ;;  %8613 = vmatpush.bf16.msra.mxu1 %v11550_v1  ;;  %v12029_v39 = vld [vmem:[%s15047_s30 + $0xe98] sm:$0xf]  ;;  %v11262_v45 = vor.u32 %v13766_v37, %v11261_v34  ;;  %v8387_v10 = vpop.f32.mrf.mxu3  ;;  %v11647_v34 = vld [vmem:[%s15047_s30 + $0xbf8] sm:$0xf0] }
 0x597   : > { %v13958_v40 = vld [vmem:[%s15047_s30 + $0xef4] sm:$0xf0]  ;;  %v8388_v59 = vadd.f32 %v8387_v10, %v8375_v53  ;;  %v13586_v6 = vld [vmem:[%s15047_s30 + $0x35c] sm:$0xf] }
 0x598   : > { %8626 = vmatpush.bf16.msra.mxu2 %v12318_v2  ;;  %8601 = vmatpush.bf16.msra.mxu0 %v10686_v14  ;;  %v12797_v41 = vld [vmem:[%s15047_s30 + $0x1498] sm:$0xf]  ;;  %v12030_v46 = vor.u32 %v13958_v40, %v12029_v39  ;;  %v14234_v39 = vld [vmem:[%s15047_s30 + $0x179c] sm:$0xf] }
 0x599   : > { %v14150_v42 = vld [vmem:[%s15047_s30 + $0x14f4] sm:$0xf0]  ;;  %14430 = vtanh.f32 %v8388_v59  ;;  %v8376_v3 = vpop.f32.mrf.mxu2  ;;  %v13183_v40 = vld [vmem:[%s15047_s30 + $0x17f8] sm:$0xf0] }
 0x59a   : > { %8639 = vmatpush.bf16.msra.mxu3 %v13086_v7  ;;  %8614 = vmatpush.bf16.msra.mxu1 %v11454_v16  ;;  %v13550_v18 = vld [vmem:[%s15047_s30 + $0x234] sm:$0xf0]  ;;  %v12798_v50 = vor.u32 %v14150_v42, %v12797_v41 }
 0x59b   : > { %v11165_v47 = vld [vmem:[%s15047_s30 + $0x7d8] sm:$0xf]  ;;  %v10398_v58 = vor.u32 %v13550_v18, %v10397_v0  ;;  %v13826_v0 = vld [vmem:[%s15047_s30 + $0xadc] sm:$0xf]  ;;  %v13186_v18 = vor.u32 %v14234_v39, %v13183_v40 }
 0x59c   : > { %8627 = vmatpush.bf16.msra.mxu2 %v12222_v62  ;;  %8602 = vmatpush.bf16.msra.mxu0 %v10590_v30  ;;  %v13742_v12 = vld [vmem:[%s15047_s30 + $0x834] sm:$0xf0]  ;;  %v13538_v39 = vld [vmem:[%s15047_s30 + $0x1dc] sm:$0xf] }
 0x59d   : > { %v11933_v51 = vld [vmem:[%s15047_s30 + $0xdd8] sm:$0xf]  ;;  %v11166_v61 = vor.u32 %v13742_v12, %v11165_v47  ;;  %v11551_v47 = vld [vmem:[%s15047_s30 + $0xb38] sm:$0xf0] }
 0x59e   : > { %8640 = vmatpush.bf16.msra.mxu3 %v12990_v21  ;;  %8615 = vmatpush.bf16.msra.mxu1 %v11358_v31  ;;  %v13934_v52 = vld [vmem:[%s15047_s30 + $0xe34] sm:$0xf0]  ;;  %v8389_v30 = vpop.f32.mrf.mxu3  ;;  %v10879_v31 = vld [vmem:[%s15047_s30 + $0x5f8] sm:$0xf0]  ;;  %v11554_v53 = vor.u32 %v13826_v0, %v11551_v47 }
 0x59f   : > { %v12701_v55 = vld [vmem:[%s15047_s30 + $0x13d8] sm:$0xf]  ;;  %v11934_v1 = vor.u32 %v13934_v52, %v11933_v51  ;;  %v14431_v33 = vpop.eup %14430  ;;  %v10882_v42 = vor.u32 %v13658_v63, %v10879_v31  ;;  %v14210_v12 = vld [vmem:[%s15047_s30 + $0x16dc] sm:$0xf] }
 0x5a0   : > { %8628 = vmatpush.bf16.msra.mxu2 %v12126_v32  ;;  %v14126_v56 = vld [vmem:[%s15047_s30 + $0x1434] sm:$0xf0]  ;;  %8603 = vmatpush.bf16.msra.mxu0 %v10494_v44  ;;  %v13850_v32 = vld [vmem:[%s15047_s30 + $0xb9c] sm:$0xf]  ;;  %8744 = vst [vmem:[%s15057_s7 + $0x88] sm:$0xff] %v14431_v33  ;;  %v12418_v44 = vor.u32 %v14042_v54, %v12415_v35 }
 0x5a1   : > { %v10301_v2 = vld [vmem:[%s15047_s30 + $0x118] sm:$0xf]  ;;  %v12702_v7 = vor.u32 %v14126_v56, %v12701_v55  ;;  %v11650_v43 = vor.u32 %v13850_v32, %v11647_v34  ;;  %v13087_v51 = vld [vmem:[%s15047_s30 + $0x1738] sm:$0xf0] }
 0x5a2   : > { %8641 = vmatpush.bf16.msra.mxu3 %v12894_v36  ;;  %8616 = vmatpush.bf16.msra.mxu1 %v11262_v45  ;;  %v13526_v4 = vld [vmem:[%s15047_s30 + $0x174] sm:$0xf0]  ;;  %v13634_v45 = vld [vmem:[%s15047_s30 + $0x4dc] sm:$0xf]  ;;  %v13090_v59 = vor.u32 %v14210_v12, %v13087_v51 }
 0x5a3   : > { %v11069_v5 = vld [vmem:[%s15047_s30 + $0x718] sm:$0xf]  ;;  %v10302_v14 = vor.u32 %v13526_v4, %v10301_v2  ;;  %v13610_v55 = vld [vmem:[%s15047_s30 + $0x41c] sm:$0xf] }
 0x5a4   : > { %8629 = vmatpush.bf16.msra.mxu2 %v12030_v46  ;;  %v13718_v8 = vld [vmem:[%s15047_s30 + $0x774] sm:$0xf0]  ;;  %8604 = vmatpush.bf16.msra.mxu0 %v10398_v58  ;;  %v10783_v46 = vld [vmem:[%s15047_s30 + $0x538] sm:$0xf0] }
 0x5a5   : > { %v11837_v9 = vld [vmem:[%s15047_s30 + $0xd18] sm:$0xf]  ;;  %v11070_v62 = vor.u32 %v13718_v8, %v11069_v5  ;;  %v10786_v52 = vor.u32 %v13634_v45, %v10783_v46  ;;  %v10687_v56 = vld [vmem:[%s15047_s30 + $0x478] sm:$0xf0] }
 0x5a6   : > { %8642 = vmatpush.bf16.msra.mxu3 %v12798_v50  ;;  %v13910_v38 = vld [vmem:[%s15047_s30 + $0xd74] sm:$0xf0]  ;;  %8617 = vmatpush.bf16.msra.mxu1 %v11166_v61  ;;  %v12319_v50 = vld [vmem:[%s15047_s30 + $0x1138] sm:$0xf0]  ;;  %v10690_v5 = vor.u32 %v13610_v55, %v10687_v56 }
 0x5a7   : > { %v12605_v11 = vld [vmem:[%s15047_s30 + $0x1318] sm:$0xf]  ;;  %v11838_v17 = vor.u32 %v13910_v38, %v11837_v9  ;;  %v12322_v10 = vor.u32 %v14018_v48, %v12319_v50  ;;  %v13802_v58 = vld [vmem:[%s15047_s30 + $0xa1c] sm:$0xf] }
 0x5a8   : > { %v14102_v13 = vld [vmem:[%s15047_s30 + $0x1374] sm:$0xf0]  ;;  %8630 = vmatpush.bf16.msra.mxu2 %v11934_v1  ;;  %8605 = vmatpush.bf16.msra.mxu0 %v10302_v14  ;;  %v13994_v61 = vld [vmem:[%s15047_s30 + $0x101c] sm:$0xf] }
 0x5a9   : > { %v10205_v15 = vld [vmem:[%s15047_s30 + $0x58] sm:$0xf]  ;;  %v12606_v22 = vor.u32 %v14102_v13, %v12605_v11  ;;  %v12223_v1 = vld [vmem:[%s15047_s30 + $0x1078] sm:$0xf0]  ;;  %v3571_v11 = vperm.slane %v16614_v20, 2 }
 0x5aa   : > { %v13502_v16 = vld [vmem:[%s15047_s30 + $0xb4] sm:$0xf0]  ;;  %8643 = vmatpush.bf16.msra.mxu3 %v12702_v7  ;;  %8618 = vmatpush.bf16.msra.mxu1 %v11070_v62  ;;  %v14186_v2 = vld [vmem:[%s15047_s30 + $0x161c] sm:$0xf]  ;;  %v11458_v7 = vor.u32 %v13802_v58, %v11455_v60  ;;  %v12226_v8 = vor.u32 %v13994_v61, %v12223_v1 }
 0x5ab   : > { %v10973_v19 = vld [vmem:[%s15047_s30 + $0x658] sm:$0xf]  ;;  %v10206_v49 = vor.u32 %v13502_v16, %v10205_v15  ;;  %v12991_v4 = vld [vmem:[%s15047_s30 + $0x1678] sm:$0xf0]  ;;  %v8413_v30 = vpop.f32.mrf.mxu1 }
 0x5ac   : > { %v13694_v57 = vld [vmem:[%s15047_s30 + $0x6b4] sm:$0xf0]  ;;  %8631 = vmatpush.bf16.msra.mxu2 %v11838_v17  ;;  %v10591_v9 = vld [vmem:[%s15047_s30 + $0x3b8] sm:$0xf0]  ;;  %v12994_v13 = vor.u32 %v14186_v2, %v12991_v4 }
 0x5ad   : > { %v11741_v21 = vld [vmem:[%s15047_s30 + $0xc58] sm:$0xf]  ;;  %v10974_v36 = vor.u32 %v13694_v57, %v10973_v19  ;;  %8606 = vmatpush.bf16.msra.mxu0 %v10206_v49  ;;  %v13778_v38 = vld [vmem:[%s15047_s30 + $0x95c] sm:$0xf]  ;;  %v10594_v19 = vor.u32 %v13586_v6, %v10591_v9  ;;  %v8400_v57 = vpop.f32.mrf.mxu0 }
 0x5ae   : > { %v13886_v23 = vld [vmem:[%s15047_s30 + $0xcb4] sm:$0xf0]  ;;  %8644 = vmatpush.bf16.msra.mxu3 %v12606_v22  ;;  %v11359_v14 = vld [vmem:[%s15047_s30 + $0x9b8] sm:$0xf0] }
 0x5af   : > { %v12509_v24 = vld [vmem:[%s15047_s30 + $0x1258] sm:$0xf]  ;;  %v11742_v37 = vor.u32 %v13886_v23, %v11741_v21  ;;  %8619 = vmatpush.bf16.msra.mxu1 %v10974_v36  ;;  %v13970_v15 = vld [vmem:[%s15047_s30 + $0xf5c] sm:$0xf]  ;;  %v11362_v21 = vor.u32 %v13778_v38, %v11359_v14 }
 0x5b0   : > { %v14078_v28 = vld [vmem:[%s15047_s30 + $0x12b4] sm:$0xf0]  ;;  %8607 = vmatmul.bf16.vlgmr.msra.gmra.mxu0 %v15212_v26  ;;  %v12127_v16 = vld [vmem:[%s15047_s30 + $0xfb8] sm:$0xf0] }
 0x5b1   : > { %v12510_v41 = vor.u32 %v14078_v28, %v12509_v24  ;;  %8632 = vmatpush.bf16.msra.mxu2 %v11742_v37  ;;  %8651 = vmatpush.bf16.msrb.mxu0 %v10882_v42  ;;  %v14162_v62 = vld [vmem:[%s15047_s30 + $0x155c] sm:$0xf]  ;;  %v12130_v3 = vor.u32 %v13970_v15, %v12127_v16  ;;  %v8401_v28 = vadd.f32 %v8400_v57, %v3571_v11 }
 0x5b2   : > { %8620 = vmatmul.bf16.vlgmr.msra.gmra.mxu1 %v15216_v29  ;;  %v12895_v17 = vld [vmem:[%s15047_s30 + $0x15b8] sm:$0xf0] }
 0x5b3   : > { %8645 = vmatpush.bf16.msra.mxu3 %v12510_v41  ;;  %8664 = vmatpush.bf16.msrb.mxu1 %v11650_v43  ;;  %v13562_v22 = vld [vmem:[%s15047_s30 + $0x29c] sm:$0xf]  ;;  %v12898_v63 = vor.u32 %v14162_v62, %v12895_v17  ;;  %v8414_v54 = vadd.f32 %v8413_v30, %v8401_v28  ;;  %v8426_v42 = vpop.f32.mrf.mxu2  ;;  %v8415_v58 = vpop.f32.mrf.mxu1 }
 0x5b4   : > { %8633 = vmatmul.bf16.vlgmr.msra.gmra.mxu2 %v15210_v25  ;;  %v10495_v23 = vld [vmem:[%s15047_s30 + $0x2f8] sm:$0xf0] }
 0x5b5   : > { %8677 = vmatpush.bf16.msrb.mxu2 %v12418_v44  ;;  %8652 = vmatpush.bf16.msrb.mxu0 %v10786_v52  ;;  %v13754_v24 = vld [vmem:[%s15047_s30 + $0x89c] sm:$0xf]  ;;  %v10498_v35 = vor.u32 %v13562_v22, %v10495_v23  ;;  %v8427_v0 = vadd.f32 %v8426_v42, %v8414_v54  ;;  %v8402_v51 = vpop.f32.mrf.mxu0 }
 0x5b6   : > { %8646 = vmatmul.bf16.vlgmr.msra.gmra.mxu3 %v15214_v27  ;;  %v11263_v31 = vld [vmem:[%s15047_s30 + $0x8f8] sm:$0xf0] }
 0x5b7   : > { %8690 = vmatpush.bf16.msrb.mxu3 %v13186_v18  ;;  %8665 = vmatpush.bf16.msrb.mxu1 %v11554_v53  ;;  %v13946_v32 = vld [vmem:[%s15047_s30 + $0xe9c] sm:$0xf]  ;;  %v11266_v36 = vor.u32 %v13754_v24, %v11263_v31  ;;  %v8439_v18 = vpop.f32.mrf.mxu3  ;;  %v3572_v24 = vperm.slane %v16614_v20, 3 }
 0x5b8   : > { %v12031_v33 = vld [vmem:[%s15047_s30 + $0xef8] sm:$0xf0]  ;;  %v8440_v12 = vadd.f32 %v8439_v18, %v8427_v0 }
 0x5b9   : > { %8678 = vmatpush.bf16.msrb.mxu2 %v12322_v10  ;;  %8653 = vmatpush.bf16.msrb.mxu0 %v10690_v5  ;;  %v14138_v49 = vld [vmem:[%s15047_s30 + $0x149c] sm:$0xf]  ;;  %v12034_v37 = vor.u32 %v13946_v32, %v12031_v33 }
 0x5ba   : > { %v12799_v34 = vld [vmem:[%s15047_s30 + $0x14f8] sm:$0xf0]  ;;  %14432 = vtanh.f32 %v8440_v12 }
 0x5bb   : > { %8691 = vmatpush.bf16.msrb.mxu3 %v13090_v59  ;;  %8666 = vmatpush.bf16.msrb.mxu1 %v11458_v7  ;;  %v10399_v40 = vld [vmem:[%s15047_s30 + $0x238] sm:$0xf0]  ;;  %v12802_v43 = vor.u32 %v14138_v49, %v12799_v34  ;;  %v8428_v11 = vpop.f32.mrf.mxu2 }
 0x5bc   : > { %v13730_v41 = vld [vmem:[%s15047_s30 + $0x7dc] sm:$0xf]  ;;  %v10402_v50 = vor.u32 %v13538_v39, %v10399_v40 }
 0x5bd   : > { %8679 = vmatpush.bf16.msrb.mxu2 %v12226_v8  ;;  %8654 = vmatpush.bf16.msrb.mxu0 %v10594_v19  ;;  %v11167_v44 = vld [vmem:[%s15047_s30 + $0x838] sm:$0xf0] }
 0x5be   : > { %v13922_v45 = vld [vmem:[%s15047_s30 + $0xddc] sm:$0xf]  ;;  %v11170_v52 = vor.u32 %v13730_v41, %v11167_v44 }
 0x5bf   : > { %8692 = vmatpush.bf16.msrb.mxu3 %v12994_v13  ;;  %8667 = vmatpush.bf16.msrb.mxu1 %v11362_v21  ;;  %v11935_v46 = vld [vmem:[%s15047_s30 + $0xe38] sm:$0xf0]  ;;  %v8441_v62 = vpop.f32.mrf.mxu3 }
 0x5c0   : > { %v14114_v47 = vld [vmem:[%s15047_s30 + $0x13dc] sm:$0xf]  ;;  %v11938_v53 = vor.u32 %v13922_v45, %v11935_v46  ;;  %v14433_v57 = vpop.eup %14432 }
 0x5c1   : > { %8680 = vmatpush.bf16.msrb.mxu2 %v12130_v3  ;;  %v12703_v48 = vld [vmem:[%s15047_s30 + $0x1438] sm:$0xf0]  ;;  %8655 = vmatpush.bf16.msrb.mxu0 %v10498_v35  ;;  %8745 = vst [vmem:[%s15057_s7 + $0x90] sm:$0xff] %v14433_v57 }
 0x5c2   : > { %v13514_v10 = vld [vmem:[%s15047_s30 + $0x11c] sm:$0xf]  ;;  %v12706_v59 = vor.u32 %v14114_v47, %v12703_v48  ;;  %v3574_v48 = vperm.slane %v16614_v20, 5 }
 0x5c3   : > { %8693 = vmatpush.bf16.msrb.mxu3 %v12898_v63  ;;  %8668 = vmatpush.bf16.msrb.mxu1 %v11266_v36  ;;  %v10303_v55 = vld [vmem:[%s15047_s30 + $0x178] sm:$0xf0] }
 0x5c4   : > { %v13706_v56 = vld [vmem:[%s15047_s30 + $0x71c] sm:$0xf]  ;;  %v10306_v5 = vor.u32 %v13514_v10, %v10303_v55 }
 0x5c5   : > { %8681 = vmatpush.bf16.msrb.mxu2 %v12034_v37  ;;  %v11071_v60 = vld [vmem:[%s15047_s30 + $0x778] sm:$0xf0]  ;;  %8656 = vmatpush.bf16.msrb.mxu0 %v10402_v50 }
 0x5c6   : > { %v13898_v61 = vld [vmem:[%s15047_s30 + $0xd1c] sm:$0xf]  ;;  %v11074_v6 = vor.u32 %v13706_v56, %v11071_v60 }
 0x5c7   : > { %8694 = vmatpush.bf16.msrb.mxu3 %v12802_v43  ;;  %v11839_v1 = vld [vmem:[%s15047_s30 + $0xd78] sm:$0xf0]  ;;  %8669 = vmatpush.bf16.msrb.mxu1 %v11170_v52 }
 0x5c8   : > { %v14090_v2 = vld [vmem:[%s15047_s30 + $0x131c] sm:$0xf]  ;;  %v11842_v7 = vor.u32 %v13898_v61, %v11839_v1 }
 0x5c9   : > { %v12607_v4 = vld [vmem:[%s15047_s30 + $0x1378] sm:$0xf0]  ;;  %8682 = vmatpush.bf16.msrb.mxu2 %v11938_v53  ;;  %8657 = vmatpush.bf16.msrb.mxu0 %v10306_v5 }
 0x5ca   : > { %v13490_v8 = vld [vmem:[%s15047_s30 + $0x5c] sm:$0xf]  ;;  %v12610_v13 = vor.u32 %v14090_v2, %v12607_v4  ;;  %v8452_v28 = vpop.f32.mrf.mxu0  ;;  %v3575_v2 = vperm.slane %v16614_v20, 6 }
 0x5cb   : > { %v10207_v9 = vld [vmem:[%s15047_s30 + $0xb8] sm:$0xf0]  ;;  %8695 = vmatpush.bf16.msrb.mxu3 %v12706_v59  ;;  %8670 = vmatpush.bf16.msrb.mxu1 %v11074_v6  ;;  %v8453_v30 = vadd.f32 %v8452_v28, %v3572_v24 }
 0x5cc   : > { %v13682_v38 = vld [vmem:[%s15047_s30 + $0x65c] sm:$0xf]  ;;  %v10210_v21 = vor.u32 %v13490_v8, %v10207_v9  ;;  %v8465_v63 = vpop.f32.mrf.mxu1 }
 0x5cd   : > { %v10975_v14 = vld [vmem:[%s15047_s30 + $0x6b8] sm:$0xf0]  ;;  %8683 = vmatpush.bf16.msrb.mxu2 %v11842_v7  ;;  %v8466_v31 = vadd.f32 %v8465_v63, %v8453_v30 }
 0x5ce   : > { %v13874_v15 = vld [vmem:[%s15047_s30 + $0xc5c] sm:$0xf]  ;;  %v10978_v3 = vor.u32 %v13682_v38, %v10975_v14  ;;  %8658 = vmatpush.bf16.msrb.mxu0 %v10210_v21 }
 0x5cf   : > { %v11743_v16 = vld [vmem:[%s15047_s30 + $0xcb8] sm:$0xf0]  ;;  %8696 = vmatpush.bf16.msrb.mxu3 %v12610_v13 }
 0x5d0   : > { %v14066_v17 = vld [vmem:[%s15047_s30 + $0x125c] sm:$0xf]  ;;  %v11746_v22 = vor.u32 %v13874_v15, %v11743_v16  ;;  %8671 = vmatpush.bf16.msrb.mxu1 %v10978_v3 }
 0x5d1   : > { %v12511_v19 = vld [vmem:[%s15047_s30 + $0x12b8] sm:$0xf0]  ;;  %8659 = vmatmul.bf16.vlgmr.msrb.gmra.mxu0 %v15212_v26 }
 0x5d2   : > { %v12514_v23 = vor.u32 %v14066_v17, %v12511_v19  ;;  %8684 = vmatpush.bf16.msrb.mxu2 %v11746_v22  ;;  %v8454_v54 = vpop.f32.mrf.mxu0  ;;  %v3576_v17 = vperm.slane %v16614_v20, 7 }
 0x5d3   : > { %8672 = vmatmul.bf16.vlgmr.msrb.gmra.mxu1 %v15216_v29 }
 0x5d4   : > { %8697 = vmatpush.bf16.msrb.mxu3 %v12514_v23  ;;  %v8478_v32 = vpop.f32.mrf.mxu2  ;;  %v8467_v35 = vpop.f32.mrf.mxu1 }
 0x5d5   : > { %8685 = vmatmul.bf16.vlgmr.msrb.gmra.mxu2 %v15210_v25  ;;  %v8479_v33 = vadd.f32 %v8478_v32, %v8466_v31  ;;  %v3573_v25 = vperm.slane %v16614_v20, 4 }
 0x5d6   : > { %v8491_v49 = vpop.f32.mrf.mxu3 }
 0x5d7   : > { %8698 = vmatmul.bf16.vlgmr.msrb.gmra.mxu3 %v15214_v27  ;;  %v8492_v34 = vadd.f32 %v8491_v49, %v8479_v33 }
 0x5d9   : > { %14434 = vtanh.f32 %v8492_v34 }
 0x5dc   : > { %v8480_v26 = vpop.f32.mrf.mxu2 }
 0x5de   : > { %v8493_v29 = vpop.f32.mrf.mxu3 }
 0x5df   : > { %v14435_v36 = vpop.eup %14434 }
 0x5e0   : > { %8746 = vst [vmem:[%s15057_s7 + $0x98] sm:$0xff] %v14435_v36 }
 0x5ea   : > { %v8504_v27 = vpop.f32.mrf.mxu0 }
 0x5eb   : > { %v8505_v37 = vadd.f32 %v8504_v27, %v3573_v25 }
 0x5ec   : > { %v8517_v39 = vpop.f32.mrf.mxu1 }
 0x5ed   : > { %v8518_v40 = vadd.f32 %v8517_v39, %v8505_v37 }
 0x5f2   : > { %v8506_v45 = vpop.f32.mrf.mxu0 }
 0x5f4   : > { %v8530_v41 = vpop.f32.mrf.mxu2  ;;  %v8519_v46 = vpop.f32.mrf.mxu1 }
 0x5f5   : > { %v8531_v42 = vadd.f32 %v8530_v41, %v8518_v40 }
 0x5f6   : > { %v8543_v43 = vpop.f32.mrf.mxu3 }
 0x5f7   : > { %v8544_v44 = vadd.f32 %v8543_v43, %v8531_v42 }
 0x5f9   : > { %14436 = vtanh.f32 %v8544_v44 }
 0x5fc   : > { %v8532_v0 = vpop.f32.mrf.mxu2 }
 0x5fe   : > { %v8545_v18 = vpop.f32.mrf.mxu3 }
 0x5ff   : > { %v14437_v47 = vpop.eup %14436 }
 0x600   : > { %8747 = vst [vmem:[%s15057_s7 + $0xa0] sm:$0xff] %v14437_v47 }
 0x60c   : > { %v8556_v50 = vpop.f32.mrf.mxu0 }
 0x60d   : > { %v8557_v12 = vadd.f32 %v8556_v50, %v3574_v48 }
 0x60e   : > { %v8569_v51 = vpop.f32.mrf.mxu1 }
 0x60f   : > { %v8570_v52 = vadd.f32 %v8569_v51, %v8557_v12 }
 0x614   : > { %v8558_v58 = vpop.f32.mrf.mxu0 }
 0x616   : > { %v8582_v53 = vpop.f32.mrf.mxu2  ;;  %v8571_v59 = vpop.f32.mrf.mxu1 }
 0x617   : > { %v8583_v10 = vadd.f32 %v8582_v53, %v8570_v52 }
 0x618   : > { %v8595_v55 = vpop.f32.mrf.mxu3 }
 0x619   : > { %v8596_v56 = vadd.f32 %v8595_v55, %v8583_v10 }
 0x61b   : > { %14438 = vtanh.f32 %v8596_v56 }
 0x61e   : > { %v8584_v60 = vpop.f32.mrf.mxu2 }
 0x620   : > { %v8597_v61 = vpop.f32.mrf.mxu3 }
 0x621   : > { %v14439_v1 = vpop.eup %14438 }
 0x622   : > { %8748 = vst [vmem:[%s15057_s7 + $0xa8] sm:$0xff] %v14439_v1 }
 0x62d   : > { %v8608_v4 = vpop.f32.mrf.mxu0 }
 0x62e   : > { %v8609_v5 = vadd.f32 %v8608_v4, %v3575_v2 }
 0x62f   : > { %v8621_v6 = vpop.f32.mrf.mxu1 }
 0x630   : > { %v8622_v7 = vadd.f32 %v8621_v6, %v8609_v5 }
 0x635   : > { %v8610_v13 = vpop.f32.mrf.mxu0 }
 0x637   : > { %v8634_v8 = vpop.f32.mrf.mxu2  ;;  %v8623_v14 = vpop.f32.mrf.mxu1 }
 0x638   : > { %v8635_v9 = vadd.f32 %v8634_v8, %v8622_v7 }
 0x639   : > { %v8647_v38 = vpop.f32.mrf.mxu3 }
 0x63a   : > { %v8648_v11 = vadd.f32 %v8647_v38, %v8635_v9 }
 0x63c   : > { %14440 = vtanh.f32 %v8648_v11 }
 0x63f   : > { %v8636_v15 = vpop.f32.mrf.mxu2 }
 0x641   : > { %v8649_v16 = vpop.f32.mrf.mxu3 }
 0x642   : > { %v14441_v62 = vpop.eup %14440 }
 0x643   : > { %8749 = vst [vmem:[%s15057_s7 + $0xb0] sm:$0xff] %v14441_v62 }
 0x64e   : > { %v8660_v19 = vpop.f32.mrf.mxu0 }
 0x64f   : > { %v8661_v57 = vadd.f32 %v8660_v19, %v3576_v17 }
 0x650   : > { %v8673_v21 = vpop.f32.mrf.mxu1 }
 0x651   : > { %v8674_v3 = vadd.f32 %v8673_v21, %v8661_v57 }
 0x656   : > { %v8662_v28 = vpop.f32.mrf.mxu0 }
 0x658   : > { %v8686_v22 = vpop.f32.mrf.mxu2  ;;  %v8675_v30 = vpop.f32.mrf.mxu1 }
 0x659   : > { %v8687_v23 = vadd.f32 %v8686_v22, %v8674_v3 }
 0x65a   : > { %v8699_v24 = vpop.f32.mrf.mxu3 }
 0x65b   : > { %v8700_v63 = vadd.f32 %v8699_v24, %v8687_v23 }
 0x65d   : > { %14442 = vtanh.f32 %v8700_v63 }
 0x660   : > { %v8688_v20 = vpop.f32.mrf.mxu2 }
 0x662   : > { %v8701_v31 = vpop.f32.mrf.mxu3 }
 0x663   : > { %v14443_v32 = vpop.eup %14442 }
 0x664   : > { %8750 = vst [vmem:[%s15057_s7 + $0xb8] sm:$0xff] %v14443_v32 }
 0x665   : > { %14743 = shalt.err (!%p14740_p12)
}
 0x666   : > { %14285 = dma.vmem_to_hbm [thread:$0]  (%p14964_p2), %s8768_s24, 3072, %s8770_s20, %s8752_s12  }
 0x667 PF: > { %s16896_s19 = sld [smem:[#allocation26_spill]] }
 0x668   : > { %s16897_s16 = sld [smem:[#allocation25_spill]] }
 0x66d   : > { %p14335_p13 = scmp.ge.s32.totalorder %s16896_s19, 2 }
 0x66e   : > { %s8781_s15 = sand.u32 1, %s16897_s16  }
 0x66f   : > { %p14317_p0 = pnand %p14335_p13, %p14972_p6  ;;  %s8782_s17 = scalar_lea.sflag [#allocation5], %s8781_s15 }
 0x671   : > { %p14318_p4 = pneg %p14317_p0 }
 0x673   : > { %14789 = dma.done.wait (%p14318_p4), %s8782_s17, 3072  }
 0x674   : > { %14791 = vsyncadd (%p14318_p4), %s8782_s17, 4294964224  ;;  %s29_s14 = sadd.s32 1, %s16896_s19   ;;  %s16899_s23 = sld [smem:[#allocation29_spill]] }
 0x675   : > { %p26_p8 = scmp.ge.s32.totalorder %s29_s14, 6   ;;  %s16900_s7 = sld [smem:[#allocation27_spill]] }
 0x676   : > { %s16901_s30 = smov %s14798_s10  ;;  %s16902_s10 = smov %s14802_s11 }
 0x677   : > { %s16904_s12 = smov %s14810_s13  ;;  %28 = sbr.rel (!%p26_p8) target bundleno = 15 (0xf), region = 146 }
 0x67a   : > { %s16903_s11 = smov %s16899_s23 }
 0x67b   : > { %s16905_s13 = smov %s16900_s7 }
 0x67c   :  { %8788 = vsyncpa [#allocation4], 1 }
 0x67d   :  { %8790 = vsyncpa [#allocation4 + $0x1], 1 }
 0x67e   :  { %8791 = vsyncpa [#allocation7], 1 }
 0x67f   :  { %8792 = vsyncpa [#allocation10], 1 }
 0x680   :  { %8793 = vsyncpa [#allocation13], 1 }
 0x681   :  { %8794 = vsyncpa [#allocation16], 1 }
 0x682   :  { %8796 = vsyncpa [#allocation16 + $0x1], 1 }
 0x683   :  { %8797 = vsyncpa [#allocation5], 1 }
 0x684   :  { %8799 = vsyncpa [#allocation5 + $0x1], 1 }

</bundles_post_ra>
